<compile_context>
chip_gen: v7x
topology: tpu7x:2x2x1
jax: 0.10.0
libtpu: 0.0.40
codegen_flags: <defaults>
</compile_context>

<pallas_src>
import functools

import jax
import jax.numpy as jnp
from jax.experimental import pallas as pl
from jax.experimental.pallas import tpu as pltpu

BN_EPS = 1e-4


# ----------------------------------------------------------------------------
# Fused whole-network Pallas kernel (one batch image per grid step)
# ----------------------------------------------------------------------------
def _denoise2d_kernel(layer_cfg, n1, n2, H, W,
                      x_ref, y_ref, masks_ref, *refs):
    """layer_cfg: tuple of (cin_parts, cout, relu) per conv layer (static).

    Activations live as (C, H*W) f32 arrays: lanes = spatial, sublanes = C.
    """
    L = len(layer_cfg)
    n_w = sum(len(cfg[0]) for cfg in layer_cfg)
    w_flat = refs[:n_w]                       # per-layer weight parts (bf16)
    a_refs = refs[n_w:n_w + L]                # per-layer (scale, shift') f32
    o_ref = refs[n_w + L]
    P = H * W

    # Group the flat weight-part refs back per layer.
    w_refs, pos = [], 0
    for cin_parts, _, _ in layer_cfg:
        w_refs.append(w_flat[pos:pos + len(cin_parts)])
        pos += len(cin_parts)

    def conv3x3(parts, li):
        """3x3 conv (stride 1, zero pad 1) + folded bias/BN affine + ReLU.

        `parts` are the activation slabs whose channel-concatenation is the
        conv input; the weight is pre-split along Cin, so no in-kernel concat
        is needed.  Each tap is a lane roll + border mask of the flat (C, P)
        activation, contracted on the MXU in bf16 with f32 accumulation.
        """
        cin_parts, cout, relu = layer_cfg[li]
        acc = None
        for part, wref in zip(parts, w_refs[li]):
            for dy in range(3):
                for dx in range(3):
                    t = dy * 3 + dx
                    s = (dy - 1) * W + (dx - 1)          # flat tap offset
                    # shifted[p] = part[p + s]  (roll by -s, jnp.roll semantics)
                    sh = part if s == 0 else pltpu.roll(part, (-s) % P, axis=1)
                    tap = (sh * masks_ref[t:t + 1, :]).astype(jnp.bfloat16)
                    contrib = jnp.dot(wref[t], tap,       # (cout, cin)x(cin, P)
                                      preferred_element_type=jnp.float32)
                    acc = contrib if acc is None else acc + contrib
        aff = a_refs[li][...]                             # (cout, 2) f32
        out = acc * aff[:, 0:1] + aff[:, 1:2]             # bias folded in shift
        if relu:
            out = jnp.maximum(out, 0.0)
        return out

    x = x_ref[0]                                          # (Cx, H*W) f32
    y = y_ref[0]
    identity = (x + y) * 0.5

    # common1: its first conv consumes cat(x, y) -> split weights, summed.
    h = conv3x3([x, y], 0)
    for li in range(1, n1):
        h = conv3x3([h], li)
    out_1 = h

    i_m14_1, i_m14_2, i_m19 = n1, n1 + 1, n1 + 2
    m14_2out = conv3x3([out_1], i_m14_1) + identity       # M14_1(out_1)+identity
    m14_3out = conv3x3([m14_2out], i_m14_2)               # M14_2 (ReLU)
    m19_2out = conv3x3([out_1], i_m19)                    # M19 (BN + ReLU)

    # common2: first conv consumes cat(M14_3out, M19_2out) via split weights.
    h = conv3x3([m14_3out, m19_2out], n1 + 3)
    for li in range(n1 + 4, n1 + 3 + n2):
        h = conv3x3([h], li)

    o_ref[0] = h + m14_2out                               # final residual add


# ----------------------------------------------------------------------------
# Host-side helpers
# ----------------------------------------------------------------------------
def _tap_masks(H, W):
    """(9, H*W) f32 masks: 1 where the tap's source pixel is inside the image."""
    yy = jnp.arange(H, dtype=jnp.int32).reshape(H, 1)
    xx = jnp.arange(W, dtype=jnp.int32).reshape(1, W)
    rows = []
    for dy in range(3):
        for dx in range(3):
            vy = jnp.logical_and(yy + (dy - 1) >= 0, yy + (dy - 1) <= H - 1)
            vx = jnp.logical_and(xx + (dx - 1) >= 0, xx + (dx - 1) <= W - 1)
            rows.append(jnp.logical_and(vy, vx).astype(jnp.float32).reshape(H * W))
    return jnp.stack(rows, axis=0)


def _orthogonal(key, rows, cols):
    a = jax.random.normal(key, (max(rows, cols), min(rows, cols)), jnp.float32)
    q, r = jnp.linalg.qr(a)
    d = jnp.sign(jnp.diagonal(r))
    d = jnp.where(d == 0, 1.0, d)
    q = q * d
    if rows < cols:
        q = q.T
    return q[:rows, :cols]


def _conv_layer(key, cin_parts, cout, *, bn, relu):
    """One Conv2d(3x3,pad=1,bias) [+ eval-mode BN] [+ ReLU] parameter set."""
    cin = sum(cin_parts)
    # PyTorch init.orthogonal_ == orthogonal rows of the (cout, cin*9) flatten.
    w2d = _orthogonal(key, cout, cin * 9)
    w_oihw = w2d.reshape(cout, cin, 3, 3)                 # (Cout, Cin, ky, kx)
    # (9, Cout, Cin) with tap index t = ky*3 + kx
    w9 = w_oihw.transpose(2, 3, 0, 1).reshape(9, cout, cin)
    # Split along Cin into the channel-concat parts (avoids in-kernel concat).
    w_parts, off = [], 0
    for c in cin_parts:
        w_parts.append(w9[:, :, off:off + c].astype(jnp.bfloat16))
        off += c
    bias = jnp.zeros((cout,), jnp.float32)
    if bn:  # eval-mode BN: gamma=1, beta=0, running_mean=0, running_var=1
        scale = jnp.full((cout,), 1.0 / jnp.sqrt(1.0 + BN_EPS), jnp.float32)
    else:
        scale = jnp.ones((cout,), jnp.float32)
    shift = bias * scale                                  # bias folded into shift
    aff = jnp.stack([scale, shift], axis=1)               # (cout, 2) f32
    return dict(w_parts=w_parts, aff=aff, cin_parts=tuple(cin_parts),
                cout=int(cout), relu=bool(relu))


def build_denoise2d_params(key, in_channels, out_channel, n_channels, depth):
    nc2 = n_channels * 2
    cx = in_channels // 2
    defs = []                                  # (cin_parts, cout, bn, relu)
    # common1 = DoubleModule(in_channels, 2*n_channels, depth)
    defs.append(((cx, cx), nc2, False, True))  # consumes cat(x, y)
    for _ in range(depth):
        defs.append(((nc2,), nc2, True, True))
    defs.append(((nc2,), nc2, True, True))
    n1 = len(defs)
    # M14_1, M14_2, M19
    defs.append(((nc2,), out_channel, False, False))
    defs.append(((out_channel,), n_channels, False, True))
    defs.append(((nc2,), n_channels, True, True))
    # common2 = DoubleM(2*n_channels, out_channel, depth)
    start2 = len(defs)
    defs.append(((n_channels, n_channels), nc2, True, True))  # consumes cat(.,.)
    for _ in range(depth - 1):
        defs.append(((nc2,), nc2, True, True))
    defs.append(((nc2,), nc2, True, True))
    defs.append(((nc2,), out_channel, False, False))
    n2 = len(defs) - start2

    keys = jax.random.split(key, len(defs))
    layers = [_conv_layer(k, cps, co, bn=bn, relu=rl)
              for k, (cps, co, bn, rl) in zip(keys, defs)]
    return dict(layers=layers, n1=n1, n2=n2, out_channel=out_channel)


# ----------------------------------------------------------------------------
# Forward pass (mirrors Denoise2D.forward), single fused pallas_call
# ----------------------------------------------------------------------------
def denoise2d_forward(params, x_nchw, y_nchw):
    N, cx, H, W = x_nchw.shape
    P = H * W
    layers = params["layers"]
    n1, n2 = params["n1"], params["n2"]
    out_channel = params["out_channel"]
    layer_cfg = tuple((l["cin_parts"], l["cout"], l["relu"]) for l in layers)

    # ReLU is applied inside conv3x3 *before* the external residual adds; this
    # is only valid because the residual-carrying layers have no ReLU.
    assert not layer_cfg[n1][2], "M14_1 must not have ReLU (residual layer)"
    assert not layer_cfg[-1][2], "last common2 conv must not have ReLU"
    assert cx == out_channel, "identity residual requires in_channels//2 == out_channel"

    x = x_nchw.reshape(N, cx, P).astype(jnp.float32)      # free reshape (NCHW)
    y = y_nchw.reshape(N, cx, P).astype(jnp.float32)
    masks = _tap_masks(H, W)

    inputs = [x, y, masks]
    in_specs = [
        pl.BlockSpec((1, cx, P), lambda n: (n, 0, 0)),
        pl.BlockSpec((1, cx, P), lambda n: (n, 0, 0)),
        pl.BlockSpec((9, P), lambda n: (0, 0)),
    ]
    for l in layers:                                      # weight parts (bf16)
        for wp in l["w_parts"]:
            inputs.append(wp)
            in_specs.append(pl.BlockSpec(wp.shape, lambda n: (0, 0, 0)))
    for l in layers:                                      # folded affines (f32)
        inputs.append(l["aff"])
        in_specs.append(pl.BlockSpec(l["aff"].shape, lambda n: (0, 0)))

    kernel = functools.partial(_denoise2d_kernel, layer_cfg, n1, n2, H, W)
    out = pl.pallas_call(
        kernel,
        out_shape=jax.ShapeDtypeStruct((N, out_channel, P), jnp.float32),
        grid=(N,),
        in_specs=in_specs,
        out_specs=pl.BlockSpec((1, out_channel, P), lambda n: (n, 0, 0)),
        compiler_params=pltpu.CompilerParams(
            dimension_semantics=("parallel",)),
    )(*inputs)
    return out.reshape(N, out_channel, H, W)              # back to NCHW (free)


# ----------------------------------------------------------------------------
if __name__ == "__main__":
    # Small config consistent with the module: in_channels=4 => x,y have 2
    # channels each; out_channel=2; shrink n_channels/depth to stay small.
    N, H, W = 2, 16, 16
    in_channels, out_channel, n_channels, depth = 4, 2, 8, 2

    key = jax.random.PRNGKey(0)
    kp, kx, ky = jax.random.split(key, 3)

    params = build_denoise2d_params(kp, in_channels, out_channel,
                                    n_channels, depth)

    # PyTorch-convention NCHW inputs (each half of the channel concat).
    x_nchw = jax.random.normal(kx, (N, in_channels // 2, H, W), jnp.float32)
    y_nchw = jax.random.normal(ky, (N, in_channels // 2, H, W), jnp.float32)

    fwd = jax.jit(functools.partial(denoise2d_forward, params))
    out_nchw = fwd(x_nchw, y_nchw)
    jax.block_until_ready(out_nchw)

    assert out_nchw.shape == (N, out_channel, H, W), out_nchw.shape
    assert bool(jnp.all(jnp.isfinite(out_nchw)))
    print("KERNEL_OK")
</pallas_src>

<mosaic_0001>
module attributes {stable_mosaic.version = 11 : i64} {
  func.func @_denoise2d_kernel(%arg0: i32, %arg1: memref<1x2x256xf32, #tpu.memory_space<vmem>>, %arg2: memref<1x2x256xf32, #tpu.memory_space<vmem>>, %arg3: memref<9x256xf32, #tpu.memory_space<vmem>>, %arg4: memref<9x16x2xbf16, #tpu.memory_space<vmem>>, %arg5: memref<9x16x2xbf16, #tpu.memory_space<vmem>>, %arg6: memref<9x16x16xbf16, #tpu.memory_space<vmem>>, %arg7: memref<9x16x16xbf16, #tpu.memory_space<vmem>>, %arg8: memref<9x16x16xbf16, #tpu.memory_space<vmem>>, %arg9: memref<9x2x16xbf16, #tpu.memory_space<vmem>>, %arg10: memref<9x8x2xbf16, #tpu.memory_space<vmem>>, %arg11: memref<9x8x16xbf16, #tpu.memory_space<vmem>>, %arg12: memref<9x16x8xbf16, #tpu.memory_space<vmem>>, %arg13: memref<9x16x8xbf16, #tpu.memory_space<vmem>>, %arg14: memref<9x16x16xbf16, #tpu.memory_space<vmem>>, %arg15: memref<9x16x16xbf16, #tpu.memory_space<vmem>>, %arg16: memref<9x2x16xbf16, #tpu.memory_space<vmem>>, %arg17: memref<16x2xf32, #tpu.memory_space<vmem>>, %arg18: memref<16x2xf32, #tpu.memory_space<vmem>>, %arg19: memref<16x2xf32, #tpu.memory_space<vmem>>, %arg20: memref<16x2xf32, #tpu.memory_space<vmem>>, %arg21: memref<2x2xf32, #tpu.memory_space<vmem>>, %arg22: memref<8x2xf32, #tpu.memory_space<vmem>>, %arg23: memref<8x2xf32, #tpu.memory_space<vmem>>, %arg24: memref<16x2xf32, #tpu.memory_space<vmem>>, %arg25: memref<16x2xf32, #tpu.memory_space<vmem>>, %arg26: memref<16x2xf32, #tpu.memory_space<vmem>>, %arg27: memref<2x2xf32, #tpu.memory_space<vmem>>, %arg28: memref<1x2x256xf32, #tpu.memory_space<vmem>>) attributes {dimension_semantics = [#tpu.dimension_semantics<parallel>], iteration_bounds = array<i64: 2>, scalar_prefetch = 0 : i64, scratch_operands = 0 : i64, tpu.core_type = #tpu.core_type<tc>, window_params = [{transform_indices = @transform_0, window_bounds = array<i64: 1, 2, 256>}, {transform_indices = @transform_1, window_bounds = array<i64: 1, 2, 256>}, {pipeline_mode = #tpu.pipeline_mode<synchronous>, transform_indices = @transform_2, window_bounds = array<i64: 9, 256>}, {pipeline_mode = #tpu.pipeline_mode<synchronous>, transform_indices = @transform_3, window_bounds = array<i64: 9, 16, 2>}, {pipeline_mode = #tpu.pipeline_mode<synchronous>, transform_indices = @transform_4, window_bounds = array<i64: 9, 16, 2>}, {pipeline_mode = #tpu.pipeline_mode<synchronous>, transform_indices = @transform_5, window_bounds = array<i64: 9, 16, 16>}, {pipeline_mode = #tpu.pipeline_mode<synchronous>, transform_indices = @transform_6, window_bounds = array<i64: 9, 16, 16>}, {pipeline_mode = #tpu.pipeline_mode<synchronous>, transform_indices = @transform_7, window_bounds = array<i64: 9, 16, 16>}, {pipeline_mode = #tpu.pipeline_mode<synchronous>, transform_indices = @transform_8, window_bounds = array<i64: 9, 2, 16>}, {pipeline_mode = #tpu.pipeline_mode<synchronous>, transform_indices = @transform_9, window_bounds = array<i64: 9, 8, 2>}, {pipeline_mode = #tpu.pipeline_mode<synchronous>, transform_indices = @transform_10, window_bounds = array<i64: 9, 8, 16>}, {pipeline_mode = #tpu.pipeline_mode<synchronous>, transform_indices = @transform_11, window_bounds = array<i64: 9, 16, 8>}, {pipeline_mode = #tpu.pipeline_mode<synchronous>, transform_indices = @transform_12, window_bounds = array<i64: 9, 16, 8>}, {pipeline_mode = #tpu.pipeline_mode<synchronous>, transform_indices = @transform_13, window_bounds = array<i64: 9, 16, 16>}, {pipeline_mode = #tpu.pipeline_mode<synchronous>, transform_indices = @transform_14, window_bounds = array<i64: 9, 16, 16>}, {pipeline_mode = #tpu.pipeline_mode<synchronous>, transform_indices = @transform_15, window_bounds = array<i64: 9, 2, 16>}, {pipeline_mode = #tpu.pipeline_mode<synchronous>, transform_indices = @transform_16, window_bounds = array<i64: 16, 2>}, {pipeline_mode = #tpu.pipeline_mode<synchronous>, transform_indices = @transform_17, window_bounds = array<i64: 16, 2>}, {pipeline_mode = #tpu.pipeline_mode<synchronous>, transform_indices = @transform_18, window_bounds = array<i64: 16, 2>}, {pipeline_mode = #tpu.pipeline_mode<synchronous>, transform_indices = @transform_19, window_bounds = array<i64: 16, 2>}, {pipeline_mode = #tpu.pipeline_mode<synchronous>, transform_indices = @transform_20, window_bounds = array<i64: 2, 2>}, {pipeline_mode = #tpu.pipeline_mode<synchronous>, transform_indices = @transform_21, window_bounds = array<i64: 8, 2>}, {pipeline_mode = #tpu.pipeline_mode<synchronous>, transform_indices = @transform_22, window_bounds = array<i64: 8, 2>}, {pipeline_mode = #tpu.pipeline_mode<synchronous>, transform_indices = @transform_23, window_bounds = array<i64: 16, 2>}, {pipeline_mode = #tpu.pipeline_mode<synchronous>, transform_indices = @transform_24, window_bounds = array<i64: 16, 2>}, {pipeline_mode = #tpu.pipeline_mode<synchronous>, transform_indices = @transform_25, window_bounds = array<i64: 16, 2>}, {pipeline_mode = #tpu.pipeline_mode<synchronous>, transform_indices = @transform_26, window_bounds = array<i64: 2, 2>}, {transform_indices = @transform_27, window_bounds = array<i64: 1, 2, 256>}]} {
    %c0 = arith.constant 0 : index
    %c0_0 = arith.constant 0 : index
    %c0_1 = arith.constant 0 : index
    %0 = vector.load %arg1[%c0, %c0_0, %c0_1] : memref<1x2x256xf32, #tpu.memory_space<vmem>>, vector<1x2x256xf32>
    %1 = vector.shape_cast %0 : vector<1x2x256xf32> to vector<2x256xf32>
    %c0_2 = arith.constant 0 : index
    %c0_3 = arith.constant 0 : index
    %c0_4 = arith.constant 0 : index
    %2 = vector.load %arg2[%c0_2, %c0_3, %c0_4] : memref<1x2x256xf32, #tpu.memory_space<vmem>>, vector<1x2x256xf32>
    %3 = vector.shape_cast %2 : vector<1x2x256xf32> to vector<2x256xf32>
    %4 = arith.addf %1, %3 : vector<2x256xf32>
    %cst = arith.constant 5.000000e-01 : f32
    %5 = vector.broadcast %cst : f32 to vector<2x256xf32>
    %6 = arith.mulf %4, %5 : vector<2x256xf32>
    %c17_i32 = arith.constant 17 : i32
    %7 = tpu.dynamic_rotate %1 by %c17_i32 dim 1 : vector<2x256xf32>, i32 -> vector<2x256xf32>
    %c0_5 = arith.constant 0 : index
    %c0_6 = arith.constant 0 : index
    %8 = vector.load %arg3[%c0_5, %c0_6] : memref<9x256xf32, #tpu.memory_space<vmem>>, vector<1x256xf32>
    %9 = vector.broadcast %8 : vector<1x256xf32> to vector<2x256xf32>
    %10 = arith.mulf %7, %9 : vector<2x256xf32>
    %11 = arith.truncf %10 : vector<2x256xf32> to vector<2x256xbf16>
    %c0_7 = arith.constant 0 : index
    %c0_8 = arith.constant 0 : index
    %c0_9 = arith.constant 0 : index
    %12 = vector.load %arg4[%c0_7, %c0_8, %c0_9] : memref<9x16x2xbf16, #tpu.memory_space<vmem>>, vector<1x16x2xbf16>
    %13 = vector.shape_cast %12 : vector<1x16x2xbf16> to vector<16x2xbf16>
    %cst_10 = arith.constant dense<0.000000e+00> : vector<16x256xf32>
    %14 = tpu.matmul %13, %11, %cst_10 {dimension_numbers = #tpu.dot_dimension_numbers<[1], [0], [0], [1], [0, 0, 1, 1], [], []>} : vector<16x2xbf16>, vector<2x256xbf16>, vector<16x256xf32> -> vector<16x256xf32>
    %c16_i32 = arith.constant 16 : i32
    %15 = tpu.dynamic_rotate %1 by %c16_i32 dim 1 : vector<2x256xf32>, i32 -> vector<2x256xf32>
    %c1 = arith.constant 1 : index
    %c0_11 = arith.constant 0 : index
    %16 = vector.load %arg3[%c1, %c0_11] : memref<9x256xf32, #tpu.memory_space<vmem>>, vector<1x256xf32>
    %17 = vector.broadcast %16 : vector<1x256xf32> to vector<2x256xf32>
    %18 = arith.mulf %15, %17 : vector<2x256xf32>
    %19 = arith.truncf %18 : vector<2x256xf32> to vector<2x256xbf16>
    %c1_12 = arith.constant 1 : index
    %c0_13 = arith.constant 0 : index
    %c0_14 = arith.constant 0 : index
    %20 = vector.load %arg4[%c1_12, %c0_13, %c0_14] : memref<9x16x2xbf16, #tpu.memory_space<vmem>>, vector<1x16x2xbf16>
    %21 = vector.shape_cast %20 : vector<1x16x2xbf16> to vector<16x2xbf16>
    %cst_15 = arith.constant dense<0.000000e+00> : vector<16x256xf32>
    %22 = tpu.matmul %21, %19, %cst_15 {dimension_numbers = #tpu.dot_dimension_numbers<[1], [0], [0], [1], [0, 0, 1, 1], [], []>} : vector<16x2xbf16>, vector<2x256xbf16>, vector<16x256xf32> -> vector<16x256xf32>
    %23 = arith.addf %14, %22 : vector<16x256xf32>
    %c15_i32 = arith.constant 15 : i32
    %24 = tpu.dynamic_rotate %1 by %c15_i32 dim 1 : vector<2x256xf32>, i32 -> vector<2x256xf32>
    %c2 = arith.constant 2 : index
    %c0_16 = arith.constant 0 : index
    %25 = vector.load %arg3[%c2, %c0_16] : memref<9x256xf32, #tpu.memory_space<vmem>>, vector<1x256xf32>
    %26 = vector.broadcast %25 : vector<1x256xf32> to vector<2x256xf32>
    %27 = arith.mulf %24, %26 : vector<2x256xf32>
    %28 = arith.truncf %27 : vector<2x256xf32> to vector<2x256xbf16>
    %c2_17 = arith.constant 2 : index
    %c0_18 = arith.constant 0 : index
    %c0_19 = arith.constant 0 : index
    %29 = vector.load %arg4[%c2_17, %c0_18, %c0_19] : memref<9x16x2xbf16, #tpu.memory_space<vmem>>, vector<1x16x2xbf16>
    %30 = vector.shape_cast %29 : vector<1x16x2xbf16> to vector<16x2xbf16>
    %cst_20 = arith.constant dense<0.000000e+00> : vector<16x256xf32>
    %31 = tpu.matmul %30, %28, %cst_20 {dimension_numbers = #tpu.dot_dimension_numbers<[1], [0], [0], [1], [0, 0, 1, 1], [], []>} : vector<16x2xbf16>, vector<2x256xbf16>, vector<16x256xf32> -> vector<16x256xf32>
    %32 = arith.addf %23, %31 : vector<16x256xf32>
    %c1_i32 = arith.constant 1 : i32
    %33 = tpu.dynamic_rotate %1 by %c1_i32 dim 1 : vector<2x256xf32>, i32 -> vector<2x256xf32>
    %c3 = arith.constant 3 : index
    %c0_21 = arith.constant 0 : index
    %34 = vector.load %arg3[%c3, %c0_21] : memref<9x256xf32, #tpu.memory_space<vmem>>, vector<1x256xf32>
    %35 = vector.broadcast %34 : vector<1x256xf32> to vector<2x256xf32>
    %36 = arith.mulf %33, %35 : vector<2x256xf32>
    %37 = arith.truncf %36 : vector<2x256xf32> to vector<2x256xbf16>
    %c3_22 = arith.constant 3 : index
    %c0_23 = arith.constant 0 : index
    %c0_24 = arith.constant 0 : index
    %38 = vector.load %arg4[%c3_22, %c0_23, %c0_24] : memref<9x16x2xbf16, #tpu.memory_space<vmem>>, vector<1x16x2xbf16>
    %39 = vector.shape_cast %38 : vector<1x16x2xbf16> to vector<16x2xbf16>
    %cst_25 = arith.constant dense<0.000000e+00> : vector<16x256xf32>
    %40 = tpu.matmul %39, %37, %cst_25 {dimension_numbers = #tpu.dot_dimension_numbers<[1], [0], [0], [1], [0, 0, 1, 1], [], []>} : vector<16x2xbf16>, vector<2x256xbf16>, vector<16x256xf32> -> vector<16x256xf32>
    %41 = arith.addf %32, %40 : vector<16x256xf32>
    %c4 = arith.constant 4 : index
    %c0_26 = arith.constant 0 : index
    %42 = vector.load %arg3[%c4, %c0_26] : memref<9x256xf32, #tpu.memory_space<vmem>>, vector<1x256xf32>
    %43 = vector.broadcast %42 : vector<1x256xf32> to vector<2x256xf32>
    %44 = arith.mulf %1, %43 : vector<2x256xf32>
    %45 = arith.truncf %44 : vector<2x256xf32> to vector<2x256xbf16>
    %c4_27 = arith.constant 4 : index
    %c0_28 = arith.constant 0 : index
    %c0_29 = arith.constant 0 : index
    %46 = vector.load %arg4[%c4_27, %c0_28, %c0_29] : memref<9x16x2xbf16, #tpu.memory_space<vmem>>, vector<1x16x2xbf16>
    %47 = vector.shape_cast %46 : vector<1x16x2xbf16> to vector<16x2xbf16>
    %cst_30 = arith.constant dense<0.000000e+00> : vector<16x256xf32>
    %48 = tpu.matmul %47, %45, %cst_30 {dimension_numbers = #tpu.dot_dimension_numbers<[1], [0], [0], [1], [0, 0, 1, 1], [], []>} : vector<16x2xbf16>, vector<2x256xbf16>, vector<16x256xf32> -> vector<16x256xf32>
    %49 = arith.addf %41, %48 : vector<16x256xf32>
    %c255_i32 = arith.constant 255 : i32
    %50 = tpu.dynamic_rotate %1 by %c255_i32 dim 1 : vector<2x256xf32>, i32 -> vector<2x256xf32>
    %c5 = arith.constant 5 : index
    %c0_31 = arith.constant 0 : index
    %51 = vector.load %arg3[%c5, %c0_31] : memref<9x256xf32, #tpu.memory_space<vmem>>, vector<1x256xf32>
    %52 = vector.broadcast %51 : vector<1x256xf32> to vector<2x256xf32>
    %53 = arith.mulf %50, %52 : vector<2x256xf32>
    %54 = arith.truncf %53 : vector<2x256xf32> to vector<2x256xbf16>
    %c5_32 = arith.constant 5 : index
    %c0_33 = arith.constant 0 : index
    %c0_34 = arith.constant 0 : index
    %55 = vector.load %arg4[%c5_32, %c0_33, %c0_34] : memref<9x16x2xbf16, #tpu.memory_space<vmem>>, vector<1x16x2xbf16>
    %56 = vector.shape_cast %55 : vector<1x16x2xbf16> to vector<16x2xbf16>
    %cst_35 = arith.constant dense<0.000000e+00> : vector<16x256xf32>
    %57 = tpu.matmul %56, %54, %cst_35 {dimension_numbers = #tpu.dot_dimension_numbers<[1], [0], [0], [1], [0, 0, 1, 1], [], []>} : vector<16x2xbf16>, vector<2x256xbf16>, vector<16x256xf32> -> vector<16x256xf32>
    %58 = arith.addf %49, %57 : vector<16x256xf32>
    %c241_i32 = arith.constant 241 : i32
    %59 = tpu.dynamic_rotate %1 by %c241_i32 dim 1 : vector<2x256xf32>, i32 -> vector<2x256xf32>
    %c6 = arith.constant 6 : index
    %c0_36 = arith.constant 0 : index
    %60 = vector.load %arg3[%c6, %c0_36] : memref<9x256xf32, #tpu.memory_space<vmem>>, vector<1x256xf32>
    %61 = vector.broadcast %60 : vector<1x256xf32> to vector<2x256xf32>
    %62 = arith.mulf %59, %61 : vector<2x256xf32>
    %63 = arith.truncf %62 : vector<2x256xf32> to vector<2x256xbf16>
    %c6_37 = arith.constant 6 : index
    %c0_38 = arith.constant 0 : index
    %c0_39 = arith.constant 0 : index
    %64 = vector.load %arg4[%c6_37, %c0_38, %c0_39] : memref<9x16x2xbf16, #tpu.memory_space<vmem>>, vector<1x16x2xbf16>
    %65 = vector.shape_cast %64 : vector<1x16x2xbf16> to vector<16x2xbf16>
    %cst_40 = arith.constant dense<0.000000e+00> : vector<16x256xf32>
    %66 = tpu.matmul %65, %63, %cst_40 {dimension_numbers = #tpu.dot_dimension_numbers<[1], [0], [0], [1], [0, 0, 1, 1], [], []>} : vector<16x2xbf16>, vector<2x256xbf16>, vector<16x256xf32> -> vector<16x256xf32>
    %67 = arith.addf %58, %66 : vector<16x256xf32>
    %c240_i32 = arith.constant 240 : i32
    %68 = tpu.dynamic_rotate %1 by %c240_i32 dim 1 : vector<2x256xf32>, i32 -> vector<2x256xf32>
    %c7 = arith.constant 7 : index
    %c0_41 = arith.constant 0 : index
    %69 = vector.load %arg3[%c7, %c0_41] : memref<9x256xf32, #tpu.memory_space<vmem>>, vector<1x256xf32>
    %70 = vector.broadcast %69 : vector<1x256xf32> to vector<2x256xf32>
    %71 = arith.mulf %68, %70 : vector<2x256xf32>
    %72 = arith.truncf %71 : vector<2x256xf32> to vector<2x256xbf16>
    %c7_42 = arith.constant 7 : index
    %c0_43 = arith.constant 0 : index
    %c0_44 = arith.constant 0 : index
    %73 = vector.load %arg4[%c7_42, %c0_43, %c0_44] : memref<9x16x2xbf16, #tpu.memory_space<vmem>>, vector<1x16x2xbf16>
    %74 = vector.shape_cast %73 : vector<1x16x2xbf16> to vector<16x2xbf16>
    %cst_45 = arith.constant dense<0.000000e+00> : vector<16x256xf32>
    %75 = tpu.matmul %74, %72, %cst_45 {dimension_numbers = #tpu.dot_dimension_numbers<[1], [0], [0], [1], [0, 0, 1, 1], [], []>} : vector<16x2xbf16>, vector<2x256xbf16>, vector<16x256xf32> -> vector<16x256xf32>
    %76 = arith.addf %67, %75 : vector<16x256xf32>
    %c239_i32 = arith.constant 239 : i32
    %77 = tpu.dynamic_rotate %1 by %c239_i32 dim 1 : vector<2x256xf32>, i32 -> vector<2x256xf32>
    %c8 = arith.constant 8 : index
    %c0_46 = arith.constant 0 : index
    %78 = vector.load %arg3[%c8, %c0_46] : memref<9x256xf32, #tpu.memory_space<vmem>>, vector<1x256xf32>
    %79 = vector.broadcast %78 : vector<1x256xf32> to vector<2x256xf32>
    %80 = arith.mulf %77, %79 : vector<2x256xf32>
    %81 = arith.truncf %80 : vector<2x256xf32> to vector<2x256xbf16>
    %c8_47 = arith.constant 8 : index
    %c0_48 = arith.constant 0 : index
    %c0_49 = arith.constant 0 : index
    %82 = vector.load %arg4[%c8_47, %c0_48, %c0_49] : memref<9x16x2xbf16, #tpu.memory_space<vmem>>, vector<1x16x2xbf16>
    %83 = vector.shape_cast %82 : vector<1x16x2xbf16> to vector<16x2xbf16>
    %cst_50 = arith.constant dense<0.000000e+00> : vector<16x256xf32>
    %84 = tpu.matmul %83, %81, %cst_50 {dimension_numbers = #tpu.dot_dimension_numbers<[1], [0], [0], [1], [0, 0, 1, 1], [], []>} : vector<16x2xbf16>, vector<2x256xbf16>, vector<16x256xf32> -> vector<16x256xf32>
    %85 = arith.addf %76, %84 : vector<16x256xf32>
    %c17_i32_51 = arith.constant 17 : i32
    %86 = tpu.dynamic_rotate %3 by %c17_i32_51 dim 1 : vector<2x256xf32>, i32 -> vector<2x256xf32>
    %c0_52 = arith.constant 0 : index
    %c0_53 = arith.constant 0 : index
    %87 = vector.load %arg3[%c0_52, %c0_53] : memref<9x256xf32, #tpu.memory_space<vmem>>, vector<1x256xf32>
    %88 = vector.broadcast %87 : vector<1x256xf32> to vector<2x256xf32>
    %89 = arith.mulf %86, %88 : vector<2x256xf32>
    %90 = arith.truncf %89 : vector<2x256xf32> to vector<2x256xbf16>
    %c0_54 = arith.constant 0 : index
    %c0_55 = arith.constant 0 : index
    %c0_56 = arith.constant 0 : index
    %91 = vector.load %arg5[%c0_54, %c0_55, %c0_56] : memref<9x16x2xbf16, #tpu.memory_space<vmem>>, vector<1x16x2xbf16>
    %92 = vector.shape_cast %91 : vector<1x16x2xbf16> to vector<16x2xbf16>
    %cst_57 = arith.constant dense<0.000000e+00> : vector<16x256xf32>
    %93 = tpu.matmul %92, %90, %cst_57 {dimension_numbers = #tpu.dot_dimension_numbers<[1], [0], [0], [1], [0, 0, 1, 1], [], []>} : vector<16x2xbf16>, vector<2x256xbf16>, vector<16x256xf32> -> vector<16x256xf32>
    %94 = arith.addf %85, %93 : vector<16x256xf32>
    %c16_i32_58 = arith.constant 16 : i32
    %95 = tpu.dynamic_rotate %3 by %c16_i32_58 dim 1 : vector<2x256xf32>, i32 -> vector<2x256xf32>
    %c1_59 = arith.constant 1 : index
    %c0_60 = arith.constant 0 : index
    %96 = vector.load %arg3[%c1_59, %c0_60] : memref<9x256xf32, #tpu.memory_space<vmem>>, vector<1x256xf32>
    %97 = vector.broadcast %96 : vector<1x256xf32> to vector<2x256xf32>
    %98 = arith.mulf %95, %97 : vector<2x256xf32>
    %99 = arith.truncf %98 : vector<2x256xf32> to vector<2x256xbf16>
    %c1_61 = arith.constant 1 : index
    %c0_62 = arith.constant 0 : index
    %c0_63 = arith.constant 0 : index
    %100 = vector.load %arg5[%c1_61, %c0_62, %c0_63] : memref<9x16x2xbf16, #tpu.memory_space<vmem>>, vector<1x16x2xbf16>
    %101 = vector.shape_cast %100 : vector<1x16x2xbf16> to vector<16x2xbf16>
    %cst_64 = arith.constant dense<0.000000e+00> : vector<16x256xf32>
    %102 = tpu.matmul %101, %99, %cst_64 {dimension_numbers = #tpu.dot_dimension_numbers<[1], [0], [0], [1], [0, 0, 1, 1], [], []>} : vector<16x2xbf16>, vector<2x256xbf16>, vector<16x256xf32> -> vector<16x256xf32>
    %103 = arith.addf %94, %102 : vector<16x256xf32>
    %c15_i32_65 = arith.constant 15 : i32
    %104 = tpu.dynamic_rotate %3 by %c15_i32_65 dim 1 : vector<2x256xf32>, i32 -> vector<2x256xf32>
    %c2_66 = arith.constant 2 : index
    %c0_67 = arith.constant 0 : index
    %105 = vector.load %arg3[%c2_66, %c0_67] : memref<9x256xf32, #tpu.memory_space<vmem>>, vector<1x256xf32>
    %106 = vector.broadcast %105 : vector<1x256xf32> to vector<2x256xf32>
    %107 = arith.mulf %104, %106 : vector<2x256xf32>
    %108 = arith.truncf %107 : vector<2x256xf32> to vector<2x256xbf16>
    %c2_68 = arith.constant 2 : index
    %c0_69 = arith.constant 0 : index
    %c0_70 = arith.constant 0 : index
    %109 = vector.load %arg5[%c2_68, %c0_69, %c0_70] : memref<9x16x2xbf16, #tpu.memory_space<vmem>>, vector<1x16x2xbf16>
    %110 = vector.shape_cast %109 : vector<1x16x2xbf16> to vector<16x2xbf16>
    %cst_71 = arith.constant dense<0.000000e+00> : vector<16x256xf32>
    %111 = tpu.matmul %110, %108, %cst_71 {dimension_numbers = #tpu.dot_dimension_numbers<[1], [0], [0], [1], [0, 0, 1, 1], [], []>} : vector<16x2xbf16>, vector<2x256xbf16>, vector<16x256xf32> -> vector<16x256xf32>
    %112 = arith.addf %103, %111 : vector<16x256xf32>
    %c1_i32_72 = arith.constant 1 : i32
    %113 = tpu.dynamic_rotate %3 by %c1_i32_72 dim 1 : vector<2x256xf32>, i32 -> vector<2x256xf32>
    %c3_73 = arith.constant 3 : index
    %c0_74 = arith.constant 0 : index
    %114 = vector.load %arg3[%c3_73, %c0_74] : memref<9x256xf32, #tpu.memory_space<vmem>>, vector<1x256xf32>
    %115 = vector.broadcast %114 : vector<1x256xf32> to vector<2x256xf32>
    %116 = arith.mulf %113, %115 : vector<2x256xf32>
    %117 = arith.truncf %116 : vector<2x256xf32> to vector<2x256xbf16>
    %c3_75 = arith.constant 3 : index
    %c0_76 = arith.constant 0 : index
    %c0_77 = arith.constant 0 : index
    %118 = vector.load %arg5[%c3_75, %c0_76, %c0_77] : memref<9x16x2xbf16, #tpu.memory_space<vmem>>, vector<1x16x2xbf16>
    %119 = vector.shape_cast %118 : vector<1x16x2xbf16> to vector<16x2xbf16>
    %cst_78 = arith.constant dense<0.000000e+00> : vector<16x256xf32>
    %120 = tpu.matmul %119, %117, %cst_78 {dimension_numbers = #tpu.dot_dimension_numbers<[1], [0], [0], [1], [0, 0, 1, 1], [], []>} : vector<16x2xbf16>, vector<2x256xbf16>, vector<16x256xf32> -> vector<16x256xf32>
    %121 = arith.addf %112, %120 : vector<16x256xf32>
    %c4_79 = arith.constant 4 : index
    %c0_80 = arith.constant 0 : index
    %122 = vector.load %arg3[%c4_79, %c0_80] : memref<9x256xf32, #tpu.memory_space<vmem>>, vector<1x256xf32>
    %123 = vector.broadcast %122 : vector<1x256xf32> to vector<2x256xf32>
    %124 = arith.mulf %3, %123 : vector<2x256xf32>
    %125 = arith.truncf %124 : vector<2x256xf32> to vector<2x256xbf16>
    %c4_81 = arith.constant 4 : index
    %c0_82 = arith.constant 0 : index
    %c0_83 = arith.constant 0 : index
    %126 = vector.load %arg5[%c4_81, %c0_82, %c0_83] : memref<9x16x2xbf16, #tpu.memory_space<vmem>>, vector<1x16x2xbf16>
    %127 = vector.shape_cast %126 : vector<1x16x2xbf16> to vector<16x2xbf16>
    %cst_84 = arith.constant dense<0.000000e+00> : vector<16x256xf32>
    %128 = tpu.matmul %127, %125, %cst_84 {dimension_numbers = #tpu.dot_dimension_numbers<[1], [0], [0], [1], [0, 0, 1, 1], [], []>} : vector<16x2xbf16>, vector<2x256xbf16>, vector<16x256xf32> -> vector<16x256xf32>
    %129 = arith.addf %121, %128 : vector<16x256xf32>
    %c255_i32_85 = arith.constant 255 : i32
    %130 = tpu.dynamic_rotate %3 by %c255_i32_85 dim 1 : vector<2x256xf32>, i32 -> vector<2x256xf32>
    %c5_86 = arith.constant 5 : index
    %c0_87 = arith.constant 0 : index
    %131 = vector.load %arg3[%c5_86, %c0_87] : memref<9x256xf32, #tpu.memory_space<vmem>>, vector<1x256xf32>
    %132 = vector.broadcast %131 : vector<1x256xf32> to vector<2x256xf32>
    %133 = arith.mulf %130, %132 : vector<2x256xf32>
    %134 = arith.truncf %133 : vector<2x256xf32> to vector<2x256xbf16>
    %c5_88 = arith.constant 5 : index
    %c0_89 = arith.constant 0 : index
    %c0_90 = arith.constant 0 : index
    %135 = vector.load %arg5[%c5_88, %c0_89, %c0_90] : memref<9x16x2xbf16, #tpu.memory_space<vmem>>, vector<1x16x2xbf16>
    %136 = vector.shape_cast %135 : vector<1x16x2xbf16> to vector<16x2xbf16>
    %cst_91 = arith.constant dense<0.000000e+00> : vector<16x256xf32>
    %137 = tpu.matmul %136, %134, %cst_91 {dimension_numbers = #tpu.dot_dimension_numbers<[1], [0], [0], [1], [0, 0, 1, 1], [], []>} : vector<16x2xbf16>, vector<2x256xbf16>, vector<16x256xf32> -> vector<16x256xf32>
    %138 = arith.addf %129, %137 : vector<16x256xf32>
    %c241_i32_92 = arith.constant 241 : i32
    %139 = tpu.dynamic_rotate %3 by %c241_i32_92 dim 1 : vector<2x256xf32>, i32 -> vector<2x256xf32>
    %c6_93 = arith.constant 6 : index
    %c0_94 = arith.constant 0 : index
    %140 = vector.load %arg3[%c6_93, %c0_94] : memref<9x256xf32, #tpu.memory_space<vmem>>, vector<1x256xf32>
    %141 = vector.broadcast %140 : vector<1x256xf32> to vector<2x256xf32>
    %142 = arith.mulf %139, %141 : vector<2x256xf32>
    %143 = arith.truncf %142 : vector<2x256xf32> to vector<2x256xbf16>
    %c6_95 = arith.constant 6 : index
    %c0_96 = arith.constant 0 : index
    %c0_97 = arith.constant 0 : index
    %144 = vector.load %arg5[%c6_95, %c0_96, %c0_97] : memref<9x16x2xbf16, #tpu.memory_space<vmem>>, vector<1x16x2xbf16>
    %145 = vector.shape_cast %144 : vector<1x16x2xbf16> to vector<16x2xbf16>
    %cst_98 = arith.constant dense<0.000000e+00> : vector<16x256xf32>
    %146 = tpu.matmul %145, %143, %cst_98 {dimension_numbers = #tpu.dot_dimension_numbers<[1], [0], [0], [1], [0, 0, 1, 1], [], []>} : vector<16x2xbf16>, vector<2x256xbf16>, vector<16x256xf32> -> vector<16x256xf32>
    %147 = arith.addf %138, %146 : vector<16x256xf32>
    %c240_i32_99 = arith.constant 240 : i32
    %148 = tpu.dynamic_rotate %3 by %c240_i32_99 dim 1 : vector<2x256xf32>, i32 -> vector<2x256xf32>
    %c7_100 = arith.constant 7 : index
    %c0_101 = arith.constant 0 : index
    %149 = vector.load %arg3[%c7_100, %c0_101] : memref<9x256xf32, #tpu.memory_space<vmem>>, vector<1x256xf32>
    %150 = vector.broadcast %149 : vector<1x256xf32> to vector<2x256xf32>
    %151 = arith.mulf %148, %150 : vector<2x256xf32>
    %152 = arith.truncf %151 : vector<2x256xf32> to vector<2x256xbf16>
    %c7_102 = arith.constant 7 : index
    %c0_103 = arith.constant 0 : index
    %c0_104 = arith.constant 0 : index
    %153 = vector.load %arg5[%c7_102, %c0_103, %c0_104] : memref<9x16x2xbf16, #tpu.memory_space<vmem>>, vector<1x16x2xbf16>
    %154 = vector.shape_cast %153 : vector<1x16x2xbf16> to vector<16x2xbf16>
    %cst_105 = arith.constant dense<0.000000e+00> : vector<16x256xf32>
    %155 = tpu.matmul %154, %152, %cst_105 {dimension_numbers = #tpu.dot_dimension_numbers<[1], [0], [0], [1], [0, 0, 1, 1], [], []>} : vector<16x2xbf16>, vector<2x256xbf16>, vector<16x256xf32> -> vector<16x256xf32>
    %156 = arith.addf %147, %155 : vector<16x256xf32>
    %c239_i32_106 = arith.constant 239 : i32
    %157 = tpu.dynamic_rotate %3 by %c239_i32_106 dim 1 : vector<2x256xf32>, i32 -> vector<2x256xf32>
    %c8_107 = arith.constant 8 : index
    %c0_108 = arith.constant 0 : index
    %158 = vector.load %arg3[%c8_107, %c0_108] : memref<9x256xf32, #tpu.memory_space<vmem>>, vector<1x256xf32>
    %159 = vector.broadcast %158 : vector<1x256xf32> to vector<2x256xf32>
    %160 = arith.mulf %157, %159 : vector<2x256xf32>
    %161 = arith.truncf %160 : vector<2x256xf32> to vector<2x256xbf16>
    %c8_109 = arith.constant 8 : index
    %c0_110 = arith.constant 0 : index
    %c0_111 = arith.constant 0 : index
    %162 = vector.load %arg5[%c8_109, %c0_110, %c0_111] : memref<9x16x2xbf16, #tpu.memory_space<vmem>>, vector<1x16x2xbf16>
    %163 = vector.shape_cast %162 : vector<1x16x2xbf16> to vector<16x2xbf16>
    %cst_112 = arith.constant dense<0.000000e+00> : vector<16x256xf32>
    %164 = tpu.matmul %163, %161, %cst_112 {dimension_numbers = #tpu.dot_dimension_numbers<[1], [0], [0], [1], [0, 0, 1, 1], [], []>} : vector<16x2xbf16>, vector<2x256xbf16>, vector<16x256xf32> -> vector<16x256xf32>
    %165 = arith.addf %156, %164 : vector<16x256xf32>
    %c0_113 = arith.constant 0 : index
    %c0_114 = arith.constant 0 : index
    %166 = vector.load %arg17[%c0_113, %c0_114] : memref<16x2xf32, #tpu.memory_space<vmem>>, vector<16x2xf32>
    %167 = vector.extract_strided_slice %166 {offsets = [0, 0], sizes = [16, 1], strides = [1, 1]} : vector<16x2xf32> to vector<16x1xf32>
    %168 = vector.broadcast %167 : vector<16x1xf32> to vector<16x256xf32>
    %169 = arith.mulf %165, %168 : vector<16x256xf32>
    %170 = vector.extract_strided_slice %166 {offsets = [0, 1], sizes = [16, 1], strides = [1, 1]} : vector<16x2xf32> to vector<16x1xf32>
    %171 = vector.broadcast %170 : vector<16x1xf32> to vector<16x256xf32>
    %172 = arith.addf %169, %171 : vector<16x256xf32>
    %cst_115 = arith.constant 0.000000e+00 : f32
    %173 = vector.broadcast %cst_115 : f32 to vector<16x256xf32>
    %174 = arith.maximumf %172, %173 : vector<16x256xf32>
    %c17_i32_116 = arith.constant 17 : i32
    %175 = tpu.dynamic_rotate %174 by %c17_i32_116 dim 1 : vector<16x256xf32>, i32 -> vector<16x256xf32>
    %c0_117 = arith.constant 0 : index
    %c0_118 = arith.constant 0 : index
    %176 = vector.load %arg3[%c0_117, %c0_118] : memref<9x256xf32, #tpu.memory_space<vmem>>, vector<1x256xf32>
    %177 = vector.broadcast %176 : vector<1x256xf32> to vector<16x256xf32>
    %178 = arith.mulf %175, %177 : vector<16x256xf32>
    %179 = arith.truncf %178 : vector<16x256xf32> to vector<16x256xbf16>
    %c0_119 = arith.constant 0 : index
    %c0_120 = arith.constant 0 : index
    %c0_121 = arith.constant 0 : index
    %180 = vector.load %arg6[%c0_119, %c0_120, %c0_121] : memref<9x16x16xbf16, #tpu.memory_space<vmem>>, vector<1x16x16xbf16>
    %181 = vector.shape_cast %180 : vector<1x16x16xbf16> to vector<16x16xbf16>
    %cst_122 = arith.constant dense<0.000000e+00> : vector<16x256xf32>
    %182 = tpu.matmul %181, %179, %cst_122 {dimension_numbers = #tpu.dot_dimension_numbers<[1], [0], [0], [1], [0, 0, 1, 1], [], []>} : vector<16x16xbf16>, vector<16x256xbf16>, vector<16x256xf32> -> vector<16x256xf32>
    %c16_i32_123 = arith.constant 16 : i32
    %183 = tpu.dynamic_rotate %174 by %c16_i32_123 dim 1 : vector<16x256xf32>, i32 -> vector<16x256xf32>
    %c1_124 = arith.constant 1 : index
    %c0_125 = arith.constant 0 : index
    %184 = vector.load %arg3[%c1_124, %c0_125] : memref<9x256xf32, #tpu.memory_space<vmem>>, vector<1x256xf32>
    %185 = vector.broadcast %184 : vector<1x256xf32> to vector<16x256xf32>
    %186 = arith.mulf %183, %185 : vector<16x256xf32>
    %187 = arith.truncf %186 : vector<16x256xf32> to vector<16x256xbf16>
    %c1_126 = arith.constant 1 : index
    %c0_127 = arith.constant 0 : index
    %c0_128 = arith.constant 0 : index
    %188 = vector.load %arg6[%c1_126, %c0_127, %c0_128] : memref<9x16x16xbf16, #tpu.memory_space<vmem>>, vector<1x16x16xbf16>
    %189 = vector.shape_cast %188 : vector<1x16x16xbf16> to vector<16x16xbf16>
    %cst_129 = arith.constant dense<0.000000e+00> : vector<16x256xf32>
    %190 = tpu.matmul %189, %187, %cst_129 {dimension_numbers = #tpu.dot_dimension_numbers<[1], [0], [0], [1], [0, 0, 1, 1], [], []>} : vector<16x16xbf16>, vector<16x256xbf16>, vector<16x256xf32> -> vector<16x256xf32>
    %191 = arith.addf %182, %190 : vector<16x256xf32>
    %c15_i32_130 = arith.constant 15 : i32
    %192 = tpu.dynamic_rotate %174 by %c15_i32_130 dim 1 : vector<16x256xf32>, i32 -> vector<16x256xf32>
    %c2_131 = arith.constant 2 : index
    %c0_132 = arith.constant 0 : index
    %193 = vector.load %arg3[%c2_131, %c0_132] : memref<9x256xf32, #tpu.memory_space<vmem>>, vector<1x256xf32>
    %194 = vector.broadcast %193 : vector<1x256xf32> to vector<16x256xf32>
    %195 = arith.mulf %192, %194 : vector<16x256xf32>
    %196 = arith.truncf %195 : vector<16x256xf32> to vector<16x256xbf16>
    %c2_133 = arith.constant 2 : index
    %c0_134 = arith.constant 0 : index
    %c0_135 = arith.constant 0 : index
    %197 = vector.load %arg6[%c2_133, %c0_134, %c0_135] : memref<9x16x16xbf16, #tpu.memory_space<vmem>>, vector<1x16x16xbf16>
    %198 = vector.shape_cast %197 : vector<1x16x16xbf16> to vector<16x16xbf16>
    %cst_136 = arith.constant dense<0.000000e+00> : vector<16x256xf32>
    %199 = tpu.matmul %198, %196, %cst_136 {dimension_numbers = #tpu.dot_dimension_numbers<[1], [0], [0], [1], [0, 0, 1, 1], [], []>} : vector<16x16xbf16>, vector<16x256xbf16>, vector<16x256xf32> -> vector<16x256xf32>
    %200 = arith.addf %191, %199 : vector<16x256xf32>
    %c1_i32_137 = arith.constant 1 : i32
    %201 = tpu.dynamic_rotate %174 by %c1_i32_137 dim 1 : vector<16x256xf32>, i32 -> vector<16x256xf32>
    %c3_138 = arith.constant 3 : index
    %c0_139 = arith.constant 0 : index
    %202 = vector.load %arg3[%c3_138, %c0_139] : memref<9x256xf32, #tpu.memory_space<vmem>>, vector<1x256xf32>
    %203 = vector.broadcast %202 : vector<1x256xf32> to vector<16x256xf32>
    %204 = arith.mulf %201, %203 : vector<16x256xf32>
    %205 = arith.truncf %204 : vector<16x256xf32> to vector<16x256xbf16>
    %c3_140 = arith.constant 3 : index
    %c0_141 = arith.constant 0 : index
    %c0_142 = arith.constant 0 : index
    %206 = vector.load %arg6[%c3_140, %c0_141, %c0_142] : memref<9x16x16xbf16, #tpu.memory_space<vmem>>, vector<1x16x16xbf16>
    %207 = vector.shape_cast %206 : vector<1x16x16xbf16> to vector<16x16xbf16>
    %cst_143 = arith.constant dense<0.000000e+00> : vector<16x256xf32>
    %208 = tpu.matmul %207, %205, %cst_143 {dimension_numbers = #tpu.dot_dimension_numbers<[1], [0], [0], [1], [0, 0, 1, 1], [], []>} : vector<16x16xbf16>, vector<16x256xbf16>, vector<16x256xf32> -> vector<16x256xf32>
    %209 = arith.addf %200, %208 : vector<16x256xf32>
    %c4_144 = arith.constant 4 : index
    %c0_145 = arith.constant 0 : index
    %210 = vector.load %arg3[%c4_144, %c0_145] : memref<9x256xf32, #tpu.memory_space<vmem>>, vector<1x256xf32>
    %211 = vector.broadcast %210 : vector<1x256xf32> to vector<16x256xf32>
    %212 = arith.mulf %174, %211 : vector<16x256xf32>
    %213 = arith.truncf %212 : vector<16x256xf32> to vector<16x256xbf16>
    %c4_146 = arith.constant 4 : index
    %c0_147 = arith.constant 0 : index
    %c0_148 = arith.constant 0 : index
    %214 = vector.load %arg6[%c4_146, %c0_147, %c0_148] : memref<9x16x16xbf16, #tpu.memory_space<vmem>>, vector<1x16x16xbf16>
    %215 = vector.shape_cast %214 : vector<1x16x16xbf16> to vector<16x16xbf16>
    %cst_149 = arith.constant dense<0.000000e+00> : vector<16x256xf32>
    %216 = tpu.matmul %215, %213, %cst_149 {dimension_numbers = #tpu.dot_dimension_numbers<[1], [0], [0], [1], [0, 0, 1, 1], [], []>} : vector<16x16xbf16>, vector<16x256xbf16>, vector<16x256xf32> -> vector<16x256xf32>
    %217 = arith.addf %209, %216 : vector<16x256xf32>
    %c255_i32_150 = arith.constant 255 : i32
    %218 = tpu.dynamic_rotate %174 by %c255_i32_150 dim 1 : vector<16x256xf32>, i32 -> vector<16x256xf32>
    %c5_151 = arith.constant 5 : index
    %c0_152 = arith.constant 0 : index
    %219 = vector.load %arg3[%c5_151, %c0_152] : memref<9x256xf32, #tpu.memory_space<vmem>>, vector<1x256xf32>
    %220 = vector.broadcast %219 : vector<1x256xf32> to vector<16x256xf32>
    %221 = arith.mulf %218, %220 : vector<16x256xf32>
    %222 = arith.truncf %221 : vector<16x256xf32> to vector<16x256xbf16>
    %c5_153 = arith.constant 5 : index
    %c0_154 = arith.constant 0 : index
    %c0_155 = arith.constant 0 : index
    %223 = vector.load %arg6[%c5_153, %c0_154, %c0_155] : memref<9x16x16xbf16, #tpu.memory_space<vmem>>, vector<1x16x16xbf16>
    %224 = vector.shape_cast %223 : vector<1x16x16xbf16> to vector<16x16xbf16>
    %cst_156 = arith.constant dense<0.000000e+00> : vector<16x256xf32>
    %225 = tpu.matmul %224, %222, %cst_156 {dimension_numbers = #tpu.dot_dimension_numbers<[1], [0], [0], [1], [0, 0, 1, 1], [], []>} : vector<16x16xbf16>, vector<16x256xbf16>, vector<16x256xf32> -> vector<16x256xf32>
    %226 = arith.addf %217, %225 : vector<16x256xf32>
    %c241_i32_157 = arith.constant 241 : i32
    %227 = tpu.dynamic_rotate %174 by %c241_i32_157 dim 1 : vector<16x256xf32>, i32 -> vector<16x256xf32>
    %c6_158 = arith.constant 6 : index
    %c0_159 = arith.constant 0 : index
    %228 = vector.load %arg3[%c6_158, %c0_159] : memref<9x256xf32, #tpu.memory_space<vmem>>, vector<1x256xf32>
    %229 = vector.broadcast %228 : vector<1x256xf32> to vector<16x256xf32>
    %230 = arith.mulf %227, %229 : vector<16x256xf32>
    %231 = arith.truncf %230 : vector<16x256xf32> to vector<16x256xbf16>
    %c6_160 = arith.constant 6 : index
    %c0_161 = arith.constant 0 : index
    %c0_162 = arith.constant 0 : index
    %232 = vector.load %arg6[%c6_160, %c0_161, %c0_162] : memref<9x16x16xbf16, #tpu.memory_space<vmem>>, vector<1x16x16xbf16>
    %233 = vector.shape_cast %232 : vector<1x16x16xbf16> to vector<16x16xbf16>
    %cst_163 = arith.constant dense<0.000000e+00> : vector<16x256xf32>
    %234 = tpu.matmul %233, %231, %cst_163 {dimension_numbers = #tpu.dot_dimension_numbers<[1], [0], [0], [1], [0, 0, 1, 1], [], []>} : vector<16x16xbf16>, vector<16x256xbf16>, vector<16x256xf32> -> vector<16x256xf32>
    %235 = arith.addf %226, %234 : vector<16x256xf32>
    %c240_i32_164 = arith.constant 240 : i32
    %236 = tpu.dynamic_rotate %174 by %c240_i32_164 dim 1 : vector<16x256xf32>, i32 -> vector<16x256xf32>
    %c7_165 = arith.constant 7 : index
    %c0_166 = arith.constant 0 : index
    %237 = vector.load %arg3[%c7_165, %c0_166] : memref<9x256xf32, #tpu.memory_space<vmem>>, vector<1x256xf32>
    %238 = vector.broadcast %237 : vector<1x256xf32> to vector<16x256xf32>
    %239 = arith.mulf %236, %238 : vector<16x256xf32>
    %240 = arith.truncf %239 : vector<16x256xf32> to vector<16x256xbf16>
    %c7_167 = arith.constant 7 : index
    %c0_168 = arith.constant 0 : index
    %c0_169 = arith.constant 0 : index
    %241 = vector.load %arg6[%c7_167, %c0_168, %c0_169] : memref<9x16x16xbf16, #tpu.memory_space<vmem>>, vector<1x16x16xbf16>
    %242 = vector.shape_cast %241 : vector<1x16x16xbf16> to vector<16x16xbf16>
    %cst_170 = arith.constant dense<0.000000e+00> : vector<16x256xf32>
    %243 = tpu.matmul %242, %240, %cst_170 {dimension_numbers = #tpu.dot_dimension_numbers<[1], [0], [0], [1], [0, 0, 1, 1], [], []>} : vector<16x16xbf16>, vector<16x256xbf16>, vector<16x256xf32> -> vector<16x256xf32>
    %244 = arith.addf %235, %243 : vector<16x256xf32>
    %c239_i32_171 = arith.constant 239 : i32
    %245 = tpu.dynamic_rotate %174 by %c239_i32_171 dim 1 : vector<16x256xf32>, i32 -> vector<16x256xf32>
    %c8_172 = arith.constant 8 : index
    %c0_173 = arith.constant 0 : index
    %246 = vector.load %arg3[%c8_172, %c0_173] : memref<9x256xf32, #tpu.memory_space<vmem>>, vector<1x256xf32>
    %247 = vector.broadcast %246 : vector<1x256xf32> to vector<16x256xf32>
    %248 = arith.mulf %245, %247 : vector<16x256xf32>
    %249 = arith.truncf %248 : vector<16x256xf32> to vector<16x256xbf16>
    %c8_174 = arith.constant 8 : index
    %c0_175 = arith.constant 0 : index
    %c0_176 = arith.constant 0 : index
    %250 = vector.load %arg6[%c8_174, %c0_175, %c0_176] : memref<9x16x16xbf16, #tpu.memory_space<vmem>>, vector<1x16x16xbf16>
    %251 = vector.shape_cast %250 : vector<1x16x16xbf16> to vector<16x16xbf16>
    %cst_177 = arith.constant dense<0.000000e+00> : vector<16x256xf32>
    %252 = tpu.matmul %251, %249, %cst_177 {dimension_numbers = #tpu.dot_dimension_numbers<[1], [0], [0], [1], [0, 0, 1, 1], [], []>} : vector<16x16xbf16>, vector<16x256xbf16>, vector<16x256xf32> -> vector<16x256xf32>
    %253 = arith.addf %244, %252 : vector<16x256xf32>
    %c0_178 = arith.constant 0 : index
    %c0_179 = arith.constant 0 : index
    %254 = vector.load %arg18[%c0_178, %c0_179] : memref<16x2xf32, #tpu.memory_space<vmem>>, vector<16x2xf32>
    %255 = vector.extract_strided_slice %254 {offsets = [0, 0], sizes = [16, 1], strides = [1, 1]} : vector<16x2xf32> to vector<16x1xf32>
    %256 = vector.broadcast %255 : vector<16x1xf32> to vector<16x256xf32>
    %257 = arith.mulf %253, %256 : vector<16x256xf32>
    %258 = vector.extract_strided_slice %254 {offsets = [0, 1], sizes = [16, 1], strides = [1, 1]} : vector<16x2xf32> to vector<16x1xf32>
    %259 = vector.broadcast %258 : vector<16x1xf32> to vector<16x256xf32>
    %260 = arith.addf %257, %259 : vector<16x256xf32>
    %cst_180 = arith.constant 0.000000e+00 : f32
    %261 = vector.broadcast %cst_180 : f32 to vector<16x256xf32>
    %262 = arith.maximumf %260, %261 : vector<16x256xf32>
    %c17_i32_181 = arith.constant 17 : i32
    %263 = tpu.dynamic_rotate %262 by %c17_i32_181 dim 1 : vector<16x256xf32>, i32 -> vector<16x256xf32>
    %c0_182 = arith.constant 0 : index
    %c0_183 = arith.constant 0 : index
    %264 = vector.load %arg3[%c0_182, %c0_183] : memref<9x256xf32, #tpu.memory_space<vmem>>, vector<1x256xf32>
    %265 = vector.broadcast %264 : vector<1x256xf32> to vector<16x256xf32>
    %266 = arith.mulf %263, %265 : vector<16x256xf32>
    %267 = arith.truncf %266 : vector<16x256xf32> to vector<16x256xbf16>
    %c0_184 = arith.constant 0 : index
    %c0_185 = arith.constant 0 : index
    %c0_186 = arith.constant 0 : index
    %268 = vector.load %arg7[%c0_184, %c0_185, %c0_186] : memref<9x16x16xbf16, #tpu.memory_space<vmem>>, vector<1x16x16xbf16>
    %269 = vector.shape_cast %268 : vector<1x16x16xbf16> to vector<16x16xbf16>
    %cst_187 = arith.constant dense<0.000000e+00> : vector<16x256xf32>
    %270 = tpu.matmul %269, %267, %cst_187 {dimension_numbers = #tpu.dot_dimension_numbers<[1], [0], [0], [1], [0, 0, 1, 1], [], []>} : vector<16x16xbf16>, vector<16x256xbf16>, vector<16x256xf32> -> vector<16x256xf32>
    %c16_i32_188 = arith.constant 16 : i32
    %271 = tpu.dynamic_rotate %262 by %c16_i32_188 dim 1 : vector<16x256xf32>, i32 -> vector<16x256xf32>
    %c1_189 = arith.constant 1 : index
    %c0_190 = arith.constant 0 : index
    %272 = vector.load %arg3[%c1_189, %c0_190] : memref<9x256xf32, #tpu.memory_space<vmem>>, vector<1x256xf32>
    %273 = vector.broadcast %272 : vector<1x256xf32> to vector<16x256xf32>
    %274 = arith.mulf %271, %273 : vector<16x256xf32>
    %275 = arith.truncf %274 : vector<16x256xf32> to vector<16x256xbf16>
    %c1_191 = arith.constant 1 : index
    %c0_192 = arith.constant 0 : index
    %c0_193 = arith.constant 0 : index
    %276 = vector.load %arg7[%c1_191, %c0_192, %c0_193] : memref<9x16x16xbf16, #tpu.memory_space<vmem>>, vector<1x16x16xbf16>
    %277 = vector.shape_cast %276 : vector<1x16x16xbf16> to vector<16x16xbf16>
    %cst_194 = arith.constant dense<0.000000e+00> : vector<16x256xf32>
    %278 = tpu.matmul %277, %275, %cst_194 {dimension_numbers = #tpu.dot_dimension_numbers<[1], [0], [0], [1], [0, 0, 1, 1], [], []>} : vector<16x16xbf16>, vector<16x256xbf16>, vector<16x256xf32> -> vector<16x256xf32>
    %279 = arith.addf %270, %278 : vector<16x256xf32>
    %c15_i32_195 = arith.constant 15 : i32
    %280 = tpu.dynamic_rotate %262 by %c15_i32_195 dim 1 : vector<16x256xf32>, i32 -> vector<16x256xf32>
    %c2_196 = arith.constant 2 : index
    %c0_197 = arith.constant 0 : index
    %281 = vector.load %arg3[%c2_196, %c0_197] : memref<9x256xf32, #tpu.memory_space<vmem>>, vector<1x256xf32>
    %282 = vector.broadcast %281 : vector<1x256xf32> to vector<16x256xf32>
    %283 = arith.mulf %280, %282 : vector<16x256xf32>
    %284 = arith.truncf %283 : vector<16x256xf32> to vector<16x256xbf16>
    %c2_198 = arith.constant 2 : index
    %c0_199 = arith.constant 0 : index
    %c0_200 = arith.constant 0 : index
    %285 = vector.load %arg7[%c2_198, %c0_199, %c0_200] : memref<9x16x16xbf16, #tpu.memory_space<vmem>>, vector<1x16x16xbf16>
    %286 = vector.shape_cast %285 : vector<1x16x16xbf16> to vector<16x16xbf16>
    %cst_201 = arith.constant dense<0.000000e+00> : vector<16x256xf32>
    %287 = tpu.matmul %286, %284, %cst_201 {dimension_numbers = #tpu.dot_dimension_numbers<[1], [0], [0], [1], [0, 0, 1, 1], [], []>} : vector<16x16xbf16>, vector<16x256xbf16>, vector<16x256xf32> -> vector<16x256xf32>
    %288 = arith.addf %279, %287 : vector<16x256xf32>
    %c1_i32_202 = arith.constant 1 : i32
    %289 = tpu.dynamic_rotate %262 by %c1_i32_202 dim 1 : vector<16x256xf32>, i32 -> vector<16x256xf32>
    %c3_203 = arith.constant 3 : index
    %c0_204 = arith.constant 0 : index
    %290 = vector.load %arg3[%c3_203, %c0_204] : memref<9x256xf32, #tpu.memory_space<vmem>>, vector<1x256xf32>
    %291 = vector.broadcast %290 : vector<1x256xf32> to vector<16x256xf32>
    %292 = arith.mulf %289, %291 : vector<16x256xf32>
    %293 = arith.truncf %292 : vector<16x256xf32> to vector<16x256xbf16>
    %c3_205 = arith.constant 3 : index
    %c0_206 = arith.constant 0 : index
    %c0_207 = arith.constant 0 : index
    %294 = vector.load %arg7[%c3_205, %c0_206, %c0_207] : memref<9x16x16xbf16, #tpu.memory_space<vmem>>, vector<1x16x16xbf16>
    %295 = vector.shape_cast %294 : vector<1x16x16xbf16> to vector<16x16xbf16>
    %cst_208 = arith.constant dense<0.000000e+00> : vector<16x256xf32>
    %296 = tpu.matmul %295, %293, %cst_208 {dimension_numbers = #tpu.dot_dimension_numbers<[1], [0], [0], [1], [0, 0, 1, 1], [], []>} : vector<16x16xbf16>, vector<16x256xbf16>, vector<16x256xf32> -> vector<16x256xf32>
    %297 = arith.addf %288, %296 : vector<16x256xf32>
    %c4_209 = arith.constant 4 : index
    %c0_210 = arith.constant 0 : index
    %298 = vector.load %arg3[%c4_209, %c0_210] : memref<9x256xf32, #tpu.memory_space<vmem>>, vector<1x256xf32>
    %299 = vector.broadcast %298 : vector<1x256xf32> to vector<16x256xf32>
    %300 = arith.mulf %262, %299 : vector<16x256xf32>
    %301 = arith.truncf %300 : vector<16x256xf32> to vector<16x256xbf16>
    %c4_211 = arith.constant 4 : index
    %c0_212 = arith.constant 0 : index
    %c0_213 = arith.constant 0 : index
    %302 = vector.load %arg7[%c4_211, %c0_212, %c0_213] : memref<9x16x16xbf16, #tpu.memory_space<vmem>>, vector<1x16x16xbf16>
    %303 = vector.shape_cast %302 : vector<1x16x16xbf16> to vector<16x16xbf16>
    %cst_214 = arith.constant dense<0.000000e+00> : vector<16x256xf32>
    %304 = tpu.matmul %303, %301, %cst_214 {dimension_numbers = #tpu.dot_dimension_numbers<[1], [0], [0], [1], [0, 0, 1, 1], [], []>} : vector<16x16xbf16>, vector<16x256xbf16>, vector<16x256xf32> -> vector<16x256xf32>
    %305 = arith.addf %297, %304 : vector<16x256xf32>
    %c255_i32_215 = arith.constant 255 : i32
    %306 = tpu.dynamic_rotate %262 by %c255_i32_215 dim 1 : vector<16x256xf32>, i32 -> vector<16x256xf32>
    %c5_216 = arith.constant 5 : index
    %c0_217 = arith.constant 0 : index
    %307 = vector.load %arg3[%c5_216, %c0_217] : memref<9x256xf32, #tpu.memory_space<vmem>>, vector<1x256xf32>
    %308 = vector.broadcast %307 : vector<1x256xf32> to vector<16x256xf32>
    %309 = arith.mulf %306, %308 : vector<16x256xf32>
    %310 = arith.truncf %309 : vector<16x256xf32> to vector<16x256xbf16>
    %c5_218 = arith.constant 5 : index
    %c0_219 = arith.constant 0 : index
    %c0_220 = arith.constant 0 : index
    %311 = vector.load %arg7[%c5_218, %c0_219, %c0_220] : memref<9x16x16xbf16, #tpu.memory_space<vmem>>, vector<1x16x16xbf16>
    %312 = vector.shape_cast %311 : vector<1x16x16xbf16> to vector<16x16xbf16>
    %cst_221 = arith.constant dense<0.000000e+00> : vector<16x256xf32>
    %313 = tpu.matmul %312, %310, %cst_221 {dimension_numbers = #tpu.dot_dimension_numbers<[1], [0], [0], [1], [0, 0, 1, 1], [], []>} : vector<16x16xbf16>, vector<16x256xbf16>, vector<16x256xf32> -> vector<16x256xf32>
    %314 = arith.addf %305, %313 : vector<16x256xf32>
    %c241_i32_222 = arith.constant 241 : i32
    %315 = tpu.dynamic_rotate %262 by %c241_i32_222 dim 1 : vector<16x256xf32>, i32 -> vector<16x256xf32>
    %c6_223 = arith.constant 6 : index
    %c0_224 = arith.constant 0 : index
    %316 = vector.load %arg3[%c6_223, %c0_224] : memref<9x256xf32, #tpu.memory_space<vmem>>, vector<1x256xf32>
    %317 = vector.broadcast %316 : vector<1x256xf32> to vector<16x256xf32>
    %318 = arith.mulf %315, %317 : vector<16x256xf32>
    %319 = arith.truncf %318 : vector<16x256xf32> to vector<16x256xbf16>
    %c6_225 = arith.constant 6 : index
    %c0_226 = arith.constant 0 : index
    %c0_227 = arith.constant 0 : index
    %320 = vector.load %arg7[%c6_225, %c0_226, %c0_227] : memref<9x16x16xbf16, #tpu.memory_space<vmem>>, vector<1x16x16xbf16>
    %321 = vector.shape_cast %320 : vector<1x16x16xbf16> to vector<16x16xbf16>
    %cst_228 = arith.constant dense<0.000000e+00> : vector<16x256xf32>
    %322 = tpu.matmul %321, %319, %cst_228 {dimension_numbers = #tpu.dot_dimension_numbers<[1], [0], [0], [1], [0, 0, 1, 1], [], []>} : vector<16x16xbf16>, vector<16x256xbf16>, vector<16x256xf32> -> vector<16x256xf32>
    %323 = arith.addf %314, %322 : vector<16x256xf32>
    %c240_i32_229 = arith.constant 240 : i32
    %324 = tpu.dynamic_rotate %262 by %c240_i32_229 dim 1 : vector<16x256xf32>, i32 -> vector<16x256xf32>
    %c7_230 = arith.constant 7 : index
    %c0_231 = arith.constant 0 : index
    %325 = vector.load %arg3[%c7_230, %c0_231] : memref<9x256xf32, #tpu.memory_space<vmem>>, vector<1x256xf32>
    %326 = vector.broadcast %325 : vector<1x256xf32> to vector<16x256xf32>
    %327 = arith.mulf %324, %326 : vector<16x256xf32>
    %328 = arith.truncf %327 : vector<16x256xf32> to vector<16x256xbf16>
    %c7_232 = arith.constant 7 : index
    %c0_233 = arith.constant 0 : index
    %c0_234 = arith.constant 0 : index
    %329 = vector.load %arg7[%c7_232, %c0_233, %c0_234] : memref<9x16x16xbf16, #tpu.memory_space<vmem>>, vector<1x16x16xbf16>
    %330 = vector.shape_cast %329 : vector<1x16x16xbf16> to vector<16x16xbf16>
    %cst_235 = arith.constant dense<0.000000e+00> : vector<16x256xf32>
    %331 = tpu.matmul %330, %328, %cst_235 {dimension_numbers = #tpu.dot_dimension_numbers<[1], [0], [0], [1], [0, 0, 1, 1], [], []>} : vector<16x16xbf16>, vector<16x256xbf16>, vector<16x256xf32> -> vector<16x256xf32>
    %332 = arith.addf %323, %331 : vector<16x256xf32>
    %c239_i32_236 = arith.constant 239 : i32
    %333 = tpu.dynamic_rotate %262 by %c239_i32_236 dim 1 : vector<16x256xf32>, i32 -> vector<16x256xf32>
    %c8_237 = arith.constant 8 : index
    %c0_238 = arith.constant 0 : index
    %334 = vector.load %arg3[%c8_237, %c0_238] : memref<9x256xf32, #tpu.memory_space<vmem>>, vector<1x256xf32>
    %335 = vector.broadcast %334 : vector<1x256xf32> to vector<16x256xf32>
    %336 = arith.mulf %333, %335 : vector<16x256xf32>
    %337 = arith.truncf %336 : vector<16x256xf32> to vector<16x256xbf16>
    %c8_239 = arith.constant 8 : index
    %c0_240 = arith.constant 0 : index
    %c0_241 = arith.constant 0 : index
    %338 = vector.load %arg7[%c8_239, %c0_240, %c0_241] : memref<9x16x16xbf16, #tpu.memory_space<vmem>>, vector<1x16x16xbf16>
    %339 = vector.shape_cast %338 : vector<1x16x16xbf16> to vector<16x16xbf16>
    %cst_242 = arith.constant dense<0.000000e+00> : vector<16x256xf32>
    %340 = tpu.matmul %339, %337, %cst_242 {dimension_numbers = #tpu.dot_dimension_numbers<[1], [0], [0], [1], [0, 0, 1, 1], [], []>} : vector<16x16xbf16>, vector<16x256xbf16>, vector<16x256xf32> -> vector<16x256xf32>
    %341 = arith.addf %332, %340 : vector<16x256xf32>
    %c0_243 = arith.constant 0 : index
    %c0_244 = arith.constant 0 : index
    %342 = vector.load %arg19[%c0_243, %c0_244] : memref<16x2xf32, #tpu.memory_space<vmem>>, vector<16x2xf32>
    %343 = vector.extract_strided_slice %342 {offsets = [0, 0], sizes = [16, 1], strides = [1, 1]} : vector<16x2xf32> to vector<16x1xf32>
    %344 = vector.broadcast %343 : vector<16x1xf32> to vector<16x256xf32>
    %345 = arith.mulf %341, %344 : vector<16x256xf32>
    %346 = vector.extract_strided_slice %342 {offsets = [0, 1], sizes = [16, 1], strides = [1, 1]} : vector<16x2xf32> to vector<16x1xf32>
    %347 = vector.broadcast %346 : vector<16x1xf32> to vector<16x256xf32>
    %348 = arith.addf %345, %347 : vector<16x256xf32>
    %cst_245 = arith.constant 0.000000e+00 : f32
    %349 = vector.broadcast %cst_245 : f32 to vector<16x256xf32>
    %350 = arith.maximumf %348, %349 : vector<16x256xf32>
    %c17_i32_246 = arith.constant 17 : i32
    %351 = tpu.dynamic_rotate %350 by %c17_i32_246 dim 1 : vector<16x256xf32>, i32 -> vector<16x256xf32>
    %c0_247 = arith.constant 0 : index
    %c0_248 = arith.constant 0 : index
    %352 = vector.load %arg3[%c0_247, %c0_248] : memref<9x256xf32, #tpu.memory_space<vmem>>, vector<1x256xf32>
    %353 = vector.broadcast %352 : vector<1x256xf32> to vector<16x256xf32>
    %354 = arith.mulf %351, %353 : vector<16x256xf32>
    %355 = arith.truncf %354 : vector<16x256xf32> to vector<16x256xbf16>
    %c0_249 = arith.constant 0 : index
    %c0_250 = arith.constant 0 : index
    %c0_251 = arith.constant 0 : index
    %356 = vector.load %arg8[%c0_249, %c0_250, %c0_251] : memref<9x16x16xbf16, #tpu.memory_space<vmem>>, vector<1x16x16xbf16>
    %357 = vector.shape_cast %356 : vector<1x16x16xbf16> to vector<16x16xbf16>
    %cst_252 = arith.constant dense<0.000000e+00> : vector<16x256xf32>
    %358 = tpu.matmul %357, %355, %cst_252 {dimension_numbers = #tpu.dot_dimension_numbers<[1], [0], [0], [1], [0, 0, 1, 1], [], []>} : vector<16x16xbf16>, vector<16x256xbf16>, vector<16x256xf32> -> vector<16x256xf32>
    %c16_i32_253 = arith.constant 16 : i32
    %359 = tpu.dynamic_rotate %350 by %c16_i32_253 dim 1 : vector<16x256xf32>, i32 -> vector<16x256xf32>
    %c1_254 = arith.constant 1 : index
    %c0_255 = arith.constant 0 : index
    %360 = vector.load %arg3[%c1_254, %c0_255] : memref<9x256xf32, #tpu.memory_space<vmem>>, vector<1x256xf32>
    %361 = vector.broadcast %360 : vector<1x256xf32> to vector<16x256xf32>
    %362 = arith.mulf %359, %361 : vector<16x256xf32>
    %363 = arith.truncf %362 : vector<16x256xf32> to vector<16x256xbf16>
    %c1_256 = arith.constant 1 : index
    %c0_257 = arith.constant 0 : index
    %c0_258 = arith.constant 0 : index
    %364 = vector.load %arg8[%c1_256, %c0_257, %c0_258] : memref<9x16x16xbf16, #tpu.memory_space<vmem>>, vector<1x16x16xbf16>
    %365 = vector.shape_cast %364 : vector<1x16x16xbf16> to vector<16x16xbf16>
    %cst_259 = arith.constant dense<0.000000e+00> : vector<16x256xf32>
    %366 = tpu.matmul %365, %363, %cst_259 {dimension_numbers = #tpu.dot_dimension_numbers<[1], [0], [0], [1], [0, 0, 1, 1], [], []>} : vector<16x16xbf16>, vector<16x256xbf16>, vector<16x256xf32> -> vector<16x256xf32>
    %367 = arith.addf %358, %366 : vector<16x256xf32>
    %c15_i32_260 = arith.constant 15 : i32
    %368 = tpu.dynamic_rotate %350 by %c15_i32_260 dim 1 : vector<16x256xf32>, i32 -> vector<16x256xf32>
    %c2_261 = arith.constant 2 : index
    %c0_262 = arith.constant 0 : index
    %369 = vector.load %arg3[%c2_261, %c0_262] : memref<9x256xf32, #tpu.memory_space<vmem>>, vector<1x256xf32>
    %370 = vector.broadcast %369 : vector<1x256xf32> to vector<16x256xf32>
    %371 = arith.mulf %368, %370 : vector<16x256xf32>
    %372 = arith.truncf %371 : vector<16x256xf32> to vector<16x256xbf16>
    %c2_263 = arith.constant 2 : index
    %c0_264 = arith.constant 0 : index
    %c0_265 = arith.constant 0 : index
    %373 = vector.load %arg8[%c2_263, %c0_264, %c0_265] : memref<9x16x16xbf16, #tpu.memory_space<vmem>>, vector<1x16x16xbf16>
    %374 = vector.shape_cast %373 : vector<1x16x16xbf16> to vector<16x16xbf16>
    %cst_266 = arith.constant dense<0.000000e+00> : vector<16x256xf32>
    %375 = tpu.matmul %374, %372, %cst_266 {dimension_numbers = #tpu.dot_dimension_numbers<[1], [0], [0], [1], [0, 0, 1, 1], [], []>} : vector<16x16xbf16>, vector<16x256xbf16>, vector<16x256xf32> -> vector<16x256xf32>
    %376 = arith.addf %367, %375 : vector<16x256xf32>
    %c1_i32_267 = arith.constant 1 : i32
    %377 = tpu.dynamic_rotate %350 by %c1_i32_267 dim 1 : vector<16x256xf32>, i32 -> vector<16x256xf32>
    %c3_268 = arith.constant 3 : index
    %c0_269 = arith.constant 0 : index
    %378 = vector.load %arg3[%c3_268, %c0_269] : memref<9x256xf32, #tpu.memory_space<vmem>>, vector<1x256xf32>
    %379 = vector.broadcast %378 : vector<1x256xf32> to vector<16x256xf32>
    %380 = arith.mulf %377, %379 : vector<16x256xf32>
    %381 = arith.truncf %380 : vector<16x256xf32> to vector<16x256xbf16>
    %c3_270 = arith.constant 3 : index
    %c0_271 = arith.constant 0 : index
    %c0_272 = arith.constant 0 : index
    %382 = vector.load %arg8[%c3_270, %c0_271, %c0_272] : memref<9x16x16xbf16, #tpu.memory_space<vmem>>, vector<1x16x16xbf16>
    %383 = vector.shape_cast %382 : vector<1x16x16xbf16> to vector<16x16xbf16>
    %cst_273 = arith.constant dense<0.000000e+00> : vector<16x256xf32>
    %384 = tpu.matmul %383, %381, %cst_273 {dimension_numbers = #tpu.dot_dimension_numbers<[1], [0], [0], [1], [0, 0, 1, 1], [], []>} : vector<16x16xbf16>, vector<16x256xbf16>, vector<16x256xf32> -> vector<16x256xf32>
    %385 = arith.addf %376, %384 : vector<16x256xf32>
    %c4_274 = arith.constant 4 : index
    %c0_275 = arith.constant 0 : index
    %386 = vector.load %arg3[%c4_274, %c0_275] : memref<9x256xf32, #tpu.memory_space<vmem>>, vector<1x256xf32>
    %387 = vector.broadcast %386 : vector<1x256xf32> to vector<16x256xf32>
    %388 = arith.mulf %350, %387 : vector<16x256xf32>
    %389 = arith.truncf %388 : vector<16x256xf32> to vector<16x256xbf16>
    %c4_276 = arith.constant 4 : index
    %c0_277 = arith.constant 0 : index
    %c0_278 = arith.constant 0 : index
    %390 = vector.load %arg8[%c4_276, %c0_277, %c0_278] : memref<9x16x16xbf16, #tpu.memory_space<vmem>>, vector<1x16x16xbf16>
    %391 = vector.shape_cast %390 : vector<1x16x16xbf16> to vector<16x16xbf16>
    %cst_279 = arith.constant dense<0.000000e+00> : vector<16x256xf32>
    %392 = tpu.matmul %391, %389, %cst_279 {dimension_numbers = #tpu.dot_dimension_numbers<[1], [0], [0], [1], [0, 0, 1, 1], [], []>} : vector<16x16xbf16>, vector<16x256xbf16>, vector<16x256xf32> -> vector<16x256xf32>
    %393 = arith.addf %385, %392 : vector<16x256xf32>
    %c255_i32_280 = arith.constant 255 : i32
    %394 = tpu.dynamic_rotate %350 by %c255_i32_280 dim 1 : vector<16x256xf32>, i32 -> vector<16x256xf32>
    %c5_281 = arith.constant 5 : index
    %c0_282 = arith.constant 0 : index
    %395 = vector.load %arg3[%c5_281, %c0_282] : memref<9x256xf32, #tpu.memory_space<vmem>>, vector<1x256xf32>
    %396 = vector.broadcast %395 : vector<1x256xf32> to vector<16x256xf32>
    %397 = arith.mulf %394, %396 : vector<16x256xf32>
    %398 = arith.truncf %397 : vector<16x256xf32> to vector<16x256xbf16>
    %c5_283 = arith.constant 5 : index
    %c0_284 = arith.constant 0 : index
    %c0_285 = arith.constant 0 : index
    %399 = vector.load %arg8[%c5_283, %c0_284, %c0_285] : memref<9x16x16xbf16, #tpu.memory_space<vmem>>, vector<1x16x16xbf16>
    %400 = vector.shape_cast %399 : vector<1x16x16xbf16> to vector<16x16xbf16>
    %cst_286 = arith.constant dense<0.000000e+00> : vector<16x256xf32>
    %401 = tpu.matmul %400, %398, %cst_286 {dimension_numbers = #tpu.dot_dimension_numbers<[1], [0], [0], [1], [0, 0, 1, 1], [], []>} : vector<16x16xbf16>, vector<16x256xbf16>, vector<16x256xf32> -> vector<16x256xf32>
    %402 = arith.addf %393, %401 : vector<16x256xf32>
    %c241_i32_287 = arith.constant 241 : i32
    %403 = tpu.dynamic_rotate %350 by %c241_i32_287 dim 1 : vector<16x256xf32>, i32 -> vector<16x256xf32>
    %c6_288 = arith.constant 6 : index
    %c0_289 = arith.constant 0 : index
    %404 = vector.load %arg3[%c6_288, %c0_289] : memref<9x256xf32, #tpu.memory_space<vmem>>, vector<1x256xf32>
    %405 = vector.broadcast %404 : vector<1x256xf32> to vector<16x256xf32>
    %406 = arith.mulf %403, %405 : vector<16x256xf32>
    %407 = arith.truncf %406 : vector<16x256xf32> to vector<16x256xbf16>
    %c6_290 = arith.constant 6 : index
    %c0_291 = arith.constant 0 : index
    %c0_292 = arith.constant 0 : index
    %408 = vector.load %arg8[%c6_290, %c0_291, %c0_292] : memref<9x16x16xbf16, #tpu.memory_space<vmem>>, vector<1x16x16xbf16>
    %409 = vector.shape_cast %408 : vector<1x16x16xbf16> to vector<16x16xbf16>
    %cst_293 = arith.constant dense<0.000000e+00> : vector<16x256xf32>
    %410 = tpu.matmul %409, %407, %cst_293 {dimension_numbers = #tpu.dot_dimension_numbers<[1], [0], [0], [1], [0, 0, 1, 1], [], []>} : vector<16x16xbf16>, vector<16x256xbf16>, vector<16x256xf32> -> vector<16x256xf32>
    %411 = arith.addf %402, %410 : vector<16x256xf32>
    %c240_i32_294 = arith.constant 240 : i32
    %412 = tpu.dynamic_rotate %350 by %c240_i32_294 dim 1 : vector<16x256xf32>, i32 -> vector<16x256xf32>
    %c7_295 = arith.constant 7 : index
    %c0_296 = arith.constant 0 : index
    %413 = vector.load %arg3[%c7_295, %c0_296] : memref<9x256xf32, #tpu.memory_space<vmem>>, vector<1x256xf32>
    %414 = vector.broadcast %413 : vector<1x256xf32> to vector<16x256xf32>
    %415 = arith.mulf %412, %414 : vector<16x256xf32>
    %416 = arith.truncf %415 : vector<16x256xf32> to vector<16x256xbf16>
    %c7_297 = arith.constant 7 : index
    %c0_298 = arith.constant 0 : index
    %c0_299 = arith.constant 0 : index
    %417 = vector.load %arg8[%c7_297, %c0_298, %c0_299] : memref<9x16x16xbf16, #tpu.memory_space<vmem>>, vector<1x16x16xbf16>
    %418 = vector.shape_cast %417 : vector<1x16x16xbf16> to vector<16x16xbf16>
    %cst_300 = arith.constant dense<0.000000e+00> : vector<16x256xf32>
    %419 = tpu.matmul %418, %416, %cst_300 {dimension_numbers = #tpu.dot_dimension_numbers<[1], [0], [0], [1], [0, 0, 1, 1], [], []>} : vector<16x16xbf16>, vector<16x256xbf16>, vector<16x256xf32> -> vector<16x256xf32>
    %420 = arith.addf %411, %419 : vector<16x256xf32>
    %c239_i32_301 = arith.constant 239 : i32
    %421 = tpu.dynamic_rotate %350 by %c239_i32_301 dim 1 : vector<16x256xf32>, i32 -> vector<16x256xf32>
    %c8_302 = arith.constant 8 : index
    %c0_303 = arith.constant 0 : index
    %422 = vector.load %arg3[%c8_302, %c0_303] : memref<9x256xf32, #tpu.memory_space<vmem>>, vector<1x256xf32>
    %423 = vector.broadcast %422 : vector<1x256xf32> to vector<16x256xf32>
    %424 = arith.mulf %421, %423 : vector<16x256xf32>
    %425 = arith.truncf %424 : vector<16x256xf32> to vector<16x256xbf16>
    %c8_304 = arith.constant 8 : index
    %c0_305 = arith.constant 0 : index
    %c0_306 = arith.constant 0 : index
    %426 = vector.load %arg8[%c8_304, %c0_305, %c0_306] : memref<9x16x16xbf16, #tpu.memory_space<vmem>>, vector<1x16x16xbf16>
    %427 = vector.shape_cast %426 : vector<1x16x16xbf16> to vector<16x16xbf16>
    %cst_307 = arith.constant dense<0.000000e+00> : vector<16x256xf32>
    %428 = tpu.matmul %427, %425, %cst_307 {dimension_numbers = #tpu.dot_dimension_numbers<[1], [0], [0], [1], [0, 0, 1, 1], [], []>} : vector<16x16xbf16>, vector<16x256xbf16>, vector<16x256xf32> -> vector<16x256xf32>
    %429 = arith.addf %420, %428 : vector<16x256xf32>
    %c0_308 = arith.constant 0 : index
    %c0_309 = arith.constant 0 : index
    %430 = vector.load %arg20[%c0_308, %c0_309] : memref<16x2xf32, #tpu.memory_space<vmem>>, vector<16x2xf32>
    %431 = vector.extract_strided_slice %430 {offsets = [0, 0], sizes = [16, 1], strides = [1, 1]} : vector<16x2xf32> to vector<16x1xf32>
    %432 = vector.broadcast %431 : vector<16x1xf32> to vector<16x256xf32>
    %433 = arith.mulf %429, %432 : vector<16x256xf32>
    %434 = vector.extract_strided_slice %430 {offsets = [0, 1], sizes = [16, 1], strides = [1, 1]} : vector<16x2xf32> to vector<16x1xf32>
    %435 = vector.broadcast %434 : vector<16x1xf32> to vector<16x256xf32>
    %436 = arith.addf %433, %435 : vector<16x256xf32>
    %cst_310 = arith.constant 0.000000e+00 : f32
    %437 = vector.broadcast %cst_310 : f32 to vector<16x256xf32>
    %438 = arith.maximumf %436, %437 : vector<16x256xf32>
    %c17_i32_311 = arith.constant 17 : i32
    %439 = tpu.dynamic_rotate %438 by %c17_i32_311 dim 1 : vector<16x256xf32>, i32 -> vector<16x256xf32>
    %c0_312 = arith.constant 0 : index
    %c0_313 = arith.constant 0 : index
    %440 = vector.load %arg3[%c0_312, %c0_313] : memref<9x256xf32, #tpu.memory_space<vmem>>, vector<1x256xf32>
    %441 = vector.broadcast %440 : vector<1x256xf32> to vector<16x256xf32>
    %442 = arith.mulf %439, %441 : vector<16x256xf32>
    %443 = arith.truncf %442 : vector<16x256xf32> to vector<16x256xbf16>
    %c0_314 = arith.constant 0 : index
    %c0_315 = arith.constant 0 : index
    %c0_316 = arith.constant 0 : index
    %444 = vector.load %arg9[%c0_314, %c0_315, %c0_316] : memref<9x2x16xbf16, #tpu.memory_space<vmem>>, vector<1x2x16xbf16>
    %445 = vector.shape_cast %444 : vector<1x2x16xbf16> to vector<2x16xbf16>
    %cst_317 = arith.constant dense<0.000000e+00> : vector<2x256xf32>
    %446 = tpu.matmul %445, %443, %cst_317 {dimension_numbers = #tpu.dot_dimension_numbers<[1], [0], [0], [1], [0, 0, 1, 1], [], []>} : vector<2x16xbf16>, vector<16x256xbf16>, vector<2x256xf32> -> vector<2x256xf32>
    %c16_i32_318 = arith.constant 16 : i32
    %447 = tpu.dynamic_rotate %438 by %c16_i32_318 dim 1 : vector<16x256xf32>, i32 -> vector<16x256xf32>
    %c1_319 = arith.constant 1 : index
    %c0_320 = arith.constant 0 : index
    %448 = vector.load %arg3[%c1_319, %c0_320] : memref<9x256xf32, #tpu.memory_space<vmem>>, vector<1x256xf32>
    %449 = vector.broadcast %448 : vector<1x256xf32> to vector<16x256xf32>
    %450 = arith.mulf %447, %449 : vector<16x256xf32>
    %451 = arith.truncf %450 : vector<16x256xf32> to vector<16x256xbf16>
    %c1_321 = arith.constant 1 : index
    %c0_322 = arith.constant 0 : index
    %c0_323 = arith.constant 0 : index
    %452 = vector.load %arg9[%c1_321, %c0_322, %c0_323] : memref<9x2x16xbf16, #tpu.memory_space<vmem>>, vector<1x2x16xbf16>
    %453 = vector.shape_cast %452 : vector<1x2x16xbf16> to vector<2x16xbf16>
    %cst_324 = arith.constant dense<0.000000e+00> : vector<2x256xf32>
    %454 = tpu.matmul %453, %451, %cst_324 {dimension_numbers = #tpu.dot_dimension_numbers<[1], [0], [0], [1], [0, 0, 1, 1], [], []>} : vector<2x16xbf16>, vector<16x256xbf16>, vector<2x256xf32> -> vector<2x256xf32>
    %455 = arith.addf %446, %454 : vector<2x256xf32>
    %c15_i32_325 = arith.constant 15 : i32
    %456 = tpu.dynamic_rotate %438 by %c15_i32_325 dim 1 : vector<16x256xf32>, i32 -> vector<16x256xf32>
    %c2_326 = arith.constant 2 : index
    %c0_327 = arith.constant 0 : index
    %457 = vector.load %arg3[%c2_326, %c0_327] : memref<9x256xf32, #tpu.memory_space<vmem>>, vector<1x256xf32>
    %458 = vector.broadcast %457 : vector<1x256xf32> to vector<16x256xf32>
    %459 = arith.mulf %456, %458 : vector<16x256xf32>
    %460 = arith.truncf %459 : vector<16x256xf32> to vector<16x256xbf16>
    %c2_328 = arith.constant 2 : index
    %c0_329 = arith.constant 0 : index
    %c0_330 = arith.constant 0 : index
    %461 = vector.load %arg9[%c2_328, %c0_329, %c0_330] : memref<9x2x16xbf16, #tpu.memory_space<vmem>>, vector<1x2x16xbf16>
    %462 = vector.shape_cast %461 : vector<1x2x16xbf16> to vector<2x16xbf16>
    %cst_331 = arith.constant dense<0.000000e+00> : vector<2x256xf32>
    %463 = tpu.matmul %462, %460, %cst_331 {dimension_numbers = #tpu.dot_dimension_numbers<[1], [0], [0], [1], [0, 0, 1, 1], [], []>} : vector<2x16xbf16>, vector<16x256xbf16>, vector<2x256xf32> -> vector<2x256xf32>
    %464 = arith.addf %455, %463 : vector<2x256xf32>
    %c1_i32_332 = arith.constant 1 : i32
    %465 = tpu.dynamic_rotate %438 by %c1_i32_332 dim 1 : vector<16x256xf32>, i32 -> vector<16x256xf32>
    %c3_333 = arith.constant 3 : index
    %c0_334 = arith.constant 0 : index
    %466 = vector.load %arg3[%c3_333, %c0_334] : memref<9x256xf32, #tpu.memory_space<vmem>>, vector<1x256xf32>
    %467 = vector.broadcast %466 : vector<1x256xf32> to vector<16x256xf32>
    %468 = arith.mulf %465, %467 : vector<16x256xf32>
    %469 = arith.truncf %468 : vector<16x256xf32> to vector<16x256xbf16>
    %c3_335 = arith.constant 3 : index
    %c0_336 = arith.constant 0 : index
    %c0_337 = arith.constant 0 : index
    %470 = vector.load %arg9[%c3_335, %c0_336, %c0_337] : memref<9x2x16xbf16, #tpu.memory_space<vmem>>, vector<1x2x16xbf16>
    %471 = vector.shape_cast %470 : vector<1x2x16xbf16> to vector<2x16xbf16>
    %cst_338 = arith.constant dense<0.000000e+00> : vector<2x256xf32>
    %472 = tpu.matmul %471, %469, %cst_338 {dimension_numbers = #tpu.dot_dimension_numbers<[1], [0], [0], [1], [0, 0, 1, 1], [], []>} : vector<2x16xbf16>, vector<16x256xbf16>, vector<2x256xf32> -> vector<2x256xf32>
    %473 = arith.addf %464, %472 : vector<2x256xf32>
    %c4_339 = arith.constant 4 : index
    %c0_340 = arith.constant 0 : index
    %474 = vector.load %arg3[%c4_339, %c0_340] : memref<9x256xf32, #tpu.memory_space<vmem>>, vector<1x256xf32>
    %475 = vector.broadcast %474 : vector<1x256xf32> to vector<16x256xf32>
    %476 = arith.mulf %438, %475 : vector<16x256xf32>
    %477 = arith.truncf %476 : vector<16x256xf32> to vector<16x256xbf16>
    %c4_341 = arith.constant 4 : index
    %c0_342 = arith.constant 0 : index
    %c0_343 = arith.constant 0 : index
    %478 = vector.load %arg9[%c4_341, %c0_342, %c0_343] : memref<9x2x16xbf16, #tpu.memory_space<vmem>>, vector<1x2x16xbf16>
    %479 = vector.shape_cast %478 : vector<1x2x16xbf16> to vector<2x16xbf16>
    %cst_344 = arith.constant dense<0.000000e+00> : vector<2x256xf32>
    %480 = tpu.matmul %479, %477, %cst_344 {dimension_numbers = #tpu.dot_dimension_numbers<[1], [0], [0], [1], [0, 0, 1, 1], [], []>} : vector<2x16xbf16>, vector<16x256xbf16>, vector<2x256xf32> -> vector<2x256xf32>
    %481 = arith.addf %473, %480 : vector<2x256xf32>
    %c255_i32_345 = arith.constant 255 : i32
    %482 = tpu.dynamic_rotate %438 by %c255_i32_345 dim 1 : vector<16x256xf32>, i32 -> vector<16x256xf32>
    %c5_346 = arith.constant 5 : index
    %c0_347 = arith.constant 0 : index
    %483 = vector.load %arg3[%c5_346, %c0_347] : memref<9x256xf32, #tpu.memory_space<vmem>>, vector<1x256xf32>
    %484 = vector.broadcast %483 : vector<1x256xf32> to vector<16x256xf32>
    %485 = arith.mulf %482, %484 : vector<16x256xf32>
    %486 = arith.truncf %485 : vector<16x256xf32> to vector<16x256xbf16>
    %c5_348 = arith.constant 5 : index
    %c0_349 = arith.constant 0 : index
    %c0_350 = arith.constant 0 : index
    %487 = vector.load %arg9[%c5_348, %c0_349, %c0_350] : memref<9x2x16xbf16, #tpu.memory_space<vmem>>, vector<1x2x16xbf16>
    %488 = vector.shape_cast %487 : vector<1x2x16xbf16> to vector<2x16xbf16>
    %cst_351 = arith.constant dense<0.000000e+00> : vector<2x256xf32>
    %489 = tpu.matmul %488, %486, %cst_351 {dimension_numbers = #tpu.dot_dimension_numbers<[1], [0], [0], [1], [0, 0, 1, 1], [], []>} : vector<2x16xbf16>, vector<16x256xbf16>, vector<2x256xf32> -> vector<2x256xf32>
    %490 = arith.addf %481, %489 : vector<2x256xf32>
    %c241_i32_352 = arith.constant 241 : i32
    %491 = tpu.dynamic_rotate %438 by %c241_i32_352 dim 1 : vector<16x256xf32>, i32 -> vector<16x256xf32>
    %c6_353 = arith.constant 6 : index
    %c0_354 = arith.constant 0 : index
    %492 = vector.load %arg3[%c6_353, %c0_354] : memref<9x256xf32, #tpu.memory_space<vmem>>, vector<1x256xf32>
    %493 = vector.broadcast %492 : vector<1x256xf32> to vector<16x256xf32>
    %494 = arith.mulf %491, %493 : vector<16x256xf32>
    %495 = arith.truncf %494 : vector<16x256xf32> to vector<16x256xbf16>
    %c6_355 = arith.constant 6 : index
    %c0_356 = arith.constant 0 : index
    %c0_357 = arith.constant 0 : index
    %496 = vector.load %arg9[%c6_355, %c0_356, %c0_357] : memref<9x2x16xbf16, #tpu.memory_space<vmem>>, vector<1x2x16xbf16>
    %497 = vector.shape_cast %496 : vector<1x2x16xbf16> to vector<2x16xbf16>
    %cst_358 = arith.constant dense<0.000000e+00> : vector<2x256xf32>
    %498 = tpu.matmul %497, %495, %cst_358 {dimension_numbers = #tpu.dot_dimension_numbers<[1], [0], [0], [1], [0, 0, 1, 1], [], []>} : vector<2x16xbf16>, vector<16x256xbf16>, vector<2x256xf32> -> vector<2x256xf32>
    %499 = arith.addf %490, %498 : vector<2x256xf32>
    %c240_i32_359 = arith.constant 240 : i32
    %500 = tpu.dynamic_rotate %438 by %c240_i32_359 dim 1 : vector<16x256xf32>, i32 -> vector<16x256xf32>
    %c7_360 = arith.constant 7 : index
    %c0_361 = arith.constant 0 : index
    %501 = vector.load %arg3[%c7_360, %c0_361] : memref<9x256xf32, #tpu.memory_space<vmem>>, vector<1x256xf32>
    %502 = vector.broadcast %501 : vector<1x256xf32> to vector<16x256xf32>
    %503 = arith.mulf %500, %502 : vector<16x256xf32>
    %504 = arith.truncf %503 : vector<16x256xf32> to vector<16x256xbf16>
    %c7_362 = arith.constant 7 : index
    %c0_363 = arith.constant 0 : index
    %c0_364 = arith.constant 0 : index
    %505 = vector.load %arg9[%c7_362, %c0_363, %c0_364] : memref<9x2x16xbf16, #tpu.memory_space<vmem>>, vector<1x2x16xbf16>
    %506 = vector.shape_cast %505 : vector<1x2x16xbf16> to vector<2x16xbf16>
    %cst_365 = arith.constant dense<0.000000e+00> : vector<2x256xf32>
    %507 = tpu.matmul %506, %504, %cst_365 {dimension_numbers = #tpu.dot_dimension_numbers<[1], [0], [0], [1], [0, 0, 1, 1], [], []>} : vector<2x16xbf16>, vector<16x256xbf16>, vector<2x256xf32> -> vector<2x256xf32>
    %508 = arith.addf %499, %507 : vector<2x256xf32>
    %c239_i32_366 = arith.constant 239 : i32
    %509 = tpu.dynamic_rotate %438 by %c239_i32_366 dim 1 : vector<16x256xf32>, i32 -> vector<16x256xf32>
    %c8_367 = arith.constant 8 : index
    %c0_368 = arith.constant 0 : index
    %510 = vector.load %arg3[%c8_367, %c0_368] : memref<9x256xf32, #tpu.memory_space<vmem>>, vector<1x256xf32>
    %511 = vector.broadcast %510 : vector<1x256xf32> to vector<16x256xf32>
    %512 = arith.mulf %509, %511 : vector<16x256xf32>
    %513 = arith.truncf %512 : vector<16x256xf32> to vector<16x256xbf16>
    %c8_369 = arith.constant 8 : index
    %c0_370 = arith.constant 0 : index
    %c0_371 = arith.constant 0 : index
    %514 = vector.load %arg9[%c8_369, %c0_370, %c0_371] : memref<9x2x16xbf16, #tpu.memory_space<vmem>>, vector<1x2x16xbf16>
    %515 = vector.shape_cast %514 : vector<1x2x16xbf16> to vector<2x16xbf16>
    %cst_372 = arith.constant dense<0.000000e+00> : vector<2x256xf32>
    %516 = tpu.matmul %515, %513, %cst_372 {dimension_numbers = #tpu.dot_dimension_numbers<[1], [0], [0], [1], [0, 0, 1, 1], [], []>} : vector<2x16xbf16>, vector<16x256xbf16>, vector<2x256xf32> -> vector<2x256xf32>
    %517 = arith.addf %508, %516 : vector<2x256xf32>
    %c0_373 = arith.constant 0 : index
    %c0_374 = arith.constant 0 : index
    %518 = vector.load %arg21[%c0_373, %c0_374] : memref<2x2xf32, #tpu.memory_space<vmem>>, vector<2x2xf32>
    %519 = vector.extract_strided_slice %518 {offsets = [0, 0], sizes = [2, 1], strides = [1, 1]} : vector<2x2xf32> to vector<2x1xf32>
    %520 = vector.broadcast %519 : vector<2x1xf32> to vector<2x256xf32>
    %521 = arith.mulf %517, %520 : vector<2x256xf32>
    %522 = vector.extract_strided_slice %518 {offsets = [0, 1], sizes = [2, 1], strides = [1, 1]} : vector<2x2xf32> to vector<2x1xf32>
    %523 = vector.broadcast %522 : vector<2x1xf32> to vector<2x256xf32>
    %524 = arith.addf %521, %523 : vector<2x256xf32>
    %525 = arith.addf %524, %6 : vector<2x256xf32>
    %c17_i32_375 = arith.constant 17 : i32
    %526 = tpu.dynamic_rotate %525 by %c17_i32_375 dim 1 : vector<2x256xf32>, i32 -> vector<2x256xf32>
    %c0_376 = arith.constant 0 : index
    %c0_377 = arith.constant 0 : index
    %527 = vector.load %arg3[%c0_376, %c0_377] : memref<9x256xf32, #tpu.memory_space<vmem>>, vector<1x256xf32>
    %528 = vector.broadcast %527 : vector<1x256xf32> to vector<2x256xf32>
    %529 = arith.mulf %526, %528 : vector<2x256xf32>
    %530 = arith.truncf %529 : vector<2x256xf32> to vector<2x256xbf16>
    %c0_378 = arith.constant 0 : index
    %c0_379 = arith.constant 0 : index
    %c0_380 = arith.constant 0 : index
    %531 = vector.load %arg10[%c0_378, %c0_379, %c0_380] : memref<9x8x2xbf16, #tpu.memory_space<vmem>>, vector<1x8x2xbf16>
    %532 = vector.shape_cast %531 : vector<1x8x2xbf16> to vector<8x2xbf16>
    %cst_381 = arith.constant dense<0.000000e+00> : vector<8x256xf32>
    %533 = tpu.matmul %532, %530, %cst_381 {dimension_numbers = #tpu.dot_dimension_numbers<[1], [0], [0], [1], [0, 0, 1, 1], [], []>} : vector<8x2xbf16>, vector<2x256xbf16>, vector<8x256xf32> -> vector<8x256xf32>
    %c16_i32_382 = arith.constant 16 : i32
    %534 = tpu.dynamic_rotate %525 by %c16_i32_382 dim 1 : vector<2x256xf32>, i32 -> vector<2x256xf32>
    %c1_383 = arith.constant 1 : index
    %c0_384 = arith.constant 0 : index
    %535 = vector.load %arg3[%c1_383, %c0_384] : memref<9x256xf32, #tpu.memory_space<vmem>>, vector<1x256xf32>
    %536 = vector.broadcast %535 : vector<1x256xf32> to vector<2x256xf32>
    %537 = arith.mulf %534, %536 : vector<2x256xf32>
    %538 = arith.truncf %537 : vector<2x256xf32> to vector<2x256xbf16>
    %c1_385 = arith.constant 1 : index
    %c0_386 = arith.constant 0 : index
    %c0_387 = arith.constant 0 : index
    %539 = vector.load %arg10[%c1_385, %c0_386, %c0_387] : memref<9x8x2xbf16, #tpu.memory_space<vmem>>, vector<1x8x2xbf16>
    %540 = vector.shape_cast %539 : vector<1x8x2xbf16> to vector<8x2xbf16>
    %cst_388 = arith.constant dense<0.000000e+00> : vector<8x256xf32>
    %541 = tpu.matmul %540, %538, %cst_388 {dimension_numbers = #tpu.dot_dimension_numbers<[1], [0], [0], [1], [0, 0, 1, 1], [], []>} : vector<8x2xbf16>, vector<2x256xbf16>, vector<8x256xf32> -> vector<8x256xf32>
    %542 = arith.addf %533, %541 : vector<8x256xf32>
    %c15_i32_389 = arith.constant 15 : i32
    %543 = tpu.dynamic_rotate %525 by %c15_i32_389 dim 1 : vector<2x256xf32>, i32 -> vector<2x256xf32>
    %c2_390 = arith.constant 2 : index
    %c0_391 = arith.constant 0 : index
    %544 = vector.load %arg3[%c2_390, %c0_391] : memref<9x256xf32, #tpu.memory_space<vmem>>, vector<1x256xf32>
    %545 = vector.broadcast %544 : vector<1x256xf32> to vector<2x256xf32>
    %546 = arith.mulf %543, %545 : vector<2x256xf32>
    %547 = arith.truncf %546 : vector<2x256xf32> to vector<2x256xbf16>
    %c2_392 = arith.constant 2 : index
    %c0_393 = arith.constant 0 : index
    %c0_394 = arith.constant 0 : index
    %548 = vector.load %arg10[%c2_392, %c0_393, %c0_394] : memref<9x8x2xbf16, #tpu.memory_space<vmem>>, vector<1x8x2xbf16>
    %549 = vector.shape_cast %548 : vector<1x8x2xbf16> to vector<8x2xbf16>
    %cst_395 = arith.constant dense<0.000000e+00> : vector<8x256xf32>
    %550 = tpu.matmul %549, %547, %cst_395 {dimension_numbers = #tpu.dot_dimension_numbers<[1], [0], [0], [1], [0, 0, 1, 1], [], []>} : vector<8x2xbf16>, vector<2x256xbf16>, vector<8x256xf32> -> vector<8x256xf32>
    %551 = arith.addf %542, %550 : vector<8x256xf32>
    %c1_i32_396 = arith.constant 1 : i32
    %552 = tpu.dynamic_rotate %525 by %c1_i32_396 dim 1 : vector<2x256xf32>, i32 -> vector<2x256xf32>
    %c3_397 = arith.constant 3 : index
    %c0_398 = arith.constant 0 : index
    %553 = vector.load %arg3[%c3_397, %c0_398] : memref<9x256xf32, #tpu.memory_space<vmem>>, vector<1x256xf32>
    %554 = vector.broadcast %553 : vector<1x256xf32> to vector<2x256xf32>
    %555 = arith.mulf %552, %554 : vector<2x256xf32>
    %556 = arith.truncf %555 : vector<2x256xf32> to vector<2x256xbf16>
    %c3_399 = arith.constant 3 : index
    %c0_400 = arith.constant 0 : index
    %c0_401 = arith.constant 0 : index
    %557 = vector.load %arg10[%c3_399, %c0_400, %c0_401] : memref<9x8x2xbf16, #tpu.memory_space<vmem>>, vector<1x8x2xbf16>
    %558 = vector.shape_cast %557 : vector<1x8x2xbf16> to vector<8x2xbf16>
    %cst_402 = arith.constant dense<0.000000e+00> : vector<8x256xf32>
    %559 = tpu.matmul %558, %556, %cst_402 {dimension_numbers = #tpu.dot_dimension_numbers<[1], [0], [0], [1], [0, 0, 1, 1], [], []>} : vector<8x2xbf16>, vector<2x256xbf16>, vector<8x256xf32> -> vector<8x256xf32>
    %560 = arith.addf %551, %559 : vector<8x256xf32>
    %c4_403 = arith.constant 4 : index
    %c0_404 = arith.constant 0 : index
    %561 = vector.load %arg3[%c4_403, %c0_404] : memref<9x256xf32, #tpu.memory_space<vmem>>, vector<1x256xf32>
    %562 = vector.broadcast %561 : vector<1x256xf32> to vector<2x256xf32>
    %563 = arith.mulf %525, %562 : vector<2x256xf32>
    %564 = arith.truncf %563 : vector<2x256xf32> to vector<2x256xbf16>
    %c4_405 = arith.constant 4 : index
    %c0_406 = arith.constant 0 : index
    %c0_407 = arith.constant 0 : index
    %565 = vector.load %arg10[%c4_405, %c0_406, %c0_407] : memref<9x8x2xbf16, #tpu.memory_space<vmem>>, vector<1x8x2xbf16>
    %566 = vector.shape_cast %565 : vector<1x8x2xbf16> to vector<8x2xbf16>
    %cst_408 = arith.constant dense<0.000000e+00> : vector<8x256xf32>
    %567 = tpu.matmul %566, %564, %cst_408 {dimension_numbers = #tpu.dot_dimension_numbers<[1], [0], [0], [1], [0, 0, 1, 1], [], []>} : vector<8x2xbf16>, vector<2x256xbf16>, vector<8x256xf32> -> vector<8x256xf32>
    %568 = arith.addf %560, %567 : vector<8x256xf32>
    %c255_i32_409 = arith.constant 255 : i32
    %569 = tpu.dynamic_rotate %525 by %c255_i32_409 dim 1 : vector<2x256xf32>, i32 -> vector<2x256xf32>
    %c5_410 = arith.constant 5 : index
    %c0_411 = arith.constant 0 : index
    %570 = vector.load %arg3[%c5_410, %c0_411] : memref<9x256xf32, #tpu.memory_space<vmem>>, vector<1x256xf32>
    %571 = vector.broadcast %570 : vector<1x256xf32> to vector<2x256xf32>
    %572 = arith.mulf %569, %571 : vector<2x256xf32>
    %573 = arith.truncf %572 : vector<2x256xf32> to vector<2x256xbf16>
    %c5_412 = arith.constant 5 : index
    %c0_413 = arith.constant 0 : index
    %c0_414 = arith.constant 0 : index
    %574 = vector.load %arg10[%c5_412, %c0_413, %c0_414] : memref<9x8x2xbf16, #tpu.memory_space<vmem>>, vector<1x8x2xbf16>
    %575 = vector.shape_cast %574 : vector<1x8x2xbf16> to vector<8x2xbf16>
    %cst_415 = arith.constant dense<0.000000e+00> : vector<8x256xf32>
    %576 = tpu.matmul %575, %573, %cst_415 {dimension_numbers = #tpu.dot_dimension_numbers<[1], [0], [0], [1], [0, 0, 1, 1], [], []>} : vector<8x2xbf16>, vector<2x256xbf16>, vector<8x256xf32> -> vector<8x256xf32>
    %577 = arith.addf %568, %576 : vector<8x256xf32>
    %c241_i32_416 = arith.constant 241 : i32
    %578 = tpu.dynamic_rotate %525 by %c241_i32_416 dim 1 : vector<2x256xf32>, i32 -> vector<2x256xf32>
    %c6_417 = arith.constant 6 : index
    %c0_418 = arith.constant 0 : index
    %579 = vector.load %arg3[%c6_417, %c0_418] : memref<9x256xf32, #tpu.memory_space<vmem>>, vector<1x256xf32>
    %580 = vector.broadcast %579 : vector<1x256xf32> to vector<2x256xf32>
    %581 = arith.mulf %578, %580 : vector<2x256xf32>
    %582 = arith.truncf %581 : vector<2x256xf32> to vector<2x256xbf16>
    %c6_419 = arith.constant 6 : index
    %c0_420 = arith.constant 0 : index
    %c0_421 = arith.constant 0 : index
    %583 = vector.load %arg10[%c6_419, %c0_420, %c0_421] : memref<9x8x2xbf16, #tpu.memory_space<vmem>>, vector<1x8x2xbf16>
    %584 = vector.shape_cast %583 : vector<1x8x2xbf16> to vector<8x2xbf16>
    %cst_422 = arith.constant dense<0.000000e+00> : vector<8x256xf32>
    %585 = tpu.matmul %584, %582, %cst_422 {dimension_numbers = #tpu.dot_dimension_numbers<[1], [0], [0], [1], [0, 0, 1, 1], [], []>} : vector<8x2xbf16>, vector<2x256xbf16>, vector<8x256xf32> -> vector<8x256xf32>
    %586 = arith.addf %577, %585 : vector<8x256xf32>
    %c240_i32_423 = arith.constant 240 : i32
    %587 = tpu.dynamic_rotate %525 by %c240_i32_423 dim 1 : vector<2x256xf32>, i32 -> vector<2x256xf32>
    %c7_424 = arith.constant 7 : index
    %c0_425 = arith.constant 0 : index
    %588 = vector.load %arg3[%c7_424, %c0_425] : memref<9x256xf32, #tpu.memory_space<vmem>>, vector<1x256xf32>
    %589 = vector.broadcast %588 : vector<1x256xf32> to vector<2x256xf32>
    %590 = arith.mulf %587, %589 : vector<2x256xf32>
    %591 = arith.truncf %590 : vector<2x256xf32> to vector<2x256xbf16>
    %c7_426 = arith.constant 7 : index
    %c0_427 = arith.constant 0 : index
    %c0_428 = arith.constant 0 : index
    %592 = vector.load %arg10[%c7_426, %c0_427, %c0_428] : memref<9x8x2xbf16, #tpu.memory_space<vmem>>, vector<1x8x2xbf16>
    %593 = vector.shape_cast %592 : vector<1x8x2xbf16> to vector<8x2xbf16>
    %cst_429 = arith.constant dense<0.000000e+00> : vector<8x256xf32>
    %594 = tpu.matmul %593, %591, %cst_429 {dimension_numbers = #tpu.dot_dimension_numbers<[1], [0], [0], [1], [0, 0, 1, 1], [], []>} : vector<8x2xbf16>, vector<2x256xbf16>, vector<8x256xf32> -> vector<8x256xf32>
    %595 = arith.addf %586, %594 : vector<8x256xf32>
    %c239_i32_430 = arith.constant 239 : i32
    %596 = tpu.dynamic_rotate %525 by %c239_i32_430 dim 1 : vector<2x256xf32>, i32 -> vector<2x256xf32>
    %c8_431 = arith.constant 8 : index
    %c0_432 = arith.constant 0 : index
    %597 = vector.load %arg3[%c8_431, %c0_432] : memref<9x256xf32, #tpu.memory_space<vmem>>, vector<1x256xf32>
    %598 = vector.broadcast %597 : vector<1x256xf32> to vector<2x256xf32>
    %599 = arith.mulf %596, %598 : vector<2x256xf32>
    %600 = arith.truncf %599 : vector<2x256xf32> to vector<2x256xbf16>
    %c8_433 = arith.constant 8 : index
    %c0_434 = arith.constant 0 : index
    %c0_435 = arith.constant 0 : index
    %601 = vector.load %arg10[%c8_433, %c0_434, %c0_435] : memref<9x8x2xbf16, #tpu.memory_space<vmem>>, vector<1x8x2xbf16>
    %602 = vector.shape_cast %601 : vector<1x8x2xbf16> to vector<8x2xbf16>
    %cst_436 = arith.constant dense<0.000000e+00> : vector<8x256xf32>
    %603 = tpu.matmul %602, %600, %cst_436 {dimension_numbers = #tpu.dot_dimension_numbers<[1], [0], [0], [1], [0, 0, 1, 1], [], []>} : vector<8x2xbf16>, vector<2x256xbf16>, vector<8x256xf32> -> vector<8x256xf32>
    %604 = arith.addf %595, %603 : vector<8x256xf32>
    %c0_437 = arith.constant 0 : index
    %c0_438 = arith.constant 0 : index
    %605 = vector.load %arg22[%c0_437, %c0_438] : memref<8x2xf32, #tpu.memory_space<vmem>>, vector<8x2xf32>
    %606 = vector.extract_strided_slice %605 {offsets = [0, 0], sizes = [8, 1], strides = [1, 1]} : vector<8x2xf32> to vector<8x1xf32>
    %607 = vector.broadcast %606 : vector<8x1xf32> to vector<8x256xf32>
    %608 = arith.mulf %604, %607 : vector<8x256xf32>
    %609 = vector.extract_strided_slice %605 {offsets = [0, 1], sizes = [8, 1], strides = [1, 1]} : vector<8x2xf32> to vector<8x1xf32>
    %610 = vector.broadcast %609 : vector<8x1xf32> to vector<8x256xf32>
    %611 = arith.addf %608, %610 : vector<8x256xf32>
    %cst_439 = arith.constant 0.000000e+00 : f32
    %612 = vector.broadcast %cst_439 : f32 to vector<8x256xf32>
    %613 = arith.maximumf %611, %612 : vector<8x256xf32>
    %c17_i32_440 = arith.constant 17 : i32
    %614 = tpu.dynamic_rotate %438 by %c17_i32_440 dim 1 : vector<16x256xf32>, i32 -> vector<16x256xf32>
    %c0_441 = arith.constant 0 : index
    %c0_442 = arith.constant 0 : index
    %615 = vector.load %arg3[%c0_441, %c0_442] : memref<9x256xf32, #tpu.memory_space<vmem>>, vector<1x256xf32>
    %616 = vector.broadcast %615 : vector<1x256xf32> to vector<16x256xf32>
    %617 = arith.mulf %614, %616 : vector<16x256xf32>
    %618 = arith.truncf %617 : vector<16x256xf32> to vector<16x256xbf16>
    %c0_443 = arith.constant 0 : index
    %c0_444 = arith.constant 0 : index
    %c0_445 = arith.constant 0 : index
    %619 = vector.load %arg11[%c0_443, %c0_444, %c0_445] : memref<9x8x16xbf16, #tpu.memory_space<vmem>>, vector<1x8x16xbf16>
    %620 = vector.shape_cast %619 : vector<1x8x16xbf16> to vector<8x16xbf16>
    %cst_446 = arith.constant dense<0.000000e+00> : vector<8x256xf32>
    %621 = tpu.matmul %620, %618, %cst_446 {dimension_numbers = #tpu.dot_dimension_numbers<[1], [0], [0], [1], [0, 0, 1, 1], [], []>} : vector<8x16xbf16>, vector<16x256xbf16>, vector<8x256xf32> -> vector<8x256xf32>
    %c16_i32_447 = arith.constant 16 : i32
    %622 = tpu.dynamic_rotate %438 by %c16_i32_447 dim 1 : vector<16x256xf32>, i32 -> vector<16x256xf32>
    %c1_448 = arith.constant 1 : index
    %c0_449 = arith.constant 0 : index
    %623 = vector.load %arg3[%c1_448, %c0_449] : memref<9x256xf32, #tpu.memory_space<vmem>>, vector<1x256xf32>
    %624 = vector.broadcast %623 : vector<1x256xf32> to vector<16x256xf32>
    %625 = arith.mulf %622, %624 : vector<16x256xf32>
    %626 = arith.truncf %625 : vector<16x256xf32> to vector<16x256xbf16>
    %c1_450 = arith.constant 1 : index
    %c0_451 = arith.constant 0 : index
    %c0_452 = arith.constant 0 : index
    %627 = vector.load %arg11[%c1_450, %c0_451, %c0_452] : memref<9x8x16xbf16, #tpu.memory_space<vmem>>, vector<1x8x16xbf16>
    %628 = vector.shape_cast %627 : vector<1x8x16xbf16> to vector<8x16xbf16>
    %cst_453 = arith.constant dense<0.000000e+00> : vector<8x256xf32>
    %629 = tpu.matmul %628, %626, %cst_453 {dimension_numbers = #tpu.dot_dimension_numbers<[1], [0], [0], [1], [0, 0, 1, 1], [], []>} : vector<8x16xbf16>, vector<16x256xbf16>, vector<8x256xf32> -> vector<8x256xf32>
    %630 = arith.addf %621, %629 : vector<8x256xf32>
    %c15_i32_454 = arith.constant 15 : i32
    %631 = tpu.dynamic_rotate %438 by %c15_i32_454 dim 1 : vector<16x256xf32>, i32 -> vector<16x256xf32>
    %c2_455 = arith.constant 2 : index
    %c0_456 = arith.constant 0 : index
    %632 = vector.load %arg3[%c2_455, %c0_456] : memref<9x256xf32, #tpu.memory_space<vmem>>, vector<1x256xf32>
    %633 = vector.broadcast %632 : vector<1x256xf32> to vector<16x256xf32>
    %634 = arith.mulf %631, %633 : vector<16x256xf32>
    %635 = arith.truncf %634 : vector<16x256xf32> to vector<16x256xbf16>
    %c2_457 = arith.constant 2 : index
    %c0_458 = arith.constant 0 : index
    %c0_459 = arith.constant 0 : index
    %636 = vector.load %arg11[%c2_457, %c0_458, %c0_459] : memref<9x8x16xbf16, #tpu.memory_space<vmem>>, vector<1x8x16xbf16>
    %637 = vector.shape_cast %636 : vector<1x8x16xbf16> to vector<8x16xbf16>
    %cst_460 = arith.constant dense<0.000000e+00> : vector<8x256xf32>
    %638 = tpu.matmul %637, %635, %cst_460 {dimension_numbers = #tpu.dot_dimension_numbers<[1], [0], [0], [1], [0, 0, 1, 1], [], []>} : vector<8x16xbf16>, vector<16x256xbf16>, vector<8x256xf32> -> vector<8x256xf32>
    %639 = arith.addf %630, %638 : vector<8x256xf32>
    %c1_i32_461 = arith.constant 1 : i32
    %640 = tpu.dynamic_rotate %438 by %c1_i32_461 dim 1 : vector<16x256xf32>, i32 -> vector<16x256xf32>
    %c3_462 = arith.constant 3 : index
    %c0_463 = arith.constant 0 : index
    %641 = vector.load %arg3[%c3_462, %c0_463] : memref<9x256xf32, #tpu.memory_space<vmem>>, vector<1x256xf32>
    %642 = vector.broadcast %641 : vector<1x256xf32> to vector<16x256xf32>
    %643 = arith.mulf %640, %642 : vector<16x256xf32>
    %644 = arith.truncf %643 : vector<16x256xf32> to vector<16x256xbf16>
    %c3_464 = arith.constant 3 : index
    %c0_465 = arith.constant 0 : index
    %c0_466 = arith.constant 0 : index
    %645 = vector.load %arg11[%c3_464, %c0_465, %c0_466] : memref<9x8x16xbf16, #tpu.memory_space<vmem>>, vector<1x8x16xbf16>
    %646 = vector.shape_cast %645 : vector<1x8x16xbf16> to vector<8x16xbf16>
    %cst_467 = arith.constant dense<0.000000e+00> : vector<8x256xf32>
    %647 = tpu.matmul %646, %644, %cst_467 {dimension_numbers = #tpu.dot_dimension_numbers<[1], [0], [0], [1], [0, 0, 1, 1], [], []>} : vector<8x16xbf16>, vector<16x256xbf16>, vector<8x256xf32> -> vector<8x256xf32>
    %648 = arith.addf %639, %647 : vector<8x256xf32>
    %c4_468 = arith.constant 4 : index
    %c0_469 = arith.constant 0 : index
    %649 = vector.load %arg3[%c4_468, %c0_469] : memref<9x256xf32, #tpu.memory_space<vmem>>, vector<1x256xf32>
    %650 = vector.broadcast %649 : vector<1x256xf32> to vector<16x256xf32>
    %651 = arith.mulf %438, %650 : vector<16x256xf32>
    %652 = arith.truncf %651 : vector<16x256xf32> to vector<16x256xbf16>
    %c4_470 = arith.constant 4 : index
    %c0_471 = arith.constant 0 : index
    %c0_472 = arith.constant 0 : index
    %653 = vector.load %arg11[%c4_470, %c0_471, %c0_472] : memref<9x8x16xbf16, #tpu.memory_space<vmem>>, vector<1x8x16xbf16>
    %654 = vector.shape_cast %653 : vector<1x8x16xbf16> to vector<8x16xbf16>
    %cst_473 = arith.constant dense<0.000000e+00> : vector<8x256xf32>
    %655 = tpu.matmul %654, %652, %cst_473 {dimension_numbers = #tpu.dot_dimension_numbers<[1], [0], [0], [1], [0, 0, 1, 1], [], []>} : vector<8x16xbf16>, vector<16x256xbf16>, vector<8x256xf32> -> vector<8x256xf32>
    %656 = arith.addf %648, %655 : vector<8x256xf32>
    %c255_i32_474 = arith.constant 255 : i32
    %657 = tpu.dynamic_rotate %438 by %c255_i32_474 dim 1 : vector<16x256xf32>, i32 -> vector<16x256xf32>
    %c5_475 = arith.constant 5 : index
    %c0_476 = arith.constant 0 : index
    %658 = vector.load %arg3[%c5_475, %c0_476] : memref<9x256xf32, #tpu.memory_space<vmem>>, vector<1x256xf32>
    %659 = vector.broadcast %658 : vector<1x256xf32> to vector<16x256xf32>
    %660 = arith.mulf %657, %659 : vector<16x256xf32>
    %661 = arith.truncf %660 : vector<16x256xf32> to vector<16x256xbf16>
    %c5_477 = arith.constant 5 : index
    %c0_478 = arith.constant 0 : index
    %c0_479 = arith.constant 0 : index
    %662 = vector.load %arg11[%c5_477, %c0_478, %c0_479] : memref<9x8x16xbf16, #tpu.memory_space<vmem>>, vector<1x8x16xbf16>
    %663 = vector.shape_cast %662 : vector<1x8x16xbf16> to vector<8x16xbf16>
    %cst_480 = arith.constant dense<0.000000e+00> : vector<8x256xf32>
    %664 = tpu.matmul %663, %661, %cst_480 {dimension_numbers = #tpu.dot_dimension_numbers<[1], [0], [0], [1], [0, 0, 1, 1], [], []>} : vector<8x16xbf16>, vector<16x256xbf16>, vector<8x256xf32> -> vector<8x256xf32>
    %665 = arith.addf %656, %664 : vector<8x256xf32>
    %c241_i32_481 = arith.constant 241 : i32
    %666 = tpu.dynamic_rotate %438 by %c241_i32_481 dim 1 : vector<16x256xf32>, i32 -> vector<16x256xf32>
    %c6_482 = arith.constant 6 : index
    %c0_483 = arith.constant 0 : index
    %667 = vector.load %arg3[%c6_482, %c0_483] : memref<9x256xf32, #tpu.memory_space<vmem>>, vector<1x256xf32>
    %668 = vector.broadcast %667 : vector<1x256xf32> to vector<16x256xf32>
    %669 = arith.mulf %666, %668 : vector<16x256xf32>
    %670 = arith.truncf %669 : vector<16x256xf32> to vector<16x256xbf16>
    %c6_484 = arith.constant 6 : index
    %c0_485 = arith.constant 0 : index
    %c0_486 = arith.constant 0 : index
    %671 = vector.load %arg11[%c6_484, %c0_485, %c0_486] : memref<9x8x16xbf16, #tpu.memory_space<vmem>>, vector<1x8x16xbf16>
    %672 = vector.shape_cast %671 : vector<1x8x16xbf16> to vector<8x16xbf16>
    %cst_487 = arith.constant dense<0.000000e+00> : vector<8x256xf32>
    %673 = tpu.matmul %672, %670, %cst_487 {dimension_numbers = #tpu.dot_dimension_numbers<[1], [0], [0], [1], [0, 0, 1, 1], [], []>} : vector<8x16xbf16>, vector<16x256xbf16>, vector<8x256xf32> -> vector<8x256xf32>
    %674 = arith.addf %665, %673 : vector<8x256xf32>
    %c240_i32_488 = arith.constant 240 : i32
    %675 = tpu.dynamic_rotate %438 by %c240_i32_488 dim 1 : vector<16x256xf32>, i32 -> vector<16x256xf32>
    %c7_489 = arith.constant 7 : index
    %c0_490 = arith.constant 0 : index
    %676 = vector.load %arg3[%c7_489, %c0_490] : memref<9x256xf32, #tpu.memory_space<vmem>>, vector<1x256xf32>
    %677 = vector.broadcast %676 : vector<1x256xf32> to vector<16x256xf32>
    %678 = arith.mulf %675, %677 : vector<16x256xf32>
    %679 = arith.truncf %678 : vector<16x256xf32> to vector<16x256xbf16>
    %c7_491 = arith.constant 7 : index
    %c0_492 = arith.constant 0 : index
    %c0_493 = arith.constant 0 : index
    %680 = vector.load %arg11[%c7_491, %c0_492, %c0_493] : memref<9x8x16xbf16, #tpu.memory_space<vmem>>, vector<1x8x16xbf16>
    %681 = vector.shape_cast %680 : vector<1x8x16xbf16> to vector<8x16xbf16>
    %cst_494 = arith.constant dense<0.000000e+00> : vector<8x256xf32>
    %682 = tpu.matmul %681, %679, %cst_494 {dimension_numbers = #tpu.dot_dimension_numbers<[1], [0], [0], [1], [0, 0, 1, 1], [], []>} : vector<8x16xbf16>, vector<16x256xbf16>, vector<8x256xf32> -> vector<8x256xf32>
    %683 = arith.addf %674, %682 : vector<8x256xf32>
    %c239_i32_495 = arith.constant 239 : i32
    %684 = tpu.dynamic_rotate %438 by %c239_i32_495 dim 1 : vector<16x256xf32>, i32 -> vector<16x256xf32>
    %c8_496 = arith.constant 8 : index
    %c0_497 = arith.constant 0 : index
    %685 = vector.load %arg3[%c8_496, %c0_497] : memref<9x256xf32, #tpu.memory_space<vmem>>, vector<1x256xf32>
    %686 = vector.broadcast %685 : vector<1x256xf32> to vector<16x256xf32>
    %687 = arith.mulf %684, %686 : vector<16x256xf32>
    %688 = arith.truncf %687 : vector<16x256xf32> to vector<16x256xbf16>
    %c8_498 = arith.constant 8 : index
    %c0_499 = arith.constant 0 : index
    %c0_500 = arith.constant 0 : index
    %689 = vector.load %arg11[%c8_498, %c0_499, %c0_500] : memref<9x8x16xbf16, #tpu.memory_space<vmem>>, vector<1x8x16xbf16>
    %690 = vector.shape_cast %689 : vector<1x8x16xbf16> to vector<8x16xbf16>
    %cst_501 = arith.constant dense<0.000000e+00> : vector<8x256xf32>
    %691 = tpu.matmul %690, %688, %cst_501 {dimension_numbers = #tpu.dot_dimension_numbers<[1], [0], [0], [1], [0, 0, 1, 1], [], []>} : vector<8x16xbf16>, vector<16x256xbf16>, vector<8x256xf32> -> vector<8x256xf32>
    %692 = arith.addf %683, %691 : vector<8x256xf32>
    %c0_502 = arith.constant 0 : index
    %c0_503 = arith.constant 0 : index
    %693 = vector.load %arg23[%c0_502, %c0_503] : memref<8x2xf32, #tpu.memory_space<vmem>>, vector<8x2xf32>
    %694 = vector.extract_strided_slice %693 {offsets = [0, 0], sizes = [8, 1], strides = [1, 1]} : vector<8x2xf32> to vector<8x1xf32>
    %695 = vector.broadcast %694 : vector<8x1xf32> to vector<8x256xf32>
    %696 = arith.mulf %692, %695 : vector<8x256xf32>
    %697 = vector.extract_strided_slice %693 {offsets = [0, 1], sizes = [8, 1], strides = [1, 1]} : vector<8x2xf32> to vector<8x1xf32>
    %698 = vector.broadcast %697 : vector<8x1xf32> to vector<8x256xf32>
    %699 = arith.addf %696, %698 : vector<8x256xf32>
    %cst_504 = arith.constant 0.000000e+00 : f32
    %700 = vector.broadcast %cst_504 : f32 to vector<8x256xf32>
    %701 = arith.maximumf %699, %700 : vector<8x256xf32>
    %c17_i32_505 = arith.constant 17 : i32
    %702 = tpu.dynamic_rotate %613 by %c17_i32_505 dim 1 : vector<8x256xf32>, i32 -> vector<8x256xf32>
    %c0_506 = arith.constant 0 : index
    %c0_507 = arith.constant 0 : index
    %703 = vector.load %arg3[%c0_506, %c0_507] : memref<9x256xf32, #tpu.memory_space<vmem>>, vector<1x256xf32>
    %704 = vector.broadcast %703 : vector<1x256xf32> to vector<8x256xf32>
    %705 = arith.mulf %702, %704 : vector<8x256xf32>
    %706 = arith.truncf %705 : vector<8x256xf32> to vector<8x256xbf16>
    %c0_508 = arith.constant 0 : index
    %c0_509 = arith.constant 0 : index
    %c0_510 = arith.constant 0 : index
    %707 = vector.load %arg12[%c0_508, %c0_509, %c0_510] : memref<9x16x8xbf16, #tpu.memory_space<vmem>>, vector<1x16x8xbf16>
    %708 = vector.shape_cast %707 : vector<1x16x8xbf16> to vector<16x8xbf16>
    %cst_511 = arith.constant dense<0.000000e+00> : vector<16x256xf32>
    %709 = tpu.matmul %708, %706, %cst_511 {dimension_numbers = #tpu.dot_dimension_numbers<[1], [0], [0], [1], [0, 0, 1, 1], [], []>} : vector<16x8xbf16>, vector<8x256xbf16>, vector<16x256xf32> -> vector<16x256xf32>
    %c16_i32_512 = arith.constant 16 : i32
    %710 = tpu.dynamic_rotate %613 by %c16_i32_512 dim 1 : vector<8x256xf32>, i32 -> vector<8x256xf32>
    %c1_513 = arith.constant 1 : index
    %c0_514 = arith.constant 0 : index
    %711 = vector.load %arg3[%c1_513, %c0_514] : memref<9x256xf32, #tpu.memory_space<vmem>>, vector<1x256xf32>
    %712 = vector.broadcast %711 : vector<1x256xf32> to vector<8x256xf32>
    %713 = arith.mulf %710, %712 : vector<8x256xf32>
    %714 = arith.truncf %713 : vector<8x256xf32> to vector<8x256xbf16>
    %c1_515 = arith.constant 1 : index
    %c0_516 = arith.constant 0 : index
    %c0_517 = arith.constant 0 : index
    %715 = vector.load %arg12[%c1_515, %c0_516, %c0_517] : memref<9x16x8xbf16, #tpu.memory_space<vmem>>, vector<1x16x8xbf16>
    %716 = vector.shape_cast %715 : vector<1x16x8xbf16> to vector<16x8xbf16>
    %cst_518 = arith.constant dense<0.000000e+00> : vector<16x256xf32>
    %717 = tpu.matmul %716, %714, %cst_518 {dimension_numbers = #tpu.dot_dimension_numbers<[1], [0], [0], [1], [0, 0, 1, 1], [], []>} : vector<16x8xbf16>, vector<8x256xbf16>, vector<16x256xf32> -> vector<16x256xf32>
    %718 = arith.addf %709, %717 : vector<16x256xf32>
    %c15_i32_519 = arith.constant 15 : i32
    %719 = tpu.dynamic_rotate %613 by %c15_i32_519 dim 1 : vector<8x256xf32>, i32 -> vector<8x256xf32>
    %c2_520 = arith.constant 2 : index
    %c0_521 = arith.constant 0 : index
    %720 = vector.load %arg3[%c2_520, %c0_521] : memref<9x256xf32, #tpu.memory_space<vmem>>, vector<1x256xf32>
    %721 = vector.broadcast %720 : vector<1x256xf32> to vector<8x256xf32>
    %722 = arith.mulf %719, %721 : vector<8x256xf32>
    %723 = arith.truncf %722 : vector<8x256xf32> to vector<8x256xbf16>
    %c2_522 = arith.constant 2 : index
    %c0_523 = arith.constant 0 : index
    %c0_524 = arith.constant 0 : index
    %724 = vector.load %arg12[%c2_522, %c0_523, %c0_524] : memref<9x16x8xbf16, #tpu.memory_space<vmem>>, vector<1x16x8xbf16>
    %725 = vector.shape_cast %724 : vector<1x16x8xbf16> to vector<16x8xbf16>
    %cst_525 = arith.constant dense<0.000000e+00> : vector<16x256xf32>
    %726 = tpu.matmul %725, %723, %cst_525 {dimension_numbers = #tpu.dot_dimension_numbers<[1], [0], [0], [1], [0, 0, 1, 1], [], []>} : vector<16x8xbf16>, vector<8x256xbf16>, vector<16x256xf32> -> vector<16x256xf32>
    %727 = arith.addf %718, %726 : vector<16x256xf32>
    %c1_i32_526 = arith.constant 1 : i32
    %728 = tpu.dynamic_rotate %613 by %c1_i32_526 dim 1 : vector<8x256xf32>, i32 -> vector<8x256xf32>
    %c3_527 = arith.constant 3 : index
    %c0_528 = arith.constant 0 : index
    %729 = vector.load %arg3[%c3_527, %c0_528] : memref<9x256xf32, #tpu.memory_space<vmem>>, vector<1x256xf32>
    %730 = vector.broadcast %729 : vector<1x256xf32> to vector<8x256xf32>
    %731 = arith.mulf %728, %730 : vector<8x256xf32>
    %732 = arith.truncf %731 : vector<8x256xf32> to vector<8x256xbf16>
    %c3_529 = arith.constant 3 : index
    %c0_530 = arith.constant 0 : index
    %c0_531 = arith.constant 0 : index
    %733 = vector.load %arg12[%c3_529, %c0_530, %c0_531] : memref<9x16x8xbf16, #tpu.memory_space<vmem>>, vector<1x16x8xbf16>
    %734 = vector.shape_cast %733 : vector<1x16x8xbf16> to vector<16x8xbf16>
    %cst_532 = arith.constant dense<0.000000e+00> : vector<16x256xf32>
    %735 = tpu.matmul %734, %732, %cst_532 {dimension_numbers = #tpu.dot_dimension_numbers<[1], [0], [0], [1], [0, 0, 1, 1], [], []>} : vector<16x8xbf16>, vector<8x256xbf16>, vector<16x256xf32> -> vector<16x256xf32>
    %736 = arith.addf %727, %735 : vector<16x256xf32>
    %c4_533 = arith.constant 4 : index
    %c0_534 = arith.constant 0 : index
    %737 = vector.load %arg3[%c4_533, %c0_534] : memref<9x256xf32, #tpu.memory_space<vmem>>, vector<1x256xf32>
    %738 = vector.broadcast %737 : vector<1x256xf32> to vector<8x256xf32>
    %739 = arith.mulf %613, %738 : vector<8x256xf32>
    %740 = arith.truncf %739 : vector<8x256xf32> to vector<8x256xbf16>
    %c4_535 = arith.constant 4 : index
    %c0_536 = arith.constant 0 : index
    %c0_537 = arith.constant 0 : index
    %741 = vector.load %arg12[%c4_535, %c0_536, %c0_537] : memref<9x16x8xbf16, #tpu.memory_space<vmem>>, vector<1x16x8xbf16>
    %742 = vector.shape_cast %741 : vector<1x16x8xbf16> to vector<16x8xbf16>
    %cst_538 = arith.constant dense<0.000000e+00> : vector<16x256xf32>
    %743 = tpu.matmul %742, %740, %cst_538 {dimension_numbers = #tpu.dot_dimension_numbers<[1], [0], [0], [1], [0, 0, 1, 1], [], []>} : vector<16x8xbf16>, vector<8x256xbf16>, vector<16x256xf32> -> vector<16x256xf32>
    %744 = arith.addf %736, %743 : vector<16x256xf32>
    %c255_i32_539 = arith.constant 255 : i32
    %745 = tpu.dynamic_rotate %613 by %c255_i32_539 dim 1 : vector<8x256xf32>, i32 -> vector<8x256xf32>
    %c5_540 = arith.constant 5 : index
    %c0_541 = arith.constant 0 : index
    %746 = vector.load %arg3[%c5_540, %c0_541] : memref<9x256xf32, #tpu.memory_space<vmem>>, vector<1x256xf32>
    %747 = vector.broadcast %746 : vector<1x256xf32> to vector<8x256xf32>
    %748 = arith.mulf %745, %747 : vector<8x256xf32>
    %749 = arith.truncf %748 : vector<8x256xf32> to vector<8x256xbf16>
    %c5_542 = arith.constant 5 : index
    %c0_543 = arith.constant 0 : index
    %c0_544 = arith.constant 0 : index
    %750 = vector.load %arg12[%c5_542, %c0_543, %c0_544] : memref<9x16x8xbf16, #tpu.memory_space<vmem>>, vector<1x16x8xbf16>
    %751 = vector.shape_cast %750 : vector<1x16x8xbf16> to vector<16x8xbf16>
    %cst_545 = arith.constant dense<0.000000e+00> : vector<16x256xf32>
    %752 = tpu.matmul %751, %749, %cst_545 {dimension_numbers = #tpu.dot_dimension_numbers<[1], [0], [0], [1], [0, 0, 1, 1], [], []>} : vector<16x8xbf16>, vector<8x256xbf16>, vector<16x256xf32> -> vector<16x256xf32>
    %753 = arith.addf %744, %752 : vector<16x256xf32>
    %c241_i32_546 = arith.constant 241 : i32
    %754 = tpu.dynamic_rotate %613 by %c241_i32_546 dim 1 : vector<8x256xf32>, i32 -> vector<8x256xf32>
    %c6_547 = arith.constant 6 : index
    %c0_548 = arith.constant 0 : index
    %755 = vector.load %arg3[%c6_547, %c0_548] : memref<9x256xf32, #tpu.memory_space<vmem>>, vector<1x256xf32>
    %756 = vector.broadcast %755 : vector<1x256xf32> to vector<8x256xf32>
    %757 = arith.mulf %754, %756 : vector<8x256xf32>
    %758 = arith.truncf %757 : vector<8x256xf32> to vector<8x256xbf16>
    %c6_549 = arith.constant 6 : index
    %c0_550 = arith.constant 0 : index
    %c0_551 = arith.constant 0 : index
    %759 = vector.load %arg12[%c6_549, %c0_550, %c0_551] : memref<9x16x8xbf16, #tpu.memory_space<vmem>>, vector<1x16x8xbf16>
    %760 = vector.shape_cast %759 : vector<1x16x8xbf16> to vector<16x8xbf16>
    %cst_552 = arith.constant dense<0.000000e+00> : vector<16x256xf32>
    %761 = tpu.matmul %760, %758, %cst_552 {dimension_numbers = #tpu.dot_dimension_numbers<[1], [0], [0], [1], [0, 0, 1, 1], [], []>} : vector<16x8xbf16>, vector<8x256xbf16>, vector<16x256xf32> -> vector<16x256xf32>
    %762 = arith.addf %753, %761 : vector<16x256xf32>
    %c240_i32_553 = arith.constant 240 : i32
    %763 = tpu.dynamic_rotate %613 by %c240_i32_553 dim 1 : vector<8x256xf32>, i32 -> vector<8x256xf32>
    %c7_554 = arith.constant 7 : index
    %c0_555 = arith.constant 0 : index
    %764 = vector.load %arg3[%c7_554, %c0_555] : memref<9x256xf32, #tpu.memory_space<vmem>>, vector<1x256xf32>
    %765 = vector.broadcast %764 : vector<1x256xf32> to vector<8x256xf32>
    %766 = arith.mulf %763, %765 : vector<8x256xf32>
    %767 = arith.truncf %766 : vector<8x256xf32> to vector<8x256xbf16>
    %c7_556 = arith.constant 7 : index
    %c0_557 = arith.constant 0 : index
    %c0_558 = arith.constant 0 : index
    %768 = vector.load %arg12[%c7_556, %c0_557, %c0_558] : memref<9x16x8xbf16, #tpu.memory_space<vmem>>, vector<1x16x8xbf16>
    %769 = vector.shape_cast %768 : vector<1x16x8xbf16> to vector<16x8xbf16>
    %cst_559 = arith.constant dense<0.000000e+00> : vector<16x256xf32>
    %770 = tpu.matmul %769, %767, %cst_559 {dimension_numbers = #tpu.dot_dimension_numbers<[1], [0], [0], [1], [0, 0, 1, 1], [], []>} : vector<16x8xbf16>, vector<8x256xbf16>, vector<16x256xf32> -> vector<16x256xf32>
    %771 = arith.addf %762, %770 : vector<16x256xf32>
    %c239_i32_560 = arith.constant 239 : i32
    %772 = tpu.dynamic_rotate %613 by %c239_i32_560 dim 1 : vector<8x256xf32>, i32 -> vector<8x256xf32>
    %c8_561 = arith.constant 8 : index
    %c0_562 = arith.constant 0 : index
    %773 = vector.load %arg3[%c8_561, %c0_562] : memref<9x256xf32, #tpu.memory_space<vmem>>, vector<1x256xf32>
    %774 = vector.broadcast %773 : vector<1x256xf32> to vector<8x256xf32>
    %775 = arith.mulf %772, %774 : vector<8x256xf32>
    %776 = arith.truncf %775 : vector<8x256xf32> to vector<8x256xbf16>
    %c8_563 = arith.constant 8 : index
    %c0_564 = arith.constant 0 : index
    %c0_565 = arith.constant 0 : index
    %777 = vector.load %arg12[%c8_563, %c0_564, %c0_565] : memref<9x16x8xbf16, #tpu.memory_space<vmem>>, vector<1x16x8xbf16>
    %778 = vector.shape_cast %777 : vector<1x16x8xbf16> to vector<16x8xbf16>
    %cst_566 = arith.constant dense<0.000000e+00> : vector<16x256xf32>
    %779 = tpu.matmul %778, %776, %cst_566 {dimension_numbers = #tpu.dot_dimension_numbers<[1], [0], [0], [1], [0, 0, 1, 1], [], []>} : vector<16x8xbf16>, vector<8x256xbf16>, vector<16x256xf32> -> vector<16x256xf32>
    %780 = arith.addf %771, %779 : vector<16x256xf32>
    %c17_i32_567 = arith.constant 17 : i32
    %781 = tpu.dynamic_rotate %701 by %c17_i32_567 dim 1 : vector<8x256xf32>, i32 -> vector<8x256xf32>
    %c0_568 = arith.constant 0 : index
    %c0_569 = arith.constant 0 : index
    %782 = vector.load %arg3[%c0_568, %c0_569] : memref<9x256xf32, #tpu.memory_space<vmem>>, vector<1x256xf32>
    %783 = vector.broadcast %782 : vector<1x256xf32> to vector<8x256xf32>
    %784 = arith.mulf %781, %783 : vector<8x256xf32>
    %785 = arith.truncf %784 : vector<8x256xf32> to vector<8x256xbf16>
    %c0_570 = arith.constant 0 : index
    %c0_571 = arith.constant 0 : index
    %c0_572 = arith.constant 0 : index
    %786 = vector.load %arg13[%c0_570, %c0_571, %c0_572] : memref<9x16x8xbf16, #tpu.memory_space<vmem>>, vector<1x16x8xbf16>
    %787 = vector.shape_cast %786 : vector<1x16x8xbf16> to vector<16x8xbf16>
    %cst_573 = arith.constant dense<0.000000e+00> : vector<16x256xf32>
    %788 = tpu.matmul %787, %785, %cst_573 {dimension_numbers = #tpu.dot_dimension_numbers<[1], [0], [0], [1], [0, 0, 1, 1], [], []>} : vector<16x8xbf16>, vector<8x256xbf16>, vector<16x256xf32> -> vector<16x256xf32>
    %789 = arith.addf %780, %788 : vector<16x256xf32>
    %c16_i32_574 = arith.constant 16 : i32
    %790 = tpu.dynamic_rotate %701 by %c16_i32_574 dim 1 : vector<8x256xf32>, i32 -> vector<8x256xf32>
    %c1_575 = arith.constant 1 : index
    %c0_576 = arith.constant 0 : index
    %791 = vector.load %arg3[%c1_575, %c0_576] : memref<9x256xf32, #tpu.memory_space<vmem>>, vector<1x256xf32>
    %792 = vector.broadcast %791 : vector<1x256xf32> to vector<8x256xf32>
    %793 = arith.mulf %790, %792 : vector<8x256xf32>
    %794 = arith.truncf %793 : vector<8x256xf32> to vector<8x256xbf16>
    %c1_577 = arith.constant 1 : index
    %c0_578 = arith.constant 0 : index
    %c0_579 = arith.constant 0 : index
    %795 = vector.load %arg13[%c1_577, %c0_578, %c0_579] : memref<9x16x8xbf16, #tpu.memory_space<vmem>>, vector<1x16x8xbf16>
    %796 = vector.shape_cast %795 : vector<1x16x8xbf16> to vector<16x8xbf16>
    %cst_580 = arith.constant dense<0.000000e+00> : vector<16x256xf32>
    %797 = tpu.matmul %796, %794, %cst_580 {dimension_numbers = #tpu.dot_dimension_numbers<[1], [0], [0], [1], [0, 0, 1, 1], [], []>} : vector<16x8xbf16>, vector<8x256xbf16>, vector<16x256xf32> -> vector<16x256xf32>
    %798 = arith.addf %789, %797 : vector<16x256xf32>
    %c15_i32_581 = arith.constant 15 : i32
    %799 = tpu.dynamic_rotate %701 by %c15_i32_581 dim 1 : vector<8x256xf32>, i32 -> vector<8x256xf32>
    %c2_582 = arith.constant 2 : index
    %c0_583 = arith.constant 0 : index
    %800 = vector.load %arg3[%c2_582, %c0_583] : memref<9x256xf32, #tpu.memory_space<vmem>>, vector<1x256xf32>
    %801 = vector.broadcast %800 : vector<1x256xf32> to vector<8x256xf32>
    %802 = arith.mulf %799, %801 : vector<8x256xf32>
    %803 = arith.truncf %802 : vector<8x256xf32> to vector<8x256xbf16>
    %c2_584 = arith.constant 2 : index
    %c0_585 = arith.constant 0 : index
    %c0_586 = arith.constant 0 : index
    %804 = vector.load %arg13[%c2_584, %c0_585, %c0_586] : memref<9x16x8xbf16, #tpu.memory_space<vmem>>, vector<1x16x8xbf16>
    %805 = vector.shape_cast %804 : vector<1x16x8xbf16> to vector<16x8xbf16>
    %cst_587 = arith.constant dense<0.000000e+00> : vector<16x256xf32>
    %806 = tpu.matmul %805, %803, %cst_587 {dimension_numbers = #tpu.dot_dimension_numbers<[1], [0], [0], [1], [0, 0, 1, 1], [], []>} : vector<16x8xbf16>, vector<8x256xbf16>, vector<16x256xf32> -> vector<16x256xf32>
    %807 = arith.addf %798, %806 : vector<16x256xf32>
    %c1_i32_588 = arith.constant 1 : i32
    %808 = tpu.dynamic_rotate %701 by %c1_i32_588 dim 1 : vector<8x256xf32>, i32 -> vector<8x256xf32>
    %c3_589 = arith.constant 3 : index
    %c0_590 = arith.constant 0 : index
    %809 = vector.load %arg3[%c3_589, %c0_590] : memref<9x256xf32, #tpu.memory_space<vmem>>, vector<1x256xf32>
    %810 = vector.broadcast %809 : vector<1x256xf32> to vector<8x256xf32>
    %811 = arith.mulf %808, %810 : vector<8x256xf32>
    %812 = arith.truncf %811 : vector<8x256xf32> to vector<8x256xbf16>
    %c3_591 = arith.constant 3 : index
    %c0_592 = arith.constant 0 : index
    %c0_593 = arith.constant 0 : index
    %813 = vector.load %arg13[%c3_591, %c0_592, %c0_593] : memref<9x16x8xbf16, #tpu.memory_space<vmem>>, vector<1x16x8xbf16>
    %814 = vector.shape_cast %813 : vector<1x16x8xbf16> to vector<16x8xbf16>
    %cst_594 = arith.constant dense<0.000000e+00> : vector<16x256xf32>
    %815 = tpu.matmul %814, %812, %cst_594 {dimension_numbers = #tpu.dot_dimension_numbers<[1], [0], [0], [1], [0, 0, 1, 1], [], []>} : vector<16x8xbf16>, vector<8x256xbf16>, vector<16x256xf32> -> vector<16x256xf32>
    %816 = arith.addf %807, %815 : vector<16x256xf32>
    %c4_595 = arith.constant 4 : index
    %c0_596 = arith.constant 0 : index
    %817 = vector.load %arg3[%c4_595, %c0_596] : memref<9x256xf32, #tpu.memory_space<vmem>>, vector<1x256xf32>
    %818 = vector.broadcast %817 : vector<1x256xf32> to vector<8x256xf32>
    %819 = arith.mulf %701, %818 : vector<8x256xf32>
    %820 = arith.truncf %819 : vector<8x256xf32> to vector<8x256xbf16>
    %c4_597 = arith.constant 4 : index
    %c0_598 = arith.constant 0 : index
    %c0_599 = arith.constant 0 : index
    %821 = vector.load %arg13[%c4_597, %c0_598, %c0_599] : memref<9x16x8xbf16, #tpu.memory_space<vmem>>, vector<1x16x8xbf16>
    %822 = vector.shape_cast %821 : vector<1x16x8xbf16> to vector<16x8xbf16>
    %cst_600 = arith.constant dense<0.000000e+00> : vector<16x256xf32>
    %823 = tpu.matmul %822, %820, %cst_600 {dimension_numbers = #tpu.dot_dimension_numbers<[1], [0], [0], [1], [0, 0, 1, 1], [], []>} : vector<16x8xbf16>, vector<8x256xbf16>, vector<16x256xf32> -> vector<16x256xf32>
    %824 = arith.addf %816, %823 : vector<16x256xf32>
    %c255_i32_601 = arith.constant 255 : i32
    %825 = tpu.dynamic_rotate %701 by %c255_i32_601 dim 1 : vector<8x256xf32>, i32 -> vector<8x256xf32>
    %c5_602 = arith.constant 5 : index
    %c0_603 = arith.constant 0 : index
    %826 = vector.load %arg3[%c5_602, %c0_603] : memref<9x256xf32, #tpu.memory_space<vmem>>, vector<1x256xf32>
    %827 = vector.broadcast %826 : vector<1x256xf32> to vector<8x256xf32>
    %828 = arith.mulf %825, %827 : vector<8x256xf32>
    %829 = arith.truncf %828 : vector<8x256xf32> to vector<8x256xbf16>
    %c5_604 = arith.constant 5 : index
    %c0_605 = arith.constant 0 : index
    %c0_606 = arith.constant 0 : index
    %830 = vector.load %arg13[%c5_604, %c0_605, %c0_606] : memref<9x16x8xbf16, #tpu.memory_space<vmem>>, vector<1x16x8xbf16>
    %831 = vector.shape_cast %830 : vector<1x16x8xbf16> to vector<16x8xbf16>
    %cst_607 = arith.constant dense<0.000000e+00> : vector<16x256xf32>
    %832 = tpu.matmul %831, %829, %cst_607 {dimension_numbers = #tpu.dot_dimension_numbers<[1], [0], [0], [1], [0, 0, 1, 1], [], []>} : vector<16x8xbf16>, vector<8x256xbf16>, vector<16x256xf32> -> vector<16x256xf32>
    %833 = arith.addf %824, %832 : vector<16x256xf32>
    %c241_i32_608 = arith.constant 241 : i32
    %834 = tpu.dynamic_rotate %701 by %c241_i32_608 dim 1 : vector<8x256xf32>, i32 -> vector<8x256xf32>
    %c6_609 = arith.constant 6 : index
    %c0_610 = arith.constant 0 : index
    %835 = vector.load %arg3[%c6_609, %c0_610] : memref<9x256xf32, #tpu.memory_space<vmem>>, vector<1x256xf32>
    %836 = vector.broadcast %835 : vector<1x256xf32> to vector<8x256xf32>
    %837 = arith.mulf %834, %836 : vector<8x256xf32>
    %838 = arith.truncf %837 : vector<8x256xf32> to vector<8x256xbf16>
    %c6_611 = arith.constant 6 : index
    %c0_612 = arith.constant 0 : index
    %c0_613 = arith.constant 0 : index
    %839 = vector.load %arg13[%c6_611, %c0_612, %c0_613] : memref<9x16x8xbf16, #tpu.memory_space<vmem>>, vector<1x16x8xbf16>
    %840 = vector.shape_cast %839 : vector<1x16x8xbf16> to vector<16x8xbf16>
    %cst_614 = arith.constant dense<0.000000e+00> : vector<16x256xf32>
    %841 = tpu.matmul %840, %838, %cst_614 {dimension_numbers = #tpu.dot_dimension_numbers<[1], [0], [0], [1], [0, 0, 1, 1], [], []>} : vector<16x8xbf16>, vector<8x256xbf16>, vector<16x256xf32> -> vector<16x256xf32>
    %842 = arith.addf %833, %841 : vector<16x256xf32>
    %c240_i32_615 = arith.constant 240 : i32
    %843 = tpu.dynamic_rotate %701 by %c240_i32_615 dim 1 : vector<8x256xf32>, i32 -> vector<8x256xf32>
    %c7_616 = arith.constant 7 : index
    %c0_617 = arith.constant 0 : index
    %844 = vector.load %arg3[%c7_616, %c0_617] : memref<9x256xf32, #tpu.memory_space<vmem>>, vector<1x256xf32>
    %845 = vector.broadcast %844 : vector<1x256xf32> to vector<8x256xf32>
    %846 = arith.mulf %843, %845 : vector<8x256xf32>
    %847 = arith.truncf %846 : vector<8x256xf32> to vector<8x256xbf16>
    %c7_618 = arith.constant 7 : index
    %c0_619 = arith.constant 0 : index
    %c0_620 = arith.constant 0 : index
    %848 = vector.load %arg13[%c7_618, %c0_619, %c0_620] : memref<9x16x8xbf16, #tpu.memory_space<vmem>>, vector<1x16x8xbf16>
    %849 = vector.shape_cast %848 : vector<1x16x8xbf16> to vector<16x8xbf16>
    %cst_621 = arith.constant dense<0.000000e+00> : vector<16x256xf32>
    %850 = tpu.matmul %849, %847, %cst_621 {dimension_numbers = #tpu.dot_dimension_numbers<[1], [0], [0], [1], [0, 0, 1, 1], [], []>} : vector<16x8xbf16>, vector<8x256xbf16>, vector<16x256xf32> -> vector<16x256xf32>
    %851 = arith.addf %842, %850 : vector<16x256xf32>
    %c239_i32_622 = arith.constant 239 : i32
    %852 = tpu.dynamic_rotate %701 by %c239_i32_622 dim 1 : vector<8x256xf32>, i32 -> vector<8x256xf32>
    %c8_623 = arith.constant 8 : index
    %c0_624 = arith.constant 0 : index
    %853 = vector.load %arg3[%c8_623, %c0_624] : memref<9x256xf32, #tpu.memory_space<vmem>>, vector<1x256xf32>
    %854 = vector.broadcast %853 : vector<1x256xf32> to vector<8x256xf32>
    %855 = arith.mulf %852, %854 : vector<8x256xf32>
    %856 = arith.truncf %855 : vector<8x256xf32> to vector<8x256xbf16>
    %c8_625 = arith.constant 8 : index
    %c0_626 = arith.constant 0 : index
    %c0_627 = arith.constant 0 : index
    %857 = vector.load %arg13[%c8_625, %c0_626, %c0_627] : memref<9x16x8xbf16, #tpu.memory_space<vmem>>, vector<1x16x8xbf16>
    %858 = vector.shape_cast %857 : vector<1x16x8xbf16> to vector<16x8xbf16>
    %cst_628 = arith.constant dense<0.000000e+00> : vector<16x256xf32>
    %859 = tpu.matmul %858, %856, %cst_628 {dimension_numbers = #tpu.dot_dimension_numbers<[1], [0], [0], [1], [0, 0, 1, 1], [], []>} : vector<16x8xbf16>, vector<8x256xbf16>, vector<16x256xf32> -> vector<16x256xf32>
    %860 = arith.addf %851, %859 : vector<16x256xf32>
    %c0_629 = arith.constant 0 : index
    %c0_630 = arith.constant 0 : index
    %861 = vector.load %arg24[%c0_629, %c0_630] : memref<16x2xf32, #tpu.memory_space<vmem>>, vector<16x2xf32>
    %862 = vector.extract_strided_slice %861 {offsets = [0, 0], sizes = [16, 1], strides = [1, 1]} : vector<16x2xf32> to vector<16x1xf32>
    %863 = vector.broadcast %862 : vector<16x1xf32> to vector<16x256xf32>
    %864 = arith.mulf %860, %863 : vector<16x256xf32>
    %865 = vector.extract_strided_slice %861 {offsets = [0, 1], sizes = [16, 1], strides = [1, 1]} : vector<16x2xf32> to vector<16x1xf32>
    %866 = vector.broadcast %865 : vector<16x1xf32> to vector<16x256xf32>
    %867 = arith.addf %864, %866 : vector<16x256xf32>
    %cst_631 = arith.constant 0.000000e+00 : f32
    %868 = vector.broadcast %cst_631 : f32 to vector<16x256xf32>
    %869 = arith.maximumf %867, %868 : vector<16x256xf32>
    %c17_i32_632 = arith.constant 17 : i32
    %870 = tpu.dynamic_rotate %869 by %c17_i32_632 dim 1 : vector<16x256xf32>, i32 -> vector<16x256xf32>
    %c0_633 = arith.constant 0 : index
    %c0_634 = arith.constant 0 : index
    %871 = vector.load %arg3[%c0_633, %c0_634] : memref<9x256xf32, #tpu.memory_space<vmem>>, vector<1x256xf32>
    %872 = vector.broadcast %871 : vector<1x256xf32> to vector<16x256xf32>
    %873 = arith.mulf %870, %872 : vector<16x256xf32>
    %874 = arith.truncf %873 : vector<16x256xf32> to vector<16x256xbf16>
    %c0_635 = arith.constant 0 : index
    %c0_636 = arith.constant 0 : index
    %c0_637 = arith.constant 0 : index
    %875 = vector.load %arg14[%c0_635, %c0_636, %c0_637] : memref<9x16x16xbf16, #tpu.memory_space<vmem>>, vector<1x16x16xbf16>
    %876 = vector.shape_cast %875 : vector<1x16x16xbf16> to vector<16x16xbf16>
    %cst_638 = arith.constant dense<0.000000e+00> : vector<16x256xf32>
    %877 = tpu.matmul %876, %874, %cst_638 {dimension_numbers = #tpu.dot_dimension_numbers<[1], [0], [0], [1], [0, 0, 1, 1], [], []>} : vector<16x16xbf16>, vector<16x256xbf16>, vector<16x256xf32> -> vector<16x256xf32>
    %c16_i32_639 = arith.constant 16 : i32
    %878 = tpu.dynamic_rotate %869 by %c16_i32_639 dim 1 : vector<16x256xf32>, i32 -> vector<16x256xf32>
    %c1_640 = arith.constant 1 : index
    %c0_641 = arith.constant 0 : index
    %879 = vector.load %arg3[%c1_640, %c0_641] : memref<9x256xf32, #tpu.memory_space<vmem>>, vector<1x256xf32>
    %880 = vector.broadcast %879 : vector<1x256xf32> to vector<16x256xf32>
    %881 = arith.mulf %878, %880 : vector<16x256xf32>
    %882 = arith.truncf %881 : vector<16x256xf32> to vector<16x256xbf16>
    %c1_642 = arith.constant 1 : index
    %c0_643 = arith.constant 0 : index
    %c0_644 = arith.constant 0 : index
    %883 = vector.load %arg14[%c1_642, %c0_643, %c0_644] : memref<9x16x16xbf16, #tpu.memory_space<vmem>>, vector<1x16x16xbf16>
    %884 = vector.shape_cast %883 : vector<1x16x16xbf16> to vector<16x16xbf16>
    %cst_645 = arith.constant dense<0.000000e+00> : vector<16x256xf32>
    %885 = tpu.matmul %884, %882, %cst_645 {dimension_numbers = #tpu.dot_dimension_numbers<[1], [0], [0], [1], [0, 0, 1, 1], [], []>} : vector<16x16xbf16>, vector<16x256xbf16>, vector<16x256xf32> -> vector<16x256xf32>
    %886 = arith.addf %877, %885 : vector<16x256xf32>
    %c15_i32_646 = arith.constant 15 : i32
    %887 = tpu.dynamic_rotate %869 by %c15_i32_646 dim 1 : vector<16x256xf32>, i32 -> vector<16x256xf32>
    %c2_647 = arith.constant 2 : index
    %c0_648 = arith.constant 0 : index
    %888 = vector.load %arg3[%c2_647, %c0_648] : memref<9x256xf32, #tpu.memory_space<vmem>>, vector<1x256xf32>
    %889 = vector.broadcast %888 : vector<1x256xf32> to vector<16x256xf32>
    %890 = arith.mulf %887, %889 : vector<16x256xf32>
    %891 = arith.truncf %890 : vector<16x256xf32> to vector<16x256xbf16>
    %c2_649 = arith.constant 2 : index
    %c0_650 = arith.constant 0 : index
    %c0_651 = arith.constant 0 : index
    %892 = vector.load %arg14[%c2_649, %c0_650, %c0_651] : memref<9x16x16xbf16, #tpu.memory_space<vmem>>, vector<1x16x16xbf16>
    %893 = vector.shape_cast %892 : vector<1x16x16xbf16> to vector<16x16xbf16>
    %cst_652 = arith.constant dense<0.000000e+00> : vector<16x256xf32>
    %894 = tpu.matmul %893, %891, %cst_652 {dimension_numbers = #tpu.dot_dimension_numbers<[1], [0], [0], [1], [0, 0, 1, 1], [], []>} : vector<16x16xbf16>, vector<16x256xbf16>, vector<16x256xf32> -> vector<16x256xf32>
    %895 = arith.addf %886, %894 : vector<16x256xf32>
    %c1_i32_653 = arith.constant 1 : i32
    %896 = tpu.dynamic_rotate %869 by %c1_i32_653 dim 1 : vector<16x256xf32>, i32 -> vector<16x256xf32>
    %c3_654 = arith.constant 3 : index
    %c0_655 = arith.constant 0 : index
    %897 = vector.load %arg3[%c3_654, %c0_655] : memref<9x256xf32, #tpu.memory_space<vmem>>, vector<1x256xf32>
    %898 = vector.broadcast %897 : vector<1x256xf32> to vector<16x256xf32>
    %899 = arith.mulf %896, %898 : vector<16x256xf32>
    %900 = arith.truncf %899 : vector<16x256xf32> to vector<16x256xbf16>
    %c3_656 = arith.constant 3 : index
    %c0_657 = arith.constant 0 : index
    %c0_658 = arith.constant 0 : index
    %901 = vector.load %arg14[%c3_656, %c0_657, %c0_658] : memref<9x16x16xbf16, #tpu.memory_space<vmem>>, vector<1x16x16xbf16>
    %902 = vector.shape_cast %901 : vector<1x16x16xbf16> to vector<16x16xbf16>
    %cst_659 = arith.constant dense<0.000000e+00> : vector<16x256xf32>
    %903 = tpu.matmul %902, %900, %cst_659 {dimension_numbers = #tpu.dot_dimension_numbers<[1], [0], [0], [1], [0, 0, 1, 1], [], []>} : vector<16x16xbf16>, vector<16x256xbf16>, vector<16x256xf32> -> vector<16x256xf32>
    %904 = arith.addf %895, %903 : vector<16x256xf32>
    %c4_660 = arith.constant 4 : index
    %c0_661 = arith.constant 0 : index
    %905 = vector.load %arg3[%c4_660, %c0_661] : memref<9x256xf32, #tpu.memory_space<vmem>>, vector<1x256xf32>
    %906 = vector.broadcast %905 : vector<1x256xf32> to vector<16x256xf32>
    %907 = arith.mulf %869, %906 : vector<16x256xf32>
    %908 = arith.truncf %907 : vector<16x256xf32> to vector<16x256xbf16>
    %c4_662 = arith.constant 4 : index
    %c0_663 = arith.constant 0 : index
    %c0_664 = arith.constant 0 : index
    %909 = vector.load %arg14[%c4_662, %c0_663, %c0_664] : memref<9x16x16xbf16, #tpu.memory_space<vmem>>, vector<1x16x16xbf16>
    %910 = vector.shape_cast %909 : vector<1x16x16xbf16> to vector<16x16xbf16>
    %cst_665 = arith.constant dense<0.000000e+00> : vector<16x256xf32>
    %911 = tpu.matmul %910, %908, %cst_665 {dimension_numbers = #tpu.dot_dimension_numbers<[1], [0], [0], [1], [0, 0, 1, 1], [], []>} : vector<16x16xbf16>, vector<16x256xbf16>, vector<16x256xf32> -> vector<16x256xf32>
    %912 = arith.addf %904, %911 : vector<16x256xf32>
    %c255_i32_666 = arith.constant 255 : i32
    %913 = tpu.dynamic_rotate %869 by %c255_i32_666 dim 1 : vector<16x256xf32>, i32 -> vector<16x256xf32>
    %c5_667 = arith.constant 5 : index
    %c0_668 = arith.constant 0 : index
    %914 = vector.load %arg3[%c5_667, %c0_668] : memref<9x256xf32, #tpu.memory_space<vmem>>, vector<1x256xf32>
    %915 = vector.broadcast %914 : vector<1x256xf32> to vector<16x256xf32>
    %916 = arith.mulf %913, %915 : vector<16x256xf32>
    %917 = arith.truncf %916 : vector<16x256xf32> to vector<16x256xbf16>
    %c5_669 = arith.constant 5 : index
    %c0_670 = arith.constant 0 : index
    %c0_671 = arith.constant 0 : index
    %918 = vector.load %arg14[%c5_669, %c0_670, %c0_671] : memref<9x16x16xbf16, #tpu.memory_space<vmem>>, vector<1x16x16xbf16>
    %919 = vector.shape_cast %918 : vector<1x16x16xbf16> to vector<16x16xbf16>
    %cst_672 = arith.constant dense<0.000000e+00> : vector<16x256xf32>
    %920 = tpu.matmul %919, %917, %cst_672 {dimension_numbers = #tpu.dot_dimension_numbers<[1], [0], [0], [1], [0, 0, 1, 1], [], []>} : vector<16x16xbf16>, vector<16x256xbf16>, vector<16x256xf32> -> vector<16x256xf32>
    %921 = arith.addf %912, %920 : vector<16x256xf32>
    %c241_i32_673 = arith.constant 241 : i32
    %922 = tpu.dynamic_rotate %869 by %c241_i32_673 dim 1 : vector<16x256xf32>, i32 -> vector<16x256xf32>
    %c6_674 = arith.constant 6 : index
    %c0_675 = arith.constant 0 : index
    %923 = vector.load %arg3[%c6_674, %c0_675] : memref<9x256xf32, #tpu.memory_space<vmem>>, vector<1x256xf32>
    %924 = vector.broadcast %923 : vector<1x256xf32> to vector<16x256xf32>
    %925 = arith.mulf %922, %924 : vector<16x256xf32>
    %926 = arith.truncf %925 : vector<16x256xf32> to vector<16x256xbf16>
    %c6_676 = arith.constant 6 : index
    %c0_677 = arith.constant 0 : index
    %c0_678 = arith.constant 0 : index
    %927 = vector.load %arg14[%c6_676, %c0_677, %c0_678] : memref<9x16x16xbf16, #tpu.memory_space<vmem>>, vector<1x16x16xbf16>
    %928 = vector.shape_cast %927 : vector<1x16x16xbf16> to vector<16x16xbf16>
    %cst_679 = arith.constant dense<0.000000e+00> : vector<16x256xf32>
    %929 = tpu.matmul %928, %926, %cst_679 {dimension_numbers = #tpu.dot_dimension_numbers<[1], [0], [0], [1], [0, 0, 1, 1], [], []>} : vector<16x16xbf16>, vector<16x256xbf16>, vector<16x256xf32> -> vector<16x256xf32>
    %930 = arith.addf %921, %929 : vector<16x256xf32>
    %c240_i32_680 = arith.constant 240 : i32
    %931 = tpu.dynamic_rotate %869 by %c240_i32_680 dim 1 : vector<16x256xf32>, i32 -> vector<16x256xf32>
    %c7_681 = arith.constant 7 : index
    %c0_682 = arith.constant 0 : index
    %932 = vector.load %arg3[%c7_681, %c0_682] : memref<9x256xf32, #tpu.memory_space<vmem>>, vector<1x256xf32>
    %933 = vector.broadcast %932 : vector<1x256xf32> to vector<16x256xf32>
    %934 = arith.mulf %931, %933 : vector<16x256xf32>
    %935 = arith.truncf %934 : vector<16x256xf32> to vector<16x256xbf16>
    %c7_683 = arith.constant 7 : index
    %c0_684 = arith.constant 0 : index
    %c0_685 = arith.constant 0 : index
    %936 = vector.load %arg14[%c7_683, %c0_684, %c0_685] : memref<9x16x16xbf16, #tpu.memory_space<vmem>>, vector<1x16x16xbf16>
    %937 = vector.shape_cast %936 : vector<1x16x16xbf16> to vector<16x16xbf16>
    %cst_686 = arith.constant dense<0.000000e+00> : vector<16x256xf32>
    %938 = tpu.matmul %937, %935, %cst_686 {dimension_numbers = #tpu.dot_dimension_numbers<[1], [0], [0], [1], [0, 0, 1, 1], [], []>} : vector<16x16xbf16>, vector<16x256xbf16>, vector<16x256xf32> -> vector<16x256xf32>
    %939 = arith.addf %930, %938 : vector<16x256xf32>
    %c239_i32_687 = arith.constant 239 : i32
    %940 = tpu.dynamic_rotate %869 by %c239_i32_687 dim 1 : vector<16x256xf32>, i32 -> vector<16x256xf32>
    %c8_688 = arith.constant 8 : index
    %c0_689 = arith.constant 0 : index
    %941 = vector.load %arg3[%c8_688, %c0_689] : memref<9x256xf32, #tpu.memory_space<vmem>>, vector<1x256xf32>
    %942 = vector.broadcast %941 : vector<1x256xf32> to vector<16x256xf32>
    %943 = arith.mulf %940, %942 : vector<16x256xf32>
    %944 = arith.truncf %943 : vector<16x256xf32> to vector<16x256xbf16>
    %c8_690 = arith.constant 8 : index
    %c0_691 = arith.constant 0 : index
    %c0_692 = arith.constant 0 : index
    %945 = vector.load %arg14[%c8_690, %c0_691, %c0_692] : memref<9x16x16xbf16, #tpu.memory_space<vmem>>, vector<1x16x16xbf16>
    %946 = vector.shape_cast %945 : vector<1x16x16xbf16> to vector<16x16xbf16>
    %cst_693 = arith.constant dense<0.000000e+00> : vector<16x256xf32>
    %947 = tpu.matmul %946, %944, %cst_693 {dimension_numbers = #tpu.dot_dimension_numbers<[1], [0], [0], [1], [0, 0, 1, 1], [], []>} : vector<16x16xbf16>, vector<16x256xbf16>, vector<16x256xf32> -> vector<16x256xf32>
    %948 = arith.addf %939, %947 : vector<16x256xf32>
    %c0_694 = arith.constant 0 : index
    %c0_695 = arith.constant 0 : index
    %949 = vector.load %arg25[%c0_694, %c0_695] : memref<16x2xf32, #tpu.memory_space<vmem>>, vector<16x2xf32>
    %950 = vector.extract_strided_slice %949 {offsets = [0, 0], sizes = [16, 1], strides = [1, 1]} : vector<16x2xf32> to vector<16x1xf32>
    %951 = vector.broadcast %950 : vector<16x1xf32> to vector<16x256xf32>
    %952 = arith.mulf %948, %951 : vector<16x256xf32>
    %953 = vector.extract_strided_slice %949 {offsets = [0, 1], sizes = [16, 1], strides = [1, 1]} : vector<16x2xf32> to vector<16x1xf32>
    %954 = vector.broadcast %953 : vector<16x1xf32> to vector<16x256xf32>
    %955 = arith.addf %952, %954 : vector<16x256xf32>
    %cst_696 = arith.constant 0.000000e+00 : f32
    %956 = vector.broadcast %cst_696 : f32 to vector<16x256xf32>
    %957 = arith.maximumf %955, %956 : vector<16x256xf32>
    %c17_i32_697 = arith.constant 17 : i32
    %958 = tpu.dynamic_rotate %957 by %c17_i32_697 dim 1 : vector<16x256xf32>, i32 -> vector<16x256xf32>
    %c0_698 = arith.constant 0 : index
    %c0_699 = arith.constant 0 : index
    %959 = vector.load %arg3[%c0_698, %c0_699] : memref<9x256xf32, #tpu.memory_space<vmem>>, vector<1x256xf32>
    %960 = vector.broadcast %959 : vector<1x256xf32> to vector<16x256xf32>
    %961 = arith.mulf %958, %960 : vector<16x256xf32>
    %962 = arith.truncf %961 : vector<16x256xf32> to vector<16x256xbf16>
    %c0_700 = arith.constant 0 : index
    %c0_701 = arith.constant 0 : index
    %c0_702 = arith.constant 0 : index
    %963 = vector.load %arg15[%c0_700, %c0_701, %c0_702] : memref<9x16x16xbf16, #tpu.memory_space<vmem>>, vector<1x16x16xbf16>
    %964 = vector.shape_cast %963 : vector<1x16x16xbf16> to vector<16x16xbf16>
    %cst_703 = arith.constant dense<0.000000e+00> : vector<16x256xf32>
    %965 = tpu.matmul %964, %962, %cst_703 {dimension_numbers = #tpu.dot_dimension_numbers<[1], [0], [0], [1], [0, 0, 1, 1], [], []>} : vector<16x16xbf16>, vector<16x256xbf16>, vector<16x256xf32> -> vector<16x256xf32>
    %c16_i32_704 = arith.constant 16 : i32
    %966 = tpu.dynamic_rotate %957 by %c16_i32_704 dim 1 : vector<16x256xf32>, i32 -> vector<16x256xf32>
    %c1_705 = arith.constant 1 : index
    %c0_706 = arith.constant 0 : index
    %967 = vector.load %arg3[%c1_705, %c0_706] : memref<9x256xf32, #tpu.memory_space<vmem>>, vector<1x256xf32>
    %968 = vector.broadcast %967 : vector<1x256xf32> to vector<16x256xf32>
    %969 = arith.mulf %966, %968 : vector<16x256xf32>
    %970 = arith.truncf %969 : vector<16x256xf32> to vector<16x256xbf16>
    %c1_707 = arith.constant 1 : index
    %c0_708 = arith.constant 0 : index
    %c0_709 = arith.constant 0 : index
    %971 = vector.load %arg15[%c1_707, %c0_708, %c0_709] : memref<9x16x16xbf16, #tpu.memory_space<vmem>>, vector<1x16x16xbf16>
    %972 = vector.shape_cast %971 : vector<1x16x16xbf16> to vector<16x16xbf16>
    %cst_710 = arith.constant dense<0.000000e+00> : vector<16x256xf32>
    %973 = tpu.matmul %972, %970, %cst_710 {dimension_numbers = #tpu.dot_dimension_numbers<[1], [0], [0], [1], [0, 0, 1, 1], [], []>} : vector<16x16xbf16>, vector<16x256xbf16>, vector<16x256xf32> -> vector<16x256xf32>
    %974 = arith.addf %965, %973 : vector<16x256xf32>
    %c15_i32_711 = arith.constant 15 : i32
    %975 = tpu.dynamic_rotate %957 by %c15_i32_711 dim 1 : vector<16x256xf32>, i32 -> vector<16x256xf32>
    %c2_712 = arith.constant 2 : index
    %c0_713 = arith.constant 0 : index
    %976 = vector.load %arg3[%c2_712, %c0_713] : memref<9x256xf32, #tpu.memory_space<vmem>>, vector<1x256xf32>
    %977 = vector.broadcast %976 : vector<1x256xf32> to vector<16x256xf32>
    %978 = arith.mulf %975, %977 : vector<16x256xf32>
    %979 = arith.truncf %978 : vector<16x256xf32> to vector<16x256xbf16>
    %c2_714 = arith.constant 2 : index
    %c0_715 = arith.constant 0 : index
    %c0_716 = arith.constant 0 : index
    %980 = vector.load %arg15[%c2_714, %c0_715, %c0_716] : memref<9x16x16xbf16, #tpu.memory_space<vmem>>, vector<1x16x16xbf16>
    %981 = vector.shape_cast %980 : vector<1x16x16xbf16> to vector<16x16xbf16>
    %cst_717 = arith.constant dense<0.000000e+00> : vector<16x256xf32>
    %982 = tpu.matmul %981, %979, %cst_717 {dimension_numbers = #tpu.dot_dimension_numbers<[1], [0], [0], [1], [0, 0, 1, 1], [], []>} : vector<16x16xbf16>, vector<16x256xbf16>, vector<16x256xf32> -> vector<16x256xf32>
    %983 = arith.addf %974, %982 : vector<16x256xf32>
    %c1_i32_718 = arith.constant 1 : i32
    %984 = tpu.dynamic_rotate %957 by %c1_i32_718 dim 1 : vector<16x256xf32>, i32 -> vector<16x256xf32>
    %c3_719 = arith.constant 3 : index
    %c0_720 = arith.constant 0 : index
    %985 = vector.load %arg3[%c3_719, %c0_720] : memref<9x256xf32, #tpu.memory_space<vmem>>, vector<1x256xf32>
    %986 = vector.broadcast %985 : vector<1x256xf32> to vector<16x256xf32>
    %987 = arith.mulf %984, %986 : vector<16x256xf32>
    %988 = arith.truncf %987 : vector<16x256xf32> to vector<16x256xbf16>
    %c3_721 = arith.constant 3 : index
    %c0_722 = arith.constant 0 : index
    %c0_723 = arith.constant 0 : index
    %989 = vector.load %arg15[%c3_721, %c0_722, %c0_723] : memref<9x16x16xbf16, #tpu.memory_space<vmem>>, vector<1x16x16xbf16>
    %990 = vector.shape_cast %989 : vector<1x16x16xbf16> to vector<16x16xbf16>
    %cst_724 = arith.constant dense<0.000000e+00> : vector<16x256xf32>
    %991 = tpu.matmul %990, %988, %cst_724 {dimension_numbers = #tpu.dot_dimension_numbers<[1], [0], [0], [1], [0, 0, 1, 1], [], []>} : vector<16x16xbf16>, vector<16x256xbf16>, vector<16x256xf32> -> vector<16x256xf32>
    %992 = arith.addf %983, %991 : vector<16x256xf32>
    %c4_725 = arith.constant 4 : index
    %c0_726 = arith.constant 0 : index
    %993 = vector.load %arg3[%c4_725, %c0_726] : memref<9x256xf32, #tpu.memory_space<vmem>>, vector<1x256xf32>
    %994 = vector.broadcast %993 : vector<1x256xf32> to vector<16x256xf32>
    %995 = arith.mulf %957, %994 : vector<16x256xf32>
    %996 = arith.truncf %995 : vector<16x256xf32> to vector<16x256xbf16>
    %c4_727 = arith.constant 4 : index
    %c0_728 = arith.constant 0 : index
    %c0_729 = arith.constant 0 : index
    %997 = vector.load %arg15[%c4_727, %c0_728, %c0_729] : memref<9x16x16xbf16, #tpu.memory_space<vmem>>, vector<1x16x16xbf16>
    %998 = vector.shape_cast %997 : vector<1x16x16xbf16> to vector<16x16xbf16>
    %cst_730 = arith.constant dense<0.000000e+00> : vector<16x256xf32>
    %999 = tpu.matmul %998, %996, %cst_730 {dimension_numbers = #tpu.dot_dimension_numbers<[1], [0], [0], [1], [0, 0, 1, 1], [], []>} : vector<16x16xbf16>, vector<16x256xbf16>, vector<16x256xf32> -> vector<16x256xf32>
    %1000 = arith.addf %992, %999 : vector<16x256xf32>
    %c255_i32_731 = arith.constant 255 : i32
    %1001 = tpu.dynamic_rotate %957 by %c255_i32_731 dim 1 : vector<16x256xf32>, i32 -> vector<16x256xf32>
    %c5_732 = arith.constant 5 : index
    %c0_733 = arith.constant 0 : index
    %1002 = vector.load %arg3[%c5_732, %c0_733] : memref<9x256xf32, #tpu.memory_space<vmem>>, vector<1x256xf32>
    %1003 = vector.broadcast %1002 : vector<1x256xf32> to vector<16x256xf32>
    %1004 = arith.mulf %1001, %1003 : vector<16x256xf32>
    %1005 = arith.truncf %1004 : vector<16x256xf32> to vector<16x256xbf16>
    %c5_734 = arith.constant 5 : index
    %c0_735 = arith.constant 0 : index
    %c0_736 = arith.constant 0 : index
    %1006 = vector.load %arg15[%c5_734, %c0_735, %c0_736] : memref<9x16x16xbf16, #tpu.memory_space<vmem>>, vector<1x16x16xbf16>
    %1007 = vector.shape_cast %1006 : vector<1x16x16xbf16> to vector<16x16xbf16>
    %cst_737 = arith.constant dense<0.000000e+00> : vector<16x256xf32>
    %1008 = tpu.matmul %1007, %1005, %cst_737 {dimension_numbers = #tpu.dot_dimension_numbers<[1], [0], [0], [1], [0, 0, 1, 1], [], []>} : vector<16x16xbf16>, vector<16x256xbf16>, vector<16x256xf32> -> vector<16x256xf32>
    %1009 = arith.addf %1000, %1008 : vector<16x256xf32>
    %c241_i32_738 = arith.constant 241 : i32
    %1010 = tpu.dynamic_rotate %957 by %c241_i32_738 dim 1 : vector<16x256xf32>, i32 -> vector<16x256xf32>
    %c6_739 = arith.constant 6 : index
    %c0_740 = arith.constant 0 : index
    %1011 = vector.load %arg3[%c6_739, %c0_740] : memref<9x256xf32, #tpu.memory_space<vmem>>, vector<1x256xf32>
    %1012 = vector.broadcast %1011 : vector<1x256xf32> to vector<16x256xf32>
    %1013 = arith.mulf %1010, %1012 : vector<16x256xf32>
    %1014 = arith.truncf %1013 : vector<16x256xf32> to vector<16x256xbf16>
    %c6_741 = arith.constant 6 : index
    %c0_742 = arith.constant 0 : index
    %c0_743 = arith.constant 0 : index
    %1015 = vector.load %arg15[%c6_741, %c0_742, %c0_743] : memref<9x16x16xbf16, #tpu.memory_space<vmem>>, vector<1x16x16xbf16>
    %1016 = vector.shape_cast %1015 : vector<1x16x16xbf16> to vector<16x16xbf16>
    %cst_744 = arith.constant dense<0.000000e+00> : vector<16x256xf32>
    %1017 = tpu.matmul %1016, %1014, %cst_744 {dimension_numbers = #tpu.dot_dimension_numbers<[1], [0], [0], [1], [0, 0, 1, 1], [], []>} : vector<16x16xbf16>, vector<16x256xbf16>, vector<16x256xf32> -> vector<16x256xf32>
    %1018 = arith.addf %1009, %1017 : vector<16x256xf32>
    %c240_i32_745 = arith.constant 240 : i32
    %1019 = tpu.dynamic_rotate %957 by %c240_i32_745 dim 1 : vector<16x256xf32>, i32 -> vector<16x256xf32>
    %c7_746 = arith.constant 7 : index
    %c0_747 = arith.constant 0 : index
    %1020 = vector.load %arg3[%c7_746, %c0_747] : memref<9x256xf32, #tpu.memory_space<vmem>>, vector<1x256xf32>
    %1021 = vector.broadcast %1020 : vector<1x256xf32> to vector<16x256xf32>
    %1022 = arith.mulf %1019, %1021 : vector<16x256xf32>
    %1023 = arith.truncf %1022 : vector<16x256xf32> to vector<16x256xbf16>
    %c7_748 = arith.constant 7 : index
    %c0_749 = arith.constant 0 : index
    %c0_750 = arith.constant 0 : index
    %1024 = vector.load %arg15[%c7_748, %c0_749, %c0_750] : memref<9x16x16xbf16, #tpu.memory_space<vmem>>, vector<1x16x16xbf16>
    %1025 = vector.shape_cast %1024 : vector<1x16x16xbf16> to vector<16x16xbf16>
    %cst_751 = arith.constant dense<0.000000e+00> : vector<16x256xf32>
    %1026 = tpu.matmul %1025, %1023, %cst_751 {dimension_numbers = #tpu.dot_dimension_numbers<[1], [0], [0], [1], [0, 0, 1, 1], [], []>} : vector<16x16xbf16>, vector<16x256xbf16>, vector<16x256xf32> -> vector<16x256xf32>
    %1027 = arith.addf %1018, %1026 : vector<16x256xf32>
    %c239_i32_752 = arith.constant 239 : i32
    %1028 = tpu.dynamic_rotate %957 by %c239_i32_752 dim 1 : vector<16x256xf32>, i32 -> vector<16x256xf32>
    %c8_753 = arith.constant 8 : index
    %c0_754 = arith.constant 0 : index
    %1029 = vector.load %arg3[%c8_753, %c0_754] : memref<9x256xf32, #tpu.memory_space<vmem>>, vector<1x256xf32>
    %1030 = vector.broadcast %1029 : vector<1x256xf32> to vector<16x256xf32>
    %1031 = arith.mulf %1028, %1030 : vector<16x256xf32>
    %1032 = arith.truncf %1031 : vector<16x256xf32> to vector<16x256xbf16>
    %c8_755 = arith.constant 8 : index
    %c0_756 = arith.constant 0 : index
    %c0_757 = arith.constant 0 : index
    %1033 = vector.load %arg15[%c8_755, %c0_756, %c0_757] : memref<9x16x16xbf16, #tpu.memory_space<vmem>>, vector<1x16x16xbf16>
    %1034 = vector.shape_cast %1033 : vector<1x16x16xbf16> to vector<16x16xbf16>
    %cst_758 = arith.constant dense<0.000000e+00> : vector<16x256xf32>
    %1035 = tpu.matmul %1034, %1032, %cst_758 {dimension_numbers = #tpu.dot_dimension_numbers<[1], [0], [0], [1], [0, 0, 1, 1], [], []>} : vector<16x16xbf16>, vector<16x256xbf16>, vector<16x256xf32> -> vector<16x256xf32>
    %1036 = arith.addf %1027, %1035 : vector<16x256xf32>
    %c0_759 = arith.constant 0 : index
    %c0_760 = arith.constant 0 : index
    %1037 = vector.load %arg26[%c0_759, %c0_760] : memref<16x2xf32, #tpu.memory_space<vmem>>, vector<16x2xf32>
    %1038 = vector.extract_strided_slice %1037 {offsets = [0, 0], sizes = [16, 1], strides = [1, 1]} : vector<16x2xf32> to vector<16x1xf32>
    %1039 = vector.broadcast %1038 : vector<16x1xf32> to vector<16x256xf32>
    %1040 = arith.mulf %1036, %1039 : vector<16x256xf32>
    %1041 = vector.extract_strided_slice %1037 {offsets = [0, 1], sizes = [16, 1], strides = [1, 1]} : vector<16x2xf32> to vector<16x1xf32>
    %1042 = vector.broadcast %1041 : vector<16x1xf32> to vector<16x256xf32>
    %1043 = arith.addf %1040, %1042 : vector<16x256xf32>
    %cst_761 = arith.constant 0.000000e+00 : f32
    %1044 = vector.broadcast %cst_761 : f32 to vector<16x256xf32>
    %1045 = arith.maximumf %1043, %1044 : vector<16x256xf32>
    %c17_i32_762 = arith.constant 17 : i32
    %1046 = tpu.dynamic_rotate %1045 by %c17_i32_762 dim 1 : vector<16x256xf32>, i32 -> vector<16x256xf32>
    %c0_763 = arith.constant 0 : index
    %c0_764 = arith.constant 0 : index
    %1047 = vector.load %arg3[%c0_763, %c0_764] : memref<9x256xf32, #tpu.memory_space<vmem>>, vector<1x256xf32>
    %1048 = vector.broadcast %1047 : vector<1x256xf32> to vector<16x256xf32>
    %1049 = arith.mulf %1046, %1048 : vector<16x256xf32>
    %1050 = arith.truncf %1049 : vector<16x256xf32> to vector<16x256xbf16>
    %c0_765 = arith.constant 0 : index
    %c0_766 = arith.constant 0 : index
    %c0_767 = arith.constant 0 : index
    %1051 = vector.load %arg16[%c0_765, %c0_766, %c0_767] : memref<9x2x16xbf16, #tpu.memory_space<vmem>>, vector<1x2x16xbf16>
    %1052 = vector.shape_cast %1051 : vector<1x2x16xbf16> to vector<2x16xbf16>
    %cst_768 = arith.constant dense<0.000000e+00> : vector<2x256xf32>
    %1053 = tpu.matmul %1052, %1050, %cst_768 {dimension_numbers = #tpu.dot_dimension_numbers<[1], [0], [0], [1], [0, 0, 1, 1], [], []>} : vector<2x16xbf16>, vector<16x256xbf16>, vector<2x256xf32> -> vector<2x256xf32>
    %c16_i32_769 = arith.constant 16 : i32
    %1054 = tpu.dynamic_rotate %1045 by %c16_i32_769 dim 1 : vector<16x256xf32>, i32 -> vector<16x256xf32>
    %c1_770 = arith.constant 1 : index
    %c0_771 = arith.constant 0 : index
    %1055 = vector.load %arg3[%c1_770, %c0_771] : memref<9x256xf32, #tpu.memory_space<vmem>>, vector<1x256xf32>
    %1056 = vector.broadcast %1055 : vector<1x256xf32> to vector<16x256xf32>
    %1057 = arith.mulf %1054, %1056 : vector<16x256xf32>
    %1058 = arith.truncf %1057 : vector<16x256xf32> to vector<16x256xbf16>
    %c1_772 = arith.constant 1 : index
    %c0_773 = arith.constant 0 : index
    %c0_774 = arith.constant 0 : index
    %1059 = vector.load %arg16[%c1_772, %c0_773, %c0_774] : memref<9x2x16xbf16, #tpu.memory_space<vmem>>, vector<1x2x16xbf16>
    %1060 = vector.shape_cast %1059 : vector<1x2x16xbf16> to vector<2x16xbf16>
    %cst_775 = arith.constant dense<0.000000e+00> : vector<2x256xf32>
    %1061 = tpu.matmul %1060, %1058, %cst_775 {dimension_numbers = #tpu.dot_dimension_numbers<[1], [0], [0], [1], [0, 0, 1, 1], [], []>} : vector<2x16xbf16>, vector<16x256xbf16>, vector<2x256xf32> -> vector<2x256xf32>
    %1062 = arith.addf %1053, %1061 : vector<2x256xf32>
    %c15_i32_776 = arith.constant 15 : i32
    %1063 = tpu.dynamic_rotate %1045 by %c15_i32_776 dim 1 : vector<16x256xf32>, i32 -> vector<16x256xf32>
    %c2_777 = arith.constant 2 : index
    %c0_778 = arith.constant 0 : index
    %1064 = vector.load %arg3[%c2_777, %c0_778] : memref<9x256xf32, #tpu.memory_space<vmem>>, vector<1x256xf32>
    %1065 = vector.broadcast %1064 : vector<1x256xf32> to vector<16x256xf32>
    %1066 = arith.mulf %1063, %1065 : vector<16x256xf32>
    %1067 = arith.truncf %1066 : vector<16x256xf32> to vector<16x256xbf16>
    %c2_779 = arith.constant 2 : index
    %c0_780 = arith.constant 0 : index
    %c0_781 = arith.constant 0 : index
    %1068 = vector.load %arg16[%c2_779, %c0_780, %c0_781] : memref<9x2x16xbf16, #tpu.memory_space<vmem>>, vector<1x2x16xbf16>
    %1069 = vector.shape_cast %1068 : vector<1x2x16xbf16> to vector<2x16xbf16>
    %cst_782 = arith.constant dense<0.000000e+00> : vector<2x256xf32>
    %1070 = tpu.matmul %1069, %1067, %cst_782 {dimension_numbers = #tpu.dot_dimension_numbers<[1], [0], [0], [1], [0, 0, 1, 1], [], []>} : vector<2x16xbf16>, vector<16x256xbf16>, vector<2x256xf32> -> vector<2x256xf32>
    %1071 = arith.addf %1062, %1070 : vector<2x256xf32>
    %c1_i32_783 = arith.constant 1 : i32
    %1072 = tpu.dynamic_rotate %1045 by %c1_i32_783 dim 1 : vector<16x256xf32>, i32 -> vector<16x256xf32>
    %c3_784 = arith.constant 3 : index
    %c0_785 = arith.constant 0 : index
    %1073 = vector.load %arg3[%c3_784, %c0_785] : memref<9x256xf32, #tpu.memory_space<vmem>>, vector<1x256xf32>
    %1074 = vector.broadcast %1073 : vector<1x256xf32> to vector<16x256xf32>
    %1075 = arith.mulf %1072, %1074 : vector<16x256xf32>
    %1076 = arith.truncf %1075 : vector<16x256xf32> to vector<16x256xbf16>
    %c3_786 = arith.constant 3 : index
    %c0_787 = arith.constant 0 : index
    %c0_788 = arith.constant 0 : index
    %1077 = vector.load %arg16[%c3_786, %c0_787, %c0_788] : memref<9x2x16xbf16, #tpu.memory_space<vmem>>, vector<1x2x16xbf16>
    %1078 = vector.shape_cast %1077 : vector<1x2x16xbf16> to vector<2x16xbf16>
    %cst_789 = arith.constant dense<0.000000e+00> : vector<2x256xf32>
    %1079 = tpu.matmul %1078, %1076, %cst_789 {dimension_numbers = #tpu.dot_dimension_numbers<[1], [0], [0], [1], [0, 0, 1, 1], [], []>} : vector<2x16xbf16>, vector<16x256xbf16>, vector<2x256xf32> -> vector<2x256xf32>
    %1080 = arith.addf %1071, %1079 : vector<2x256xf32>
    %c4_790 = arith.constant 4 : index
    %c0_791 = arith.constant 0 : index
    %1081 = vector.load %arg3[%c4_790, %c0_791] : memref<9x256xf32, #tpu.memory_space<vmem>>, vector<1x256xf32>
    %1082 = vector.broadcast %1081 : vector<1x256xf32> to vector<16x256xf32>
    %1083 = arith.mulf %1045, %1082 : vector<16x256xf32>
    %1084 = arith.truncf %1083 : vector<16x256xf32> to vector<16x256xbf16>
    %c4_792 = arith.constant 4 : index
    %c0_793 = arith.constant 0 : index
    %c0_794 = arith.constant 0 : index
    %1085 = vector.load %arg16[%c4_792, %c0_793, %c0_794] : memref<9x2x16xbf16, #tpu.memory_space<vmem>>, vector<1x2x16xbf16>
    %1086 = vector.shape_cast %1085 : vector<1x2x16xbf16> to vector<2x16xbf16>
    %cst_795 = arith.constant dense<0.000000e+00> : vector<2x256xf32>
    %1087 = tpu.matmul %1086, %1084, %cst_795 {dimension_numbers = #tpu.dot_dimension_numbers<[1], [0], [0], [1], [0, 0, 1, 1], [], []>} : vector<2x16xbf16>, vector<16x256xbf16>, vector<2x256xf32> -> vector<2x256xf32>
    %1088 = arith.addf %1080, %1087 : vector<2x256xf32>
    %c255_i32_796 = arith.constant 255 : i32
    %1089 = tpu.dynamic_rotate %1045 by %c255_i32_796 dim 1 : vector<16x256xf32>, i32 -> vector<16x256xf32>
    %c5_797 = arith.constant 5 : index
    %c0_798 = arith.constant 0 : index
    %1090 = vector.load %arg3[%c5_797, %c0_798] : memref<9x256xf32, #tpu.memory_space<vmem>>, vector<1x256xf32>
    %1091 = vector.broadcast %1090 : vector<1x256xf32> to vector<16x256xf32>
    %1092 = arith.mulf %1089, %1091 : vector<16x256xf32>
    %1093 = arith.truncf %1092 : vector<16x256xf32> to vector<16x256xbf16>
    %c5_799 = arith.constant 5 : index
    %c0_800 = arith.constant 0 : index
    %c0_801 = arith.constant 0 : index
    %1094 = vector.load %arg16[%c5_799, %c0_800, %c0_801] : memref<9x2x16xbf16, #tpu.memory_space<vmem>>, vector<1x2x16xbf16>
    %1095 = vector.shape_cast %1094 : vector<1x2x16xbf16> to vector<2x16xbf16>
    %cst_802 = arith.constant dense<0.000000e+00> : vector<2x256xf32>
    %1096 = tpu.matmul %1095, %1093, %cst_802 {dimension_numbers = #tpu.dot_dimension_numbers<[1], [0], [0], [1], [0, 0, 1, 1], [], []>} : vector<2x16xbf16>, vector<16x256xbf16>, vector<2x256xf32> -> vector<2x256xf32>
    %1097 = arith.addf %1088, %1096 : vector<2x256xf32>
    %c241_i32_803 = arith.constant 241 : i32
    %1098 = tpu.dynamic_rotate %1045 by %c241_i32_803 dim 1 : vector<16x256xf32>, i32 -> vector<16x256xf32>
    %c6_804 = arith.constant 6 : index
    %c0_805 = arith.constant 0 : index
    %1099 = vector.load %arg3[%c6_804, %c0_805] : memref<9x256xf32, #tpu.memory_space<vmem>>, vector<1x256xf32>
    %1100 = vector.broadcast %1099 : vector<1x256xf32> to vector<16x256xf32>
    %1101 = arith.mulf %1098, %1100 : vector<16x256xf32>
    %1102 = arith.truncf %1101 : vector<16x256xf32> to vector<16x256xbf16>
    %c6_806 = arith.constant 6 : index
    %c0_807 = arith.constant 0 : index
    %c0_808 = arith.constant 0 : index
    %1103 = vector.load %arg16[%c6_806, %c0_807, %c0_808] : memref<9x2x16xbf16, #tpu.memory_space<vmem>>, vector<1x2x16xbf16>
    %1104 = vector.shape_cast %1103 : vector<1x2x16xbf16> to vector<2x16xbf16>
    %cst_809 = arith.constant dense<0.000000e+00> : vector<2x256xf32>
    %1105 = tpu.matmul %1104, %1102, %cst_809 {dimension_numbers = #tpu.dot_dimension_numbers<[1], [0], [0], [1], [0, 0, 1, 1], [], []>} : vector<2x16xbf16>, vector<16x256xbf16>, vector<2x256xf32> -> vector<2x256xf32>
    %1106 = arith.addf %1097, %1105 : vector<2x256xf32>
    %c240_i32_810 = arith.constant 240 : i32
    %1107 = tpu.dynamic_rotate %1045 by %c240_i32_810 dim 1 : vector<16x256xf32>, i32 -> vector<16x256xf32>
    %c7_811 = arith.constant 7 : index
    %c0_812 = arith.constant 0 : index
    %1108 = vector.load %arg3[%c7_811, %c0_812] : memref<9x256xf32, #tpu.memory_space<vmem>>, vector<1x256xf32>
    %1109 = vector.broadcast %1108 : vector<1x256xf32> to vector<16x256xf32>
    %1110 = arith.mulf %1107, %1109 : vector<16x256xf32>
    %1111 = arith.truncf %1110 : vector<16x256xf32> to vector<16x256xbf16>
    %c7_813 = arith.constant 7 : index
    %c0_814 = arith.constant 0 : index
    %c0_815 = arith.constant 0 : index
    %1112 = vector.load %arg16[%c7_813, %c0_814, %c0_815] : memref<9x2x16xbf16, #tpu.memory_space<vmem>>, vector<1x2x16xbf16>
    %1113 = vector.shape_cast %1112 : vector<1x2x16xbf16> to vector<2x16xbf16>
    %cst_816 = arith.constant dense<0.000000e+00> : vector<2x256xf32>
    %1114 = tpu.matmul %1113, %1111, %cst_816 {dimension_numbers = #tpu.dot_dimension_numbers<[1], [0], [0], [1], [0, 0, 1, 1], [], []>} : vector<2x16xbf16>, vector<16x256xbf16>, vector<2x256xf32> -> vector<2x256xf32>
    %1115 = arith.addf %1106, %1114 : vector<2x256xf32>
    %c239_i32_817 = arith.constant 239 : i32
    %1116 = tpu.dynamic_rotate %1045 by %c239_i32_817 dim 1 : vector<16x256xf32>, i32 -> vector<16x256xf32>
    %c8_818 = arith.constant 8 : index
    %c0_819 = arith.constant 0 : index
    %1117 = vector.load %arg3[%c8_818, %c0_819] : memref<9x256xf32, #tpu.memory_space<vmem>>, vector<1x256xf32>
    %1118 = vector.broadcast %1117 : vector<1x256xf32> to vector<16x256xf32>
    %1119 = arith.mulf %1116, %1118 : vector<16x256xf32>
    %1120 = arith.truncf %1119 : vector<16x256xf32> to vector<16x256xbf16>
    %c8_820 = arith.constant 8 : index
    %c0_821 = arith.constant 0 : index
    %c0_822 = arith.constant 0 : index
    %1121 = vector.load %arg16[%c8_820, %c0_821, %c0_822] : memref<9x2x16xbf16, #tpu.memory_space<vmem>>, vector<1x2x16xbf16>
    %1122 = vector.shape_cast %1121 : vector<1x2x16xbf16> to vector<2x16xbf16>
    %cst_823 = arith.constant dense<0.000000e+00> : vector<2x256xf32>
    %1123 = tpu.matmul %1122, %1120, %cst_823 {dimension_numbers = #tpu.dot_dimension_numbers<[1], [0], [0], [1], [0, 0, 1, 1], [], []>} : vector<2x16xbf16>, vector<16x256xbf16>, vector<2x256xf32> -> vector<2x256xf32>
    %1124 = arith.addf %1115, %1123 : vector<2x256xf32>
    %c0_824 = arith.constant 0 : index
    %c0_825 = arith.constant 0 : index
    %1125 = vector.load %arg27[%c0_824, %c0_825] : memref<2x2xf32, #tpu.memory_space<vmem>>, vector<2x2xf32>
    %1126 = vector.extract_strided_slice %1125 {offsets = [0, 0], sizes = [2, 1], strides = [1, 1]} : vector<2x2xf32> to vector<2x1xf32>
    %1127 = vector.broadcast %1126 : vector<2x1xf32> to vector<2x256xf32>
    %1128 = arith.mulf %1124, %1127 : vector<2x256xf32>
    %1129 = vector.extract_strided_slice %1125 {offsets = [0, 1], sizes = [2, 1], strides = [1, 1]} : vector<2x2xf32> to vector<2x1xf32>
    %1130 = vector.broadcast %1129 : vector<2x1xf32> to vector<2x256xf32>
    %1131 = arith.addf %1128, %1130 : vector<2x256xf32>
    %1132 = arith.addf %1131, %525 : vector<2x256xf32>
    %c0_826 = arith.constant 0 : index
    %c0_827 = arith.constant 0 : index
    %c0_828 = arith.constant 0 : index
    %1133 = vector.load %arg28[%c0_826, %c0_827, %c0_828] : memref<1x2x256xf32, #tpu.memory_space<vmem>>, vector<1x2x256xf32>
    %1134 = vector.shape_cast %1133 : vector<1x2x256xf32> to vector<2x256xf32>
    %1135 = vector.shape_cast %1132 : vector<2x256xf32> to vector<1x2x256xf32>
    tpu.vector_store %arg28[%c0_826, %c0_827, %c0_828], %1135 {strides = array<i32>} : memref<1x2x256xf32, #tpu.memory_space<vmem>>, vector<1x2x256xf32>,
    return
  }
  func.func @transform_0(%arg0: i32) -> (i32, i32, i32) {
    %c0_i32 = arith.constant 0 : i32
    %c0_i32_0 = arith.constant 0 : i32
    %c0_i32_1 = arith.constant 0 : i32
    return %arg0, %c0_i32, %c0_i32_0 : i32, i32, i32
  }
  func.func @transform_1(%arg0: i32) -> (i32, i32, i32) {
    %c0_i32 = arith.constant 0 : i32
    %c0_i32_0 = arith.constant 0 : i32
    %c0_i32_1 = arith.constant 0 : i32
    return %arg0, %c0_i32, %c0_i32_0 : i32, i32, i32
  }
  func.func @transform_2(%arg0: i32) -> (i32, i32) {
    %c0_i32 = arith.constant 0 : i32
    %c0_i32_0 = arith.constant 0 : i32
    %c0_i32_1 = arith.constant 0 : i32
    return %c0_i32, %c0_i32_0 : i32, i32
  }
  func.func @transform_3(%arg0: i32) -> (i32, i32, i32) {
    %c0_i32 = arith.constant 0 : i32
    %c0_i32_0 = arith.constant 0 : i32
    %c0_i32_1 = arith.constant 0 : i32
    %c0_i32_2 = arith.constant 0 : i32
    return %c0_i32, %c0_i32_0, %c0_i32_1 : i32, i32, i32
  }
  func.func @transform_4(%arg0: i32) -> (i32, i32, i32) {
    %c0_i32 = arith.constant 0 : i32
    %c0_i32_0 = arith.constant 0 : i32
    %c0_i32_1 = arith.constant 0 : i32
    %c0_i32_2 = arith.constant 0 : i32
    return %c0_i32, %c0_i32_0, %c0_i32_1 : i32, i32, i32
  }
  func.func @transform_5(%arg0: i32) -> (i32, i32, i32) {
    %c0_i32 = arith.constant 0 : i32
    %c0_i32_0 = arith.constant 0 : i32
    %c0_i32_1 = arith.constant 0 : i32
    %c0_i32_2 = arith.constant 0 : i32
    return %c0_i32, %c0_i32_0, %c0_i32_1 : i32, i32, i32
  }
  func.func @transform_6(%arg0: i32) -> (i32, i32, i32) {
    %c0_i32 = arith.constant 0 : i32
    %c0_i32_0 = arith.constant 0 : i32
    %c0_i32_1 = arith.constant 0 : i32
    %c0_i32_2 = arith.constant 0 : i32
    return %c0_i32, %c0_i32_0, %c0_i32_1 : i32, i32, i32
  }
  func.func @transform_7(%arg0: i32) -> (i32, i32, i32) {
    %c0_i32 = arith.constant 0 : i32
    %c0_i32_0 = arith.constant 0 : i32
    %c0_i32_1 = arith.constant 0 : i32
    %c0_i32_2 = arith.constant 0 : i32
    return %c0_i32, %c0_i32_0, %c0_i32_1 : i32, i32, i32
  }
  func.func @transform_8(%arg0: i32) -> (i32, i32, i32) {
    %c0_i32 = arith.constant 0 : i32
    %c0_i32_0 = arith.constant 0 : i32
    %c0_i32_1 = arith.constant 0 : i32
    %c0_i32_2 = arith.constant 0 : i32
    return %c0_i32, %c0_i32_0, %c0_i32_1 : i32, i32, i32
  }
  func.func @transform_9(%arg0: i32) -> (i32, i32, i32) {
    %c0_i32 = arith.constant 0 : i32
    %c0_i32_0 = arith.constant 0 : i32
    %c0_i32_1 = arith.constant 0 : i32
    %c0_i32_2 = arith.constant 0 : i32
    return %c0_i32, %c0_i32_0, %c0_i32_1 : i32, i32, i32
  }
  func.func @transform_10(%arg0: i32) -> (i32, i32, i32) {
    %c0_i32 = arith.constant 0 : i32
    %c0_i32_0 = arith.constant 0 : i32
    %c0_i32_1 = arith.constant 0 : i32
    %c0_i32_2 = arith.constant 0 : i32
    return %c0_i32, %c0_i32_0, %c0_i32_1 : i32, i32, i32
  }
  func.func @transform_11(%arg0: i32) -> (i32, i32, i32) {
    %c0_i32 = arith.constant 0 : i32
    %c0_i32_0 = arith.constant 0 : i32
    %c0_i32_1 = arith.constant 0 : i32
    %c0_i32_2 = arith.constant 0 : i32
    return %c0_i32, %c0_i32_0, %c0_i32_1 : i32, i32, i32
  }
  func.func @transform_12(%arg0: i32) -> (i32, i32, i32) {
    %c0_i32 = arith.constant 0 : i32
    %c0_i32_0 = arith.constant 0 : i32
    %c0_i32_1 = arith.constant 0 : i32
    %c0_i32_2 = arith.constant 0 : i32
    return %c0_i32, %c0_i32_0, %c0_i32_1 : i32, i32, i32
  }
  func.func @transform_13(%arg0: i32) -> (i32, i32, i32) {
    %c0_i32 = arith.constant 0 : i32
    %c0_i32_0 = arith.constant 0 : i32
    %c0_i32_1 = arith.constant 0 : i32
    %c0_i32_2 = arith.constant 0 : i32
    return %c0_i32, %c0_i32_0, %c0_i32_1 : i32, i32, i32
  }
  func.func @transform_14(%arg0: i32) -> (i32, i32, i32) {
    %c0_i32 = arith.constant 0 : i32
    %c0_i32_0 = arith.constant 0 : i32
    %c0_i32_1 = arith.constant 0 : i32
    %c0_i32_2 = arith.constant 0 : i32
    return %c0_i32, %c0_i32_0, %c0_i32_1 : i32, i32, i32
  }
  func.func @transform_15(%arg0: i32) -> (i32, i32, i32) {
    %c0_i32 = arith.constant 0 : i32
    %c0_i32_0 = arith.constant 0 : i32
    %c0_i32_1 = arith.constant 0 : i32
    %c0_i32_2 = arith.constant 0 : i32
    return %c0_i32, %c0_i32_0, %c0_i32_1 : i32, i32, i32
  }
  func.func @transform_16(%arg0: i32) -> (i32, i32) {
    %c0_i32 = arith.constant 0 : i32
    %c0_i32_0 = arith.constant 0 : i32
    %c0_i32_1 = arith.constant 0 : i32
    return %c0_i32, %c0_i32_0 : i32, i32
  }
  func.func @transform_17(%arg0: i32) -> (i32, i32) {
    %c0_i32 = arith.constant 0 : i32
    %c0_i32_0 = arith.constant 0 : i32
    %c0_i32_1 = arith.constant 0 : i32
    return %c0_i32, %c0_i32_0 : i32, i32
  }
  func.func @transform_18(%arg0: i32) -> (i32, i32) {
    %c0_i32 = arith.constant 0 : i32
    %c0_i32_0 = arith.constant 0 : i32
    %c0_i32_1 = arith.constant 0 : i32
    return %c0_i32, %c0_i32_0 : i32, i32
  }
  func.func @transform_19(%arg0: i32) -> (i32, i32) {
    %c0_i32 = arith.constant 0 : i32
    %c0_i32_0 = arith.constant 0 : i32
    %c0_i32_1 = arith.constant 0 : i32
    return %c0_i32, %c0_i32_0 : i32, i32
  }
  func.func @transform_20(%arg0: i32) -> (i32, i32) {
    %c0_i32 = arith.constant 0 : i32
    %c0_i32_0 = arith.constant 0 : i32
    %c0_i32_1 = arith.constant 0 : i32
    return %c0_i32, %c0_i32_0 : i32, i32
  }
  func.func @transform_21(%arg0: i32) -> (i32, i32) {
    %c0_i32 = arith.constant 0 : i32
    %c0_i32_0 = arith.constant 0 : i32
    %c0_i32_1 = arith.constant 0 : i32
    return %c0_i32, %c0_i32_0 : i32, i32
  }
  func.func @transform_22(%arg0: i32) -> (i32, i32) {
    %c0_i32 = arith.constant 0 : i32
    %c0_i32_0 = arith.constant 0 : i32
    %c0_i32_1 = arith.constant 0 : i32
    return %c0_i32, %c0_i32_0 : i32, i32
  }
  func.func @transform_23(%arg0: i32) -> (i32, i32) {
    %c0_i32 = arith.constant 0 : i32
    %c0_i32_0 = arith.constant 0 : i32
    %c0_i32_1 = arith.constant 0 : i32
    return %c0_i32, %c0_i32_0 : i32, i32
  }
  func.func @transform_24(%arg0: i32) -> (i32, i32) {
    %c0_i32 = arith.constant 0 : i32
    %c0_i32_0 = arith.constant 0 : i32
    %c0_i32_1 = arith.constant 0 : i32
    return %c0_i32, %c0_i32_0 : i32, i32
  }
  func.func @transform_25(%arg0: i32) -> (i32, i32) {
    %c0_i32 = arith.constant 0 : i32
    %c0_i32_0 = arith.constant 0 : i32
    %c0_i32_1 = arith.constant 0 : i32
    return %c0_i32, %c0_i32_0 : i32, i32
  }
  func.func @transform_26(%arg0: i32) -> (i32, i32) {
    %c0_i32 = arith.constant 0 : i32
    %c0_i32_0 = arith.constant 0 : i32
    %c0_i32_1 = arith.constant 0 : i32
    return %c0_i32, %c0_i32_0 : i32, i32
  }
  func.func @transform_27(%arg0: i32) -> (i32, i32, i32) {
    %c0_i32 = arith.constant 0 : i32
    %c0_i32_0 = arith.constant 0 : i32
    %c0_i32_1 = arith.constant 0 : i32
    return %arg0, %c0_i32, %c0_i32_0 : i32, i32, i32
  }
}

</mosaic_0001>

<bundles_post_ra>
// kernel: denoise2d_forward.1
= control target key start
LH: loop header
LB: loop body
LE: loop exit
PB: predicated region body
PF: predicated region fallthrough
CT: control target
= control target key end

     0   :  { %s13514_s0 = inlined_call_operand.vmem [shape: f32[2,2,256], index: 0, kind: input, shape index: {}]   ;;  %s13515_s1 = inlined_call_operand.vmem [shape: f32[2,2,256], index: 1, kind: input, shape index: {}]   ;;  %s13516_s2 = inlined_call_operand.vmem [shape: f32[9,256], index: 2, kind: input, shape index: {}]   ;;  %s13517_s3 = inlined_call_operand.hbm [shape: bf16[9,16,2], index: 3, kind: input, shape index: {}]   ;;  %s13518_s4 = inlined_call_operand.hbm [shape: bf16[9,16,2], index: 4, kind: input, shape index: {}]   ;;  %s13519_s5 = inlined_call_operand.hbm [shape: bf16[9,16,16], index: 5, kind: input, shape index: {}]   ;;  %s13520_s6 = inlined_call_operand.hbm [shape: bf16[9,16,16], index: 6, kind: input, shape index: {}]   ;;  %s13521_s7 = inlined_call_operand.vmem [shape: bf16[9,16,16], index: 7, kind: input, shape index: {}]   ;;  %s13522_s8 = inlined_call_operand.hbm [shape: bf16[9,2,16], index: 8, kind: input, shape index: {}]   ;;  %s13523_s9 = inlined_call_operand.hbm [shape: bf16[9,8,2], index: 9, kind: input, shape index: {}]   ;;  %s13524_s10 = inlined_call_operand.hbm [shape: bf16[9,8,16], index: 10, kind: input, shape index: {}]   ;;  %s13525_s11 = inlined_call_operand.vmem [shape: bf16[9,16,8], index: 11, kind: input, shape index: {}]   ;;  %s13526_s12 = inlined_call_operand.vmem [shape: bf16[9,16,8], index: 12, kind: input, shape index: {}]   ;;  %s13527_s13 = inlined_call_operand.vmem [shape: bf16[9,16,16], index: 13, kind: input, shape index: {}]   ;;  %s13528_s14 = inlined_call_operand.vmem [shape: bf16[9,16,16], index: 14, kind: input, shape index: {}]   ;;  %s13529_s15 = inlined_call_operand.vmem [shape: bf16[9,2,16], index: 15, kind: input, shape index: {}]   ;;  %s13530_s16 = inlined_call_operand.vmem [shape: f32[16,2], index: 16, kind: input, shape index: {}]   ;;  %s13531_s17 = inlined_call_operand.vmem [shape: f32[16,2], index: 17, kind: input, shape index: {}, may-alias: {17,18,19,23,24,25}]   ;;  %s13532_s18 = inlined_call_operand.vmem [shape: f32[16,2], index: 18, kind: input, shape index: {}, may-alias: {17,18,19,23,24,25}]   ;;  %s13533_s19 = inlined_call_operand.vmem [shape: f32[16,2], index: 19, kind: input, shape index: {}, may-alias: {17,18,19,23,24,25}]   ;;  %s13534_s20 = inlined_call_operand.vmem [shape: f32[2,2], index: 20, kind: input, shape index: {}, may-alias: {20,26}]   ;;  %s13535_s21 = inlined_call_operand.vmem [shape: f32[8,2], index: 21, kind: input, shape index: {}]   ;;  %s13536_s22 = inlined_call_operand.vmem [shape: f32[8,2], index: 22, kind: input, shape index: {}]   ;;  %s13537_s23 = inlined_call_operand.vmem [shape: f32[16,2], index: 23, kind: input, shape index: {}, may-alias: {17,18,19,23,24,25}]   ;;  %s13538_s24 = inlined_call_operand.vmem [shape: f32[16,2], index: 24, kind: input, shape index: {}, may-alias: {17,18,19,23,24,25}]   ;;  %s13539_s25 = inlined_call_operand.vmem [shape: f32[16,2], index: 25, kind: input, shape index: {}, may-alias: {17,18,19,23,24,25}]   ;;  %s13540_s26 = inlined_call_operand.vmem [shape: f32[2,2], index: 26, kind: input, shape index: {}, may-alias: {20,26}]   ;;  %s13541_s27 = inlined_call_operand.vmem [shape: f32[2,2,256], index: 27, kind: output, shape index: {}]  }
   0x1   :  { %13567 = sst [smem:[#allocation18_spill]] %s13514_s0 }
   0x2   :  { %13568 = sst [smem:[#allocation19_spill]] %s13515_s1 }
   0x3   :  { %13569 = sst [smem:[#allocation20_spill]] %s13516_s2 }
   0x4   :  { %13570 = sst [smem:[#allocation21_spill]] %s13517_s3 }
   0x5   :  { %13571 = sst [smem:[#allocation22_spill]] %s13518_s4 }
   0x6   :  { %13572 = sst [smem:[#allocation23_spill]] %s13519_s5 }
   0x7   :  { %13573 = sst [smem:[#allocation24_spill]] %s13520_s6 }
   0x8   :  { %13574 = sst [smem:[#allocation25_spill]] %s13521_s7 }
   0x9   :  { %13575 = sst [smem:[#allocation26_spill]] %s13522_s8 }
   0xa   :  { %13576 = sst [smem:[#allocation27_spill]] %s13523_s9 }
   0xb   :  { %13577 = sst [smem:[#allocation28_spill]] %s13524_s10 }
   0xc   :  { %13578 = sst [smem:[#allocation29_spill]] %s13525_s11 }
   0xd   :  { %13579 = sst [smem:[#allocation30_spill]] %s13527_s13 }
   0xe   :  { %13580 = sst [smem:[#allocation31_spill]] %s13528_s14 }
   0xf   :  { %13581 = sst [smem:[#allocation32_spill]] %s13529_s15 }
  0x10   :  { %13582 = sst [smem:[#allocation33_spill]] %s13539_s25 }
  0x11   :  { %13583 = sst [smem:[#allocation34_spill]] %s13540_s26 }
  0x12   :  { %13584 = sst [smem:[#allocation35_spill]] %s13541_s27 }
  0x13   :  { %32 = vsyncpa [#allocation3], 0 }
  0x14   :  { %33 = vsyncpa [#allocation5], 0 }
  0x15   :  { %34 = vsyncpa [#allocation8], 0 }
  0x16   :  { %35 = vsyncpa [#allocation11], 0  ;;  %s11043_s7 = smov 0  }
  0x17 LB: > { %13585 = sst [smem:[#allocation17_spill]] %s10879_s7  ;;  %s11049_s4 = sadd.s32 4294967295, %s10879_s7   ;;  %s10879_s7 = sphi %s11043_s7, %s41_s7  }
  0x18   : > { %p9658_p0 = scmp.ge.s32.totalorder %s10879_s7, 1  ;;  %p649_p1 = scmp.lt.s32.totalorder %s10879_s7, 3 }
  0x19   : > { %p13557_p2 = scmp.eq.s32.totalorder %s11049_s4, 0  ;;  %s10881_s30 = smov [#allocation4]  }
  0x1a   : > { %p11054_p3 = pnand %p9658_p0, %p649_p1  ;;  %s677_s9 = sshll.u32 %s10881_s30, 4  ;;  %s11058_s9 = int_to_ptr.vmem [resolvable:$true] %s677_s9 }
  0x1b   : > { %s10882_s5 = smov [#allocation7]   ;;  %s10883_s10 = smov [#allocation10]  }
  0x1c   : > { %s13586_s8 = scalar_select %p11054_p3, 1, 0 }
  0x1d   : > { %p10478_p4 = pneg %p11054_p3  ;;  %s703_s28 = sshll.u32 %s10882_s5, 4  ;;  %s11062_s28 = int_to_ptr.vmem [resolvable:$true] %s703_s28 }
  0x1e   : > { %s732_s29 = sshll.u32 %s10883_s10, 4  ;;  %s10884_s1 = smov [#allocation2]   ;;  %s11070_s29 = int_to_ptr.vmem [resolvable:$true] %s732_s29 }
  0x1f   : > { %p11066_p5 = pnand %p13557_p2, %p10478_p4  ;;  %s11072_s6 = sshll.u32 %s10884_s1, 4  ;;  %s665_s6 = int_to_ptr.vmem [resolvable:$true] %s11072_s6 }
  0x20   : > { %s13588_s3 = sld [smem:[#allocation22_spill]] }
  0x21   : > { %p11082_p7 = pneg %p11066_p5 }
  0x26   : > { %s10661_s30 = scalar_lea.hbm %s13588_s3, 1152 }
  0x27   : > { %p10662_p6 = scmp.ne.s32.totalorder %s13588_s3, %s10661_s30  ;;  %p10668_p10 = scmp.lt.u32.totalorder %s10661_s30, %s13588_s3 }
  0x29   : > { %p10664_p8 = pnand %p11082_p7, %p10662_p6 }
  0x2b   : > { %p10665_p9 = pneg %p10664_p8 }
  0x2d   : > { %p10670_p11 = pnand %p10668_p10, %p10665_p9 }
  0x2f   : > { %10673 = shalt.err (!%p10670_p11)
}
  0x30   : > { %s10674_s7 = scalar_lea.vmem %s11058_s9, 1152  ;;  %p10682_p1 = scmp.lt.s32.totalorder %s11058_s9, %s11058_s9 }
  0x31   : > { %p10675_p12 = scmp.ne.s32.totalorder %s11058_s9, %s10674_s7  ;;  %p10683_p4 = scmp.lt.s32.totalorder %s10674_s7, %s10674_s7 }
  0x33   : > { %p10677_p13 = pnand %p10675_p12, %p11082_p7  ;;  %p10684_p6 = por %p10683_p4, %p10682_p1 }
  0x35   : > { %p10678_p0 = pneg %p10677_p13 }
  0x37   : > { %p10685_p8 = pnand %p10684_p6, %p10678_p0 }
  0x39   : > { %10688 = shalt.err (!%p10685_p8)
}
  0x3a   : > { %s13562_s11 = smov 64   ;;  %s13563_s2 = smov 4  }
  0x3b   : > { %10484 = dma.hbm_to_vmem [thread:$0]  (!%p11066_p5), %s13588_s3, 1152, %s11058_s9, [#allocation5], %s13562_s11, %s13562_s11, %s13563_s2  }
  0x3c   : > { %s13590_s15 = sld [smem:[#allocation24_spill]] }
  0x42   : > { %s10689_s7 = scalar_lea.hbm %s13590_s15, 1152 }
  0x43   : > { %p10690_p9 = scmp.ne.s32.totalorder %s13590_s15, %s10689_s7  ;;  %p10696_p12 = scmp.lt.u32.totalorder %s10689_s7, %s13590_s15 }
  0x45   : > { %p10692_p10 = pnand %p10690_p9, %p11082_p7 }
  0x47   : > { %p10693_p11 = pneg %p10692_p10 }
  0x49   : > { %p10698_p13 = pnand %p10696_p12, %p10693_p11 }
  0x4b   : > { %10701 = shalt.err (!%p10698_p13)
}
  0x4c   : > { %s10702_s9 = scalar_lea.vmem %s11062_s28, 1152  ;;  %p10710_p6 = scmp.lt.s32.totalorder %s11062_s28, %s11062_s28 }
  0x4d   : > { %p10703_p0 = scmp.ne.s32.totalorder %s11062_s28, %s10702_s9  ;;  %p10711_p8 = scmp.lt.s32.totalorder %s10702_s9, %s10702_s9 }
  0x4f   : > { %p10705_p1 = pnand %p10703_p0, %p11082_p7  ;;  %p10712_p9 = por %p10711_p8, %p10710_p6 }
  0x51   : > { %p10706_p4 = pneg %p10705_p1 }
  0x53   : > { %p10713_p10 = pnand %p10712_p9, %p10706_p4 }
  0x55   : > { %10716 = shalt.err (!%p10713_p10)
}
  0x56   : > { %10490 = dma.hbm_to_vmem [thread:$0]  (!%p11066_p5), %s13590_s15, 1152, %s11062_s28, [#allocation8], %s13562_s11, %s13562_s11, %s13563_s2  }
  0x57   : > { %s13591_s30 = sld [smem:[#allocation27_spill]] }
  0x5d   : > { %s10717_s5 = scalar_lea.hbm %s13591_s30, 576 }
  0x5e   : > { %p10718_p11 = scmp.ne.s32.totalorder %s13591_s30, %s10717_s5  ;;  %p10724_p0 = scmp.lt.u32.totalorder %s10717_s5, %s13591_s30 }
  0x60   : > { %p10720_p12 = pnand %p10718_p11, %p11082_p7 }
  0x62   : > { %p10721_p13 = pneg %p10720_p12 }
  0x64   : > { %p10726_p1 = pnand %p10724_p0, %p10721_p13 }
  0x66   : > { %10729 = shalt.err (!%p10726_p1)
}
  0x67   : > { %s10730_s28 = scalar_lea.vmem %s11070_s29, 576  ;;  %p10738_p9 = scmp.lt.s32.totalorder %s11070_s29, %s11070_s29 }
  0x68   : > { %p10731_p4 = scmp.ne.s32.totalorder %s11070_s29, %s10730_s28  ;;  %p10739_p10 = scmp.lt.s32.totalorder %s10730_s28, %s10730_s28 }
  0x6a   : > { %p10733_p6 = pnand %p10731_p4, %p11082_p7  ;;  %p10740_p11 = por %p10739_p10, %p10738_p9 }
  0x6c   : > { %p10734_p8 = pneg %p10733_p6 }
  0x6e   : > { %p10741_p12 = pnand %p10740_p11, %p10734_p8 }
  0x70   : > { %10744 = shalt.err (!%p10741_p12)
}
  0x71   : > { %10496 = dma.hbm_to_vmem [thread:$0]  (!%p11066_p5), %s13591_s30, 576, %s11070_s29, [#allocation11], %s13562_s11, %s13562_s11, %s13563_s2  }
  0x72   : > { %s13592_s5 = sld [smem:[#allocation21_spill]] }
  0x78   : > { %s10745_s10 = scalar_lea.hbm %s13592_s5, 1152 }
  0x79   : > { %p10746_p13 = scmp.ne.s32.totalorder %s13592_s5, %s10745_s10  ;;  %p10752_p4 = scmp.lt.u32.totalorder %s10745_s10, %s13592_s5 }
  0x7b   : > { %p10748_p0 = pnand %p10746_p13, %p11082_p7 }
  0x7d   : > { %p10749_p1 = pneg %p10748_p0 }
  0x7f   : > { %p10754_p6 = pnand %p10752_p4, %p10749_p1 }
  0x81   : > { %10757 = shalt.err (!%p10754_p6)
}
  0x82   : > { %s10758_s13 = scalar_lea.vmem %s665_s6, 1152  ;;  %p10766_p11 = scmp.lt.s32.totalorder %s665_s6, %s665_s6 }
  0x83   : > { %p10759_p8 = scmp.ne.s32.totalorder %s665_s6, %s10758_s13  ;;  %p10767_p12 = scmp.lt.s32.totalorder %s10758_s13, %s10758_s13 }
  0x85   : > { %p10761_p9 = pnand %p10759_p8, %p11082_p7  ;;  %p10768_p2 = por %p10767_p12, %p10766_p11 }
  0x87   : > { %p10762_p10 = pneg %p10761_p9 }
  0x89   : > { %p10769_p3 = pnand %p10768_p2, %p10762_p10 }
  0x8b   : > { %10772 = shalt.err (!%p10769_p3)
}
  0x8c   : > { %10481 = dma.hbm_to_vmem [thread:$0]  (!%p11066_p5), %s13592_s5, 1152, %s665_s6, [#allocation3], %s13562_s11, %s13562_s11, %s13563_s2  }
  0x8d   : > { %s10887_s25 = smov [#allocation6]   ;;  %s10888_s10 = smov [#allocation9]  }
  0x8e   : > { %s690_s26 = sshll.u32 %s10887_s25, 4  ;;  %s719_s1 = sshll.u32 %s10888_s10, 4  ;;  %s691_s26 = int_to_ptr.vmem [resolvable:$true] %s690_s26  ;;  %s720_s1 = int_to_ptr.vmem [resolvable:$true] %s719_s1 }
  0x8f   : > { %s13593_s28 = sld [smem:[#allocation23_spill]] }
  0x95   : > { %s10773_s13 = scalar_lea.hbm %s13593_s28, 1152 }
  0x96   : > { %p10774_p2 = scmp.ne.s32.totalorder %s13593_s28, %s10773_s13  ;;  %p10780_p0 = scmp.lt.u32.totalorder %s10773_s13, %s13593_s28 }
  0x98   : > { %p10776_p3 = pnand %p10774_p2, %p11082_p7 }
  0x9a   : > { %p10777_p13 = pneg %p10776_p3 }
  0x9c   : > { %p10782_p1 = pnand %p10780_p0, %p10777_p13 }
  0x9e   : > { %10785 = shalt.err (!%p10782_p1)
}
  0x9f   : > { %s10786_s6 = scalar_lea.vmem %s691_s26, 1152  ;;  %p10794_p9 = scmp.lt.s32.totalorder %s691_s26, %s691_s26 }
  0xa0   : > { %p10787_p4 = scmp.ne.s32.totalorder %s691_s26, %s10786_s6  ;;  %p10795_p10 = scmp.lt.s32.totalorder %s10786_s6, %s10786_s6 }
  0xa2   : > { %p10789_p6 = pnand %p10787_p4, %p11082_p7  ;;  %p10796_p11 = por %p10795_p10, %p10794_p9 }
  0xa4   : > { %p10790_p8 = pneg %p10789_p6 }
  0xa6   : > { %p10797_p12 = pnand %p10796_p11, %p10790_p8 }
  0xa8   : > { %10800 = shalt.err (!%p10797_p12)
}
  0xa9   : > { %10487 = dma.hbm_to_vmem [thread:$0]  (!%p11066_p5), %s13593_s28, 1152, %s691_s26, [#allocation5], %s13562_s11, %s13562_s11, %s13563_s2  }
  0xaa   : > { %s13594_s25 = sld [smem:[#allocation26_spill]] }
  0xb0   : > { %s10801_s10 = scalar_lea.hbm %s13594_s25, 144 }
  0xb1   : > { %p10802_p2 = scmp.ne.s32.totalorder %s13594_s25, %s10801_s10  ;;  %p10808_p0 = scmp.lt.u32.totalorder %s10801_s10, %s13594_s25 }
  0xb3   : > { %p10804_p3 = pnand %p10802_p2, %p11082_p7 }
  0xb5   : > { %p10805_p13 = pneg %p10804_p3 }
  0xb7   : > { %p10810_p1 = pnand %p10808_p0, %p10805_p13 }
  0xb9   : > { %10813 = shalt.err (!%p10810_p1)
}
  0xba   : > { %s10814_s6 = scalar_lea.vmem %s720_s1, 144  ;;  %s10821_s26 = scalar_lea.vmem %s720_s1, 160 }
  0xbb   : > { %p10815_p4 = scmp.ne.s32.totalorder %s720_s1, %s10814_s6  ;;  %p10822_p9 = scmp.lt.s32.totalorder %s720_s1, %s720_s1 }
  0xbc   : > { %p10823_p10 = scmp.lt.s32.totalorder %s10821_s26, %s10814_s6 }
  0xbd   : > { %p10817_p6 = pnand %p10815_p4, %p11082_p7 }
  0xbe   : > { %p10824_p11 = por %p10823_p10, %p10822_p9 }
  0xbf   : > { %p10818_p8 = pneg %p10817_p6 }
  0xc1   : > { %p10825_p12 = pnand %p10824_p11, %p10818_p8 }
  0xc3   : > { %10828 = shalt.err (!%p10825_p12)
}
  0xc4   : > { %s10889_s15 = smov 16   ;;  %s10890_s3 = smov 1  }
  0xc5   : > { %10493 = dma.hbm_to_vmem [thread:$0]  (!%p11066_p5), %s13594_s25, 144, %s720_s1, [#allocation8], %s10889_s15, %s10889_s15, %s10890_s3  }
  0xc6   : > { %s10891_s10 = smov [#allocation12]   ;;  %s13595_s29 = sld [smem:[#allocation28_spill]] }
  0xc7   : > { %s745_s7 = sshll.u32 %s10891_s10, 4  ;;  %s746_s7 = int_to_ptr.vmem [resolvable:$true] %s745_s7 }
  0xcc   : > { %s10829_s11 = scalar_lea.hbm %s13595_s29, 576 }
  0xcd   : > { %p10830_p2 = scmp.ne.s32.totalorder %s13595_s29, %s10829_s11  ;;  %p10836_p0 = scmp.lt.u32.totalorder %s10829_s11, %s13595_s29 }
  0xcf   : > { %p10832_p3 = pnand %p10830_p2, %p11082_p7 }
  0xd1   : > { %p10833_p13 = pneg %p10832_p3 }
  0xd3   : > { %p10838_p1 = pnand %p10836_p0, %p10833_p13 }
  0xd5   : > { %10841 = shalt.err (!%p10838_p1)
}
  0xd6   : > { %s10842_s1 = scalar_lea.vmem %s746_s7, 576  ;;  %p10850_p9 = scmp.lt.s32.totalorder %s746_s7, %s746_s7 }
  0xd7   : > { %p10843_p4 = scmp.ne.s32.totalorder %s746_s7, %s10842_s1  ;;  %p10851_p10 = scmp.lt.s32.totalorder %s10842_s1, %s10842_s1 }
  0xd9   : > { %p10845_p6 = pnand %p10843_p4, %p11082_p7  ;;  %p10852_p11 = por %p10851_p10, %p10850_p9 }
  0xdb   : > { %p10846_p8 = pneg %p10845_p6 }
  0xdd   : > { %p10853_p12 = pnand %p10852_p11, %p10846_p8 }
  0xdf   : > { %10856 = shalt.err (!%p10853_p12)
}
  0xe0   : > { %s13596_s15 = smov 4   ;;  %s13597_s3 = smov 64  }
  0xe1   : > { %10499 = dma.hbm_to_vmem [thread:$0]  (!%p11066_p5), %s13595_s29, 576, %s746_s7, [#allocation11], %s13597_s3, %s13597_s3, %s13596_s15  }
  0xe2   : > { %p13598_p2 = scmp.ne.s32.totalorder %s13586_s8, 0 }
  0xe3   : > { %p13599_p7 = scmp.eq.s32.totalorder (!%p13598_p2), %s11049_s4, 0 }
  0xe4   : > { %825 = sbr.rel (%p13598_p2) target bundleno = 4905 (0x1329), region = 128 }
  0xeb   : > { %10862 = dma.done.wait (%p13599_p7), [#allocation3], 1152   ;;  %p13600_p3 = pmov %p13599_p7 }
  0xed   : > { %10864 = vsyncadd (%p13600_p3), [#allocation3], 4294966144  ;;  %p13601_p13 = pmov %p13600_p3 }
  0xee   : > { %p13602_p0 = pmov %p13600_p3 }
  0xef   : > { %10866 = dma.done.wait (%p13601_p13), [#allocation5], 2304  }
  0xf0   : > { %10868 = vsyncadd (%p13602_p0), [#allocation5], 4294964992  ;;  %p13603_p1 = pmov %p13602_p0 }
  0xf1   : > { %p13604_p5 = pmov %p13602_p0 }
  0xf2   : > { %10870 = dma.done.wait (%p13603_p1), [#allocation8], 1296  }
  0xf3   : > { %10872 = vsyncadd (%p13604_p5), [#allocation8], 4294966000  ;;  %p13605_p4 = pmov %p13602_p0 }
  0xf4   : > { %p13606_p6 = pmov %p13602_p0 }
  0xf5   : > { %10874 = dma.done.wait (%p13605_p4), [#allocation11], 1152  }
  0xf6   : > { %10876 = vsyncadd (%p13606_p6), [#allocation11], 4294966144  ;;  %p926_p8 = scmp.lt.s32.totalorder %s11049_s4, 1  ;;  %v950_v0 = vlaneseq  ;;  %v10892_v1 = vmov 1983009808   ;;  %v10893_v4 = vmov 0  }
  0xf7   : > { %v948_v2 = vunpack.c.l.s4 %v10892_v1  ;;  %1388 = vmatprep.mubr.bf16.mxu0 %v10893_v4  ;;  %1059 = vmatprep.mubr.bf16.mxu1 %v10893_v4  ;;  %s13607_s5 = sld [smem:[#allocation18_spill]]  ;;  %s13608_s10 = sld [smem:[#allocation20_spill]]  ;;  %vm1020_vm0 = vcmask 1040384   ;;  %vm1016_vm1 = vcmask 15360   ;;  %v10578_v26 = vld [vmem:[#allocation2 + $0x20] sm:$0xff]   ;;  %v10579_v56 = vld [vmem:[#allocation2 + $0x28] sm:$0xff]  }
  0xf8   : > { %s13621_s4 = smov (!%p926_p8, %s11049_s4), 1  ;;  %v951_v3 = vshrl.u32 %v950_v0, 7  ;;  %10545 = vset.pattern.permute.xlu1 %v10893_v4  ;;  %10544 = vset.pattern.permute.xlu0 %v10893_v4  ;;  %s10894_s7 = smov 127   ;;  %v11345_v27 = vand.u32 127, %v950_v0  ;;  %vm2513_vm10 = vcmask 130048   ;;  %vm6215_vm11 = vcmask 1043456  }
  0xf9   : > { %v949_v5 = vunpack.c.0.s8 %v948_v2  ;;  %s11265_s27 = sshll.u32 %s13621_s4, 2  ;;  %s13609_s6 = sld [smem:[#allocation19_spill]]  ;;  %vm6211_vm12 = vcmask 64512  }
  0xfa   : > { %v11276_v8 = vsub.s32 0, %v951_v3  ;;  %v11278_v9 = vsub.s32 1, %v951_v3  ;;  %s10895_s1 = smov 113   ;;  %s10896_s15 = smov 112   ;;  %vm1407_vm2 = vcmp.lt.s32.totalorder %v11345_v27, 127  ;;  %vm1495_vm3 = vcmp.lt.s32.totalorder %v11345_v27, 113 }
  0xfb   : > { %v11273_v6 = vsub.s32 %v949_v5, %v951_v3  ;;  %s13565_s3 = smov 111   ;;  %s10898_s2 = smov 17   ;;  %vm1583_vm4 = vcmp.lt.s32.totalorder %v11345_v27, 112  ;;  %vm1671_vm5 = vcmp.lt.s32.totalorder %v11345_v27, 111  ;;  %vm963_vm6 = vcmp.lt.s32.totalorder %v11345_v27, 17 }
  0xfc   : > { %s10899_s11 = smov 16   ;;  %s10900_s8 = smov 15   ;;  %vm988_vm7 = vcmp.lt.s32.totalorder %v11345_v27, 16  ;;  %vm1131_vm8 = vcmp.lt.s32.totalorder %v11345_v27, 15  ;;  %vm1219_vm9 = vcmp.lt.s32.totalorder %v11345_v27, 1 }
  0xfd   : > { %s11271_s30 = scalar_lea.vmem %s13607_s5, %s11265_s27  ;;  %v9696_v11 = vld [vmem:[%s13608_s10 + $0x4] ss:$8 sm:$0x3]  ;;  %s10901_s0 = smov 1  }
  0xfe   : > { %v942_v7 = vld [vmem:[%s11271_s30] sm:$0xf]  ;;  %v11292_v12 = vrot.slane %v9696_v11, %v11276_v8  ;;  %v11295_v13 = vrot.slane %v9696_v11, %v11278_v9  ;;  %v9700_v28 = vld [vmem:[%s13608_s10 + $0x5] ss:$8 sm:$0x3]  ;;  %s13610_s13 = sld [smem:[#allocation25_spill]] }
  0xff   : > { %v953_v10 = vrot.slane %v942_v7, %v11273_v6  ;;  %s11289_s26 = scalar_lea.vmem %s13609_s6, %s11265_s27  ;;  %v9704_v29 = vld [vmem:[%s13608_s10 + $0x6] ss:$8 sm:$0x3]  ;;  %v9708_v32 = vld [vmem:[%s13608_s10 + $0x7] ss:$8 sm:$0x3]  ;;  %v11359_v33 = vrot.slane %v9700_v28, %v11276_v8  ;;  %v11362_v34 = vrot.slane %v9700_v28, %v11278_v9 }
 0x100   : > { %v11299_v15 = vld [vmem:[%s11289_s26] sm:$0xf]  ;;  %v1316_v16 = vcombine.low %v11292_v12, %v11295_v13  ;;  %v11365_v35 = vrot.slane %v9704_v29, %v11276_v8  ;;  %v11368_v36 = vrot.slane %v9704_v29, %v11278_v9  ;;  %v11372_v37 = vrot.slane %v9708_v32, %v11278_v9  ;;  %v9712_v63 = vld [vmem:[%s13608_s10 + $0x10] ss:$8 sm:$0x3]  ;;  %s13611_s14 = sld [smem:[#allocation29_spill]] }
 0x101   : > { %1403 = vrot.lane.b32.xlu0 %v953_v10, %s10894_s7  ;;  %1491 = vrot.lane.b32.xlu1 %v953_v10, %s10895_s1  ;;  %v954_v14 = vcombine.high %v953_v10, %v953_v10  ;;  %v1762_v19 = vrot.slane %v11299_v15, %v11273_v6  ;;  %v11392_v58 = vrot.slane %v9708_v32, %v11276_v8  ;;  %v9681_v28 = vld [vmem:[%s13608_s10 + $0x1] ss:$8 sm:$0x3]  ;;  %s13612_s4 = sld [smem:[#allocation30_spill]] }
 0x102   : > { %v11306_v17 = vrot.slane %v1316_v16, %v11273_v6  ;;  %v11405_v1 = vrot.slane %v9712_v63, %v11278_v9 }
 0x103   : > { %v1763_v23 = vcombine.high %v1762_v19, %v1762_v19 }
 0x104   : > { %v1325_v18 = vmul.f32 %v11306_v17, %v942_v7 }
 0x105   : > { %1405 = vrot.lane.b32.xlu0 %v954_v14, %s10894_s7  ;;  %1493 = vrot.lane.b32.xlu1 %v954_v14, %s10895_s1 }
 0x106   : > { %v1333_v20 = vrot.slane %v1325_v18, %v11273_v6  ;;  %v10580_v18 = vld [vmem:[#allocation2 + $0x30] sm:$0xff]  }
 0x108   : > { %v1334_v21 = vcombine.high %v1333_v20, %v1333_v20  ;;  %v1337_v22 = vpack.c.bf16 %v1333_v20, %v1333_v20 }
 0x109   : > { %1581 = vrot.lane.b32.xlu1 %v954_v14, %s10896_s15  ;;  %1579 = vrot.lane.b32.xlu0 %v953_v10, %s10896_s15 }
 0x10a   : > { %v1338_v24 = vpack.c.bf16 %v1334_v21, %v1334_v21  ;;  %v1351_v25 = vsel %vm1020_vm0, %v1337_v22, 0 }
 0x10c   : > { %9698 = vmatprep.subr.msk.bf16.mxu0 %vm1020_vm0, %v1338_v24  ;;  %v966_v24 = vld [vmem:[%s13608_s10] ss:$8 sm:$0x3] }
 0x10d   : > { %1669 = vrot.lane.b32.xlu1 %v954_v14, %s13565_s3  ;;  %1667 = vrot.lane.b32.xlu0 %v953_v10, %s13565_s3 }
 0x10e   : > { %1357 = vmatpush1.bf16.msra.mxu0 %v1351_v25 }
 0x111   : > { %1768 = vrot.lane.b32.xlu1 %v1763_v23, %s10898_s2  ;;  %1766 = vrot.lane.b32.xlu0 %v1762_v19, %s10898_s2 }
 0x112   : > { %9699 = vmatmul.mubr.msk.bf16.vlgmr.msra.gmra.mrb[0].mxu0 %vm1016_vm1, %v10578_v26  ;;  %v11433_v26 = vrot.slane %v966_v24, %v11278_v9 }
 0x113   : > { %1476 = vmatprep.mubr.bf16.mxu0 %v10893_v4 }
 0x115   : > { %1841 = vrot.lane.b32.xlu1 %v1763_v23, %s10899_s11  ;;  %1839 = vrot.lane.b32.xlu0 %v1762_v19, %s10899_s11 }
 0x119   : > { %1915 = vrot.lane.b32.xlu1 %v1763_v23, %s10900_s8  ;;  %1913 = vrot.lane.b32.xlu0 %v1762_v19, %s10900_s8 }
 0x11d   : > { %1989 = vrot.lane.b32.xlu1 %v1763_v23, %s10901_s0  ;;  %1987 = vrot.lane.b32.xlu0 %v1762_v19, %s10901_s0 }
 0x121   : > { %986 = vrot.lane.b32.xlu1 %v954_v14, %s10899_s11  ;;  %984 = vrot.lane.b32.xlu0 %v953_v10, %s10899_s11 }
 0x125   : > { %2141 = vrot.lane.b32.xlu1 %v1763_v23, %s10894_s7  ;;  %2139 = vrot.lane.b32.xlu0 %v1762_v19, %s10894_s7 }
 0x129   : > { %959 = vrot.lane.b32.xlu1 %v954_v14, %s10898_s2  ;;  %957 = vrot.lane.b32.xlu0 %v953_v10, %s10898_s2 }
 0x12d   : > { %2215 = vrot.lane.b32.xlu1 %v1763_v23, %s10895_s1  ;;  %2213 = vrot.lane.b32.xlu0 %v1762_v19, %s10895_s1 }
 0x131   : > { %1129 = vrot.lane.b32.xlu1 %v954_v14, %s10900_s8  ;;  %1127 = vrot.lane.b32.xlu0 %v953_v10, %s10900_s8 }
 0x135   : > { %2289 = vrot.lane.b32.xlu1 %v1763_v23, %s10896_s15  ;;  %2287 = vrot.lane.b32.xlu0 %v1762_v19, %s10896_s15 }
 0x139   : > { %1217 = vrot.lane.b32.xlu1 %v954_v14, %s10901_s0  ;;  %1215 = vrot.lane.b32.xlu0 %v953_v10, %s10901_s0 }
 0x13d   : > { %2363 = vrot.lane.b32.xlu1 %v1763_v23, %s13565_s3  ;;  %2361 = vrot.lane.b32.xlu0 %v1762_v19, %s13565_s3  ;;  %v11417_v19 = vrot.slane %v9712_v63, %v11276_v8 }
 0x173   : > { %v1404_v30 = vpop.permute.xlu0 %1403  ;;  %v1492_v31 = vpop.permute.xlu1 %1491 }
 0x177   : > { %v1406_v38 = vpop.permute.xlu0 %1405  ;;  %v1494_v39 = vpop.permute.xlu1 %1493 }
 0x178   : > { %v1408_v40 = vsel %vm1407_vm2, %v1404_v30, %v1406_v38  ;;  %v1409_v41 = vsel %vm1407_vm2, %v1406_v38, %v1404_v30  ;;  %v1496_v42 = vsel %vm1495_vm3, %v1492_v31, %v1494_v39  ;;  %v1497_v43 = vsel %vm1495_vm3, %v1494_v39, %v1492_v31  ;;  %v2436_v38 = vld [vmem:[%s13530_s16 + $0x8] sm:$0xff]  ;;  %v2435_v39 = vld [vmem:[%s13530_s16] sm:$0xff] }
 0x179   : > { %v1423_v44 = vmul.f32 %v11359_v33, %v1408_v40  ;;  %v1424_v45 = vmul.f32 %v11362_v34, %v1409_v41  ;;  %v1511_v46 = vmul.f32 %v11365_v35, %v1496_v42  ;;  %v1512_v47 = vmul.f32 %v11368_v36, %v1497_v43  ;;  %2444 = vperm.xlu1 %10545, %v2436_v38  }
 0x17a   : > { %v11454_v40 = vrot.slane %v9681_v28, %v11276_v8  ;;  %2439 = vperm.xlu0 %10544, %v2435_v39   ;;  %v11457_v41 = vrot.slane %v9681_v28, %v11278_v9 }
 0x17b   : > { %v1425_v48 = vpack.c.bf16 %v1423_v44, %v1423_v44  ;;  %v1426_v49 = vpack.c.bf16 %v1424_v45, %v1424_v45  ;;  %v1513_v50 = vpack.c.bf16 %v1511_v46, %v1511_v46  ;;  %v1514_v51 = vpack.c.bf16 %v1512_v47, %v1512_v47  ;;  %v1582_v52 = vpop.permute.xlu1 %1581  ;;  %v1580_v53 = vpop.permute.xlu0 %1579 }
 0x17c   : > { %v1585_v54 = vsel %vm1583_vm4, %v1582_v52, %v1580_v53  ;;  %v1584_v0 = vsel %vm1583_vm4, %v1580_v53, %v1582_v52  ;;  %v10902_v52 = vmov 1  }
 0x17d   : > { %9702 = vmatprep.subr.msk.bf16.mxu0 %vm1020_vm0, %v1426_v49  ;;  %v1439_v55 = vsel %vm1020_vm0, %v1425_v48, 0  ;;  %v1600_v57 = vmul.f32 %v11372_v37, %v1585_v54  ;;  %v1527_v59 = vsel %vm1020_vm0, %v1513_v50, 0  ;;  %v1599_v2 = vmul.f32 %v11392_v58, %v1584_v0  ;;  %v10581_v48 = vld [vmem:[#allocation2 + $0x38] sm:$0xff]   ;;  %10546 = vset.pattern.permute.xlu1 %v10902_v52 }
 0x17e   : > { %1445 = vmatpush1.bf16.msra.mxu0 %v1439_v55  ;;  %10547 = vset.pattern.permute.xlu0 %v10902_v52 }
 0x17f   : > { %9706 = vmatprep.subr.msk.bf16.mxu0 %vm1020_vm0, %v1514_v51  ;;  %v1602_v60 = vpack.c.bf16 %v1600_v57, %v1600_v57  ;;  %v1670_v61 = vpop.permute.xlu1 %1669  ;;  %v1668_v62 = vpop.permute.xlu0 %1667  ;;  %v1601_v10 = vpack.c.bf16 %v1599_v2, %v1599_v2  ;;  %v11467_v51 = vrot.slane %v966_v24, %v11276_v8  ;;  %2452 = vperm.xlu1 %10546, %v2435_v39  }
 0x180   : > { %v1673_v7 = vsel %vm1671_vm5, %v1670_v61, %v1668_v62  ;;  %v1672_v25 = vsel %vm1671_vm5, %v1668_v62, %v1670_v61  ;;  %2456 = vperm.xlu0 %10547, %v2436_v38   ;;  %v10585_v62 = vld [vmem:[#allocation2 + $0x8] sm:$0xff]  }
 0x181   : > { %9703 = vmatmul.mubr.msk.bf16.vlgmr.msra.gmra.mrb[0].mxu0 %vm1016_vm1, %v10579_v56  ;;  %v1688_v11 = vmul.f32 %v11405_v1, %v1673_v7  ;;  %v1615_v20 = vsel %vm1020_vm0, %v1601_v10, 0  ;;  %v1687_v29 = vmul.f32 %v11417_v19, %v1672_v25 }
 0x182   : > { %1533 = vmatpush1.bf16.msra.mxu0 %v1527_v59  ;;  %1564 = vmatprep.mubr.bf16.mxu0 %v10893_v4 }
 0x183   : > { %9710 = vmatprep.subr.msk.bf16.mxu0 %vm1020_vm0, %v1602_v60  ;;  %v1769_v3 = vpop.permute.xlu1 %1768  ;;  %v1767_v5 = vpop.permute.xlu0 %1766  ;;  %v1690_v21 = vpack.c.bf16 %v1688_v11, %v1688_v11  ;;  %v1689_v42 = vpack.c.bf16 %v1687_v29, %v1687_v29  ;;  %10549 = vset.pattern.permute.xlu1 %v10893_v4  ;;  %v9688_v29 = vld [vmem:[%s13608_s10 + $0x2] ss:$8 sm:$0x3] }
 0x184   : > { %v1770_v32 = vsel %vm963_vm6, %v1767_v5, %v1769_v3  ;;  %v1771_v60 = vsel %vm963_vm6, %v1769_v3, %v1767_v5  ;;  %10548 = vset.pattern.permute.xlu0 %v10893_v4  ;;  %v11510_v39 = vrot.slane %v9688_v29, %v11276_v8 }
 0x185   : > { %v1773_v43 = vmul.f32 %v1770_v32, %v11433_v26  ;;  %v1703_v53 = vsel %vm1020_vm0, %v1689_v42, 0  ;;  %v1772_v63 = vmul.f32 %v1771_v60, %v11467_v51  ;;  %v10582_v32 = vld [vmem:[#allocation2 + $0x40] sm:$0xff]   ;;  %v11513_v42 = vrot.slane %v9688_v29, %v11278_v9 }
 0x187   : > { %v11412_v14 = vpop.permute.xlu1 %1841  ;;  %v11414_v16 = vpop.permute.xlu0 %1839  ;;  %v1775_v54 = vpack.c.bf16 %v1773_v43, %v1773_v43 }
 0x188   : > { %v1843_v3 = vsel %vm988_vm7, %v11414_v16, %v11412_v14 }
 0x18b   : > { %v11420_v22 = vpop.permute.xlu1 %1915  ;;  %v11422_v23 = vpop.permute.xlu0 %1913 }
 0x18d   : > { %9707 = vmatmul.mubr.msk.bf16.vlgmr.msra.gmra.mrb[0].mxu0 %vm1016_vm1, %v10580_v18  ;;  %v1774_v18 = vpack.c.bf16 %v1772_v63, %v1772_v63 }
 0x18e   : > { %1621 = vmatpush1.bf16.msra.mxu0 %v1615_v20  ;;  %1652 = vmatprep.mubr.bf16.mxu0 %v10893_v4  ;;  %v1846_v20 = vmul.f32 %v1843_v3, %v11457_v41 }
 0x18f   : > { %9714 = vmatprep.subr.msk.bf16.mxu0 %vm1020_vm0, %v1690_v21  ;;  %v11440_v30 = vpop.permute.xlu1 %1989  ;;  %v11442_v31 = vpop.permute.xlu0 %1987  ;;  %v1787_v43 = vsel %vm1020_vm0, %v1774_v18, 0  ;;  %v10583_v18 = vld [vmem:[#allocation4] sm:$0xff]  }
 0x193   : > { %v987_v44 = vpop.permute.xlu1 %986  ;;  %v985_v45 = vpop.permute.xlu0 %984 }
 0x194   : > { %v990_v46 = vsel %vm988_vm7, %v987_v44, %v985_v45  ;;  %v989_v47 = vsel %vm988_vm7, %v985_v45, %v987_v44  ;;  %v1848_v44 = vpack.c.bf16 %v1846_v20, %v1846_v20 }
 0x195   : > { %v1005_v49 = vmul.f32 %v11457_v41, %v989_v47  ;;  %v1004_v50 = vmul.f32 %v11454_v40, %v990_v46  ;;  %v1844_v47 = vsel %vm988_vm7, %v11412_v14, %v11414_v16  ;;  %v9692_v14 = vld [vmem:[%s13608_s10 + $0x3] ss:$8 sm:$0x3] }
 0x196   : > { %v1845_v16 = vmul.f32 %v1844_v47, %v11454_v40  ;;  %v10584_v47 = vld [vmem:[#allocation4 + $0x8] sm:$0xff]  }
 0x197   : > { %v1007_v55 = vpack.c.bf16 %v1005_v49, %v1005_v49  ;;  %v1006_v56 = vpack.c.bf16 %v1004_v50, %v1004_v50  ;;  %v11472_v57 = vpop.permute.xlu1 %2141  ;;  %v11474_v59 = vpop.permute.xlu0 %2139 }
 0x198   : > { %v1847_v3 = vpack.c.bf16 %v1845_v16, %v1845_v16 }
 0x199   : > { %9711 = vmatmul.mubr.msk.bf16.vlgmr.msra.gmra.mrb[0].mxu0 %vm1016_vm1, %v10581_v48  ;;  %9683 = vmatprep.subr.msk.bf16.mxu1 %vm1020_vm0, %v1007_v55  ;;  %v1022_v61 = vsel %vm1020_vm0, %v1006_v56, 0 }
 0x19a   : > { %1709 = vmatpush1.bf16.msra.mxu0 %v1703_v53  ;;  %1740 = vmatprep.mubr.bf16.mxu0 %v10893_v4 }
 0x19b   : > { %9717 = vmatprep.subr.msk.bf16.mxu0 %vm1020_vm0, %v1775_v54  ;;  %1028 = vmatpush1.bf16.msra.mxu1 %v1022_v61  ;;  %v960_v0 = vpop.permute.xlu1 %959  ;;  %v958_v2 = vpop.permute.xlu0 %957  ;;  %v10587_v54 = vld [vmem:[#allocation2] sm:$0xff]  }
 0x19c   : > { %v964_v5 = vsel %vm963_vm6, %v958_v2, %v960_v0  ;;  %v965_v7 = vsel %vm963_vm6, %v960_v0, %v958_v2  ;;  %v11544_v0 = vrot.slane %v9692_v14, %v11276_v8  ;;  %v11549_v2 = vrot.slane %v9692_v14, %v11278_v9 }
 0x19d   : > { %v978_v10 = vmul.f32 %v11467_v51, %v965_v7  ;;  %v979_v11 = vmul.f32 %v11433_v26, %v964_v5 }
 0x19e   : > { %9684 = vmatmul.mubr.msk.bf16.vlgmr.msra.gmra.mrb[0].mxu1 %vm1016_vm1, %v10585_v62  ;;  %v1917_v62 = vsel %vm1131_vm8, %v11422_v23, %v11420_v22 }
 0x19f   : > { %v980_v21 = vpack.c.bf16 %v978_v10, %v978_v10  ;;  %v981_v24 = vpack.c.bf16 %v979_v11, %v979_v11  ;;  %v11498_v25 = vpop.permute.xlu1 %2215  ;;  %v11500_v28 = vpop.permute.xlu0 %2213  ;;  %1116 = vmatprep.mubr.bf16.mxu1 %v10893_v4  ;;  %v1920_v5 = vmul.f32 %v1917_v62, %v11513_v42 }
 0x1a1   : > { %9686 = vmatprep.subr.msk.bf16.mxu1 %vm1020_vm0, %v981_v24  ;;  %v1079_v38 = vsel %vm1020_vm0, %v980_v21, 0  ;;  %v1922_v21 = vpack.c.bf16 %v1920_v5, %v1920_v5  ;;  %v1861_v24 = vsel %vm1020_vm0, %v1847_v3, 0  ;;  %v10588_v3 = vld [vmem:[#allocation4 + $0x18] sm:$0xff]  }
 0x1a2   : > { %1085 = vmatpush1.bf16.msra.mxu1 %v1079_v38 }
 0x1a3   : > { %v1130_v45 = vpop.permute.xlu1 %1129  ;;  %v1128_v46 = vpop.permute.xlu0 %1127 }
 0x1a4   : > { %v1132_v48 = vsel %vm1131_vm8, %v1128_v46, %v1130_v45  ;;  %v1133_v49 = vsel %vm1131_vm8, %v1130_v45, %v1128_v46  ;;  %v1991_v45 = vsel %vm1219_vm9, %v11442_v31, %v11440_v30 }
 0x1a5   : > { %9715 = vmatmul.mubr.msk.bf16.vlgmr.msra.gmra.mrb[0].mxu0 %vm1016_vm1, %v10582_v32  ;;  %v1147_v50 = vmul.f32 %v11510_v39, %v1133_v49  ;;  %v1148_v53 = vmul.f32 %v11513_v42, %v1132_v48  ;;  %v1918_v32 = vsel %vm1131_vm8, %v11420_v22, %v11422_v23  ;;  %v1994_v46 = vmul.f32 %v1991_v45, %v11549_v2 }
 0x1a6   : > { %1793 = vmatpush1.bf16.msra.mxu0 %v1787_v43  ;;  %1824 = vmatprep.mubr.bf16.mxu0 %v10893_v4  ;;  %v10589_v43 = vld [vmem:[#allocation2 + $0x10] sm:$0xff]   ;;  %v2061_v48 = vmul.f32 %v11306_v17, %v11299_v15 }
 0x1a7   : > { %9720 = vmatprep.subr.msk.bf16.mxu0 %vm1020_vm0, %v1848_v44  ;;  %v1149_v55 = vpack.c.bf16 %v1147_v50, %v1147_v50  ;;  %v1150_v56 = vpack.c.bf16 %v1148_v53, %v1148_v53  ;;  %v11533_v60 = vpop.permute.xlu1 %2289  ;;  %v11535_v61 = vpop.permute.xlu0 %2287  ;;  %v1919_v44 = vmul.f32 %v1918_v32, %v11510_v39  ;;  %v1996_v49 = vpack.c.bf16 %v1994_v46, %v1994_v46 }
 0x1a8   : > { %v1992_v53 = vsel %vm1219_vm9, %v11440_v30, %v11442_v31  ;;  %v2069_v15 = vrot.slane %v2061_v48, %v11273_v6 }
 0x1a9   : > { %9690 = vmatprep.subr.msk.bf16.mxu1 %vm1020_vm0, %v1150_v56  ;;  %v1163_v63 = vsel %vm1020_vm0, %v1149_v55, 0  ;;  %v1921_v23 = vpack.c.bf16 %v1919_v44, %v1919_v44  ;;  %v1993_v14 = vmul.f32 %v1992_v53, %v11544_v0  ;;  %v10586_v55 = vld [vmem:[#allocation4 + $0x10] sm:$0xff]   ;;  %v2144_v56 = vsel %vm1407_vm2, %v11472_v57, %v11474_v59 }
 0x1aa   : > { %9687 = vmatmul.mubr.msk.bf16.vlgmr.msra.gmra.mrb[0].mxu1 %vm1016_vm1, %v10587_v54  ;;  %v10591_v54 = vld [vmem:[#allocation2 + $0x18] sm:$0xff]   ;;  %v2070_v16 = vcombine.high %v2069_v15, %v2069_v15  ;;  %v2146_v62 = vmul.f32 %v2144_v56, %v11362_v34 }
 0x1ab   : > { %1169 = vmatpush1.bf16.msra.mxu1 %v1163_v63  ;;  %1200 = vmatprep.mubr.bf16.mxu1 %v10893_v4  ;;  %v1218_v7 = vpop.permute.xlu1 %1217  ;;  %v1216_v10 = vpop.permute.xlu0 %1215  ;;  %v1935_v50 = vsel %vm1020_vm0, %v1921_v23, 0  ;;  %v1995_v17 = vpack.c.bf16 %v1993_v14, %v1993_v14  ;;  %v2073_v63 = vpack.c.bf16 %v2069_v15, %v2069_v15  ;;  %v10594_v14 = vld [vmem:[#allocation4 + $0x38] sm:$0xff]  }
 0x1ac   : > { %v1220_v11 = vsel %vm1219_vm9, %v1216_v10, %v1218_v7  ;;  %v1221_v8 = vsel %vm1219_vm9, %v1218_v7, %v1216_v10  ;;  %v2074_v31 = vpack.c.bf16 %v2070_v16, %v2070_v16  ;;  %v2148_v5 = vpack.c.bf16 %v2146_v62, %v2146_v62 }
 0x1ad   : > { %v1235_v20 = vmul.f32 %v11544_v0, %v1221_v8  ;;  %v1236_v9 = vmul.f32 %v11549_v2, %v1220_v11  ;;  %v2009_v30 = vsel %vm1020_vm0, %v1995_v17, 0  ;;  %v2087_v7 = vsel %vm1020_vm0, %v2073_v63, 0  ;;  %v10595_v17 = vld [vmem:[#allocation4 + $0x40] sm:$0xff]  }
 0x1ae   : > { %v2143_v10 = vsel %vm1407_vm2, %v11474_v59, %v11472_v57  ;;  %v2218_v8 = vsel %vm1495_vm3, %v11498_v25, %v11500_v28  ;;  %v2217_v59 = vsel %vm1495_vm3, %v11500_v28, %v11498_v25  ;;  %v2291_v28 = vsel %vm1583_vm4, %v11535_v61, %v11533_v60 }
 0x1af   : > { %v1238_v29 = vpack.c.bf16 %v1236_v9, %v1236_v9  ;;  %v1237_v38 = vpack.c.bf16 %v1235_v20, %v1235_v20  ;;  %v2145_v11 = vmul.f32 %v2143_v10, %v11359_v33  ;;  %v2220_v20 = vmul.f32 %v2218_v8, %v11368_v36  ;;  %v10590_v9 = vld [vmem:[#allocation4 + $0x20] sm:$0xff]   ;;  %v2364_v45 = vpop.permute.xlu1 %2363 }
 0x1b0   : > { %v2293_v23 = vmul.f32 %v2291_v28, %v11392_v58 }
 0x1b1   : > { %9718 = vmatmul.mubr.msk.bf16.vlgmr.msra.gmra.mrb[0].mxu0 %vm1016_vm1, %v10583_v18  ;;  %9694 = vmatprep.subr.msk.bf16.mxu1 %vm1020_vm0, %v1238_v29  ;;  %v1251_v22 = vsel %vm1020_vm0, %v1237_v38, 0  ;;  %v2147_v18 = vpack.c.bf16 %v2145_v11, %v2145_v11  ;;  %v2292_v29 = vsel %vm1583_vm4, %v11533_v60, %v11535_v61 }
 0x1b2   : > { %1867 = vmatpush1.bf16.msra.mxu0 %v1861_v24  ;;  %1898 = vmatprep.mubr.bf16.mxu0 %v10893_v4  ;;  %v2219_v24 = vmul.f32 %v2217_v59, %v11365_v35  ;;  %v2294_v38 = vmul.f32 %v2292_v29, %v11372_v37 }
 0x1b3   : > { %9723 = vmatprep.subr.msk.bf16.mxu0 %vm1020_vm0, %v1922_v21  ;;  %v2222_v21 = vpack.c.bf16 %v2220_v20, %v2220_v20  ;;  %v2161_v57 = vsel %vm1020_vm0, %v2147_v18, 0 }
 0x1b4   : > { %v2221_v32 = vpack.c.bf16 %v2219_v24, %v2219_v24  ;;  %v2296_v44 = vpack.c.bf16 %v2294_v38, %v2294_v38 }
 0x1b6   : > { %9691 = vmatmul.mubr.msk.bf16.vlgmr.msra.gmra.mrb[0].mxu1 %vm1016_vm1, %v10589_v43  ;;  %v10592_v43 = vld [vmem:[#allocation4 + $0x28] sm:$0xff]   ;;  %v2235_v25 = vsel %vm1020_vm0, %v2221_v32, 0 }
 0x1b7   : > { %1257 = vmatpush1.bf16.msra.mxu1 %v1251_v22  ;;  %1288 = vmatprep.mubr.bf16.mxu1 %v10893_v4  ;;  %v2362_v22 = vpop.permute.xlu0 %2361 }
 0x1b8   : > { %v2366_v46 = vsel %vm1671_vm5, %v2364_v45, %v2362_v22 }
 0x1b9   : > { %v2368_v48 = vmul.f32 %v2366_v46, %v11405_v1 }
 0x1bb   : > { %v2370_v61 = vpack.c.bf16 %v2368_v48, %v2368_v48 }
 0x1bd   : > { %9721 = vmatmul.mubr.msk.bf16.vlgmr.msra.gmra.mrb[0].mxu0 %vm1016_vm1, %v10584_v47  ;;  %v2295_v47 = vpack.c.bf16 %v2293_v23, %v2293_v23 }
 0x1be   : > { %1941 = vmatpush1.bf16.msra.mxu0 %v1935_v50  ;;  %1972 = vmatprep.mubr.bf16.mxu0 %v10893_v4  ;;  %v2365_v50 = vsel %vm1671_vm5, %v2362_v22, %v2364_v45 }
 0x1bf   : > { %9726 = vmatprep.subr.msk.bf16.mxu0 %vm1020_vm0, %v1996_v49  ;;  %v10593_v49 = vld [vmem:[#allocation4 + $0x30] sm:$0xff]   ;;  %v2309_v60 = vsel %vm1020_vm0, %v2295_v47, 0  ;;  %v2367_v53 = vmul.f32 %v2365_v50, %v11417_v19 }
 0x1c2   : > { %9695 = vmatmul.mubr.msk.bf16.vlgmr.msra.gmra.mrb[0].mxu1 %vm1016_vm1, %v10591_v54  ;;  %v2369_v54 = vpack.c.bf16 %v2367_v53, %v2367_v53 }
 0x1c3   : > { %2549 = vmatprep.mubr.bf16.mxu1 %v10893_v4 }
 0x1c4   : > { %v2383_v15 = vsel %vm1020_vm0, %v2369_v54, 0 }
 0x1c9   : > { %9724 = vmatmul.mubr.msk.bf16.vlgmr.msra.gmra.mrb[0].mxu0 %vm1016_vm1, %v10586_v55 }
 0x1ca   : > { %2015 = vmatpush1.bf16.msra.mxu0 %v2009_v30  ;;  %2046 = vmatprep.mubr.bf16.mxu0 %v10893_v4 }
 0x1cb   : > { %9729 = vmatprep.subr.msk.bf16.mxu0 %vm1020_vm0, %v2074_v31 }
 0x1d5   : > { %9727 = vmatmul.mubr.msk.bf16.vlgmr.msra.gmra.mrb[0].mxu0 %vm1016_vm1, %v10588_v3 }
 0x1d6   : > { %2093 = vmatpush1.bf16.msra.mxu0 %v2087_v7  ;;  %2124 = vmatprep.mubr.bf16.mxu0 %v10893_v4 }
 0x1d7   : > { %9732 = vmatprep.subr.msk.bf16.mxu0 %vm1020_vm0, %v2148_v5 }
 0x1e1   : > { %9730 = vmatmul.mubr.msk.bf16.vlgmr.msra.gmra.mrb[0].mxu0 %vm1016_vm1, %v10590_v9 }
 0x1e2   : > { %2167 = vmatpush1.bf16.msra.mxu0 %v2161_v57  ;;  %2198 = vmatprep.mubr.bf16.mxu0 %v10893_v4 }
 0x1e3   : > { %9735 = vmatprep.subr.msk.bf16.mxu0 %vm1020_vm0, %v2222_v21 }
 0x1ed   : > { %9733 = vmatmul.mubr.msk.bf16.vlgmr.msra.gmra.mrb[0].mxu0 %vm1016_vm1, %v10592_v43 }
 0x1ee   : > { %2241 = vmatpush1.bf16.msra.mxu0 %v2235_v25  ;;  %2272 = vmatprep.mubr.bf16.mxu0 %v10893_v4 }
 0x1ef   : > { %9738 = vmatprep.subr.msk.bf16.mxu0 %vm1020_vm0, %v2296_v44 }
 0x1f8   : > { %v2445_v56 = vpop.permute.xlu1 %2444 }
 0x1f9   : > { %9736 = vmatmul.mubr.msk.bf16.vlgmr.msra.gmra.mrb[0].mxu0 %vm1016_vm1, %v10593_v49  ;;  %v2440_v62 = vpop.permute.xlu0 %2439 }
 0x1fa   : > { %2315 = vmatpush1.bf16.msra.mxu0 %v2309_v60  ;;  %2346 = vmatprep.mubr.bf16.mxu0 %v10893_v4  ;;  %v3132_v60 = vld [vmem:[%s13531_s17 + $0x8] sm:$0xff] }
 0x1fb   : > { %9741 = vmatprep.subr.msk.bf16.mxu0 %vm1020_vm0, %v2370_v61  ;;  %v3131_v61 = vld [vmem:[%s13531_s17] sm:$0xff] }
 0x1fe   : > { %v2453_v11 = vpop.permute.xlu1 %2452 }
 0x1ff   : > { %v2457_v57 = vpop.permute.xlu0 %2456 }
 0x205   : > { %9739 = vmatmul.mubr.msk.bf16.vlgmr.msra.gmra.mrb[0].mxu0 %vm1016_vm1, %v10594_v14 }
 0x206   : > { %2389 = vmatpush1.bf16.msra.mxu0 %v2383_v15  ;;  %2420 = vmatprep.mubr.bf16.mxu0 %v10893_v4 }
 0x211   : > { %9742 = vmatmul.mubr.msk.bf16.vlgmr.msra.gmra.mrb[0].mxu0 %vm1016_vm1, %v10595_v17 }
 0x212   : > { %3939 = vmatprep.mubr.bf16.mxu0 %v10893_v4 }
 0x295   : > { %v1290_v16 = vpop.f32.mrb[0].mxu1 }
 0x296   : > { %v1292_v55 = vpop.f32.mrb[1].mxu1 }
 0x297   : > { %v1294_v30 = vpop.f32.mrb[2].mxu1 }
 0x298   : > { %v1296_v31 = vpop.f32.mrb[3].mxu1 }
 0x2e4   : > { %v2422_v63 = vpop.f32.mrb[0].mxu0 }
 0x2e5   : > { %v10026_v3 = vadd.f32 %v2422_v63, %v1290_v16  ;;  %v2424_v5 = vpop.f32.mrb[1].mxu0 }
 0x2e6   : > { %v10027_v7 = vadd.f32 %v2424_v5, %v1292_v55  ;;  %v2426_v10 = vpop.f32.mrb[2].mxu0 }
 0x2e7   : > { %v10028_v8 = vadd.f32 %v2426_v10, %v1294_v30  ;;  %v2447_v18 = vmul.f32 %v10026_v3, %v2440_v62  ;;  %v2428_v20 = vpop.f32.mrb[3].mxu0 }
 0x2e8   : > { %v2448_v9 = vmul.f32 %v10027_v7, %v2440_v62  ;;  %v10029_v21 = vadd.f32 %v2428_v20, %v1296_v31 }
 0x2e9   : > { %v2449_v59 = vmul.f32 %v10028_v8, %v2445_v56  ;;  %v2459_v24 = vadd.f32 %v2453_v11, %v2447_v18  ;;  %v10596_v8 = vld [vmem:[#allocation6 + $0x8] sm:$0xff]  }
 0x2ea   : > { %v2450_v29 = vmul.f32 %v10029_v21, %v2445_v56  ;;  %v2460_v32 = vadd.f32 %v2453_v11, %v2448_v9 }
 0x2eb   : > { %v2463_v38 = vmax.f32 %v2459_v24, 0.0  ;;  %v2461_v43 = vadd.f32 %v2457_v57, %v2449_v59 }
 0x2ec   : > { %v2464_v44 = vmax.f32 %v2460_v32, 0.0  ;;  %v2462_v25 = vadd.f32 %v2457_v57, %v2450_v29 }
 0x2ed   : > { %v2465_v28 = vmax.f32 %v2461_v43, 0.0  ;;  %2487 = vrot.lane.b32.xlu1 %v2463_v38, %s10899_s11  ;;  %v11655_v22 = vmul.f32 %v2463_v38, %v11292_v12 }
 0x2ee   : > { %v2466_v45 = vmax.f32 %v2462_v25, 0.0  ;;  %2491 = vrot.lane.b32.xlu0 %v2464_v44, %s10899_s11  ;;  %v11661_v46 = vmul.f32 %v2464_v44, %v11295_v13 }
 0x2ef   : > { %v11658_v23 = vmul.f32 %v2465_v28, %v11292_v12 }
 0x2f0   : > { %v11664_v47 = vmul.f32 %v2466_v45, %v11295_v13 }
 0x2f1   : > { %2489 = vrot.lane.b32.xlu1 %v2465_v28, %s10899_s11  ;;  %v2767_v48 = vpack.c.bf16 %v11658_v23, %v11655_v22 }
 0x2f2   : > { %2467 = vrot.lane.b32.xlu0 %v2463_v38, %s10898_s2  ;;  %v2768_v49 = vpack.c.bf16 %v11664_v47, %v11661_v46 }
 0x2f5   : > { %2493 = vrot.lane.b32.xlu1 %v2466_v45, %s10899_s11 }
 0x2f6   : > { %2471 = vrot.lane.b32.xlu0 %v2464_v44, %s10898_s2 }
 0x2f9   : > { %2469 = vrot.lane.b32.xlu1 %v2465_v28, %s10898_s2 }
 0x2fa   : > { %2611 = vrot.lane.b32.xlu0 %v2463_v38, %s10900_s8 }
 0x2fd   : > { %2473 = vrot.lane.b32.xlu1 %v2466_v45, %s10898_s2 }
 0x2fe   : > { %2615 = vrot.lane.b32.xlu0 %v2464_v44, %s10900_s8 }
 0x301   : > { %2613 = vrot.lane.b32.xlu1 %v2465_v28, %s10900_s8 }
 0x302   : > { %2687 = vrot.lane.b32.xlu0 %v2463_v38, %s10901_s0 }
 0x305   : > { %2617 = vrot.lane.b32.xlu1 %v2466_v45, %s10900_s8 }
 0x306   : > { %2691 = vrot.lane.b32.xlu0 %v2464_v44, %s10901_s0 }
 0x309   : > { %2689 = vrot.lane.b32.xlu1 %v2465_v28, %s10901_s0 }
 0x30a   : > { %2827 = vrot.lane.b32.xlu0 %v2463_v38, %s10894_s7 }
 0x30d   : > { %2693 = vrot.lane.b32.xlu1 %v2466_v45, %s10901_s0 }
 0x30e   : > { %2831 = vrot.lane.b32.xlu0 %v2464_v44, %s10894_s7 }
 0x311   : > { %2829 = vrot.lane.b32.xlu1 %v2465_v28, %s10894_s7 }
 0x312   : > { %2903 = vrot.lane.b32.xlu0 %v2463_v38, %s10895_s1 }
 0x315   : > { %2833 = vrot.lane.b32.xlu1 %v2466_v45, %s10894_s7 }
 0x316   : > { %2907 = vrot.lane.b32.xlu0 %v2464_v44, %s10895_s1 }
 0x319   : > { %2905 = vrot.lane.b32.xlu1 %v2465_v28, %s10895_s1 }
 0x31a   : > { %2979 = vrot.lane.b32.xlu0 %v2463_v38, %s10896_s15 }
 0x31d   : > { %2909 = vrot.lane.b32.xlu1 %v2466_v45, %s10895_s1 }
 0x31e   : > { %2983 = vrot.lane.b32.xlu0 %v2464_v44, %s10896_s15 }
 0x321   : > { %2981 = vrot.lane.b32.xlu1 %v2465_v28, %s10896_s15 }
 0x322   : > { %3055 = vrot.lane.b32.xlu0 %v2463_v38, %s13565_s3 }
 0x325   : > { %2985 = vrot.lane.b32.xlu1 %v2466_v45, %s10896_s15 }
 0x326   : > { %3059 = vrot.lane.b32.xlu0 %v2464_v44, %s13565_s3 }
 0x329   : > { %3057 = vrot.lane.b32.xlu1 %v2465_v28, %s13565_s3 }
 0x32a   : > { %3135 = vperm.xlu0 %10548, %v3131_v61  }
 0x32d   : > { %3061 = vrot.lane.b32.xlu1 %v2466_v45, %s13565_s3 }
 0x32e   : > { %10551 = vset.pattern.permute.xlu0 %v10902_v52 }
 0x32f   : > { %3152 = vperm.xlu0 %10551, %v3132_v60  }
 0x331   : > { %3140 = vperm.xlu1 %10549, %v3132_v60  }
 0x333   : > { %10552 = vset.pattern.permute.xlu0 %v10893_v4 }
 0x335   : > { %10550 = vset.pattern.permute.xlu1 %v10902_v52 }
 0x336   : > { %3148 = vperm.xlu1 %10550, %v3131_v61  }
 0x33a   : > { %10553 = vset.pattern.permute.xlu1 %v10893_v4 }
 0x35f   : > { %v2488_v50 = vpop.permute.xlu1 %2487 }
 0x360   : > { %v2492_v53 = vpop.permute.xlu0 %2491 }
 0x361   : > { %v2495_v15 = vsel %vm988_vm7, %v2488_v50, %v2492_v53  ;;  %v2497_v17 = vsel %vm988_vm7, %v2492_v53, %v2488_v50 }
 0x362   : > { %v2499_v56 = vmul.f32 %v2497_v17, %v11454_v40  ;;  %v2500_v62 = vmul.f32 %v2495_v15, %v11457_v41 }
 0x363   : > { %v2490_v54 = vpop.permute.xlu1 %2489 }
 0x364   : > { %v2468_v14 = vpop.permute.xlu0 %2467 }
 0x367   : > { %v2494_v16 = vpop.permute.xlu1 %2493 }
 0x368   : > { %v2496_v55 = vsel %vm988_vm7, %v2490_v54, %v2494_v16  ;;  %v2498_v30 = vsel %vm988_vm7, %v2494_v16, %v2490_v54  ;;  %v2472_v31 = vpop.permute.xlu0 %2471  ;;  %v10597_v16 = vld [vmem:[#allocation6] sm:$0xff]  }
 0x369   : > { %v2501_v63 = vmul.f32 %v2498_v30, %v11454_v40  ;;  %v2502_v3 = vmul.f32 %v2496_v55, %v11457_v41  ;;  %v2475_v18 = vsel %vm963_vm6, %v2468_v14, %v2472_v31  ;;  %v2477_v20 = vsel %vm963_vm6, %v2472_v31, %v2468_v14 }
 0x36a   : > { %v2479_v24 = vmul.f32 %v2477_v20, %v11467_v51  ;;  %v2480_v29 = vmul.f32 %v2475_v18, %v11433_v26 }
 0x36b   : > { %v2503_v5 = vpack.c.bf16 %v2501_v63, %v2499_v56  ;;  %v2470_v7 = vpop.permute.xlu1 %2469  ;;  %v2504_v10 = vpack.c.bf16 %v2502_v3, %v2500_v62 }
 0x36c   : > { %v2612_v11 = vpop.permute.xlu0 %2611 }
 0x36d   : > { %2517 = vmatprep.subr.bf16.mxu1 %v2504_v10 }
 0x36e   : > { %2518 = vmatpush1.bf16.msra.mxu1 %v2503_v5 }
 0x36f   : > { %v2474_v9 = vpop.permute.xlu1 %2473 }
 0x370   : > { %v2476_v21 = vsel %vm963_vm6, %v2470_v7, %v2474_v9  ;;  %v2478_v57 = vsel %vm963_vm6, %v2474_v9, %v2470_v7  ;;  %v2616_v59 = vpop.permute.xlu0 %2615  ;;  %v10598_v9 = vld [vmem:[#allocation6 + $0x10] sm:$0xff]  }
 0x371   : > { %v2481_v32 = vmul.f32 %v2478_v57, %v11467_v51  ;;  %v2482_v38 = vmul.f32 %v2476_v21, %v11433_v26  ;;  %9744 = vmatmul.mubr.msk.bf16.vlgmr.msra.gmra.mrb[4].mxu1 %vm2513_vm10, %v10596_v8  ;;  %v2619_v45 = vsel %vm1131_vm8, %v2612_v11, %v2616_v59  ;;  %v2621_v60 = vsel %vm1131_vm8, %v2616_v59, %v2612_v11 }
 0x372   : > { %2600 = vmatprep.mubr.bf16.mxu1 %v10893_v4  ;;  %v2623_v54 = vmul.f32 %v2621_v60, %v11510_v39  ;;  %v2624_v14 = vmul.f32 %v2619_v45, %v11513_v42 }
 0x373   : > { %v2483_v43 = vpack.c.bf16 %v2481_v32, %v2479_v24  ;;  %v2614_v44 = vpop.permute.xlu1 %2613  ;;  %v2484_v25 = vpack.c.bf16 %v2482_v38, %v2480_v29 }
 0x374   : > { %v2688_v28 = vpop.permute.xlu0 %2687 }
 0x375   : > { %2568 = vmatprep.subr.bf16.mxu1 %v2484_v25  ;;  %v10599_v25 = vld [vmem:[#allocation6 + $0x18] sm:$0xff]  }
 0x376   : > { %2569 = vmatpush1.bf16.msra.mxu1 %v2483_v43 }
 0x377   : > { %v2618_v61 = vpop.permute.xlu1 %2617 }
 0x378   : > { %v2620_v50 = vsel %vm1131_vm8, %v2614_v44, %v2618_v61  ;;  %v2622_v53 = vsel %vm1131_vm8, %v2618_v61, %v2614_v44  ;;  %v2692_v30 = vpop.permute.xlu0 %2691 }
 0x379   : > { %v2625_v15 = vmul.f32 %v2622_v53, %v11510_v39  ;;  %v2626_v17 = vmul.f32 %v2620_v50, %v11513_v42  ;;  %v2695_v62 = vsel %vm1219_vm9, %v2688_v28, %v2692_v30  ;;  %v2697_v11 = vsel %vm1219_vm9, %v2692_v30, %v2688_v28 }
 0x37a   : > { %v2700_v5 = vmul.f32 %v2695_v62, %v11549_v2  ;;  %v2699_v21 = vmul.f32 %v2697_v11, %v11544_v0  ;;  %v10601_v11 = vld [vmem:[#allocation6 + $0x28] sm:$0xff]  }
 0x37b   : > { %v2627_v55 = vpack.c.bf16 %v2625_v15, %v2623_v54  ;;  %v2690_v31 = vpop.permute.xlu1 %2689  ;;  %v2628_v56 = vpack.c.bf16 %v2626_v17, %v2624_v14  ;;  %v10600_v54 = vld [vmem:[#allocation6 + $0x20] sm:$0xff]  }
 0x37c   : > { %v2828_v57 = vpop.permute.xlu0 %2827 }
 0x37d   : > { %9746 = vmatmul.mubr.msk.bf16.vlgmr.msra.gmra.mrb[4].mxu1 %vm2513_vm10, %v10597_v16  ;;  %2640 = vmatprep.subr.bf16.mxu1 %v2628_v56 }
 0x37e   : > { %2641 = vmatpush1.bf16.msra.mxu1 %v2627_v55  ;;  %2672 = vmatprep.mubr.bf16.mxu1 %v10893_v4 }
 0x37f   : > { %v2694_v63 = vpop.permute.xlu1 %2693 }
 0x380   : > { %v2696_v3 = vsel %vm1219_vm9, %v2690_v31, %v2694_v63  ;;  %v2698_v7 = vsel %vm1219_vm9, %v2694_v63, %v2690_v31  ;;  %v2832_v29 = vpop.permute.xlu0 %2831 }
 0x381   : > { %v2702_v10 = vmul.f32 %v2696_v3, %v11549_v2  ;;  %v2701_v18 = vmul.f32 %v2698_v7, %v11544_v0  ;;  %v2837_v38 = vsel %vm1407_vm2, %v2832_v29, %v2828_v57  ;;  %v2835_v50 = vsel %vm1407_vm2, %v2828_v57, %v2832_v29 }
 0x382   : > { %v2840_v28 = vmul.f32 %v2837_v38, %v11362_v34  ;;  %v2839_v14 = vmul.f32 %v2835_v50, %v11359_v33  ;;  %v10603_v50 = vld [vmem:[#allocation6 + $0x38] sm:$0xff]  }
 0x383   : > { %v2704_v8 = vpack.c.bf16 %v2702_v10, %v2700_v5  ;;  %v2830_v20 = vpop.permute.xlu1 %2829  ;;  %v2703_v59 = vpack.c.bf16 %v2701_v18, %v2699_v21 }
 0x384   : > { %v2904_v45 = vpop.permute.xlu0 %2903 }
 0x385   : > { %2716 = vmatprep.subr.bf16.mxu1 %v2704_v8 }
 0x387   : > { %v2834_v24 = vpop.permute.xlu1 %2833 }
 0x388   : > { %v2838_v32 = vsel %vm1407_vm2, %v2834_v24, %v2830_v20  ;;  %v2836_v47 = vsel %vm1407_vm2, %v2830_v20, %v2834_v24 }
 0x389   : > { %9748 = vmatmul.mubr.msk.bf16.vlgmr.msra.gmra.mrb[4].mxu1 %vm2513_vm10, %v10598_v9  ;;  %v2842_v43 = vmul.f32 %v2838_v32, %v11362_v34  ;;  %v2841_v53 = vmul.f32 %v2836_v47, %v11359_v33 }
 0x38a   : > { %2717 = vmatpush1.bf16.msra.mxu1 %v2703_v59  ;;  %2748 = vmatprep.mubr.bf16.mxu1 %v10893_v4 }
 0x38b   : > { %2780 = vmatprep.subr.bf16.mxu1 %v2768_v49  ;;  %v2906_v44 = vpop.permute.xlu1 %2905  ;;  %v2844_v60 = vpack.c.bf16 %v2842_v43, %v2840_v28  ;;  %v2908_v49 = vpop.permute.xlu0 %2907  ;;  %v2843_v16 = vpack.c.bf16 %v2841_v53, %v2839_v14 }
 0x38c   : > { %v2913_v22 = vsel %vm1495_vm3, %v2908_v49, %v2904_v45  ;;  %v2911_v63 = vsel %vm1495_vm3, %v2904_v45, %v2908_v49 }
 0x38d   : > { %v2916_v15 = vmul.f32 %v2913_v22, %v11368_v36  ;;  %v2915_v8 = vmul.f32 %v2911_v63, %v11365_v35 }
 0x38f   : > { %v2910_v46 = vpop.permute.xlu1 %2909  ;;  %v2980_v17 = vpop.permute.xlu0 %2979 }
 0x390   : > { %v2914_v61 = vsel %vm1495_vm3, %v2910_v46, %v2906_v44  ;;  %v2912_v31 = vsel %vm1495_vm3, %v2906_v44, %v2910_v46 }
 0x391   : > { %v2918_v23 = vmul.f32 %v2914_v61, %v11368_v36  ;;  %v2917_v3 = vmul.f32 %v2912_v31, %v11365_v35 }
 0x393   : > { %v2920_v55 = vpack.c.bf16 %v2918_v23, %v2916_v15  ;;  %v2984_v56 = vpop.permute.xlu0 %2983  ;;  %v2919_v9 = vpack.c.bf16 %v2917_v3, %v2915_v8  ;;  %v10604_v23 = vld [vmem:[#allocation6 + $0x40] sm:$0xff]  }
 0x394   : > { %v2989_v5 = vsel %vm1583_vm4, %v2984_v56, %v2980_v17  ;;  %v2987_v32 = vsel %vm1583_vm4, %v2980_v17, %v2984_v56 }
 0x395   : > { %9750 = vmatmul.mubr.msk.bf16.vlgmr.msra.gmra.mrb[4].mxu1 %vm2513_vm10, %v10599_v25  ;;  %v2992_v18 = vmul.f32 %v2989_v5, %v11372_v37  ;;  %v10602_v25 = vld [vmem:[#allocation6 + $0x30] sm:$0xff]   ;;  %v2991_v28 = vmul.f32 %v2987_v32, %v11392_v58  ;;  %v3827_v32 = vld [vmem:[%s13532_s18 + $0x8] sm:$0xff] }
 0x396   : > { %2781 = vmatpush1.bf16.msra.mxu1 %v2767_v48  ;;  %2812 = vmatprep.mubr.bf16.mxu1 %v10893_v4  ;;  %v2982_v48 = vpop.permute.xlu1 %2981 }
 0x397   : > { %2856 = vmatprep.subr.bf16.mxu1 %v2844_v60  ;;  %v3056_v20 = vpop.permute.xlu0 %3055 }
 0x39a   : > { %v2986_v30 = vpop.permute.xlu1 %2985 }
 0x39b   : > { %v2990_v62 = vsel %vm1583_vm4, %v2986_v30, %v2982_v48  ;;  %v2988_v59 = vsel %vm1583_vm4, %v2982_v48, %v2986_v30  ;;  %v3060_v24 = vpop.permute.xlu0 %3059 }
 0x39c   : > { %v2994_v7 = vmul.f32 %v2990_v62, %v11372_v37  ;;  %v2993_v38 = vmul.f32 %v2988_v59, %v11392_v58  ;;  %v3065_v43 = vsel %vm1671_vm5, %v3060_v24, %v3056_v20  ;;  %v3063_v49 = vsel %vm1671_vm5, %v3056_v20, %v3060_v24 }
 0x39d   : > { %v3068_v45 = vmul.f32 %v3065_v43, %v11405_v1  ;;  %v3067_v53 = vmul.f32 %v3063_v49, %v11417_v19 }
 0x39e   : > { %v3058_v10 = vpop.permute.xlu1 %3057  ;;  %v2996_v21 = vpack.c.bf16 %v2994_v7, %v2992_v18  ;;  %v2995_v60 = vpack.c.bf16 %v2993_v38, %v2991_v28  ;;  %v3826_v38 = vld [vmem:[%s13532_s18] sm:$0xff] }
 0x3a1   : > { %9752 = vmatmul.mubr.msk.bf16.vlgmr.msra.gmra.mrb[4].mxu1 %vm2513_vm10, %v10600_v54 }
 0x3a2   : > { %2857 = vmatpush1.bf16.msra.mxu1 %v2843_v16  ;;  %2888 = vmatprep.mubr.bf16.mxu1 %v10893_v4  ;;  %v3062_v57 = vpop.permute.xlu1 %3061 }
 0x3a3   : > { %2932 = vmatprep.subr.bf16.mxu1 %v2920_v55  ;;  %v3066_v29 = vsel %vm1671_vm5, %v3062_v57, %v3058_v10  ;;  %v3064_v47 = vsel %vm1671_vm5, %v3058_v10, %v3062_v57 }
 0x3a4   : > { %v3070_v44 = vmul.f32 %v3066_v29, %v11405_v1  ;;  %v3069_v61 = vmul.f32 %v3064_v47, %v11417_v19 }
 0x3a6   : > { %v3072_v46 = vpack.c.bf16 %v3070_v44, %v3068_v45  ;;  %v3071_v22 = vpack.c.bf16 %v3069_v61, %v3067_v53 }
 0x3a9   : > { %v3136_v54 = vpop.permute.xlu0 %3135 }
 0x3ad   : > { %9754 = vmatmul.mubr.msk.bf16.vlgmr.msra.gmra.mrb[4].mxu1 %vm2513_vm10, %v10601_v11 }
 0x3ae   : > { %2933 = vmatpush1.bf16.msra.mxu1 %v2919_v9  ;;  %2964 = vmatprep.mubr.bf16.mxu1 %v10893_v4  ;;  %v3153_v31 = vpop.permute.xlu0 %3152 }
 0x3af   : > { %3008 = vmatprep.subr.bf16.mxu1 %v2996_v21 }
 0x3b0   : > { %v3141_v48 = vpop.permute.xlu1 %3140 }
 0x3b5   : > { %v3149_v15 = vpop.permute.xlu1 %3148 }
 0x3b9   : > { %9756 = vmatmul.mubr.msk.bf16.vlgmr.msra.gmra.mrb[4].mxu1 %vm2513_vm10, %v10602_v25 }
 0x3ba   : > { %3009 = vmatpush1.bf16.msra.mxu1 %v2995_v60  ;;  %3040 = vmatprep.mubr.bf16.mxu1 %v10893_v4 }
 0x3bb   : > { %3084 = vmatprep.subr.bf16.mxu1 %v3072_v46 }
 0x3c5   : > { %9758 = vmatmul.mubr.msk.bf16.vlgmr.msra.gmra.mrb[4].mxu1 %vm2513_vm10, %v10603_v50 }
 0x3c6   : > { %3085 = vmatpush1.bf16.msra.mxu1 %v3071_v22  ;;  %3116 = vmatprep.mubr.bf16.mxu1 %v10893_v4 }
 0x3d1   : > { %9760 = vmatmul.mubr.msk.bf16.vlgmr.msra.gmra.mrb[4].mxu1 %vm2513_vm10, %v10604_v23 }
 0x3d2   : > { %3244 = vmatprep.mubr.bf16.mxu1 %v10893_v4 }
 0x4a4   : > { %v3118_v14 = vpop.f32.mrb[4].mxu1 }
 0x4a5   : > { %v3143_v17 = vmul.f32 %v3136_v54, %v3118_v14  ;;  %v3120_v16 = vpop.f32.mrb[5].mxu1 }
 0x4a6   : > { %v3144_v55 = vmul.f32 %v3136_v54, %v3120_v16  ;;  %v3122_v30 = vpop.f32.mrb[6].mxu1 }
 0x4a7   : > { %v3155_v56 = vadd.f32 %v3149_v15, %v3143_v17  ;;  %v3145_v62 = vmul.f32 %v3141_v48, %v3122_v30  ;;  %v3124_v63 = vpop.f32.mrb[7].mxu1  ;;  %v10605_v17 = vld [vmem:[#allocation7 + $0x8] sm:$0xff]  }
 0x4a8   : > { %v3156_v3 = vadd.f32 %v3149_v15, %v3144_v55  ;;  %v3146_v5 = vmul.f32 %v3141_v48, %v3124_v63 }
 0x4a9   : > { %v3159_v7 = vmax.f32 %v3155_v56, 0.0  ;;  %v3157_v10 = vadd.f32 %v3153_v31, %v3145_v62 }
 0x4aa   : > { %v3160_v11 = vmax.f32 %v3156_v3, 0.0  ;;  %v3158_v8 = vadd.f32 %v3153_v31, %v3146_v5 }
 0x4ab   : > { %v3161_v18 = vmax.f32 %v3157_v10, 0.0  ;;  %3183 = vrot.lane.b32.xlu1 %v3159_v7, %s10899_s11  ;;  %v11833_v9 = vmul.f32 %v3159_v7, %v11292_v12 }
 0x4ac   : > { %v3162_v20 = vmax.f32 %v3158_v8, 0.0  ;;  %3187 = vrot.lane.b32.xlu0 %v3160_v11, %s10899_s11  ;;  %v11839_v57 = vmul.f32 %v3160_v11, %v11295_v13 }
 0x4ad   : > { %v11836_v21 = vmul.f32 %v3161_v18, %v11292_v12 }
 0x4ae   : > { %v11842_v59 = vmul.f32 %v3162_v20, %v11295_v13 }
 0x4af   : > { %3185 = vrot.lane.b32.xlu1 %v3161_v18, %s10899_s11  ;;  %v3462_v24 = vpack.c.bf16 %v11836_v21, %v11833_v9 }
 0x4b0   : > { %3163 = vrot.lane.b32.xlu0 %v3159_v7, %s10898_s2  ;;  %v3463_v29 = vpack.c.bf16 %v11842_v59, %v11839_v57 }
 0x4b3   : > { %3189 = vrot.lane.b32.xlu1 %v3162_v20, %s10899_s11 }
 0x4b4   : > { %3167 = vrot.lane.b32.xlu0 %v3160_v11, %s10898_s2 }
 0x4b7   : > { %3165 = vrot.lane.b32.xlu1 %v3161_v18, %s10898_s2 }
 0x4b8   : > { %3306 = vrot.lane.b32.xlu0 %v3159_v7, %s10900_s8 }
 0x4bb   : > { %3169 = vrot.lane.b32.xlu1 %v3162_v20, %s10898_s2 }
 0x4bc   : > { %3310 = vrot.lane.b32.xlu0 %v3160_v11, %s10900_s8 }
 0x4bf   : > { %3308 = vrot.lane.b32.xlu1 %v3161_v18, %s10900_s8 }
 0x4c0   : > { %3382 = vrot.lane.b32.xlu0 %v3159_v7, %s10901_s0 }
 0x4c3   : > { %3312 = vrot.lane.b32.xlu1 %v3162_v20, %s10900_s8 }
 0x4c4   : > { %3386 = vrot.lane.b32.xlu0 %v3160_v11, %s10901_s0 }
 0x4c7   : > { %3384 = vrot.lane.b32.xlu1 %v3161_v18, %s10901_s0 }
 0x4c8   : > { %3522 = vrot.lane.b32.xlu0 %v3159_v7, %s10894_s7 }
 0x4cb   : > { %3388 = vrot.lane.b32.xlu1 %v3162_v20, %s10901_s0 }
 0x4cc   : > { %3526 = vrot.lane.b32.xlu0 %v3160_v11, %s10894_s7 }
 0x4cf   : > { %3524 = vrot.lane.b32.xlu1 %v3161_v18, %s10894_s7 }
 0x4d0   : > { %3598 = vrot.lane.b32.xlu0 %v3159_v7, %s10895_s1 }
 0x4d3   : > { %3528 = vrot.lane.b32.xlu1 %v3162_v20, %s10894_s7 }
 0x4d4   : > { %3602 = vrot.lane.b32.xlu0 %v3160_v11, %s10895_s1 }
 0x4d7   : > { %3600 = vrot.lane.b32.xlu1 %v3161_v18, %s10895_s1 }
 0x4d8   : > { %3674 = vrot.lane.b32.xlu0 %v3159_v7, %s10896_s15 }
 0x4db   : > { %3604 = vrot.lane.b32.xlu1 %v3162_v20, %s10895_s1 }
 0x4dc   : > { %3678 = vrot.lane.b32.xlu0 %v3160_v11, %s10896_s15 }
 0x4df   : > { %3676 = vrot.lane.b32.xlu1 %v3161_v18, %s10896_s15 }
 0x4e0   : > { %3750 = vrot.lane.b32.xlu0 %v3159_v7, %s13565_s3 }
 0x4e3   : > { %3680 = vrot.lane.b32.xlu1 %v3162_v20, %s10896_s15 }
 0x4e4   : > { %3754 = vrot.lane.b32.xlu0 %v3160_v11, %s13565_s3 }
 0x4e7   : > { %3752 = vrot.lane.b32.xlu1 %v3161_v18, %s13565_s3 }
 0x4e8   : > { %3830 = vperm.xlu0 %10552, %v3826_v38  }
 0x4eb   : > { %3756 = vrot.lane.b32.xlu1 %v3162_v20, %s13565_s3 }
 0x4ec   : > { %10555 = vset.pattern.permute.xlu0 %v10902_v52 }
 0x4ed   : > { %3847 = vperm.xlu0 %10555, %v3827_v32  }
 0x4ef   : > { %3835 = vperm.xlu1 %10553, %v3827_v32  }
 0x4f1   : > { %10556 = vset.pattern.permute.xlu0 %v10893_v4 }
 0x4f3   : > { %10554 = vset.pattern.permute.xlu1 %v10902_v52 }
 0x4f4   : > { %3843 = vperm.xlu1 %10554, %v3826_v38  }
 0x4f8   : > { %10557 = vset.pattern.permute.xlu1 %v10893_v4 }
 0x51d   : > { %v3184_v43 = vpop.permute.xlu1 %3183 }
 0x51e   : > { %v3188_v44 = vpop.permute.xlu0 %3187 }
 0x51f   : > { %v3191_v45 = vsel %vm988_vm7, %v3184_v43, %v3188_v44  ;;  %v3193_v60 = vsel %vm988_vm7, %v3188_v44, %v3184_v43 }
 0x520   : > { %v3195_v50 = vmul.f32 %v3193_v60, %v11454_v40  ;;  %v3196_v53 = vmul.f32 %v3191_v45, %v11457_v41 }
 0x521   : > { %v3186_v25 = vpop.permute.xlu1 %3185 }
 0x522   : > { %v3164_v28 = vpop.permute.xlu0 %3163 }
 0x525   : > { %v3190_v46 = vpop.permute.xlu1 %3189 }
 0x526   : > { %v3192_v47 = vsel %vm988_vm7, %v3186_v25, %v3190_v46  ;;  %v3194_v49 = vsel %vm988_vm7, %v3190_v46, %v3186_v25  ;;  %v3168_v61 = vpop.permute.xlu0 %3167  ;;  %v10606_v46 = vld [vmem:[#allocation7] sm:$0xff]  }
 0x527   : > { %v3197_v22 = vmul.f32 %v3194_v49, %v11454_v40  ;;  %v3198_v23 = vmul.f32 %v3192_v47, %v11457_v41  ;;  %v3171_v16 = vsel %vm963_vm6, %v3164_v28, %v3168_v61  ;;  %v3173_v55 = vsel %vm963_vm6, %v3168_v61, %v3164_v28 }
 0x528   : > { %v3175_v63 = vmul.f32 %v3173_v55, %v11467_v51  ;;  %v3176_v3 = vmul.f32 %v3171_v16, %v11433_v26 }
 0x529   : > { %v3199_v48 = vpack.c.bf16 %v3197_v22, %v3195_v50  ;;  %v3166_v54 = vpop.permute.xlu1 %3165  ;;  %v3200_v14 = vpack.c.bf16 %v3198_v23, %v3196_v53 }
 0x52a   : > { %v3307_v15 = vpop.permute.xlu0 %3306 }
 0x52b   : > { %3212 = vmatprep.subr.bf16.mxu1 %v3200_v14 }
 0x52c   : > { %3213 = vmatpush1.bf16.msra.mxu1 %v3199_v48 }
 0x52d   : > { %v3170_v30 = vpop.permute.xlu1 %3169 }
 0x52e   : > { %v3172_v31 = vsel %vm963_vm6, %v3166_v54, %v3170_v30  ;;  %v3174_v56 = vsel %vm963_vm6, %v3170_v30, %v3166_v54  ;;  %v3311_v62 = vpop.permute.xlu0 %3310  ;;  %v10607_v30 = vld [vmem:[#allocation7 + $0x10] sm:$0xff]  }
 0x52f   : > { %v3177_v5 = vmul.f32 %v3174_v56, %v11467_v51  ;;  %v3178_v7 = vmul.f32 %v3172_v31, %v11433_v26  ;;  %9762 = vmatmul.mubr.msk.bf16.vlgmr.msra.gmra.mrb[8].mxu1 %vm2513_vm10, %v10605_v17  ;;  %v3314_v20 = vsel %vm1131_vm8, %v3307_v15, %v3311_v62  ;;  %v3316_v32 = vsel %vm1131_vm8, %v3311_v62, %v3307_v15 }
 0x530   : > { %3295 = vmatprep.mubr.bf16.mxu1 %v10893_v4  ;;  %v3318_v25 = vmul.f32 %v3316_v32, %v11510_v39  ;;  %v3319_v28 = vmul.f32 %v3314_v20, %v11513_v42 }
 0x531   : > { %v3179_v10 = vpack.c.bf16 %v3177_v5, %v3175_v63  ;;  %v3309_v11 = vpop.permute.xlu1 %3308  ;;  %v3180_v8 = vpack.c.bf16 %v3178_v7, %v3176_v3 }
 0x532   : > { %v3383_v18 = vpop.permute.xlu0 %3382 }
 0x533   : > { %3263 = vmatprep.subr.bf16.mxu1 %v3180_v8  ;;  %v10608_v8 = vld [vmem:[#allocation7 + $0x18] sm:$0xff]  }
 0x534   : > { %3264 = vmatpush1.bf16.msra.mxu1 %v3179_v10 }
 0x535   : > { %v3313_v38 = vpop.permute.xlu1 %3312 }
 0x536   : > { %v3315_v43 = vsel %vm1131_vm8, %v3309_v11, %v3313_v38  ;;  %v3317_v44 = vsel %vm1131_vm8, %v3313_v38, %v3309_v11  ;;  %v3387_v49 = vpop.permute.xlu0 %3386 }
 0x537   : > { %v3320_v45 = vmul.f32 %v3317_v44, %v11510_v39  ;;  %v3321_v60 = vmul.f32 %v3315_v43, %v11513_v42  ;;  %v3390_v53 = vsel %vm1219_vm9, %v3383_v18, %v3387_v49  ;;  %v3392_v15 = vsel %vm1219_vm9, %v3387_v49, %v3383_v18 }
 0x538   : > { %v3395_v48 = vmul.f32 %v3390_v53, %v11549_v2  ;;  %v3394_v31 = vmul.f32 %v3392_v15, %v11544_v0  ;;  %v10610_v15 = vld [vmem:[#allocation7 + $0x28] sm:$0xff]  }
 0x539   : > { %v3322_v47 = vpack.c.bf16 %v3320_v45, %v3318_v25  ;;  %v3385_v61 = vpop.permute.xlu1 %3384  ;;  %v3323_v50 = vpack.c.bf16 %v3321_v60, %v3319_v28  ;;  %v10609_v25 = vld [vmem:[#allocation7 + $0x20] sm:$0xff]  }
 0x53a   : > { %v3523_v56 = vpop.permute.xlu0 %3522 }
 0x53b   : > { %9764 = vmatmul.mubr.msk.bf16.vlgmr.msra.gmra.mrb[8].mxu1 %vm2513_vm10, %v10606_v46  ;;  %3335 = vmatprep.subr.bf16.mxu1 %v3323_v50 }
 0x53c   : > { %3336 = vmatpush1.bf16.msra.mxu1 %v3322_v47  ;;  %3367 = vmatprep.mubr.bf16.mxu1 %v10893_v4 }
 0x53d   : > { %v3389_v22 = vpop.permute.xlu1 %3388 }
 0x53e   : > { %v3391_v23 = vsel %vm1219_vm9, %v3385_v61, %v3389_v22  ;;  %v3393_v54 = vsel %vm1219_vm9, %v3389_v22, %v3385_v61  ;;  %v3527_v3 = vpop.permute.xlu0 %3526 }
 0x53f   : > { %v3397_v14 = vmul.f32 %v3391_v23, %v11549_v2  ;;  %v3396_v16 = vmul.f32 %v3393_v54, %v11544_v0  ;;  %v3532_v7 = vsel %vm1407_vm2, %v3527_v3, %v3523_v56  ;;  %v3530_v43 = vsel %vm1407_vm2, %v3523_v56, %v3527_v3 }
 0x540   : > { %v3535_v18 = vmul.f32 %v3532_v7, %v11362_v34  ;;  %v3534_v28 = vmul.f32 %v3530_v43, %v11359_v33  ;;  %v10612_v43 = vld [vmem:[#allocation7 + $0x38] sm:$0xff]  }
 0x541   : > { %v3399_v17 = vpack.c.bf16 %v3397_v14, %v3395_v48  ;;  %v3525_v55 = vpop.permute.xlu1 %3524  ;;  %v3398_v62 = vpack.c.bf16 %v3396_v16, %v3394_v31 }
 0x542   : > { %v3599_v20 = vpop.permute.xlu0 %3598 }
 0x543   : > { %3411 = vmatprep.subr.bf16.mxu1 %v3399_v17 }
 0x545   : > { %v3529_v63 = vpop.permute.xlu1 %3528 }
 0x546   : > { %v3533_v5 = vsel %vm1407_vm2, %v3529_v63, %v3525_v55  ;;  %v3531_v59 = vsel %vm1407_vm2, %v3525_v55, %v3529_v63 }
 0x547   : > { %9766 = vmatmul.mubr.msk.bf16.vlgmr.msra.gmra.mrb[8].mxu1 %vm2513_vm10, %v10607_v30  ;;  %v3537_v10 = vmul.f32 %v3533_v5, %v11362_v34  ;;  %v3536_v44 = vmul.f32 %v3531_v59, %v11359_v33 }
 0x548   : > { %3412 = vmatpush1.bf16.msra.mxu1 %v3398_v62  ;;  %3443 = vmatprep.mubr.bf16.mxu1 %v10893_v4 }
 0x549   : > { %3475 = vmatprep.subr.bf16.mxu1 %v3463_v29  ;;  %v3601_v11 = vpop.permute.xlu1 %3600  ;;  %v3539_v32 = vpack.c.bf16 %v3537_v10, %v3535_v18  ;;  %v3603_v29 = vpop.permute.xlu0 %3602  ;;  %v3538_v46 = vpack.c.bf16 %v3536_v44, %v3534_v28 }
 0x54a   : > { %v3608_v9 = vsel %vm1495_vm3, %v3603_v29, %v3599_v20  ;;  %v3606_v22 = vsel %vm1495_vm3, %v3599_v20, %v3603_v29 }
 0x54b   : > { %v3611_v45 = vmul.f32 %v3608_v9, %v11368_v36  ;;  %v3610_v17 = vmul.f32 %v3606_v22, %v11365_v35 }
 0x54d   : > { %v3605_v57 = vpop.permute.xlu1 %3604  ;;  %v3675_v60 = vpop.permute.xlu0 %3674 }
 0x54e   : > { %v3609_v38 = vsel %vm1495_vm3, %v3605_v57, %v3601_v11  ;;  %v3607_v61 = vsel %vm1495_vm3, %v3601_v11, %v3605_v57 }
 0x54f   : > { %v3613_v21 = vmul.f32 %v3609_v38, %v11368_v36  ;;  %v3612_v23 = vmul.f32 %v3607_v61, %v11365_v35 }
 0x551   : > { %v3615_v47 = vpack.c.bf16 %v3613_v21, %v3611_v45  ;;  %v3679_v50 = vpop.permute.xlu0 %3678  ;;  %v3614_v30 = vpack.c.bf16 %v3612_v23, %v3610_v17  ;;  %v10613_v21 = vld [vmem:[#allocation7 + $0x40] sm:$0xff]  }
 0x552   : > { %v3684_v48 = vsel %vm1583_vm4, %v3679_v50, %v3675_v60  ;;  %v3682_v5 = vsel %vm1583_vm4, %v3675_v60, %v3679_v50 }
 0x553   : > { %9768 = vmatmul.mubr.msk.bf16.vlgmr.msra.gmra.mrb[8].mxu1 %vm2513_vm10, %v10608_v8  ;;  %v3687_v16 = vmul.f32 %v3684_v48, %v11372_v37  ;;  %v10611_v8 = vld [vmem:[#allocation7 + $0x30] sm:$0xff]   ;;  %v3686_v18 = vmul.f32 %v3682_v5, %v11392_v58 }
 0x554   : > { %3476 = vmatpush1.bf16.msra.mxu1 %v3462_v24  ;;  %3507 = vmatprep.mubr.bf16.mxu1 %v10893_v4  ;;  %v3677_v24 = vpop.permute.xlu1 %3676  ;;  %v4522_v5 = vld [vmem:[%s13533_s19 + $0x8] sm:$0xff] }
 0x555   : > { %3551 = vmatprep.subr.bf16.mxu1 %v3539_v32  ;;  %v3751_v55 = vpop.permute.xlu0 %3750 }
 0x558   : > { %v3681_v49 = vpop.permute.xlu1 %3680 }
 0x559   : > { %v3685_v53 = vsel %vm1583_vm4, %v3681_v49, %v3677_v24  ;;  %v3683_v62 = vsel %vm1583_vm4, %v3677_v24, %v3681_v49  ;;  %v3755_v63 = vpop.permute.xlu0 %3754 }
 0x55a   : > { %v3689_v54 = vmul.f32 %v3685_v53, %v11372_v37  ;;  %v3688_v7 = vmul.f32 %v3683_v62, %v11392_v58  ;;  %v3760_v10 = vsel %vm1671_vm5, %v3755_v63, %v3751_v55  ;;  %v3758_v29 = vsel %vm1671_vm5, %v3751_v55, %v3755_v63 }
 0x55b   : > { %v3763_v20 = vmul.f32 %v3760_v10, %v11405_v1  ;;  %v3762_v44 = vmul.f32 %v3758_v29, %v11417_v19 }
 0x55c   : > { %v3753_v14 = vpop.permute.xlu1 %3752  ;;  %v3691_v31 = vpack.c.bf16 %v3689_v54, %v3687_v16  ;;  %v3690_v32 = vpack.c.bf16 %v3688_v7, %v3686_v18  ;;  %v4521_v7 = vld [vmem:[%s13533_s19] sm:$0xff] }
 0x55f   : > { %9770 = vmatmul.mubr.msk.bf16.vlgmr.msra.gmra.mrb[8].mxu1 %vm2513_vm10, %v10609_v25 }
 0x560   : > { %3552 = vmatpush1.bf16.msra.mxu1 %v3538_v46  ;;  %3583 = vmatprep.mubr.bf16.mxu1 %v10893_v4  ;;  %v3757_v56 = vpop.permute.xlu1 %3756 }
 0x561   : > { %3627 = vmatprep.subr.bf16.mxu1 %v3615_v47  ;;  %v3761_v3 = vsel %vm1671_vm5, %v3757_v56, %v3753_v14  ;;  %v3759_v59 = vsel %vm1671_vm5, %v3753_v14, %v3757_v56 }
 0x562   : > { %v3765_v11 = vmul.f32 %v3761_v3, %v11405_v1  ;;  %v3764_v38 = vmul.f32 %v3759_v59, %v11417_v19 }
 0x564   : > { %v3767_v57 = vpack.c.bf16 %v3765_v11, %v3763_v20  ;;  %v3766_v9 = vpack.c.bf16 %v3764_v38, %v3762_v44 }
 0x567   : > { %v3831_v25 = vpop.permute.xlu0 %3830 }
 0x56b   : > { %9772 = vmatmul.mubr.msk.bf16.vlgmr.msra.gmra.mrb[8].mxu1 %vm2513_vm10, %v10610_v15 }
 0x56c   : > { %3628 = vmatpush1.bf16.msra.mxu1 %v3614_v30  ;;  %3659 = vmatprep.mubr.bf16.mxu1 %v10893_v4  ;;  %v3848_v61 = vpop.permute.xlu0 %3847 }
 0x56d   : > { %3703 = vmatprep.subr.bf16.mxu1 %v3691_v31 }
 0x56e   : > { %v3836_v24 = vpop.permute.xlu1 %3835 }
 0x573   : > { %v3844_v45 = vpop.permute.xlu1 %3843 }
 0x577   : > { %9774 = vmatmul.mubr.msk.bf16.vlgmr.msra.gmra.mrb[8].mxu1 %vm2513_vm10, %v10611_v8 }
 0x578   : > { %3704 = vmatpush1.bf16.msra.mxu1 %v3690_v32  ;;  %3735 = vmatprep.mubr.bf16.mxu1 %v10893_v4 }
 0x579   : > { %3779 = vmatprep.subr.bf16.mxu1 %v3767_v57 }
 0x583   : > { %9776 = vmatmul.mubr.msk.bf16.vlgmr.msra.gmra.mrb[8].mxu1 %vm2513_vm10, %v10612_v43 }
 0x584   : > { %3780 = vmatpush1.bf16.msra.mxu1 %v3766_v9  ;;  %3811 = vmatprep.mubr.bf16.mxu1 %v10893_v4 }
 0x58f   : > { %9778 = vmatmul.mubr.msk.bf16.vlgmr.msra.gmra.mrb[8].mxu1 %vm2513_vm10, %v10613_v21 }
 0x590   : > { %4627 = vmatprep.mubr.bf16.mxu1 %v10893_v4 }
 0x662   : > { %v3813_v28 = vpop.f32.mrb[8].mxu1 }
 0x663   : > { %v3838_v60 = vmul.f32 %v3831_v25, %v3813_v28  ;;  %v3815_v46 = vpop.f32.mrb[9].mxu1 }
 0x664   : > { %v3839_v47 = vmul.f32 %v3831_v25, %v3815_v46  ;;  %v3817_v49 = vpop.f32.mrb[10].mxu1 }
 0x665   : > { %v3850_v50 = vadd.f32 %v3844_v45, %v3838_v60  ;;  %v3840_v53 = vmul.f32 %v3836_v24, %v3817_v49  ;;  %v3819_v22 = vpop.f32.mrb[11].mxu1  ;;  %v10614_v60 = vld [vmem:[%s13610_s13 + $0x8] sm:$0xff]  }
 0x666   : > { %v3851_v23 = vadd.f32 %v3844_v45, %v3839_v47  ;;  %v3841_v48 = vmul.f32 %v3836_v24, %v3819_v22 }
 0x667   : > { %v3854_v54 = vmax.f32 %v3850_v50, 0.0  ;;  %v3852_v14 = vadd.f32 %v3848_v61, %v3840_v53 }
 0x668   : > { %v3855_v15 = vmax.f32 %v3851_v23, 0.0  ;;  %v3853_v17 = vadd.f32 %v3848_v61, %v3841_v48 }
 0x669   : > { %v3856_v16 = vmax.f32 %v3852_v14, 0.0  ;;  %3878 = vrot.lane.b32.xlu1 %v3854_v54, %s10899_s11  ;;  %v12011_v30 = vmul.f32 %v3854_v54, %v11292_v12 }
 0x66a   : > { %v3857_v55 = vmax.f32 %v3853_v17, 0.0  ;;  %3882 = vrot.lane.b32.xlu0 %v3855_v15, %s10899_s11  ;;  %v12017_v56 = vmul.f32 %v3855_v15, %v11295_v13 }
 0x66b   : > { %v12014_v31 = vmul.f32 %v3856_v16, %v11292_v12 }
 0x66c   : > { %v12020_v62 = vmul.f32 %v3857_v55, %v11295_v13 }
 0x66d   : > { %3880 = vrot.lane.b32.xlu1 %v3856_v16, %s10899_s11  ;;  %v4157_v63 = vpack.c.bf16 %v12014_v31, %v12011_v30 }
 0x66e   : > { %3858 = vrot.lane.b32.xlu0 %v3854_v54, %s10898_s2  ;;  %v4158_v3 = vpack.c.bf16 %v12020_v62, %v12017_v56 }
 0x671   : > { %3884 = vrot.lane.b32.xlu1 %v3857_v55, %s10899_s11 }
 0x672   : > { %3862 = vrot.lane.b32.xlu0 %v3855_v15, %s10898_s2 }
 0x675   : > { %3860 = vrot.lane.b32.xlu1 %v3856_v16, %s10898_s2 }
 0x676   : > { %4001 = vrot.lane.b32.xlu0 %v3854_v54, %s10900_s8 }
 0x679   : > { %3864 = vrot.lane.b32.xlu1 %v3857_v55, %s10898_s2 }
 0x67a   : > { %4005 = vrot.lane.b32.xlu0 %v3855_v15, %s10900_s8 }
 0x67d   : > { %4003 = vrot.lane.b32.xlu1 %v3856_v16, %s10900_s8 }
 0x67e   : > { %4077 = vrot.lane.b32.xlu0 %v3854_v54, %s10901_s0 }
 0x681   : > { %4007 = vrot.lane.b32.xlu1 %v3857_v55, %s10900_s8 }
 0x682   : > { %4081 = vrot.lane.b32.xlu0 %v3855_v15, %s10901_s0 }
 0x685   : > { %4079 = vrot.lane.b32.xlu1 %v3856_v16, %s10901_s0 }
 0x686   : > { %4217 = vrot.lane.b32.xlu0 %v3854_v54, %s10894_s7 }
 0x689   : > { %4083 = vrot.lane.b32.xlu1 %v3857_v55, %s10901_s0 }
 0x68a   : > { %4221 = vrot.lane.b32.xlu0 %v3855_v15, %s10894_s7 }
 0x68d   : > { %4219 = vrot.lane.b32.xlu1 %v3856_v16, %s10894_s7 }
 0x68e   : > { %4293 = vrot.lane.b32.xlu0 %v3854_v54, %s10895_s1 }
 0x691   : > { %4223 = vrot.lane.b32.xlu1 %v3857_v55, %s10894_s7 }
 0x692   : > { %4297 = vrot.lane.b32.xlu0 %v3855_v15, %s10895_s1 }
 0x695   : > { %4295 = vrot.lane.b32.xlu1 %v3856_v16, %s10895_s1 }
 0x696   : > { %4369 = vrot.lane.b32.xlu0 %v3854_v54, %s10896_s15 }
 0x699   : > { %4299 = vrot.lane.b32.xlu1 %v3857_v55, %s10895_s1 }
 0x69a   : > { %4373 = vrot.lane.b32.xlu0 %v3855_v15, %s10896_s15 }
 0x69d   : > { %4371 = vrot.lane.b32.xlu1 %v3856_v16, %s10896_s15 }
 0x69e   : > { %4445 = vrot.lane.b32.xlu0 %v3854_v54, %s13565_s3 }
 0x6a1   : > { %4375 = vrot.lane.b32.xlu1 %v3857_v55, %s10896_s15 }
 0x6a2   : > { %4449 = vrot.lane.b32.xlu0 %v3855_v15, %s13565_s3 }
 0x6a5   : > { %4447 = vrot.lane.b32.xlu1 %v3856_v16, %s13565_s3 }
 0x6a6   : > { %4525 = vperm.xlu0 %10556, %v4521_v7  }
 0x6a9   : > { %4451 = vrot.lane.b32.xlu1 %v3857_v55, %s13565_s3 }
 0x6aa   : > { %10559 = vset.pattern.permute.xlu0 %v10902_v52 }
 0x6ab   : > { %4542 = vperm.xlu0 %10559, %v4522_v5  }
 0x6ad   : > { %4530 = vperm.xlu1 %10557, %v4522_v5  }
 0x6af   : > { %10560 = vset.pattern.permute.xlu0 %v10893_v4 }
 0x6b1   : > { %10558 = vset.pattern.permute.xlu1 %v10902_v52 }
 0x6b2   : > { %4538 = vperm.xlu1 %10558, %v4521_v7  }
 0x6db   : > { %v3879_v10 = vpop.permute.xlu1 %3878 }
 0x6dc   : > { %v3883_v11 = vpop.permute.xlu0 %3882 }
 0x6dd   : > { %v3886_v20 = vsel %vm988_vm7, %v3879_v10, %v3883_v11  ;;  %v3888_v32 = vsel %vm988_vm7, %v3883_v11, %v3879_v10 }
 0x6de   : > { %v3890_v43 = vmul.f32 %v3888_v32, %v11454_v40  ;;  %v3891_v44 = vmul.f32 %v3886_v20, %v11457_v41 }
 0x6df   : > { %v3881_v8 = vpop.permute.xlu1 %3880 }
 0x6e0   : > { %v3859_v18 = vpop.permute.xlu0 %3858 }
 0x6e3   : > { %v3885_v57 = vpop.permute.xlu1 %3884 }
 0x6e4   : > { %v3887_v59 = vsel %vm988_vm7, %v3881_v8, %v3885_v57  ;;  %v3889_v29 = vsel %vm988_vm7, %v3885_v57, %v3881_v8  ;;  %v3863_v38 = vpop.permute.xlu0 %3862  ;;  %v10615_v57 = vld [vmem:[%s13610_s13] sm:$0xff]  }
 0x6e5   : > { %v3892_v9 = vmul.f32 %v3889_v29, %v11454_v40  ;;  %v3893_v21 = vmul.f32 %v3887_v59, %v11457_v41  ;;  %v3866_v46 = vsel %vm963_vm6, %v3859_v18, %v3863_v38  ;;  %v3868_v47 = vsel %vm963_vm6, %v3863_v38, %v3859_v18 }
 0x6e6   : > { %v3870_v22 = vmul.f32 %v3868_v47, %v11467_v51  ;;  %v3871_v23 = vmul.f32 %v3866_v46, %v11433_v26 }
 0x6e7   : > { %v3894_v24 = vpack.c.bf16 %v3892_v9, %v3890_v43  ;;  %v3861_v25 = vpop.permute.xlu1 %3860  ;;  %v3895_v28 = vpack.c.bf16 %v3893_v21, %v3891_v44 }
 0x6e8   : > { %v4002_v45 = vpop.permute.xlu0 %4001 }
 0x6e9   : > { %3907 = vmatprep.subr.bf16.mxu0 %v3895_v28 }
 0x6ea   : > { %3908 = vmatpush1.bf16.msra.mxu0 %v3894_v24 }
 0x6eb   : > { %v3865_v49 = vpop.permute.xlu1 %3864 }
 0x6ec   : > { %v3867_v61 = vsel %vm963_vm6, %v3861_v25, %v3865_v49  ;;  %v3869_v50 = vsel %vm963_vm6, %v3865_v49, %v3861_v25  ;;  %v4006_v53 = vpop.permute.xlu0 %4005  ;;  %v10616_v49 = vld [vmem:[%s13610_s13 + $0x10] sm:$0xff]  }
 0x6ed   : > { %v3872_v48 = vmul.f32 %v3869_v50, %v11467_v51  ;;  %v3873_v54 = vmul.f32 %v3867_v61, %v11433_v26  ;;  %9782 = vmatmul.mubr.msk.bf16.vlgmr.msra.gmra.mrb[4].mxu0 %vm2513_vm10, %v10614_v60  ;;  %v4009_v55 = vsel %vm1131_vm8, %v4002_v45, %v4006_v53  ;;  %v4011_v5 = vsel %vm1131_vm8, %v4006_v53, %v4002_v45 }
 0x6ee   : > { %3990 = vmatprep.mubr.bf16.mxu0 %v10893_v4  ;;  %v4013_v8 = vmul.f32 %v4011_v5, %v11510_v39  ;;  %v4014_v18 = vmul.f32 %v4009_v55, %v11513_v42 }
 0x6ef   : > { %v3874_v14 = vpack.c.bf16 %v3872_v48, %v3870_v22  ;;  %v4004_v15 = vpop.permute.xlu1 %4003  ;;  %v3875_v17 = vpack.c.bf16 %v3873_v54, %v3871_v23 }
 0x6f0   : > { %v4078_v16 = vpop.permute.xlu0 %4077 }
 0x6f1   : > { %3958 = vmatprep.subr.bf16.mxu0 %v3875_v17  ;;  %v10617_v17 = vld [vmem:[%s13610_s13 + $0x18] sm:$0xff]  }
 0x6f2   : > { %3959 = vmatpush1.bf16.msra.mxu0 %v3874_v14 }
 0x6f3   : > { %v4008_v7 = vpop.permute.xlu1 %4007 }
 0x6f4   : > { %v4010_v10 = vsel %vm1131_vm8, %v4004_v15, %v4008_v7  ;;  %v4012_v11 = vsel %vm1131_vm8, %v4008_v7, %v4004_v15  ;;  %v4082_v29 = vpop.permute.xlu0 %4081 }
 0x6f5   : > { %v4015_v20 = vmul.f32 %v4012_v11, %v11510_v39  ;;  %v4016_v32 = vmul.f32 %v4010_v10, %v11513_v42  ;;  %v4085_v44 = vsel %vm1219_vm9, %v4078_v16, %v4082_v29  ;;  %v4087_v45 = vsel %vm1219_vm9, %v4082_v29, %v4078_v16 }
 0x6f6   : > { %v4090_v24 = vmul.f32 %v4085_v44, %v11549_v2  ;;  %v4089_v61 = vmul.f32 %v4087_v45, %v11544_v0  ;;  %v10619_v45 = vld [vmem:[%s13610_s13 + $0x28] sm:$0xff]  }
 0x6f7   : > { %v4017_v59 = vpack.c.bf16 %v4015_v20, %v4013_v8  ;;  %v4080_v38 = vpop.permute.xlu1 %4079  ;;  %v4018_v43 = vpack.c.bf16 %v4016_v32, %v4014_v18  ;;  %v10618_v8 = vld [vmem:[%s13610_s13 + $0x20] sm:$0xff]  }
 0x6f8   : > { %v4218_v50 = vpop.permute.xlu0 %4217 }
 0x6f9   : > { %9784 = vmatmul.mubr.msk.bf16.vlgmr.msra.gmra.mrb[4].mxu0 %vm2513_vm10, %v10615_v57  ;;  %4030 = vmatprep.subr.bf16.mxu0 %v4018_v43 }
 0x6fa   : > { %4031 = vmatpush1.bf16.msra.mxu0 %v4017_v59  ;;  %4062 = vmatprep.mubr.bf16.mxu0 %v10893_v4 }
 0x6fb   : > { %v4084_v9 = vpop.permute.xlu1 %4083 }
 0x6fc   : > { %v4086_v21 = vsel %vm1219_vm9, %v4080_v38, %v4084_v9  ;;  %v4088_v25 = vsel %vm1219_vm9, %v4084_v9, %v4080_v38  ;;  %v4222_v23 = vpop.permute.xlu0 %4221 }
 0x6fd   : > { %v4092_v28 = vmul.f32 %v4086_v21, %v11549_v2  ;;  %v4091_v46 = vmul.f32 %v4088_v25, %v11544_v0  ;;  %v4227_v54 = vsel %vm1407_vm2, %v4222_v23, %v4218_v50  ;;  %v4225_v10 = vsel %vm1407_vm2, %v4218_v50, %v4222_v23 }
 0x6fe   : > { %v4230_v16 = vmul.f32 %v4227_v54, %v11362_v34  ;;  %v4229_v18 = vmul.f32 %v4225_v10, %v11359_v33  ;;  %v10621_v10 = vld [vmem:[%s13610_s13 + $0x38] sm:$0xff]  }
 0x6ff   : > { %v4094_v60 = vpack.c.bf16 %v4092_v28, %v4090_v24  ;;  %v4220_v47 = vpop.permute.xlu1 %4219  ;;  %v4093_v53 = vpack.c.bf16 %v4091_v46, %v4089_v61 }
 0x700   : > { %v4294_v55 = vpop.permute.xlu0 %4293 }
 0x701   : > { %4106 = vmatprep.subr.bf16.mxu0 %v4094_v60 }
 0x703   : > { %v4224_v22 = vpop.permute.xlu1 %4223 }
 0x704   : > { %v4228_v48 = vsel %vm1407_vm2, %v4224_v22, %v4220_v47  ;;  %v4298_v5 = vpop.permute.xlu0 %4297 }
 0x705   : > { %9788 = vmatmul.mubr.msk.bf16.vlgmr.msra.gmra.mrb[4].mxu0 %vm2513_vm10, %v10616_v49  ;;  %v4232_v14 = vmul.f32 %v4228_v48, %v11362_v34  ;;  %v4303_v30 = vsel %vm1495_vm3, %v4298_v5, %v4294_v55  ;;  %v4301_v9 = vsel %vm1495_vm3, %v4294_v55, %v4298_v5 }
 0x706   : > { %4107 = vmatpush1.bf16.msra.mxu0 %v4093_v53  ;;  %4138 = vmatprep.mubr.bf16.mxu0 %v10893_v4  ;;  %v4306_v20 = vmul.f32 %v4303_v30, %v11368_v36  ;;  %v4305_v60 = vmul.f32 %v4301_v9, %v11365_v35 }
 0x707   : > { %4170 = vmatprep.subr.bf16.mxu0 %v4158_v3  ;;  %v4296_v15 = vpop.permute.xlu1 %4295  ;;  %v4234_v56 = vpack.c.bf16 %v4232_v14, %v4230_v16  ;;  %v4226_v3 = vsel %vm1407_vm2, %v4220_v47, %v4224_v22 }
 0x708   : > { %v4231_v11 = vmul.f32 %v4226_v3, %v11359_v33  ;;  %v4370_v32 = vpop.permute.xlu0 %4369 }
 0x70a   : > { %v4233_v57 = vpack.c.bf16 %v4231_v11, %v4229_v18 }
 0x70b   : > { %v4300_v62 = vpop.permute.xlu1 %4299 }
 0x70c   : > { %v4304_v7 = vsel %vm1495_vm3, %v4300_v62, %v4296_v15  ;;  %v4302_v38 = vsel %vm1495_vm3, %v4296_v15, %v4300_v62  ;;  %v4374_v43 = vpop.permute.xlu0 %4373 }
 0x70d   : > { %v4308_v31 = vmul.f32 %v4304_v7, %v11368_v36  ;;  %v4307_v21 = vmul.f32 %v4302_v38, %v11365_v35  ;;  %v4379_v24 = vsel %vm1583_vm4, %v4374_v43, %v4370_v32  ;;  %v4377_v48 = vsel %vm1583_vm4, %v4370_v32, %v4374_v43 }
 0x70e   : > { %v4382_v46 = vmul.f32 %v4379_v24, %v11372_v37  ;;  %v4381_v16 = vmul.f32 %v4377_v48, %v11392_v58  ;;  %v5130_v48 = vld [vmem:[%s13534_s20] sm:$0x3] }
 0x70f   : > { %v4310_v59 = vpack.c.bf16 %v4308_v31, %v4306_v20  ;;  %v4309_v49 = vpack.c.bf16 %v4307_v21, %v4305_v60  ;;  %v10622_v31 = vld [vmem:[%s13610_s13 + $0x40] sm:$0xff]  }
 0x710   : > { %v4446_v47 = vpop.permute.xlu0 %4445 }
 0x711   : > { %9792 = vmatmul.mubr.msk.bf16.vlgmr.msra.gmra.mrb[4].mxu0 %vm2513_vm10, %v10617_v17  ;;  %v10620_v17 = vld [vmem:[%s13610_s13 + $0x30] sm:$0xff]  }
 0x712   : > { %4171 = vmatpush1.bf16.msra.mxu0 %v4157_v63  ;;  %4202 = vmatprep.mubr.bf16.mxu0 %v10893_v4  ;;  %v4372_v63 = vpop.permute.xlu1 %4371 }
 0x713   : > { %4246 = vmatprep.subr.bf16.mxu0 %v4234_v56 }
 0x714   : > { %v4450_v22 = vpop.permute.xlu0 %4449 }
 0x715   : > { %v4455_v14 = vsel %vm1671_vm5, %v4450_v22, %v4446_v47  ;;  %v4453_v5 = vsel %vm1671_vm5, %v4446_v47, %v4450_v22 }
 0x716   : > { %v4376_v29 = vpop.permute.xlu1 %4375  ;;  %v4458_v55 = vmul.f32 %v4455_v14, %v11405_v1  ;;  %v4457_v11 = vmul.f32 %v4453_v5, %v11417_v19 }
 0x717   : > { %v4380_v44 = vsel %vm1583_vm4, %v4376_v29, %v4372_v63  ;;  %v4378_v53 = vsel %vm1583_vm4, %v4372_v63, %v4376_v29 }
 0x718   : > { %v4384_v25 = vmul.f32 %v4380_v44, %v11372_v37  ;;  %v4383_v54 = vmul.f32 %v4378_v53, %v11392_v58 }
 0x71a   : > { %v4448_v28 = vpop.permute.xlu1 %4447  ;;  %v4386_v61 = vpack.c.bf16 %v4384_v25, %v4382_v46  ;;  %v4385_v56 = vpack.c.bf16 %v4383_v54, %v4381_v16 }
 0x71d   : > { %9796 = vmatmul.mubr.msk.bf16.vlgmr.msra.gmra.mrb[4].mxu0 %vm2513_vm10, %v10618_v8 }
 0x71e   : > { %4247 = vmatpush1.bf16.msra.mxu0 %v4233_v57  ;;  %4278 = vmatprep.mubr.bf16.mxu0 %v10893_v4  ;;  %v4452_v50 = vpop.permute.xlu1 %4451 }
 0x71f   : > { %4322 = vmatprep.subr.bf16.mxu0 %v4310_v59  ;;  %v4456_v23 = vsel %vm1671_vm5, %v4452_v50, %v4448_v28  ;;  %v4454_v3 = vsel %vm1671_vm5, %v4448_v28, %v4452_v50 }
 0x720   : > { %v4460_v15 = vmul.f32 %v4456_v23, %v11405_v1  ;;  %v4459_v7 = vmul.f32 %v4454_v3, %v11417_v19 }
 0x722   : > { %v4462_v62 = vpack.c.bf16 %v4460_v15, %v4458_v55  ;;  %v4461_v30 = vpack.c.bf16 %v4459_v7, %v4457_v11 }
 0x725   : > { %v4526_v8 = vpop.permute.xlu0 %4525 }
 0x729   : > { %9800 = vmatmul.mubr.msk.bf16.vlgmr.msra.gmra.mrb[4].mxu0 %vm2513_vm10, %v10619_v45 }
 0x72a   : > { %4323 = vmatpush1.bf16.msra.mxu0 %v4309_v49  ;;  %4354 = vmatprep.mubr.bf16.mxu0 %v10893_v4  ;;  %v4543_v38 = vpop.permute.xlu0 %4542 }
 0x72b   : > { %4398 = vmatprep.subr.bf16.mxu0 %v4386_v61 }
 0x72c   : > { %v4531_v63 = vpop.permute.xlu1 %4530 }
 0x731   : > { %v4539_v20 = vpop.permute.xlu1 %4538 }
 0x735   : > { %9804 = vmatmul.mubr.msk.bf16.vlgmr.msra.gmra.mrb[4].mxu0 %vm2513_vm10, %v10620_v17 }
 0x736   : > { %4399 = vmatpush1.bf16.msra.mxu0 %v4385_v56  ;;  %4430 = vmatprep.mubr.bf16.mxu0 %v10893_v4 }
 0x737   : > { %4474 = vmatprep.subr.bf16.mxu0 %v4462_v62 }
 0x741   : > { %9808 = vmatmul.mubr.msk.bf16.vlgmr.msra.gmra.mrb[4].mxu0 %vm2513_vm10, %v10621_v10 }
 0x742   : > { %4475 = vmatpush1.bf16.msra.mxu0 %v4461_v30  ;;  %4506 = vmatprep.mubr.bf16.mxu0 %v10893_v4 }
 0x74d   : > { %9812 = vmatmul.mubr.msk.bf16.vlgmr.msra.gmra.mrb[4].mxu0 %vm2513_vm10, %v10622_v31 }
 0x74e   : > { %5221 = vmatprep.mubr.bf16.mxu0 %v10893_v4 }
 0x820   : > { %v4508_v18 = vpop.f32.mrb[4].mxu0 }
 0x821   : > { %v4533_v32 = vmul.f32 %v4526_v8, %v4508_v18  ;;  %v4510_v57 = vpop.f32.mrb[5].mxu0 }
 0x822   : > { %v4534_v59 = vmul.f32 %v4526_v8, %v4510_v57  ;;  %v4512_v29 = vpop.f32.mrb[6].mxu0  ;;  %v4591_v57 = vld [vmem:[#allocation9 + $0x1] sm:$0x1] }
 0x823   : > { %v4545_v43 = vadd.f32 %v4539_v20, %v4533_v32  ;;  %v4535_v44 = vmul.f32 %v4531_v63, %v4512_v29  ;;  %v4514_v9 = vpop.f32.mrb[7].mxu0 }
 0x824   : > { %v4546_v21 = vadd.f32 %v4539_v20, %v4534_v59  ;;  %v4536_v24 = vmul.f32 %v4531_v63, %v4514_v9 }
 0x825   : > { %v4549_v25 = vmax.f32 %v4545_v43, 0.0  ;;  %v4547_v28 = vadd.f32 %v4543_v38, %v4535_v44 }
 0x826   : > { %v4550_v45 = vmax.f32 %v4546_v21, 0.0  ;;  %v4548_v60 = vadd.f32 %v4543_v38, %v4536_v24 }
 0x827   : > { %v4551_v46 = vmax.f32 %v4547_v28, 0.0  ;;  %4572 = vrot.lane.b32.xlu1 %v4549_v25, %s10899_s11  ;;  %v4812_v49 = vmul.f32 %v4549_v25, %v11292_v12 }
 0x828   : > { %v4552_v47 = vmax.f32 %v4548_v60, 0.0  ;;  %4576 = vrot.lane.b32.xlu0 %v4550_v45, %s10899_s11  ;;  %v4813_v50 = vmul.f32 %v4550_v45, %v11295_v13 }
 0x829   : > { %v4814_v61 = vmul.f32 %v4551_v46, %v11292_v12 }
 0x82a   : > { %v4815_v53 = vmul.f32 %v4552_v47, %v11295_v13 }
 0x82b   : > { %4574 = vrot.lane.b32.xlu1 %v4551_v46, %s10899_s11  ;;  %v12219_v22 = vpack.c.bf16 %v4814_v61, %v4812_v49 }
 0x82c   : > { %4553 = vrot.lane.b32.xlu0 %v4549_v25, %s10898_s2  ;;  %v12222_v23 = vpack.c.bf16 %v4815_v53, %v4813_v50 }
 0x82f   : > { %4578 = vrot.lane.b32.xlu1 %v4552_v47, %s10899_s11 }
 0x830   : > { %4557 = vrot.lane.b32.xlu0 %v4550_v45, %s10898_s2 }
 0x833   : > { %4555 = vrot.lane.b32.xlu1 %v4551_v46, %s10898_s2 }
 0x834   : > { %4680 = vrot.lane.b32.xlu0 %v4549_v25, %s10900_s8 }
 0x837   : > { %4559 = vrot.lane.b32.xlu1 %v4552_v47, %s10898_s2 }
 0x838   : > { %4684 = vrot.lane.b32.xlu0 %v4550_v45, %s10900_s8 }
 0x83b   : > { %4682 = vrot.lane.b32.xlu1 %v4551_v46, %s10900_s8 }
 0x83c   : > { %4746 = vrot.lane.b32.xlu0 %v4549_v25, %s10901_s0 }
 0x83f   : > { %4686 = vrot.lane.b32.xlu1 %v4552_v47, %s10900_s8 }
 0x840   : > { %4750 = vrot.lane.b32.xlu0 %v4550_v45, %s10901_s0 }
 0x843   : > { %4748 = vrot.lane.b32.xlu1 %v4551_v46, %s10901_s0 }
 0x844   : > { %4866 = vrot.lane.b32.xlu0 %v4549_v25, %s10894_s7 }
 0x847   : > { %4752 = vrot.lane.b32.xlu1 %v4552_v47, %s10901_s0 }
 0x848   : > { %4870 = vrot.lane.b32.xlu0 %v4550_v45, %s10894_s7 }
 0x84b   : > { %4868 = vrot.lane.b32.xlu1 %v4551_v46, %s10894_s7 }
 0x84c   : > { %4932 = vrot.lane.b32.xlu0 %v4549_v25, %s10895_s1 }
 0x84f   : > { %4872 = vrot.lane.b32.xlu1 %v4552_v47, %s10894_s7 }
 0x850   : > { %4936 = vrot.lane.b32.xlu0 %v4550_v45, %s10895_s1 }
 0x853   : > { %4934 = vrot.lane.b32.xlu1 %v4551_v46, %s10895_s1 }
 0x854   : > { %4998 = vrot.lane.b32.xlu0 %v4549_v25, %s10896_s15 }
 0x857   : > { %4938 = vrot.lane.b32.xlu1 %v4552_v47, %s10895_s1 }
 0x858   : > { %5002 = vrot.lane.b32.xlu0 %v4550_v45, %s10896_s15 }
 0x85b   : > { %5000 = vrot.lane.b32.xlu1 %v4551_v46, %s10896_s15 }
 0x85c   : > { %5064 = vrot.lane.b32.xlu0 %v4549_v25, %s13565_s3 }
 0x85f   : > { %5004 = vrot.lane.b32.xlu1 %v4552_v47, %s10896_s15 }
 0x860   : > { %5068 = vrot.lane.b32.xlu0 %v4550_v45, %s13565_s3 }
 0x863   : > { %5066 = vrot.lane.b32.xlu1 %v4551_v46, %s13565_s3 }
 0x864   : > { %5133 = vperm.xlu0 %10560, %v5130_v48  }
 0x867   : > { %5070 = vrot.lane.b32.xlu1 %v4552_v47, %s13565_s3 }
 0x868   : > { %10562 = vset.pattern.permute.xlu0 %v10902_v52 }
 0x86b   : > { %5139 = vperm.xlu1 %10558, %v5130_v48  }
 0x86f   : > { %10561 = vset.pattern.permute.xlu1 %v10893_v4 }
 0x899   : > { %v4573_v54 = vpop.permute.xlu1 %4572 }
 0x89a   : > { %v4577_v14 = vpop.permute.xlu0 %4576 }
 0x89b   : > { %v4580_v16 = vsel %vm988_vm7, %v4573_v54, %v4577_v14  ;;  %v4582_v55 = vsel %vm988_vm7, %v4577_v14, %v4573_v54 }
 0x89c   : > { %v4584_v7 = vmul.f32 %v4582_v55, %v11454_v40  ;;  %v4585_v10 = vmul.f32 %v4580_v16, %v11457_v41 }
 0x89d   : > { %v4575_v15 = vpop.permute.xlu1 %4574 }
 0x89e   : > { %v4554_v17 = vpop.permute.xlu0 %4553 }
 0x8a1   : > { %v4579_v56 = vpop.permute.xlu1 %4578 }
 0x8a2   : > { %v4581_v62 = vsel %vm988_vm7, %v4575_v15, %v4579_v56  ;;  %v4583_v3 = vsel %vm988_vm7, %v4579_v56, %v4575_v15  ;;  %v4558_v5 = vpop.permute.xlu0 %4557  ;;  %v4571_v15 = vld [vmem:[#allocation9] sm:$0x1] }
 0x8a3   : > { %v4586_v11 = vmul.f32 %v4583_v3, %v11454_v40  ;;  %v4587_v30 = vmul.f32 %v4581_v62, %v11457_v41  ;;  %v4561_v20 = vsel %vm963_vm6, %v4554_v17, %v4558_v5  ;;  %v4563_v32 = vsel %vm963_vm6, %v4558_v5, %v4554_v17 }
 0x8a4   : > { %v4565_v44 = vmul.f32 %v4563_v32, %v11467_v51  ;;  %v4566_v9 = vmul.f32 %v4561_v20, %v11433_v26 }
 0x8a5   : > { %v12269_v31 = vpack.c.bf16 %v4586_v11, %v4584_v7  ;;  %v4556_v63 = vpop.permute.xlu1 %4555  ;;  %v12271_v8 = vpack.c.bf16 %v4587_v30, %v4585_v10 }
 0x8a6   : > { %v4681_v18 = vpop.permute.xlu0 %4680 }
 0x8a7   : > { %4595 = vmatprep.subr.bf16.mxu1 %v12271_v8 }
 0x8a8   : > { %4596 = vmatpush1.bf16.msra.mxu1 %v12269_v31 }
 0x8a9   : > { %v4560_v59 = vpop.permute.xlu1 %4559 }
 0x8aa   : > { %v4562_v29 = vsel %vm963_vm6, %v4556_v63, %v4560_v59  ;;  %v4564_v38 = vsel %vm963_vm6, %v4560_v59, %v4556_v63  ;;  %v4685_v43 = vpop.permute.xlu0 %4684 }
 0x8ab   : > { %v4567_v21 = vmul.f32 %v4564_v38, %v11467_v51  ;;  %v4568_v24 = vmul.f32 %v4562_v29, %v11433_v26  ;;  %9813 = vmatmul.mubr.msk.bf16.vlgmr.msra.gmra.mrb[12].mxu1 %vm2513_vm10, %v4591_v57  ;;  %v4688_v46 = vsel %vm1131_vm8, %v4681_v18, %v4685_v43  ;;  %v4690_v47 = vsel %vm1131_vm8, %v4685_v43, %v4681_v18  ;;  %v4699_v57 = vld [vmem:[#allocation9 + $0x2] sm:$0x1] }
 0x8ac   : > { %4671 = vmatprep.mubr.bf16.mxu1 %v10893_v4  ;;  %v4692_v53 = vmul.f32 %v4690_v47, %v11510_v39  ;;  %v4693_v48 = vmul.f32 %v4688_v46, %v11513_v42 }
 0x8ad   : > { %v12289_v25 = vpack.c.bf16 %v4567_v21, %v4565_v44  ;;  %v4683_v28 = vpop.permute.xlu1 %4682  ;;  %v12291_v45 = vpack.c.bf16 %v4568_v24, %v4566_v9 }
 0x8ae   : > { %v4747_v60 = vpop.permute.xlu0 %4746 }
 0x8af   : > { %4639 = vmatprep.subr.bf16.mxu1 %v12291_v45 }
 0x8b0   : > { %4640 = vmatpush1.bf16.msra.mxu1 %v12289_v25 }
 0x8b1   : > { %v4687_v49 = vpop.permute.xlu1 %4686 }
 0x8b2   : > { %v4689_v61 = vsel %vm1131_vm8, %v4683_v28, %v4687_v49  ;;  %v4691_v50 = vsel %vm1131_vm8, %v4687_v49, %v4683_v28  ;;  %v4751_v16 = vpop.permute.xlu0 %4750  ;;  %v4765_v28 = vld [vmem:[#allocation9 + $0x3] sm:$0x1] }
 0x8b3   : > { %v4694_v54 = vmul.f32 %v4691_v50, %v11510_v39  ;;  %v4695_v14 = vmul.f32 %v4689_v61, %v11513_v42  ;;  %v4754_v62 = vsel %vm1219_vm9, %v4747_v60, %v4751_v16  ;;  %v4756_v30 = vsel %vm1219_vm9, %v4751_v16, %v4747_v60 }
 0x8b4   : > { %v4759_v7 = vmul.f32 %v4754_v62, %v11549_v2  ;;  %v4758_v32 = vmul.f32 %v4756_v30, %v11544_v0  ;;  %v4819_v62 = vld [vmem:[#allocation9 + $0x4] sm:$0x1] }
 0x8b5   : > { %v12307_v17 = vpack.c.bf16 %v4694_v54, %v4692_v53  ;;  %v4749_v55 = vpop.permute.xlu1 %4748  ;;  %v12309_v56 = vpack.c.bf16 %v4695_v14, %v4693_v48 }
 0x8b6   : > { %v4867_v59 = vpop.permute.xlu0 %4866 }
 0x8b7   : > { %9814 = vmatmul.mubr.msk.bf16.vlgmr.msra.gmra.mrb[12].mxu1 %vm2513_vm10, %v4571_v15  ;;  %4703 = vmatprep.subr.bf16.mxu1 %v12309_v56 }
 0x8b8   : > { %4704 = vmatpush1.bf16.msra.mxu1 %v12307_v17  ;;  %4735 = vmatprep.mubr.bf16.mxu1 %v10893_v4 }
 0x8b9   : > { %v4753_v3 = vpop.permute.xlu1 %4752 }
 0x8ba   : > { %v4755_v5 = vsel %vm1219_vm9, %v4749_v55, %v4753_v3  ;;  %v4757_v10 = vsel %vm1219_vm9, %v4753_v3, %v4749_v55  ;;  %v4871_v43 = vpop.permute.xlu0 %4870 }
 0x8bb   : > { %v4761_v11 = vmul.f32 %v4755_v5, %v11549_v2  ;;  %v4760_v18 = vmul.f32 %v4757_v10, %v11544_v0  ;;  %v4876_v9 = vsel %vm1407_vm2, %v4871_v43, %v4867_v59  ;;  %v4874_v48 = vsel %vm1407_vm2, %v4867_v59, %v4871_v43 }
 0x8bc   : > { %v4879_v60 = vmul.f32 %v4876_v9, %v11362_v34  ;;  %v4878_v55 = vmul.f32 %v4874_v48, %v11359_v33  ;;  %v4885_v9 = vld [vmem:[#allocation9 + $0x5] sm:$0x1] }
 0x8bd   : > { %v12325_v63 = vpack.c.bf16 %v4761_v11, %v4759_v7  ;;  %v4869_v20 = vpop.permute.xlu1 %4868  ;;  %v12330_v29 = vpack.c.bf16 %v4760_v18, %v4758_v32 }
 0x8be   : > { %v4933_v46 = vpop.permute.xlu0 %4932 }
 0x8bf   : > { %4769 = vmatprep.subr.bf16.mxu1 %v12325_v63 }
 0x8c1   : > { %v4873_v38 = vpop.permute.xlu1 %4872 }
 0x8c2   : > { %v4877_v44 = vsel %vm1407_vm2, %v4873_v38, %v4869_v20  ;;  %v4875_v61 = vsel %vm1407_vm2, %v4869_v20, %v4873_v38  ;;  %v4937_v50 = vpop.permute.xlu0 %4936 }
 0x8c3   : > { %9815 = vmatmul.mubr.msk.bf16.vlgmr.msra.gmra.mrb[12].mxu1 %vm2513_vm10, %v4699_v57  ;;  %v4881_v21 = vmul.f32 %v4877_v44, %v11362_v34  ;;  %v4880_v54 = vmul.f32 %v4875_v61, %v11359_v33  ;;  %v4942_v14 = vsel %vm1495_vm3, %v4937_v50, %v4933_v46  ;;  %v4940_v32 = vsel %vm1495_vm3, %v4933_v46, %v4937_v50 }
 0x8c4   : > { %4770 = vmatpush1.bf16.msra.mxu1 %v12330_v29  ;;  %4801 = vmatprep.mubr.bf16.mxu1 %v10893_v4  ;;  %v4945_v3 = vmul.f32 %v4942_v14, %v11368_v36  ;;  %v4944_v44 = vmul.f32 %v4940_v32, %v11365_v35 }
 0x8c5   : > { %4823 = vmatprep.subr.bf16.mxu1 %v12222_v23  ;;  %v4935_v24 = vpop.permute.xlu1 %4934  ;;  %v12343_v47 = vpack.c.bf16 %v4881_v21, %v4879_v60  ;;  %v12360_v7 = vpack.c.bf16 %v4880_v54, %v4878_v55  ;;  %v4951_v55 = vld [vmem:[#allocation9 + $0x6] sm:$0x1] }
 0x8c6   : > { %v4999_v5 = vpop.permute.xlu0 %4998 }
 0x8c9   : > { %v4939_v49 = vpop.permute.xlu1 %4938 }
 0x8ca   : > { %v4943_v53 = vsel %vm1495_vm3, %v4939_v49, %v4935_v24  ;;  %v4941_v30 = vsel %vm1495_vm3, %v4935_v24, %v4939_v49  ;;  %v5003_v18 = vpop.permute.xlu0 %5002 }
 0x8cb   : > { %v4947_v15 = vmul.f32 %v4943_v53, %v11368_v36  ;;  %v4946_v57 = vmul.f32 %v4941_v30, %v11365_v35  ;;  %v5008_v59 = vsel %vm1583_vm4, %v5003_v18, %v4999_v5  ;;  %v5006_v53 = vsel %vm1583_vm4, %v4999_v5, %v5003_v18 }
 0x8cc   : > { %v5011_v21 = vmul.f32 %v5008_v59, %v11372_v37  ;;  %v5740_v59 = vld [vmem:[#allocation12 + $0x4] sm:$0xf] }
 0x8cd   : > { %v5001_v16 = vpop.permute.xlu1 %5000  ;;  %v12363_v10 = vpack.c.bf16 %v4947_v15, %v4945_v3  ;;  %v5010_v15 = vmul.f32 %v5006_v53, %v11392_v58  ;;  %v5722_v53 = vld [vmem:[%s13535_s21] sm:$0xff] }
 0x8ce   : > { %v5065_v24 = vpop.permute.xlu0 %5064 }
 0x8cf   : > { %9816 = vmatmul.mubr.msk.bf16.vlgmr.msra.gmra.mrb[12].mxu1 %vm2513_vm10, %v4765_v28  ;;  %v12380_v28 = vpack.c.bf16 %v4946_v57, %v4944_v44  ;;  %v5083_v57 = vld [vmem:[#allocation9 + $0x8] sm:$0x1] }
 0x8d0   : > { %4824 = vmatpush1.bf16.msra.mxu1 %v12219_v22  ;;  %4855 = vmatprep.mubr.bf16.mxu1 %v10893_v4 }
 0x8d1   : > { %4889 = vmatprep.subr.bf16.mxu1 %v12343_v47  ;;  %v5005_v11 = vpop.permute.xlu1 %5004 }
 0x8d2   : > { %v5009_v20 = vsel %vm1583_vm4, %v5005_v11, %v5001_v16  ;;  %v5007_v49 = vsel %vm1583_vm4, %v5001_v16, %v5005_v11  ;;  %v5069_v61 = vpop.permute.xlu0 %5068 }
 0x8d3   : > { %v5013_v38 = vmul.f32 %v5009_v20, %v11372_v37  ;;  %v5012_v48 = vmul.f32 %v5007_v49, %v11392_v58  ;;  %v5074_v54 = vsel %vm1671_vm5, %v5069_v61, %v5065_v24  ;;  %v5072_v11 = vsel %vm1671_vm5, %v5065_v24, %v5069_v61  ;;  %v5017_v20 = vld [vmem:[#allocation9 + $0x7] sm:$0x1] }
 0x8d4   : > { %v5076_v18 = vmul.f32 %v5072_v11, %v11417_v19 }
 0x8d5   : > { %v5067_v43 = vpop.permute.xlu1 %5066  ;;  %v12383_v60 = vpack.c.bf16 %v5013_v38, %v5011_v21  ;;  %v5014_v16 = vpack.c.bf16 %v5012_v48, %v5010_v15  ;;  %v5738_v38 = vld [vmem:[#allocation12] sm:$0xf] }
 0x8d9   : > { %v5071_v46 = vpop.permute.xlu1 %5070 }
 0x8da   : > { %v5075_v50 = vsel %vm1671_vm5, %v5071_v46, %v5067_v43  ;;  %v5073_v5 = vsel %vm1671_vm5, %v5067_v43, %v5071_v46 }
 0x8db   : > { %9817 = vmatmul.mubr.msk.bf16.vlgmr.msra.gmra.mrb[12].mxu1 %vm2513_vm10, %v4819_v62  ;;  %v5079_v14 = vmul.f32 %v5075_v50, %v11405_v1  ;;  %v5077_v62 = vmul.f32 %v5074_v54, %v11405_v1  ;;  %v5078_v30 = vmul.f32 %v5073_v5, %v11417_v19 }
 0x8dc   : > { %4890 = vmatpush1.bf16.msra.mxu1 %v12360_v7  ;;  %4921 = vmatprep.mubr.bf16.mxu1 %v10893_v4 }
 0x8dd   : > { %4955 = vmatprep.subr.bf16.mxu1 %v12363_v10  ;;  %v5081_v3 = vpack.c.bf16 %v5079_v14, %v5077_v62  ;;  %v5080_v32 = vpack.c.bf16 %v5078_v30, %v5076_v18 }
 0x8e7   : > { %9818 = vmatmul.mubr.msk.bf16.vlgmr.msra.gmra.mrb[12].mxu1 %vm2513_vm10, %v4885_v9 }
 0x8e8   : > { %4956 = vmatpush1.bf16.msra.mxu1 %v12380_v28  ;;  %4987 = vmatprep.mubr.bf16.mxu1 %v10893_v4 }
 0x8e9   : > { %5021 = vmatprep.subr.bf16.mxu1 %v12383_v60 }
 0x8ea   : > { %v5140_v9 = vpop.permute.xlu1 %5139 }
 0x8f3   : > { %9819 = vmatmul.mubr.msk.bf16.vlgmr.msra.gmra.mrb[12].mxu1 %vm2513_vm10, %v4951_v55 }
 0x8f4   : > { %5022 = vmatpush1.bf16.msra.mxu1 %v5014_v16  ;;  %5053 = vmatprep.mubr.bf16.mxu1 %v10893_v4 }
 0x8f5   : > { %5087 = vmatprep.subr.bf16.mxu1 %v5081_v3 }
 0x8ff   : > { %9820 = vmatmul.mubr.msk.bf16.vlgmr.msra.gmra.mrb[12].mxu1 %vm2513_vm10, %v5017_v20 }
 0x900   : > { %5088 = vmatpush1.bf16.msra.mxu1 %v5080_v32  ;;  %5119 = vmatprep.mubr.bf16.mxu1 %v10893_v4 }
 0x901   : > { %5744 = vmatprep.subr.bf16.mxu1 %v12271_v8  ;;  %v5878_v8 = vld [vmem:[#allocation12 + $0xc] sm:$0xf] }
 0x90b   : > { %9821 = vmatmul.mubr.msk.bf16.vlgmr.msra.gmra.mrb[12].mxu1 %vm2513_vm10, %v5083_v57 }
 0x90c   : > { %5745 = vmatpush1.bf16.msra.mxu1 %v12269_v31  ;;  %5776 = vmatprep.mubr.bf16.mxu1 %v10893_v4  ;;  %v5830_v31 = vld [vmem:[#allocation12 + $0x8] sm:$0xf] }
 0x90d   : > { %5788 = vmatprep.subr.bf16.mxu1 %v12291_v45  ;;  %v6070_v45 = vld [vmem:[#allocation12 + $0x1c] sm:$0xf] }
 0x913   : > { %9840 = vmatmul.mubr.msk.bf16.vlgmr.msra.gmra.mrb[16].mxu1 %vm2513_vm10, %v5740_v59 }
 0x914   : > { %5789 = vmatpush1.bf16.msra.mxu1 %v12289_v25  ;;  %5820 = vmatprep.mubr.bf16.mxu1 %v10893_v4  ;;  %v5926_v25 = vld [vmem:[#allocation12 + $0x10] sm:$0xf] }
 0x915   : > { %5834 = vmatprep.subr.bf16.mxu1 %v12309_v56  ;;  %v10660_v56 = vld [vmem:[%s11289_s26] sm:$0xf]  ;;  %s13614_s26 = sld [smem:[#allocation31_spill]] }
 0x91f   : > { %9841 = vmatmul.mubr.msk.bf16.vlgmr.msra.gmra.mrb[16].mxu1 %vm2513_vm10, %v5738_v38  ;;  %v5179_v38 = vld [vmem:[#allocation10 + $0x4] sm:$0xf] }
 0x920   : > { %5835 = vmatpush1.bf16.msra.mxu1 %v12307_v17  ;;  %5866 = vmatprep.mubr.bf16.mxu1 %v10893_v4  ;;  %v10659_v17 = vld [vmem:[%s11271_s30] sm:$0xf]  ;;  %s13613_s30 = sld [smem:[#allocation33_spill]] }
 0x921   : > { %5882 = vmatprep.subr.bf16.mxu1 %v12325_v63  ;;  %v944_v63 = vadd.f32 %v10660_v56, %v10659_v17 }
 0x92b   : > { %9842 = vmatmul.mubr.msk.bf16.vlgmr.msra.gmra.mrb[16].mxu1 %vm2513_vm10, %v5830_v31 }
 0x92c   : > { %5883 = vmatpush1.bf16.msra.mxu1 %v12330_v29  ;;  %5914 = vmatprep.mubr.bf16.mxu1 %v10893_v4  ;;  %v945_v29 = vmul.f32 0.5, %v944_v63 }
 0x92d   : > { %5930 = vmatprep.subr.bf16.mxu1 %v12222_v23  ;;  %v5974_v23 = vld [vmem:[#allocation12 + $0x14] sm:$0xf] }
 0x937   : > { %9843 = vmatmul.mubr.msk.bf16.vlgmr.msra.gmra.mrb[16].mxu1 %vm2513_vm10, %v5878_v8 }
 0x938   : > { %5931 = vmatpush1.bf16.msra.mxu1 %v12219_v22  ;;  %5962 = vmatprep.mubr.bf16.mxu1 %v10893_v4  ;;  %v6022_v22 = vld [vmem:[#allocation12 + $0x18] sm:$0xf] }
 0x939   : > { %5978 = vmatprep.subr.bf16.mxu1 %v12343_v47  ;;  %v5134_v47 = vpop.permute.xlu0 %5133 }
 0x943   : > { %9844 = vmatmul.mubr.msk.bf16.vlgmr.msra.gmra.mrb[16].mxu1 %vm2513_vm10, %v5926_v25 }
 0x944   : > { %5979 = vmatpush1.bf16.msra.mxu1 %v12360_v7  ;;  %6010 = vmatprep.mubr.bf16.mxu1 %v10893_v4  ;;  %v5151_v7 = vrot.slane %v945_v29, %v11273_v6  ;;  %v6118_v6 = vld [vmem:[#allocation12 + $0x20] sm:$0xf] }
 0x945   : > { %6026 = vmatprep.subr.bf16.mxu1 %v12363_v10 }
 0x946   : > { %v5152_v24 = vcombine.high %v5151_v7, %v5151_v7 }
 0x94f   : > { %9845 = vmatmul.mubr.msk.bf16.vlgmr.msra.gmra.mrb[16].mxu1 %vm2513_vm10, %v5974_v23 }
 0x950   : > { %6027 = vmatpush1.bf16.msra.mxu1 %v12380_v28  ;;  %6058 = vmatprep.mubr.bf16.mxu1 %v10893_v4 }
 0x951   : > { %6074 = vmatprep.subr.bf16.mxu1 %v12383_v60 }
 0x95b   : > { %9846 = vmatmul.mubr.msk.bf16.vlgmr.msra.gmra.mrb[16].mxu1 %vm2513_vm10, %v6022_v22 }
 0x95c   : > { %6075 = vmatpush1.bf16.msra.mxu1 %v5014_v16  ;;  %6106 = vmatprep.mubr.bf16.mxu1 %v10893_v4 }
 0x95d   : > { %6122 = vmatprep.subr.bf16.mxu1 %v5081_v3 }
 0x967   : > { %9847 = vmatmul.mubr.msk.bf16.vlgmr.msra.gmra.mrb[16].mxu1 %vm2513_vm10, %v6070_v45 }
 0x968   : > { %6123 = vmatpush1.bf16.msra.mxu1 %v5080_v32  ;;  %6154 = vmatprep.mubr.bf16.mxu1 %v10893_v4 }
 0x973   : > { %9848 = vmatmul.mubr.msk.bf16.vlgmr.msra.gmra.mrb[16].mxu1 %vm2513_vm10, %v6118_v6 }
 0x974   : > { %7606 = vmatprep.mubr.bf16.mxu1 %v10893_v4 }
 0x9de   : > { %v5121_v10 = vpop.f32.mrb[12].mxu1 }
 0x9df   : > { %v5136_v43 = vmul.f32 %v5134_v47, %v5121_v10  ;;  %v5123_v44 = vpop.f32.mrb[13].mxu1 }
 0x9e0   : > { %v5137_v21 = vmul.f32 %v5134_v47, %v5123_v44  ;;  %v5125_v28 = vpop.f32.mrb[14].mxu1  ;;  %v5167_v44 = vld [vmem:[#allocation10] sm:$0xf] }
 0x9e1   : > { %v5142_v60 = vadd.f32 %v5140_v9, %v5136_v43  ;;  %v5126_v46 = vpop.f32.mrb[15].mxu1 }
 0x9e2   : > { %v5143_v49 = vadd.f32 %v5140_v9, %v5137_v21 }
 0x9e3   : > { %v12446_v61 = vadd.f32 %v5151_v7, %v5142_v60 }
 0x9e4   : > { %v12448_v50 = vadd.f32 %v5152_v24, %v5143_v49  ;;  %v5291_v49 = vld [vmem:[#allocation10 + $0x8] sm:$0xf] }
 0x9e5   : > { %5168 = vrot.lane.b32.xlu1 %v12446_v61, %s10899_s11 }
 0x9e6   : > { %5170 = vrot.lane.b32.xlu0 %v12448_v50, %s10899_s11  ;;  %v5409_v46 = vmul.f32 %v12448_v50, %v11295_v13 }
 0x9e9   : > { %5157 = vrot.lane.b32.xlu1 %v12446_v61, %s10898_s2 }
 0x9ea   : > { %5159 = vrot.lane.b32.xlu0 %v12448_v50, %s10898_s2 }
 0x9ed   : > { %5280 = vrot.lane.b32.xlu1 %v12446_v61, %s10900_s8 }
 0x9ee   : > { %5282 = vrot.lane.b32.xlu0 %v12448_v50, %s10900_s8 }
 0x9f1   : > { %5344 = vrot.lane.b32.xlu1 %v12446_v61, %s10901_s0 }
 0x9f2   : > { %5346 = vrot.lane.b32.xlu0 %v12448_v50, %s10901_s0 }
 0x9f5   : > { %5466 = vrot.lane.b32.xlu1 %v12446_v61, %s10894_s7 }
 0x9f6   : > { %5468 = vrot.lane.b32.xlu0 %v12448_v50, %s10894_s7 }
 0x9f9   : > { %5530 = vrot.lane.b32.xlu1 %v12446_v61, %s10895_s1 }
 0x9fa   : > { %5532 = vrot.lane.b32.xlu0 %v12448_v50, %s10895_s1 }
 0x9fd   : > { %5594 = vrot.lane.b32.xlu1 %v12446_v61, %s10896_s15 }
 0x9fe   : > { %5596 = vrot.lane.b32.xlu0 %v12448_v50, %s10896_s15 }
 0xa01   : > { %5658 = vrot.lane.b32.xlu1 %v12446_v61, %s13565_s3 }
 0xa02   : > { %5660 = vrot.lane.b32.xlu0 %v12448_v50, %s13565_s3 }
 0xa05   : > { %5725 = vperm.xlu1 %10561, %v5722_v53  }
 0xa06   : > { %5731 = vperm.xlu0 %10562, %v5722_v53   ;;  %v5411_v53 = vpack.c.bf16 %v5409_v46, %v5409_v46 }
 0xa09   : > { %10564 = vset.pattern.permute.xlu1 %v10902_v52 }
 0xa0a   : > { %10563 = vset.pattern.permute.xlu0 %v10893_v4 }
 0xa57   : > { %v5169_v48 = vpop.permute.xlu1 %5168 }
 0xa58   : > { %v5171_v54 = vpop.permute.xlu0 %5170 }
 0xa59   : > { %v5172_v14 = vsel %vm988_vm7, %v5169_v48, %v5171_v54  ;;  %v5173_v15 = vsel %vm988_vm7, %v5171_v54, %v5169_v48 }
 0xa5a   : > { %v5174_v55 = vmul.f32 %v5173_v15, %v11454_v40  ;;  %v5175_v62 = vmul.f32 %v5172_v14, %v11457_v41  ;;  %v5408_v14 = vmul.f32 %v12446_v61, %v11292_v12 }
 0xa5b   : > { %v5158_v16 = vpop.permute.xlu1 %5157 }
 0xa5c   : > { %v5176_v3 = vpack.c.bf16 %v5174_v55, %v5174_v55  ;;  %v5177_v5 = vpack.c.bf16 %v5175_v62, %v5175_v62  ;;  %v5160_v11 = vpop.permute.xlu0 %5159  ;;  %v5410_v62 = vpack.c.bf16 %v5408_v14, %v5408_v14 }
 0xa5d   : > { %v5161_v30 = vsel %vm963_vm6, %v5158_v16, %v5160_v11  ;;  %v5162_v18 = vsel %vm963_vm6, %v5160_v11, %v5158_v16  ;;  %v5355_v16 = vld [vmem:[#allocation10 + $0xc] sm:$0xf] }
 0xa5e   : > { %v5163_v20 = vmul.f32 %v5162_v18, %v11467_v51  ;;  %v5164_v32 = vmul.f32 %v5161_v30, %v11433_v26  ;;  %9822 = vmatprep.subr.msk.bf16.mxu0 %vm1020_vm0, %v5177_v5  ;;  %v5184_v57 = vsel %vm1020_vm0, %v5176_v3, 0  ;;  %v5418_v5 = vsel %vm1020_vm0, %v5410_v62, 0 }
 0xa5f   : > { %v5281_v59 = vpop.permute.xlu1 %5280  ;;  %5190 = vmatpush1.bf16.msra.mxu0 %v5184_v57 }
 0xa60   : > { %v5165_v31 = vpack.c.bf16 %v5163_v20, %v5163_v20  ;;  %v5166_v8 = vpack.c.bf16 %v5164_v32, %v5164_v32  ;;  %v5283_v25 = vpop.permute.xlu0 %5282 }
 0xa61   : > { %v5284_v23 = vsel %vm1131_vm8, %v5281_v59, %v5283_v25  ;;  %v5285_v17 = vsel %vm1131_vm8, %v5283_v25, %v5281_v59 }
 0xa62   : > { %v5287_v22 = vmul.f32 %v5284_v23, %v11513_v42  ;;  %9823 = vmatmul.mubr.msk.bf16.vlgmr.msra.gmra.mrb[8].mxu0 %vm1016_vm1, %v5179_v38  ;;  %9824 = vmatprep.subr.msk.bf16.mxu0 %vm1020_vm0, %v5166_v8  ;;  %v5234_v45 = vsel %vm1020_vm0, %v5165_v31, 0  ;;  %v5286_v47 = vmul.f32 %v5285_v17, %v11510_v39  ;;  %v5413_v38 = vld [vmem:[#allocation10 + $0x10] sm:$0xf] }
 0xa63   : > { %5240 = vmatpush1.bf16.msra.mxu0 %v5234_v45  ;;  %5271 = vmatprep.mubr.bf16.mxu0 %v10893_v4  ;;  %v5345_v63 = vpop.permute.xlu1 %5344 }
 0xa64   : > { %v5289_v56 = vpack.c.bf16 %v5287_v22, %v5287_v22  ;;  %v5347_v29 = vpop.permute.xlu0 %5346  ;;  %v5288_v10 = vpack.c.bf16 %v5286_v47, %v5286_v47 }
 0xa65   : > { %v5348_v7 = vsel %vm1219_vm9, %v5345_v63, %v5347_v29  ;;  %v5349_v24 = vsel %vm1219_vm9, %v5347_v29, %v5345_v63  ;;  %v5477_v29 = vld [vmem:[#allocation10 + $0x14] sm:$0xf] }
 0xa66   : > { %9826 = vmatprep.subr.msk.bf16.mxu0 %vm1020_vm0, %v5289_v56  ;;  %v5351_v43 = vmul.f32 %v5348_v7, %v11549_v2  ;;  %v5296_v21 = vsel %vm1020_vm0, %v5288_v10, 0  ;;  %v5350_v28 = vmul.f32 %v5349_v24, %v11544_v0 }
 0xa67   : > { %v5467_v48 = vpop.permute.xlu1 %5466 }
 0xa68   : > { %v5353_v9 = vpack.c.bf16 %v5351_v43, %v5351_v43  ;;  %v5352_v60 = vpack.c.bf16 %v5350_v28, %v5350_v28  ;;  %v5469_v54 = vpop.permute.xlu0 %5468 }
 0xa69   : > { %v5471_v15 = vsel %vm1407_vm2, %v5469_v54, %v5467_v48  ;;  %v5470_v11 = vsel %vm1407_vm2, %v5467_v48, %v5469_v54  ;;  %v5605_v54 = vld [vmem:[#allocation10 + $0x1c] sm:$0xf] }
 0xa6a   : > { %v5360_v6 = vsel %vm1020_vm0, %v5352_v60, 0  ;;  %v5473_v55 = vmul.f32 %v5471_v15, %v11362_v34  ;;  %v5472_v20 = vmul.f32 %v5470_v11, %v11359_v33  ;;  %v5541_v60 = vld [vmem:[#allocation10 + $0x18] sm:$0xf]  ;;  %v5669_v15 = vld [vmem:[#allocation10 + $0x20] sm:$0xf] }
 0xa6b   : > { %v5531_v30 = vpop.permute.xlu1 %5530 }
 0xa6c   : > { %v5475_v3 = vpack.c.bf16 %v5473_v55, %v5473_v55  ;;  %v5533_v18 = vpop.permute.xlu0 %5532  ;;  %v5474_v57 = vpack.c.bf16 %v5472_v20, %v5472_v20  ;;  %v12577_v55 = vpop.f32.mrb[16].mxu1 }
 0xa6d   : > { %v5535_v32 = vsel %vm1495_vm3, %v5533_v18, %v5531_v30  ;;  %v5534_v25 = vsel %vm1495_vm3, %v5531_v30, %v5533_v18  ;;  %v12579_v62 = vpop.f32.mrb[17].mxu1 }
 0xa6e   : > { %9825 = vmatmul.mubr.msk.bf16.vlgmr.msra.gmra.mrb[8].mxu0 %vm1016_vm1, %v5167_v44  ;;  %v5537_v59 = vmul.f32 %v5535_v32, %v11368_v36  ;;  %v5482_v8 = vsel %vm1020_vm0, %v5474_v57, 0  ;;  %v5536_v45 = vmul.f32 %v5534_v25, %v11365_v35 }
 0xa6f   : > { %5302 = vmatpush1.bf16.msra.mxu0 %v5296_v21  ;;  %5333 = vmatprep.mubr.bf16.mxu0 %v10893_v4  ;;  %v5595_v23 = vpop.permute.xlu1 %5594 }
 0xa70   : > { %9828 = vmatprep.subr.msk.bf16.mxu0 %vm1020_vm0, %v5353_v9  ;;  %v5539_v31 = vpack.c.bf16 %v5537_v59, %v5537_v59  ;;  %v5597_v22 = vpop.permute.xlu0 %5596  ;;  %v5538_v56 = vpack.c.bf16 %v5536_v45, %v5536_v45 }
 0xa71   : > { %v5599_v17 = vsel %vm1583_vm4, %v5597_v22, %v5595_v23  ;;  %v5598_v10 = vsel %vm1583_vm4, %v5595_v23, %v5597_v22  ;;  %v6165_v23 = vld [vmem:[%s13536_s22] sm:$0xff] }
 0xa72   : > { %v5601_v63 = vmul.f32 %v5599_v17, %v11372_v37  ;;  %v5546_v7 = vsel %vm1020_vm0, %v5538_v56, 0  ;;  %v5600_v9 = vmul.f32 %v5598_v10, %v11392_v58 }
 0xa73   : > { %v5659_v43 = vpop.permute.xlu1 %5658 }
 0xa74   : > { %v5603_v47 = vpack.c.bf16 %v5601_v63, %v5601_v63  ;;  %v5661_v44 = vpop.permute.xlu0 %5660  ;;  %v5602_v24 = vpack.c.bf16 %v5600_v9, %v5600_v9 }
 0xa75   : > { %v5663_v21 = vsel %vm1671_vm5, %v5661_v44, %v5659_v43 }
 0xa76   : > { %v5665_v28 = vmul.f32 %v5663_v21, %v11405_v1 }
 0xa78   : > { %v5667_v46 = vpack.c.bf16 %v5665_v28, %v5665_v28 }
 0xa7a   : > { %9827 = vmatmul.mubr.msk.bf16.vlgmr.msra.gmra.mrb[8].mxu0 %vm1016_vm1, %v5291_v49  ;;  %v5610_v49 = vsel %vm1020_vm0, %v5602_v24, 0 }
 0xa7b   : > { %5366 = vmatpush1.bf16.msra.mxu0 %v5360_v6  ;;  %5397 = vmatprep.mubr.bf16.mxu0 %v10893_v4  ;;  %v5662_v6 = vsel %vm1671_vm5, %v5659_v43, %v5661_v44 }
 0xa7c   : > { %9830 = vmatprep.subr.msk.bf16.mxu0 %vm1020_vm0, %v5411_v53  ;;  %v5664_v53 = vmul.f32 %v5662_v6, %v11417_v19 }
 0xa7e   : > { %v5666_v48 = vpack.c.bf16 %v5664_v53, %v5664_v53 }
 0xa80   : > { %v5674_v14 = vsel %vm1020_vm0, %v5666_v48, 0 }
 0xa85   : > { %v5732_v30 = vpop.permute.xlu0 %5731 }
 0xa86   : > { %9829 = vmatmul.mubr.msk.bf16.vlgmr.msra.gmra.mrb[8].mxu0 %vm1016_vm1, %v5355_v16  ;;  %v6160_v16 = vpop.f32.mrb[18].mxu1 }
 0xa87   : > { %5424 = vmatpush1.bf16.msra.mxu0 %v5418_v5  ;;  %5455 = vmatprep.mubr.bf16.mxu0 %v10893_v4  ;;  %v5726_v5 = vpop.permute.xlu1 %5725 }
 0xa88   : > { %9832 = vmatprep.subr.msk.bf16.mxu0 %vm1020_vm0, %v5475_v3  ;;  %v6161_v3 = vpop.f32.mrb[19].mxu1 }
 0xa92   : > { %9831 = vmatmul.mubr.msk.bf16.vlgmr.msra.gmra.mrb[8].mxu0 %vm1016_vm1, %v5413_v38 }
 0xa93   : > { %5488 = vmatpush1.bf16.msra.mxu0 %v5482_v8  ;;  %5519 = vmatprep.mubr.bf16.mxu0 %v10893_v4 }
 0xa94   : > { %9834 = vmatprep.subr.msk.bf16.mxu0 %vm1020_vm0, %v5539_v31 }
 0xa9e   : > { %9833 = vmatmul.mubr.msk.bf16.vlgmr.msra.gmra.mrb[8].mxu0 %vm1016_vm1, %v5477_v29 }
 0xa9f   : > { %5552 = vmatpush1.bf16.msra.mxu0 %v5546_v7  ;;  %5583 = vmatprep.mubr.bf16.mxu0 %v10893_v4 }
 0xaa0   : > { %9836 = vmatprep.subr.msk.bf16.mxu0 %vm1020_vm0, %v5603_v47 }
 0xaaa   : > { %9835 = vmatmul.mubr.msk.bf16.vlgmr.msra.gmra.mrb[8].mxu0 %vm1016_vm1, %v5541_v60  ;;  %v10623_v60 = vld [vmem:[%s13611_s14 + $0x8] sm:$0xff]  }
 0xaab   : > { %5616 = vmatpush1.bf16.msra.mxu0 %v5610_v49  ;;  %5647 = vmatprep.mubr.bf16.mxu0 %v10893_v4 }
 0xaac   : > { %9838 = vmatprep.subr.msk.bf16.mxu0 %vm1020_vm0, %v5667_v46 }
 0xab6   : > { %9837 = vmatmul.mubr.msk.bf16.vlgmr.msra.gmra.mrb[8].mxu0 %vm1016_vm1, %v5605_v54 }
 0xab7   : > { %5680 = vmatpush1.bf16.msra.mxu0 %v5674_v14  ;;  %5711 = vmatprep.mubr.bf16.mxu0 %v10893_v4 }
 0xac2   : > { %9839 = vmatmul.mubr.msk.bf16.vlgmr.msra.gmra.mrb[8].mxu0 %vm1016_vm1, %v5669_v15 }
 0xac3   : > { %6254 = vmatprep.mubr.bf16.mxu0 %v10893_v4 }
 0xb95   : > { %v5713_v11 = vpop.f32.mrb[8].mxu0 }
 0xb96   : > { %v5728_v18 = vmul.f32 %v5726_v5, %v5713_v11  ;;  %v5715_v20 = vpop.f32.mrb[9].mxu0 }
 0xb97   : > { %v5729_v32 = vmul.f32 %v5726_v5, %v5715_v20  ;;  %v5717_v57 = vpop.f32.mrb[10].mxu0 }
 0xb98   : > { %v5734_v59 = vadd.f32 %v5732_v30, %v5728_v18  ;;  %v5718_v38 = vpop.f32.mrb[11].mxu0 }
 0xb99   : > { %v5735_v31 = vadd.f32 %v5732_v30, %v5729_v32  ;;  %v10624_v32 = vld [vmem:[%s13611_s14] sm:$0xff]  }
 0xb9a   : > { %v12581_v8 = vmax.f32 %v5734_v59, 0.0 }
 0xb9b   : > { %v12587_v25 = vmax.f32 %v5735_v31, 0.0 }
 0xb9c   : > { %6181 = vrot.lane.b32.xlu0 %v12581_v8, %s10898_s2  ;;  %6193 = vrot.lane.b32.xlu1 %v12581_v8, %s10899_s11 }
 0xba0   : > { %6322 = vrot.lane.b32.xlu0 %v12581_v8, %s10900_s8  ;;  %6195 = vrot.lane.b32.xlu1 %v12587_v25, %s10899_s11 }
 0xba4   : > { %6396 = vrot.lane.b32.xlu0 %v12581_v8, %s10901_s0  ;;  %6183 = vrot.lane.b32.xlu1 %v12587_v25, %s10898_s2 }
 0xba8   : > { %6168 = vperm.xlu0 %10563, %v6165_v23   ;;  %6324 = vrot.lane.b32.xlu1 %v12587_v25, %s10900_s8 }
 0xbac   : > { %6540 = vrot.lane.b32.xlu0 %v12587_v25, %s10894_s7  ;;  %6398 = vrot.lane.b32.xlu1 %v12587_v25, %s10901_s0 }
 0xbb0   : > { %6614 = vrot.lane.b32.xlu0 %v12587_v25, %s10895_s1  ;;  %6174 = vperm.xlu1 %10564, %v6165_v23  }
 0xbb4   : > { %6688 = vrot.lane.b32.xlu0 %v12587_v25, %s10896_s15  ;;  %6538 = vrot.lane.b32.xlu1 %v12581_v8, %s10894_s7 }
 0xbb5   : > { %10565 = vset.pattern.permute.xlu1 %v10893_v4 }
 0xbb8   : > { %6762 = vrot.lane.b32.xlu0 %v12587_v25, %s13565_s3  ;;  %6612 = vrot.lane.b32.xlu1 %v12581_v8, %s10895_s1 }
 0xbbc   : > { %6686 = vrot.lane.b32.xlu1 %v12581_v8, %s10896_s15 }
 0xbc0   : > { %6760 = vrot.lane.b32.xlu1 %v12581_v8, %s13565_s3 }
 0xc0e   : > { %v6194_v22 = vpop.permute.xlu1 %6193  ;;  %v6182_v63 = vpop.permute.xlu0 %6181 }
 0xc12   : > { %v6196_v45 = vpop.permute.xlu1 %6195  ;;  %v6323_v46 = vpop.permute.xlu0 %6322 }
 0xc13   : > { %v6197_v17 = vsel %vm988_vm7, %v6194_v22, %v6196_v45  ;;  %v6198_v56 = vsel %vm988_vm7, %v6196_v45, %v6194_v22 }
 0xc14   : > { %v6199_v29 = vmul.f32 %v6198_v56, %v11454_v40  ;;  %v6200_v47 = vmul.f32 %v6197_v17, %v11457_v41 }
 0xc16   : > { %v6201_v7 = vpack.c.bf16 %v6199_v29, %v6199_v29  ;;  %v6202_v10 = vpack.c.bf16 %v6200_v47, %v6200_v47  ;;  %v6184_v43 = vpop.permute.xlu1 %6183  ;;  %v6397_v5 = vpop.permute.xlu0 %6396  ;;  %v10625_v47 = vld [vmem:[%s13611_s14 + $0x10] sm:$0xff]  }
 0xc17   : > { %v6185_v44 = vsel %vm963_vm6, %v6182_v63, %v6184_v43  ;;  %v6186_v9 = vsel %vm963_vm6, %v6184_v43, %v6182_v63 }
 0xc18   : > { %v6187_v21 = vmul.f32 %v6186_v9, %v11467_v51  ;;  %v6188_v24 = vmul.f32 %v6185_v44, %v11433_v26  ;;  %9852 = vmatprep.subr.msk.bf16.mxu0 %vm6215_vm11, %v6202_v10  ;;  %v6217_v28 = vsel %vm6215_vm11, %v6201_v7, 0  ;;  %v6471_v7 = vmul.f32 %v12587_v25, %v11295_v13 }
 0xc19   : > { %6223 = vmatpush1.bf16.msra.mxu0 %v6217_v28  ;;  %v6470_v9 = vmul.f32 %v12581_v8, %v11292_v12  ;;  %v10626_v28 = vld [vmem:[%s13611_s14 + $0x18] sm:$0xff]  }
 0xc1a   : > { %v6189_v49 = vpack.c.bf16 %v6187_v21, %v6187_v21  ;;  %v6190_v6 = vpack.c.bf16 %v6188_v24, %v6188_v24  ;;  %v6325_v53 = vpop.permute.xlu1 %6324 }
 0xc1b   : > { %v6326_v48 = vsel %vm1131_vm8, %v6323_v46, %v6325_v53  ;;  %v6327_v15 = vsel %vm1131_vm8, %v6325_v53, %v6323_v46 }
 0xc1c   : > { %v6329_v54 = vmul.f32 %v6326_v48, %v11513_v42  ;;  %9853 = vmatmul.mubr.msk.bf16.vlgmr.msra.gmra.mrb[12].mxu0 %vm6211_vm12, %v10623_v60  ;;  %9855 = vmatprep.subr.msk.bf16.mxu0 %vm6215_vm11, %v6190_v6  ;;  %v6274_v14 = vsel %vm6215_vm11, %v6189_v49, 0  ;;  %v6328_v11 = vmul.f32 %v6327_v15, %v11510_v39  ;;  %v6472_v60 = vpack.c.bf16 %v6470_v9, %v6470_v9 }
 0xc1d   : > { %6280 = vmatpush1.bf16.msra.mxu0 %v6274_v14  ;;  %6311 = vmatprep.mubr.bf16.mxu0 %v10893_v4 }
 0xc1e   : > { %v6331_v16 = vpack.c.bf16 %v6329_v54, %v6329_v54  ;;  %v6399_v3 = vpop.permute.xlu1 %6398  ;;  %v6330_v18 = vpack.c.bf16 %v6328_v11, %v6328_v11  ;;  %v6486_v46 = vsel %vm6215_vm11, %v6472_v60, 0  ;;  %v10631_v60 = vld [vmem:[%s13611_s14 + $0x40] sm:$0xff]  }
 0xc1f   : > { %v6400_v30 = vsel %vm1219_vm9, %v6397_v5, %v6399_v3  ;;  %v6401_v38 = vsel %vm1219_vm9, %v6399_v3, %v6397_v5 }
 0xc20   : > { %9860 = vmatprep.subr.msk.bf16.mxu0 %vm6215_vm11, %v6331_v16  ;;  %v6403_v20 = vmul.f32 %v6400_v30, %v11549_v2  ;;  %v6344_v59 = vsel %vm6215_vm11, %v6330_v18, 0  ;;  %v6402_v23 = vmul.f32 %v6401_v38, %v11544_v0  ;;  %v10627_v16 = vld [vmem:[%s13611_s14 + $0x20] sm:$0xff]  }
 0xc22   : > { %v6405_v57 = vpack.c.bf16 %v6403_v20, %v6403_v20  ;;  %v6404_v56 = vpack.c.bf16 %v6402_v23, %v6402_v23 }
 0xc27   : > { %v6169_v31 = vpop.permute.xlu0 %6168 }
 0xc28   : > { %9856 = vmatmul.mubr.msk.bf16.vlgmr.msra.gmra.mrb[12].mxu0 %vm6211_vm12, %v10624_v32  ;;  %v6171_v22 = vmul.f32 %v6169_v31, %v12577_v55  ;;  %v6172_v45 = vmul.f32 %v6169_v31, %v12579_v62  ;;  %v6418_v55 = vsel %vm6215_vm11, %v6404_v56, 0  ;;  %v6473_v62 = vpack.c.bf16 %v6471_v7, %v6471_v7  ;;  %v10628_v31 = vld [vmem:[%s13611_s14 + $0x28] sm:$0xff]  }
 0xc29   : > { %6350 = vmatpush1.bf16.msra.mxu0 %v6344_v59  ;;  %6381 = vmatprep.mubr.bf16.mxu0 %v10893_v4 }
 0xc2a   : > { %9865 = vmatprep.subr.msk.bf16.mxu0 %vm6215_vm11, %v6405_v57  ;;  %v7494_v57 = vld [vmem:[%s13537_s23 + $0x8] sm:$0xff] }
 0xc2b   : > { %v6541_v25 = vpop.permute.xlu0 %6540 }
 0xc2f   : > { %v6175_v17 = vpop.permute.xlu1 %6174  ;;  %v6615_v53 = vpop.permute.xlu0 %6614 }
 0xc30   : > { %v6177_v63 = vadd.f32 %v6175_v17, %v6171_v22  ;;  %v6178_v29 = vadd.f32 %v6175_v17, %v6172_v45 }
 0xc32   : > { %v12669_v10 = vmax.f32 %v6177_v63, 0.0  ;;  %v12671_v43 = vmax.f32 %v6178_v29, 0.0 }
 0xc33   : > { %v6539_v44 = vpop.permute.xlu1 %6538  ;;  %v6689_v18 = vpop.permute.xlu0 %6688 }
 0xc34   : > { %9861 = vmatmul.mubr.msk.bf16.vlgmr.msra.gmra.mrb[12].mxu0 %vm6211_vm12, %v10625_v47  ;;  %6836 = vrot.lane.b32.xlu0 %v12671_v43, %s10898_s2  ;;  %v6543_v21 = vsel %vm1407_vm2, %v6541_v25, %v6539_v44  ;;  %v6542_v49 = vsel %vm1407_vm2, %v6539_v44, %v6541_v25 }
 0xc35   : > { %6424 = vmatpush1.bf16.msra.mxu0 %v6418_v55  ;;  %6834 = vrot.lane.b32.xlu1 %v12669_v10, %s10898_s2  ;;  %v6545_v24 = vmul.f32 %v6543_v21, %v11362_v34  ;;  %v6544_v48 = vmul.f32 %v6542_v49, %v11359_v33  ;;  %v10629_v55 = vld [vmem:[%s13611_s14 + $0x30] sm:$0xff]  }
 0xc36   : > { %9870 = vmatprep.subr.msk.bf16.mxu0 %vm6215_vm11, %v6473_v62  ;;  %6455 = vmatprep.mubr.bf16.mxu0 %v10893_v4 }
 0xc37   : > { %v6547_v8 = vpack.c.bf16 %v6545_v24, %v6545_v24  ;;  %v6613_v6 = vpop.permute.xlu1 %6612  ;;  %v6546_v14 = vpack.c.bf16 %v6544_v48, %v6544_v48  ;;  %v6763_v56 = vpop.permute.xlu0 %6762  ;;  %v10630_v24 = vld [vmem:[%s13611_s14 + $0x38] sm:$0xff]  }
 0xc38   : > { %6909 = vrot.lane.b32.xlu0 %v12671_v43, %s10899_s11  ;;  %v6617_v54 = vsel %vm1495_vm3, %v6615_v53, %v6613_v6  ;;  %v6616_v11 = vsel %vm1495_vm3, %v6613_v6, %v6615_v53 }
 0xc39   : > { %6907 = vrot.lane.b32.xlu1 %v12669_v10, %s10899_s11  ;;  %v6619_v15 = vmul.f32 %v6617_v54, %v11368_v36  ;;  %v6560_v5 = vsel %vm6215_vm11, %v6546_v14, 0  ;;  %v6618_v20 = vmul.f32 %v6616_v11, %v11365_v35 }
 0xc3b   : > { %v6621_v3 = vpack.c.bf16 %v6619_v15, %v6619_v15  ;;  %v6687_v30 = vpop.permute.xlu1 %6686  ;;  %v6620_v59 = vpack.c.bf16 %v6618_v20, %v6618_v20 }
 0xc3c   : > { %6983 = vrot.lane.b32.xlu0 %v12671_v43, %s10900_s8  ;;  %v6691_v32 = vsel %vm1583_vm4, %v6689_v18, %v6687_v30  ;;  %v6690_v45 = vsel %vm1583_vm4, %v6687_v30, %v6689_v18 }
 0xc3d   : > { %6981 = vrot.lane.b32.xlu1 %v12669_v10, %s10900_s8  ;;  %v6693_v38 = vmul.f32 %v6691_v32, %v11372_v37  ;;  %v6634_v22 = vsel %vm6215_vm11, %v6620_v59, 0  ;;  %v6692_v63 = vmul.f32 %v6690_v45, %v11392_v58  ;;  %v10632_v32 = vld [vmem:[%s13526_s12] sm:$0xff]  }
 0xc3f   : > { %v6695_v23 = vpack.c.bf16 %v6693_v38, %v6693_v38  ;;  %v6761_v17 = vpop.permute.xlu1 %6760  ;;  %v6694_v47 = vpack.c.bf16 %v6692_v63, %v6692_v63 }
 0xc40   : > { %9866 = vmatmul.mubr.msk.bf16.vlgmr.msra.gmra.mrb[12].mxu0 %vm6211_vm12, %v10626_v28  ;;  %7057 = vrot.lane.b32.xlu0 %v12671_v43, %s10901_s0  ;;  %v6765_v29 = vsel %vm1671_vm5, %v6763_v56, %v6761_v17  ;;  %v6764_v25 = vsel %vm1671_vm5, %v6761_v17, %v6763_v56 }
 0xc41   : > { %7055 = vrot.lane.b32.xlu1 %v12669_v10, %s10901_s0  ;;  %6492 = vmatpush1.bf16.msra.mxu0 %v6486_v46  ;;  %v6767_v7 = vmul.f32 %v6765_v29, %v11405_v1  ;;  %v6708_v44 = vsel %vm6215_vm11, %v6694_v47, 0  ;;  %v6766_v9 = vmul.f32 %v6764_v25, %v11417_v19 }
 0xc42   : > { %9875 = vmatprep.subr.msk.bf16.mxu0 %vm6215_vm11, %v6547_v8  ;;  %6523 = vmatprep.mubr.bf16.mxu0 %v10893_v4  ;;  %v7493_v8 = vld [vmem:[%s13537_s23] sm:$0xff] }
 0xc43   : > { %v6769_v62 = vpack.c.bf16 %v6767_v7, %v6767_v7  ;;  %v6768_v21 = vpack.c.bf16 %v6766_v9, %v6766_v9 }
 0xc44   : > { %7199 = vrot.lane.b32.xlu0 %v12671_v43, %s10894_s7 }
 0xc45   : > { %7197 = vrot.lane.b32.xlu1 %v12669_v10, %s10894_s7  ;;  %v6782_v28 = vsel %vm6215_vm11, %v6768_v21, 0 }
 0xc48   : > { %7273 = vrot.lane.b32.xlu0 %v12671_v43, %s10895_s1 }
 0xc49   : > { %7271 = vrot.lane.b32.xlu1 %v12669_v10, %s10895_s1 }
 0xc4c   : > { %7347 = vrot.lane.b32.xlu0 %v12671_v43, %s10896_s15  ;;  %9871 = vmatmul.mubr.msk.bf16.vlgmr.msra.gmra.mrb[12].mxu0 %vm6211_vm12, %v10627_v16 }
 0xc4d   : > { %7345 = vrot.lane.b32.xlu1 %v12669_v10, %s10896_s15  ;;  %6566 = vmatpush1.bf16.msra.mxu0 %v6560_v5 }
 0xc4e   : > { %9880 = vmatprep.subr.msk.bf16.mxu0 %vm6215_vm11, %v6621_v3  ;;  %6597 = vmatprep.mubr.bf16.mxu0 %v10893_v4 }
 0xc50   : > { %7421 = vrot.lane.b32.xlu0 %v12671_v43, %s13565_s3 }
 0xc51   : > { %7419 = vrot.lane.b32.xlu1 %v12669_v10, %s13565_s3 }
 0xc54   : > { %7502 = vperm.xlu0 %10563, %v7494_v57  }
 0xc55   : > { %7497 = vperm.xlu1 %10565, %v7493_v8  }
 0xc58   : > { %9876 = vmatmul.mubr.msk.bf16.vlgmr.msra.gmra.mrb[12].mxu0 %vm6211_vm12, %v10628_v31  ;;  %10567 = vset.pattern.permute.xlu0 %v10902_v52 }
 0xc59   : > { %6640 = vmatpush1.bf16.msra.mxu0 %v6634_v22  ;;  %6671 = vmatprep.mubr.bf16.mxu0 %v10893_v4 }
 0xc5a   : > { %9885 = vmatprep.subr.msk.bf16.mxu0 %vm6215_vm11, %v6695_v23  ;;  %7514 = vperm.xlu0 %10567, %v7494_v57  }
 0xc5b   : > { %10566 = vset.pattern.permute.xlu1 %v10902_v52 }
 0xc5c   : > { %7510 = vperm.xlu1 %10566, %v7493_v8   ;;  %v7130_v8 = vmul.f32 %v12671_v43, %v11295_v13 }
 0xc5e   : > { %10568 = vset.pattern.permute.xlu0 %v10893_v4 }
 0xc60   : > { %10569 = vset.pattern.permute.xlu1 %v10893_v4 }
 0xc64   : > { %9881 = vmatmul.mubr.msk.bf16.vlgmr.msra.gmra.mrb[12].mxu0 %vm6211_vm12, %v10629_v55 }
 0xc65   : > { %6714 = vmatpush1.bf16.msra.mxu0 %v6708_v44  ;;  %6745 = vmatprep.mubr.bf16.mxu0 %v10893_v4  ;;  %v10633_v44 = vld [vmem:[%s13526_s12 + $0x8] sm:$0xff]  }
 0xc66   : > { %9890 = vmatprep.subr.msk.bf16.mxu0 %vm6215_vm11, %v6769_v62 }
 0xc70   : > { %9886 = vmatmul.mubr.msk.bf16.vlgmr.msra.gmra.mrb[12].mxu0 %vm6211_vm12, %v10630_v24 }
 0xc71   : > { %6788 = vmatpush1.bf16.msra.mxu0 %v6782_v28  ;;  %6819 = vmatprep.mubr.bf16.mxu0 %v10893_v4 }
 0xc7c   : > { %9891 = vmatmul.mubr.msk.bf16.vlgmr.msra.gmra.mrb[12].mxu0 %vm6211_vm12, %v10631_v60  ;;  %v10634_v60 = vld [vmem:[%s13526_s12 + $0x10] sm:$0xff]  }
 0xc7d   : > { %6892 = vmatprep.mubr.bf16.mxu0 %v10893_v4 }
 0xca6   : > { %v6837_v46 = vpop.permute.xlu0 %6836 }
 0xca7   : > { %v6835_v49 = vpop.permute.xlu1 %6834 }
 0xca8   : > { %v6838_v6 = vsel %vm963_vm6, %v6835_v49, %v6837_v46  ;;  %v6839_v53 = vsel %vm963_vm6, %v6837_v46, %v6835_v49  ;;  %v7132_v49 = vpack.c.bf16 %v7130_v8, %v7130_v8 }
 0xca9   : > { %v6840_v48 = vmul.f32 %v6839_v53, %v11467_v51  ;;  %v6841_v54 = vmul.f32 %v6838_v6, %v11433_v26 }
 0xcaa   : > { %v6910_v14 = vpop.permute.xlu0 %6909 }
 0xcab   : > { %v6842_v15 = vpack.c.bf16 %v6840_v48, %v6840_v48  ;;  %v6843_v16 = vpack.c.bf16 %v6841_v54, %v6841_v54  ;;  %v6908_v3 = vpop.permute.xlu1 %6907  ;;  %v7129_v48 = vmul.f32 %v12669_v10, %v11292_v12 }
 0xcac   : > { %v6911_v5 = vsel %vm988_vm7, %v6908_v3, %v6910_v14  ;;  %v6912_v11 = vsel %vm988_vm7, %v6910_v14, %v6908_v3  ;;  %v10635_v14 = vld [vmem:[%s13526_s12 + $0x18] sm:$0xff]  }
 0xcad   : > { %v6913_v30 = vmul.f32 %v6912_v11, %v11454_v40  ;;  %v6914_v18 = vmul.f32 %v6911_v5, %v11457_v41  ;;  %9893 = vmatprep.subr.msk.bf16.mxu0 %vm6215_vm11, %v6843_v16  ;;  %v6855_v20 = vsel %vm6215_vm11, %v6842_v15, 0  ;;  %v7131_v15 = vpack.c.bf16 %v7129_v48, %v7129_v48 }
 0xcae   : > { %6861 = vmatpush1.bf16.msra.mxu0 %v6855_v20  ;;  %v6984_v57 = vpop.permute.xlu0 %6983 }
 0xcaf   : > { %v6915_v59 = vpack.c.bf16 %v6913_v30, %v6913_v30  ;;  %v6916_v38 = vpack.c.bf16 %v6914_v18, %v6914_v18  ;;  %v6982_v31 = vpop.permute.xlu1 %6981  ;;  %v7145_v3 = vsel %vm6215_vm11, %v7131_v15, 0 }
 0xcb0   : > { %v6985_v23 = vsel %vm1131_vm8, %v6982_v31, %v6984_v57  ;;  %v6986_v17 = vsel %vm1131_vm8, %v6984_v57, %v6982_v31  ;;  %v10636_v57 = vld [vmem:[%s13526_s12 + $0x20] sm:$0xff]  }
 0xcb1   : > { %v6988_v22 = vmul.f32 %v6985_v23, %v11513_v42  ;;  %9894 = vmatmul.mubr.msk.bf16.vlgmr.msra.gmra.mrb[12].mxu0 %vm6211_vm12, %v10632_v32  ;;  %9898 = vmatprep.subr.msk.bf16.mxu0 %vm6215_vm11, %v6916_v38  ;;  %v6929_v45 = vsel %vm6215_vm11, %v6915_v59, 0  ;;  %v6987_v47 = vmul.f32 %v6986_v17, %v11510_v39 }
 0xcb2   : > { %6935 = vmatpush1.bf16.msra.mxu0 %v6929_v45  ;;  %6966 = vmatprep.mubr.bf16.mxu0 %v10893_v4  ;;  %v7058_v63 = vpop.permute.xlu0 %7057 }
 0xcb3   : > { %v6990_v56 = vpack.c.bf16 %v6988_v22, %v6988_v22  ;;  %v7056_v29 = vpop.permute.xlu1 %7055  ;;  %v6989_v55 = vpack.c.bf16 %v6987_v47, %v6987_v47 }
 0xcb4   : > { %v7059_v7 = vsel %vm1219_vm9, %v7056_v29, %v7058_v63  ;;  %v7060_v21 = vsel %vm1219_vm9, %v7058_v63, %v7056_v29  ;;  %v10637_v29 = vld [vmem:[%s13526_s12 + $0x28] sm:$0xff]  }
 0xcb5   : > { %9903 = vmatprep.subr.msk.bf16.mxu0 %vm6215_vm11, %v6990_v56  ;;  %v7062_v62 = vmul.f32 %v7059_v7, %v11549_v2  ;;  %v7003_v9 = vsel %vm6215_vm11, %v6989_v55, 0  ;;  %v7061_v24 = vmul.f32 %v7060_v21, %v11544_v0 }
 0xcb6   : > { %v7200_v6 = vpop.permute.xlu0 %7199 }
 0xcb7   : > { %v7064_v25 = vpack.c.bf16 %v7062_v62, %v7062_v62  ;;  %v7063_v28 = vpack.c.bf16 %v7061_v24, %v7061_v24  ;;  %v7198_v53 = vpop.permute.xlu1 %7197 }
 0xcb8   : > { %v7202_v54 = vsel %vm1407_vm2, %v7200_v6, %v7198_v53  ;;  %v7201_v5 = vsel %vm1407_vm2, %v7198_v53, %v7200_v6  ;;  %v10639_v53 = vld [vmem:[%s13526_s12 + $0x38] sm:$0xff]  }
 0xcb9   : > { %v7077_v46 = vsel %vm6215_vm11, %v7063_v28, 0  ;;  %v7204_v43 = vmul.f32 %v7202_v54, %v11362_v34  ;;  %v7203_v30 = vmul.f32 %v7201_v5, %v11359_v33  ;;  %v10638_v28 = vld [vmem:[%s13526_s12 + $0x30] sm:$0xff]   ;;  %v10640_v54 = vld [vmem:[%s13526_s12 + $0x40] sm:$0xff]  }
 0xcba   : > { %v7274_v10 = vpop.permute.xlu0 %7273 }
 0xcbb   : > { %v7206_v16 = vpack.c.bf16 %v7204_v43, %v7204_v43  ;;  %v7272_v11 = vpop.permute.xlu1 %7271  ;;  %v7205_v20 = vpack.c.bf16 %v7203_v30, %v7203_v30 }
 0xcbc   : > { %v7276_v18 = vsel %vm1495_vm3, %v7274_v10, %v7272_v11  ;;  %v7275_v31 = vsel %vm1495_vm3, %v7272_v11, %v7274_v10 }
 0xcbd   : > { %9899 = vmatmul.mubr.msk.bf16.vlgmr.msra.gmra.mrb[12].mxu0 %vm6211_vm12, %v10633_v44  ;;  %v7278_v32 = vmul.f32 %v7276_v18, %v11368_v36  ;;  %v7219_v38 = vsel %vm6215_vm11, %v7205_v20, 0  ;;  %v7277_v45 = vmul.f32 %v7275_v31, %v11365_v35 }
 0xcbe   : > { %7009 = vmatpush1.bf16.msra.mxu0 %v7003_v9  ;;  %7040 = vmatprep.mubr.bf16.mxu0 %v10893_v4  ;;  %v7348_v23 = vpop.permute.xlu0 %7347 }
 0xcbf   : > { %9908 = vmatprep.subr.msk.bf16.mxu0 %vm6215_vm11, %v7064_v25  ;;  %v7280_v59 = vpack.c.bf16 %v7278_v32, %v7278_v32  ;;  %v7346_v22 = vpop.permute.xlu1 %7345  ;;  %v7279_v56 = vpack.c.bf16 %v7277_v45, %v7277_v45 }
 0xcc0   : > { %v7350_v17 = vsel %vm1583_vm4, %v7348_v23, %v7346_v22  ;;  %v7349_v55 = vsel %vm1583_vm4, %v7346_v22, %v7348_v23 }
 0xcc1   : > { %v7352_v63 = vmul.f32 %v7350_v17, %v11372_v37  ;;  %v7293_v7 = vsel %vm6215_vm11, %v7279_v56, 0  ;;  %v7351_v25 = vmul.f32 %v7349_v55, %v11392_v58 }
 0xcc2   : > { %v7422_v62 = vpop.permute.xlu0 %7421 }
 0xcc3   : > { %v7354_v47 = vpack.c.bf16 %v7352_v63, %v7352_v63  ;;  %v7420_v44 = vpop.permute.xlu1 %7419  ;;  %v7353_v21 = vpack.c.bf16 %v7351_v25, %v7351_v25 }
 0xcc4   : > { %v7424_v9 = vsel %vm1671_vm5, %v7422_v62, %v7420_v44 }
 0xcc5   : > { %v7426_v24 = vmul.f32 %v7424_v9, %v11405_v1  ;;  %v7367_v8 = vsel %vm6215_vm11, %v7353_v21, 0 }
 0xcc9   : > { %9904 = vmatmul.mubr.msk.bf16.vlgmr.msra.gmra.mrb[12].mxu0 %vm6211_vm12, %v10634_v60  ;;  %v7428_v60 = vpack.c.bf16 %v7426_v24, %v7426_v24 }
 0xcca   : > { %7083 = vmatpush1.bf16.msra.mxu0 %v7077_v46  ;;  %7114 = vmatprep.mubr.bf16.mxu0 %v10893_v4  ;;  %v7423_v46 = vsel %vm1671_vm5, %v7420_v44, %v7422_v62  ;;  %v8189_v62 = vld [vmem:[%s13538_s24 + $0x8] sm:$0xff]  ;;  %v8188_v44 = vld [vmem:[%s13538_s24] sm:$0xff] }
 0xccb   : > { %9913 = vmatprep.subr.msk.bf16.mxu0 %vm6215_vm11, %v7132_v49  ;;  %v7425_v49 = vmul.f32 %v7423_v46, %v11417_v19 }
 0xccd   : > { %v7427_v6 = vpack.c.bf16 %v7425_v49, %v7425_v49 }
 0xccf   : > { %v7441_v48 = vsel %vm6215_vm11, %v7427_v6, 0 }
 0xcd4   : > { %v7498_v43 = vpop.permute.xlu1 %7497 }
 0xcd5   : > { %9909 = vmatmul.mubr.msk.bf16.vlgmr.msra.gmra.mrb[12].mxu0 %vm6211_vm12, %v10635_v14  ;;  %v7503_v14 = vpop.permute.xlu0 %7502 }
 0xcd6   : > { %7151 = vmatpush1.bf16.msra.mxu0 %v7145_v3  ;;  %7182 = vmatprep.mubr.bf16.mxu0 %v10893_v4 }
 0xcd7   : > { %9918 = vmatprep.subr.msk.bf16.mxu0 %vm6215_vm11, %v7206_v16 }
 0xcd9   : > { %v7515_v30 = vpop.permute.xlu0 %7514 }
 0xcdb   : > { %v7511_v16 = vpop.permute.xlu1 %7510 }
 0xce1   : > { %9914 = vmatmul.mubr.msk.bf16.vlgmr.msra.gmra.mrb[12].mxu0 %vm6211_vm12, %v10636_v57 }
 0xce2   : > { %7225 = vmatpush1.bf16.msra.mxu0 %v7219_v38  ;;  %7256 = vmatprep.mubr.bf16.mxu0 %v10893_v4 }
 0xce3   : > { %9923 = vmatprep.subr.msk.bf16.mxu0 %vm6215_vm11, %v7280_v59 }
 0xced   : > { %9919 = vmatmul.mubr.msk.bf16.vlgmr.msra.gmra.mrb[12].mxu0 %vm6211_vm12, %v10637_v29 }
 0xcee   : > { %7299 = vmatpush1.bf16.msra.mxu0 %v7293_v7  ;;  %7330 = vmatprep.mubr.bf16.mxu0 %v10893_v4 }
 0xcef   : > { %9928 = vmatprep.subr.msk.bf16.mxu0 %vm6215_vm11, %v7354_v47 }
 0xcf9   : > { %9924 = vmatmul.mubr.msk.bf16.vlgmr.msra.gmra.mrb[12].mxu0 %vm6211_vm12, %v10638_v28 }
 0xcfa   : > { %7373 = vmatpush1.bf16.msra.mxu0 %v7367_v8  ;;  %7404 = vmatprep.mubr.bf16.mxu0 %v10893_v4 }
 0xcfb   : > { %9933 = vmatprep.subr.msk.bf16.mxu0 %vm6215_vm11, %v7428_v60 }
 0xd05   : > { %9929 = vmatmul.mubr.msk.bf16.vlgmr.msra.gmra.mrb[12].mxu0 %vm6211_vm12, %v10639_v53 }
 0xd06   : > { %7447 = vmatpush1.bf16.msra.mxu0 %v7441_v48  ;;  %7478 = vmatprep.mubr.bf16.mxu0 %v10893_v4 }
 0xd11   : > { %9934 = vmatmul.mubr.msk.bf16.vlgmr.msra.gmra.mrb[12].mxu0 %vm6211_vm12, %v10640_v54 }
 0xd12   : > { %8989 = vmatprep.mubr.bf16.mxu0 %v10893_v4 }
 0xde4   : > { %v7480_v15 = vpop.f32.mrb[12].mxu0 }
 0xde5   : > { %v7505_v3 = vmul.f32 %v7498_v43, %v7480_v15  ;;  %v7482_v5 = vpop.f32.mrb[13].mxu0 }
 0xde6   : > { %v7506_v10 = vmul.f32 %v7498_v43, %v7482_v5  ;;  %v7484_v11 = vpop.f32.mrb[14].mxu0  ;;  %v10641_v5 = vld [vmem:[%s13612_s4 + $0x8] sm:$0xff]  }
 0xde7   : > { %v7517_v18 = vadd.f32 %v7511_v16, %v7505_v3  ;;  %v7507_v20 = vmul.f32 %v7503_v14, %v7484_v11  ;;  %v7486_v32 = vpop.f32.mrb[15].mxu0 }
 0xde8   : > { %v7518_v57 = vadd.f32 %v7511_v16, %v7506_v10  ;;  %v7508_v59 = vmul.f32 %v7503_v14, %v7486_v32 }
 0xde9   : > { %v7521_v38 = vmax.f32 %v7517_v18, 0.0  ;;  %v7519_v31 = vadd.f32 %v7515_v30, %v7507_v20 }
 0xdea   : > { %v7522_v23 = vmax.f32 %v7518_v57, 0.0  ;;  %v7520_v22 = vadd.f32 %v7515_v30, %v7508_v59 }
 0xdeb   : > { %v7523_v45 = vmax.f32 %v7519_v31, 0.0  ;;  %7545 = vrot.lane.b32.xlu1 %v7521_v38, %s10899_s11  ;;  %v12902_v56 = vmul.f32 %v7521_v38, %v11292_v12 }
 0xdec   : > { %v7524_v17 = vmax.f32 %v7520_v22, 0.0  ;;  %7549 = vrot.lane.b32.xlu0 %v7522_v23, %s10899_s11  ;;  %v12908_v29 = vmul.f32 %v7522_v23, %v11295_v13 }
 0xded   : > { %v12905_v63 = vmul.f32 %v7523_v45, %v11292_v12 }
 0xdee   : > { %v12911_v47 = vmul.f32 %v7524_v17, %v11295_v13 }
 0xdef   : > { %7547 = vrot.lane.b32.xlu1 %v7523_v45, %s10899_s11  ;;  %v7824_v7 = vpack.c.bf16 %v12905_v63, %v12902_v56 }
 0xdf0   : > { %7525 = vrot.lane.b32.xlu0 %v7521_v38, %s10898_s2  ;;  %v7825_v55 = vpack.c.bf16 %v12911_v47, %v12908_v29 }
 0xdf3   : > { %7551 = vrot.lane.b32.xlu1 %v7524_v17, %s10899_s11 }
 0xdf4   : > { %7529 = vrot.lane.b32.xlu0 %v7522_v23, %s10898_s2 }
 0xdf7   : > { %7527 = vrot.lane.b32.xlu1 %v7523_v45, %s10898_s2 }
 0xdf8   : > { %7668 = vrot.lane.b32.xlu0 %v7521_v38, %s10900_s8 }
 0xdfb   : > { %7531 = vrot.lane.b32.xlu1 %v7524_v17, %s10898_s2 }
 0xdfc   : > { %7672 = vrot.lane.b32.xlu0 %v7522_v23, %s10900_s8 }
 0xdff   : > { %7670 = vrot.lane.b32.xlu1 %v7523_v45, %s10900_s8 }
 0xe00   : > { %7744 = vrot.lane.b32.xlu0 %v7521_v38, %s10901_s0 }
 0xe03   : > { %7674 = vrot.lane.b32.xlu1 %v7524_v17, %s10900_s8 }
 0xe04   : > { %7748 = vrot.lane.b32.xlu0 %v7522_v23, %s10901_s0 }
 0xe07   : > { %7746 = vrot.lane.b32.xlu1 %v7523_v45, %s10901_s0 }
 0xe08   : > { %7884 = vrot.lane.b32.xlu0 %v7521_v38, %s10894_s7 }
 0xe0b   : > { %7750 = vrot.lane.b32.xlu1 %v7524_v17, %s10901_s0 }
 0xe0c   : > { %7888 = vrot.lane.b32.xlu0 %v7522_v23, %s10894_s7 }
 0xe0f   : > { %7886 = vrot.lane.b32.xlu1 %v7523_v45, %s10894_s7 }
 0xe10   : > { %7960 = vrot.lane.b32.xlu0 %v7521_v38, %s10895_s1 }
 0xe13   : > { %7890 = vrot.lane.b32.xlu1 %v7524_v17, %s10894_s7 }
 0xe14   : > { %7964 = vrot.lane.b32.xlu0 %v7522_v23, %s10895_s1 }
 0xe17   : > { %7962 = vrot.lane.b32.xlu1 %v7523_v45, %s10895_s1 }
 0xe18   : > { %8036 = vrot.lane.b32.xlu0 %v7521_v38, %s10896_s15 }
 0xe1b   : > { %7966 = vrot.lane.b32.xlu1 %v7524_v17, %s10895_s1 }
 0xe1c   : > { %8040 = vrot.lane.b32.xlu0 %v7522_v23, %s10896_s15 }
 0xe1f   : > { %8038 = vrot.lane.b32.xlu1 %v7523_v45, %s10896_s15 }
 0xe20   : > { %8112 = vrot.lane.b32.xlu0 %v7521_v38, %s13565_s3 }
 0xe23   : > { %8042 = vrot.lane.b32.xlu1 %v7524_v17, %s10896_s15 }
 0xe24   : > { %8116 = vrot.lane.b32.xlu0 %v7522_v23, %s13565_s3 }
 0xe27   : > { %8114 = vrot.lane.b32.xlu1 %v7523_v45, %s13565_s3 }
 0xe28   : > { %8192 = vperm.xlu0 %10568, %v8188_v44  }
 0xe2b   : > { %8118 = vrot.lane.b32.xlu1 %v7524_v17, %s13565_s3 }
 0xe2c   : > { %10571 = vset.pattern.permute.xlu0 %v10902_v52 }
 0xe2d   : > { %8209 = vperm.xlu0 %10571, %v8189_v62  }
 0xe2f   : > { %8197 = vperm.xlu1 %10569, %v8189_v62  }
 0xe31   : > { %10572 = vset.pattern.permute.xlu0 %v10893_v4 }
 0xe33   : > { %10570 = vset.pattern.permute.xlu1 %v10902_v52 }
 0xe34   : > { %8205 = vperm.xlu1 %10570, %v8188_v44  }
 0xe38   : > { %10573 = vset.pattern.permute.xlu1 %v10893_v4 }
 0xe5d   : > { %v7546_v25 = vpop.permute.xlu1 %7545 }
 0xe5e   : > { %v7550_v9 = vpop.permute.xlu0 %7549 }
 0xe5f   : > { %v7553_v28 = vsel %vm988_vm7, %v7546_v25, %v7550_v9  ;;  %v7555_v60 = vsel %vm988_vm7, %v7550_v9, %v7546_v25 }
 0xe60   : > { %v7557_v53 = vmul.f32 %v7555_v60, %v11454_v40  ;;  %v7558_v48 = vmul.f32 %v7553_v28, %v11457_v41 }
 0xe61   : > { %v7548_v21 = vpop.permute.xlu1 %7547 }
 0xe62   : > { %v7526_v24 = vpop.permute.xlu0 %7525 }
 0xe65   : > { %v7552_v8 = vpop.permute.xlu1 %7551 }
 0xe66   : > { %v7554_v46 = vsel %vm988_vm7, %v7548_v21, %v7552_v8  ;;  %v7556_v49 = vsel %vm988_vm7, %v7552_v8, %v7548_v21  ;;  %v7530_v6 = vpop.permute.xlu0 %7529 }
 0xe67   : > { %v7559_v54 = vmul.f32 %v7556_v49, %v11454_v40  ;;  %v7560_v43 = vmul.f32 %v7554_v46, %v11457_v41  ;;  %v7533_v10 = vsel %vm963_vm6, %v7526_v24, %v7530_v6  ;;  %v7535_v11 = vsel %vm963_vm6, %v7530_v6, %v7526_v24  ;;  %v10642_v46 = vld [vmem:[%s13612_s4] sm:$0xff]  }
 0xe68   : > { %v7537_v57 = vmul.f32 %v7535_v11, %v11467_v51  ;;  %v7538_v59 = vmul.f32 %v7533_v10, %v11433_v26 }
 0xe69   : > { %v7561_v14 = vpack.c.bf16 %v7559_v54, %v7557_v53  ;;  %v7528_v15 = vpop.permute.xlu1 %7527  ;;  %v7562_v16 = vpack.c.bf16 %v7560_v43, %v7558_v48 }
 0xe6a   : > { %v7669_v3 = vpop.permute.xlu0 %7668 }
 0xe6b   : > { %7574 = vmatprep.subr.bf16.mxu1 %v7562_v16 }
 0xe6c   : > { %7575 = vmatpush1.bf16.msra.mxu1 %v7561_v14 }
 0xe6d   : > { %v7532_v30 = vpop.permute.xlu1 %7531 }
 0xe6e   : > { %v7534_v18 = vsel %vm963_vm6, %v7528_v15, %v7532_v30  ;;  %v7536_v20 = vsel %vm963_vm6, %v7532_v30, %v7528_v15  ;;  %v7673_v32 = vpop.permute.xlu0 %7672 }
 0xe6f   : > { %v7539_v38 = vmul.f32 %v7536_v20, %v11467_v51  ;;  %v7540_v31 = vmul.f32 %v7534_v18, %v11433_v26  ;;  %9938 = vmatmul.mubr.msk.bf16.vlgmr.msra.gmra.mrb[20].mxu1 %vm2513_vm10, %v10641_v5  ;;  %v7676_v62 = vsel %vm1131_vm8, %v7669_v3, %v7673_v32  ;;  %v7678_v44 = vsel %vm1131_vm8, %v7673_v32, %v7669_v3  ;;  %v10643_v18 = vld [vmem:[%s13612_s4 + $0x10] sm:$0xff]  }
 0xe70   : > { %7657 = vmatprep.mubr.bf16.mxu1 %v10893_v4  ;;  %v7680_v24 = vmul.f32 %v7678_v44, %v11510_v39  ;;  %v7681_v28 = vmul.f32 %v7676_v62, %v11513_v42 }
 0xe71   : > { %v7541_v23 = vpack.c.bf16 %v7539_v38, %v7537_v57  ;;  %v7671_v22 = vpop.permute.xlu1 %7670  ;;  %v7542_v45 = vpack.c.bf16 %v7540_v31, %v7538_v59 }
 0xe72   : > { %v7745_v17 = vpop.permute.xlu0 %7744 }
 0xe73   : > { %7625 = vmatprep.subr.bf16.mxu1 %v7542_v45 }
 0xe74   : > { %7626 = vmatpush1.bf16.msra.mxu1 %v7541_v23 }
 0xe75   : > { %v7675_v25 = vpop.permute.xlu1 %7674 }
 0xe76   : > { %v7677_v9 = vsel %vm1131_vm8, %v7671_v22, %v7675_v25  ;;  %v7679_v21 = vsel %vm1131_vm8, %v7675_v25, %v7671_v22  ;;  %v7749_v6 = vpop.permute.xlu0 %7748 }
 0xe77   : > { %v7682_v60 = vmul.f32 %v7679_v21, %v11510_v39  ;;  %v7683_v8 = vmul.f32 %v7677_v9, %v11513_v42  ;;  %v7752_v54 = vsel %vm1219_vm9, %v7745_v17, %v7749_v6  ;;  %v7754_v5 = vsel %vm1219_vm9, %v7749_v6, %v7745_v17  ;;  %v10644_v17 = vld [vmem:[%s13612_s4 + $0x18] sm:$0xff]  }
 0xe78   : > { %v7757_v15 = vmul.f32 %v7752_v54, %v11549_v2  ;;  %v7756_v20 = vmul.f32 %v7754_v5, %v11544_v0 }
 0xe79   : > { %v7684_v49 = vpack.c.bf16 %v7682_v60, %v7680_v24  ;;  %v7747_v53 = vpop.permute.xlu1 %7746  ;;  %v7685_v48 = vpack.c.bf16 %v7683_v8, %v7681_v28  ;;  %v10645_v28 = vld [vmem:[%s13612_s4 + $0x20] sm:$0xff]  }
 0xe7a   : > { %v7885_v32 = vpop.permute.xlu0 %7884 }
 0xe7b   : > { %9940 = vmatmul.mubr.msk.bf16.vlgmr.msra.gmra.mrb[20].mxu1 %vm2513_vm10, %v10642_v46  ;;  %7697 = vmatprep.subr.bf16.mxu1 %v7685_v48 }
 0xe7c   : > { %7698 = vmatpush1.bf16.msra.mxu1 %v7684_v49  ;;  %7729 = vmatprep.mubr.bf16.mxu1 %v10893_v4 }
 0xe7d   : > { %v7751_v43 = vpop.permute.xlu1 %7750 }
 0xe7e   : > { %v7753_v14 = vsel %vm1219_vm9, %v7747_v53, %v7751_v43  ;;  %v7755_v16 = vsel %vm1219_vm9, %v7751_v43, %v7747_v53  ;;  %v7889_v38 = vpop.permute.xlu0 %7888 }
 0xe7f   : > { %v7759_v3 = vmul.f32 %v7753_v14, %v11549_v2  ;;  %v7758_v11 = vmul.f32 %v7755_v16, %v11544_v0  ;;  %v7894_v23 = vsel %vm1407_vm2, %v7889_v38, %v7885_v32  ;;  %v7892_v21 = vsel %vm1407_vm2, %v7885_v32, %v7889_v38 }
 0xe80   : > { %v7897_v62 = vmul.f32 %v7894_v23, %v11362_v34  ;;  %v7896_v60 = vmul.f32 %v7892_v21, %v11359_v33 }
 0xe81   : > { %v7761_v10 = vpack.c.bf16 %v7759_v3, %v7757_v15  ;;  %v7887_v30 = vpop.permute.xlu1 %7886  ;;  %v7760_v57 = vpack.c.bf16 %v7758_v11, %v7756_v20 }
 0xe82   : > { %v7961_v44 = vpop.permute.xlu0 %7960 }
 0xe83   : > { %7773 = vmatprep.subr.bf16.mxu1 %v7761_v10  ;;  %v10646_v10 = vld [vmem:[%s13612_s4 + $0x28] sm:$0xff]  }
 0xe85   : > { %v7891_v59 = vpop.permute.xlu1 %7890 }
 0xe86   : > { %v7895_v31 = vsel %vm1407_vm2, %v7891_v59, %v7887_v30  ;;  %v7965_v25 = vpop.permute.xlu0 %7964 }
 0xe87   : > { %9944 = vmatmul.mubr.msk.bf16.vlgmr.msra.gmra.mrb[20].mxu1 %vm2513_vm10, %v10643_v18  ;;  %v7899_v22 = vmul.f32 %v7895_v31, %v11362_v34  ;;  %v7970_v56 = vsel %vm1495_vm3, %v7965_v25, %v7961_v44  ;;  %v7968_v14 = vsel %vm1495_vm3, %v7961_v44, %v7965_v25 }
 0xe88   : > { %7774 = vmatpush1.bf16.msra.mxu1 %v7760_v57  ;;  %7805 = vmatprep.mubr.bf16.mxu1 %v10893_v4  ;;  %v7973_v8 = vmul.f32 %v7970_v56, %v11368_v36  ;;  %v7972_v11 = vmul.f32 %v7968_v14, %v11365_v35 }
 0xe89   : > { %7837 = vmatprep.subr.bf16.mxu1 %v7825_v55  ;;  %v7963_v45 = vpop.permute.xlu1 %7962  ;;  %v7901_v29 = vpack.c.bf16 %v7899_v22, %v7897_v62  ;;  %v7893_v55 = vsel %vm1407_vm2, %v7887_v30, %v7891_v59  ;;  %v10647_v62 = vld [vmem:[%s13612_s4 + $0x30] sm:$0xff]  }
 0xe8a   : > { %v7898_v24 = vmul.f32 %v7893_v55, %v11359_v33  ;;  %v8037_v46 = vpop.permute.xlu0 %8036 }
 0xe8c   : > { %v7900_v49 = vpack.c.bf16 %v7898_v24, %v7896_v60  ;;  %v10648_v24 = vld [vmem:[%s13612_s4 + $0x38] sm:$0xff]  }
 0xe8d   : > { %v7967_v47 = vpop.permute.xlu1 %7966 }
 0xe8e   : > { %v7971_v9 = vsel %vm1495_vm3, %v7967_v47, %v7963_v45  ;;  %v7969_v48 = vsel %vm1495_vm3, %v7963_v45, %v7967_v47  ;;  %v8041_v54 = vpop.permute.xlu0 %8040 }
 0xe8f   : > { %v7975_v63 = vmul.f32 %v7971_v9, %v11368_v36  ;;  %v7974_v15 = vmul.f32 %v7969_v48, %v11365_v35  ;;  %v8046_v16 = vsel %vm1583_vm4, %v8041_v54, %v8037_v46  ;;  %v8044_v23 = vsel %vm1583_vm4, %v8037_v46, %v8041_v54 }
 0xe90   : > { %v8049_v30 = vmul.f32 %v8046_v16, %v11372_v37  ;;  %v8048_v44 = vmul.f32 %v8044_v23, %v11392_v58 }
 0xe91   : > { %v7977_v6 = vpack.c.bf16 %v7975_v63, %v7973_v8  ;;  %v7976_v20 = vpack.c.bf16 %v7974_v15, %v7972_v11 }
 0xe92   : > { %v8113_v18 = vpop.permute.xlu0 %8112 }
 0xe93   : > { %9948 = vmatmul.mubr.msk.bf16.vlgmr.msra.gmra.mrb[20].mxu1 %vm2513_vm10, %v10644_v17 }
 0xe94   : > { %7838 = vmatpush1.bf16.msra.mxu1 %v7824_v7  ;;  %7869 = vmatprep.mubr.bf16.mxu1 %v10893_v4  ;;  %v8039_v7 = vpop.permute.xlu1 %8038 }
 0xe95   : > { %7913 = vmatprep.subr.bf16.mxu1 %v7901_v29 }
 0xe96   : > { %v8117_v38 = vpop.permute.xlu0 %8116 }
 0xe97   : > { %v8122_v45 = vsel %vm1671_vm5, %v8117_v38, %v8113_v18  ;;  %v8120_v9 = vsel %vm1671_vm5, %v8113_v18, %v8117_v38 }
 0xe98   : > { %v8043_v53 = vpop.permute.xlu1 %8042  ;;  %v8125_v29 = vmul.f32 %v8122_v45, %v11405_v1  ;;  %v8124_v56 = vmul.f32 %v8120_v9, %v11417_v19  ;;  %v8883_v45 = vld [vmem:[%s13613_s30] sm:$0xff] }
 0xe99   : > { %v8047_v43 = vsel %vm1583_vm4, %v8043_v53, %v8039_v7  ;;  %v8045_v59 = vsel %vm1583_vm4, %v8039_v7, %v8043_v53  ;;  %v10649_v7 = vld [vmem:[%s13612_s4 + $0x40] sm:$0xff]  }
 0xe9a   : > { %v8051_v3 = vmul.f32 %v8047_v43, %v11372_v37  ;;  %v8050_v22 = vmul.f32 %v8045_v59, %v11392_v58 }
 0xe9c   : > { %v8115_v5 = vpop.permute.xlu1 %8114  ;;  %v8053_v32 = vpack.c.bf16 %v8051_v3, %v8049_v30  ;;  %v8052_v47 = vpack.c.bf16 %v8050_v22, %v8048_v44  ;;  %v8884_v22 = vld [vmem:[%s13613_s30 + $0x8] sm:$0xff] }
 0xe9f   : > { %9952 = vmatmul.mubr.msk.bf16.vlgmr.msra.gmra.mrb[20].mxu1 %vm2513_vm10, %v10645_v28 }
 0xea0   : > { %7914 = vmatpush1.bf16.msra.mxu1 %v7900_v49  ;;  %7945 = vmatprep.mubr.bf16.mxu1 %v10893_v4  ;;  %v8119_v57 = vpop.permute.xlu1 %8118 }
 0xea1   : > { %7989 = vmatprep.subr.bf16.mxu1 %v7977_v6  ;;  %v8123_v31 = vsel %vm1671_vm5, %v8119_v57, %v8115_v5  ;;  %v8121_v25 = vsel %vm1671_vm5, %v8115_v5, %v8119_v57 }
 0xea2   : > { %v8127_v17 = vmul.f32 %v8123_v31, %v11405_v1  ;;  %v8126_v21 = vmul.f32 %v8121_v25, %v11417_v19 }
 0xea4   : > { %v8129_v55 = vpack.c.bf16 %v8127_v17, %v8125_v29  ;;  %v8128_v63 = vpack.c.bf16 %v8126_v21, %v8124_v56 }
 0xea7   : > { %v8193_v60 = vpop.permute.xlu0 %8192 }
 0xeab   : > { %9956 = vmatmul.mubr.msk.bf16.vlgmr.msra.gmra.mrb[20].mxu1 %vm2513_vm10, %v10646_v10 }
 0xeac   : > { %7990 = vmatpush1.bf16.msra.mxu1 %v7976_v20  ;;  %8021 = vmatprep.mubr.bf16.mxu1 %v10893_v4  ;;  %v8210_v54 = vpop.permute.xlu0 %8209 }
 0xead   : > { %8065 = vmatprep.subr.bf16.mxu1 %v8053_v32 }
 0xeae   : > { %v8198_v28 = vpop.permute.xlu1 %8197 }
 0xeb3   : > { %v8206_v46 = vpop.permute.xlu1 %8205 }
 0xeb7   : > { %9960 = vmatmul.mubr.msk.bf16.vlgmr.msra.gmra.mrb[20].mxu1 %vm2513_vm10, %v10647_v62 }
 0xeb8   : > { %8066 = vmatpush1.bf16.msra.mxu1 %v8052_v47  ;;  %8097 = vmatprep.mubr.bf16.mxu1 %v10893_v4 }
 0xeb9   : > { %8141 = vmatprep.subr.bf16.mxu1 %v8129_v55 }
 0xec3   : > { %9964 = vmatmul.mubr.msk.bf16.vlgmr.msra.gmra.mrb[20].mxu1 %vm2513_vm10, %v10648_v24 }
 0xec4   : > { %8142 = vmatpush1.bf16.msra.mxu1 %v8128_v63  ;;  %8173 = vmatprep.mubr.bf16.mxu1 %v10893_v4 }
 0xecf   : > { %9968 = vmatmul.mubr.msk.bf16.vlgmr.msra.gmra.mrb[20].mxu1 %vm2513_vm10, %v10649_v7 }
 0xed0   : > { %8301 = vmatprep.mubr.bf16.mxu1 %v10893_v4 }
 0xfa2   : > { %v8175_v8 = vpop.f32.mrb[20].mxu1 }
 0xfa3   : > { %v8200_v49 = vmul.f32 %v8193_v60, %v8175_v8  ;;  %v8177_v6 = vpop.f32.mrb[21].mxu1 }
 0xfa4   : > { %v8201_v53 = vmul.f32 %v8193_v60, %v8177_v6  ;;  %v8179_v48 = vpop.f32.mrb[22].mxu1  ;;  %v10650_v6 = vld [vmem:[%s13614_s26 + $0x8] sm:$0xff]  }
 0xfa5   : > { %v8212_v43 = vadd.f32 %v8206_v46, %v8200_v49  ;;  %v8202_v14 = vmul.f32 %v8198_v28, %v8179_v48  ;;  %v8181_v15 = vpop.f32.mrb[23].mxu1 }
 0xfa6   : > { %v8213_v16 = vadd.f32 %v8206_v46, %v8201_v53  ;;  %v8203_v3 = vmul.f32 %v8198_v28, %v8181_v15 }
 0xfa7   : > { %v8216_v5 = vmax.f32 %v8212_v43, 0.0  ;;  %v8214_v10 = vadd.f32 %v8210_v54, %v8202_v14 }
 0xfa8   : > { %v8217_v11 = vmax.f32 %v8213_v16, 0.0  ;;  %v8215_v30 = vadd.f32 %v8210_v54, %v8203_v3 }
 0xfa9   : > { %v8218_v18 = vmax.f32 %v8214_v10, 0.0  ;;  %8240 = vrot.lane.b32.xlu1 %v8216_v5, %s10899_s11  ;;  %v13107_v32 = vmul.f32 %v8216_v5, %v11292_v12 }
 0xfaa   : > { %v8219_v20 = vmax.f32 %v8215_v30, 0.0  ;;  %8244 = vrot.lane.b32.xlu0 %v8217_v11, %s10899_s11  ;;  %v13113_v59 = vmul.f32 %v8217_v11, %v11295_v13 }
 0xfab   : > { %v13110_v57 = vmul.f32 %v8218_v18, %v11292_v12 }
 0xfac   : > { %v13116_v38 = vmul.f32 %v8219_v20, %v11295_v13 }
 0xfad   : > { %8242 = vrot.lane.b32.xlu1 %v8218_v18, %s10899_s11  ;;  %v8519_v31 = vpack.c.bf16 %v13110_v57, %v13107_v32 }
 0xfae   : > { %8220 = vrot.lane.b32.xlu0 %v8216_v5, %s10898_s2  ;;  %v8520_v23 = vpack.c.bf16 %v13116_v38, %v13113_v59 }
 0xfb1   : > { %8246 = vrot.lane.b32.xlu1 %v8219_v20, %s10899_s11 }
 0xfb2   : > { %8224 = vrot.lane.b32.xlu0 %v8217_v11, %s10898_s2 }
 0xfb5   : > { %8222 = vrot.lane.b32.xlu1 %v8218_v18, %s10898_s2 }
 0xfb6   : > { %8363 = vrot.lane.b32.xlu0 %v8216_v5, %s10900_s8 }
 0xfb9   : > { %8226 = vrot.lane.b32.xlu1 %v8219_v20, %s10898_s2 }
 0xfba   : > { %8367 = vrot.lane.b32.xlu0 %v8217_v11, %s10900_s8 }
 0xfbd   : > { %8365 = vrot.lane.b32.xlu1 %v8218_v18, %s10900_s8 }
 0xfbe   : > { %8439 = vrot.lane.b32.xlu0 %v8216_v5, %s10901_s0 }
 0xfc1   : > { %8369 = vrot.lane.b32.xlu1 %v8219_v20, %s10900_s8 }
 0xfc2   : > { %8443 = vrot.lane.b32.xlu0 %v8217_v11, %s10901_s0 }
 0xfc5   : > { %8441 = vrot.lane.b32.xlu1 %v8218_v18, %s10901_s0 }
 0xfc6   : > { %8579 = vrot.lane.b32.xlu0 %v8216_v5, %s10894_s7 }
 0xfc9   : > { %8445 = vrot.lane.b32.xlu1 %v8219_v20, %s10901_s0 }
 0xfca   : > { %8583 = vrot.lane.b32.xlu0 %v8217_v11, %s10894_s7 }
 0xfcd   : > { %8581 = vrot.lane.b32.xlu1 %v8218_v18, %s10894_s7 }
 0xfce   : > { %8655 = vrot.lane.b32.xlu0 %v8216_v5, %s10895_s1 }
 0xfd1   : > { %8585 = vrot.lane.b32.xlu1 %v8219_v20, %s10894_s7 }
 0xfd2   : > { %8659 = vrot.lane.b32.xlu0 %v8217_v11, %s10895_s1 }
 0xfd5   : > { %8657 = vrot.lane.b32.xlu1 %v8218_v18, %s10895_s1 }
 0xfd6   : > { %8731 = vrot.lane.b32.xlu0 %v8216_v5, %s10896_s15 }
 0xfd9   : > { %8661 = vrot.lane.b32.xlu1 %v8219_v20, %s10895_s1 }
 0xfda   : > { %8735 = vrot.lane.b32.xlu0 %v8217_v11, %s10896_s15 }
 0xfdd   : > { %8733 = vrot.lane.b32.xlu1 %v8218_v18, %s10896_s15 }
 0xfde   : > { %8807 = vrot.lane.b32.xlu0 %v8216_v5, %s13565_s3 }
 0xfe1   : > { %8737 = vrot.lane.b32.xlu1 %v8219_v20, %s10896_s15 }
 0xfe2   : > { %8811 = vrot.lane.b32.xlu0 %v8217_v11, %s13565_s3 }
 0xfe5   : > { %8809 = vrot.lane.b32.xlu1 %v8218_v18, %s13565_s3 }
 0xfe6   : > { %8887 = vperm.xlu0 %10572, %v8883_v45  }
 0xfe9   : > { %8813 = vrot.lane.b32.xlu1 %v8219_v20, %s13565_s3  ;;  %s13615_s3 = smov 111  }
 0xfea   : > { %10575 = vset.pattern.permute.xlu0 %v10902_v52 }
 0xfeb   : > { %8904 = vperm.xlu0 %10575, %v8884_v22  }
 0xfed   : > { %8892 = vperm.xlu1 %10573, %v8884_v22  }
 0xfef   : > { %10576 = vset.pattern.permute.xlu0 %v10893_v4 }
 0xff1   : > { %10574 = vset.pattern.permute.xlu1 %v10902_v52 }
 0xff2   : > { %8900 = vperm.xlu1 %10574, %v8883_v45  }
0x101b   : > { %v8241_v17 = vpop.permute.xlu1 %8240 }
0x101c   : > { %v8245_v62 = vpop.permute.xlu0 %8244 }
0x101d   : > { %v8248_v47 = vsel %vm988_vm7, %v8241_v17, %v8245_v62  ;;  %v8250_v55 = vsel %vm988_vm7, %v8245_v62, %v8241_v17 }
0x101e   : > { %v8252_v56 = vmul.f32 %v8250_v55, %v11454_v40  ;;  %v8253_v63 = vmul.f32 %v8248_v47, %v11457_v41 }
0x101f   : > { %v8243_v44 = vpop.permute.xlu1 %8242 }
0x1020   : > { %v8221_v29 = vpop.permute.xlu0 %8220 }
0x1023   : > { %v8247_v25 = vpop.permute.xlu1 %8246 }
0x1024   : > { %v8249_v9 = vsel %vm988_vm7, %v8243_v44, %v8247_v25  ;;  %v8251_v21 = vsel %vm988_vm7, %v8247_v25, %v8243_v44  ;;  %v8225_v24 = vpop.permute.xlu0 %8224 }
0x1025   : > { %v8254_v7 = vmul.f32 %v8251_v21, %v11454_v40  ;;  %v8255_v28 = vmul.f32 %v8249_v9, %v11457_v41  ;;  %v8228_v53 = vsel %vm963_vm6, %v8221_v29, %v8225_v24  ;;  %v8230_v48 = vsel %vm963_vm6, %v8225_v24, %v8221_v29  ;;  %v10651_v9 = vld [vmem:[%s13614_s26] sm:$0xff]  }
0x1026   : > { %v8232_v16 = vmul.f32 %v8230_v48, %v11467_v51  ;;  %v8233_v3 = vmul.f32 %v8228_v53, %v11433_v26 }
0x1027   : > { %v8256_v60 = vpack.c.bf16 %v8254_v7, %v8252_v56  ;;  %v8223_v8 = vpop.permute.xlu1 %8222  ;;  %v8257_v46 = vpack.c.bf16 %v8255_v28, %v8253_v63 }
0x1028   : > { %v8364_v49 = vpop.permute.xlu0 %8363 }
0x1029   : > { %8269 = vmatprep.subr.bf16.mxu1 %v8257_v46 }
0x102a   : > { %8270 = vmatpush1.bf16.msra.mxu1 %v8256_v60 }
0x102b   : > { %v8227_v54 = vpop.permute.xlu1 %8226 }
0x102c   : > { %v8229_v43 = vsel %vm963_vm6, %v8223_v8, %v8227_v54  ;;  %v8231_v14 = vsel %vm963_vm6, %v8227_v54, %v8223_v8  ;;  %v8368_v15 = vpop.permute.xlu0 %8367 }
0x102d   : > { %v8234_v5 = vmul.f32 %v8231_v14, %v11467_v51  ;;  %v8235_v10 = vmul.f32 %v8229_v43, %v11433_v26  ;;  %9972 = vmatmul.mubr.msk.bf16.vlgmr.msra.gmra.mrb[24].mxu1 %vm2513_vm10, %v10650_v6  ;;  %v8371_v22 = vsel %vm1131_vm8, %v8364_v49, %v8368_v15  ;;  %v8373_v45 = vsel %vm1131_vm8, %v8368_v15, %v8364_v49  ;;  %v10652_v43 = vld [vmem:[%s13614_s26 + $0x10] sm:$0xff]  }
0x102e   : > { %8352 = vmatprep.mubr.bf16.mxu1 %v10893_v4  ;;  %v8375_v29 = vmul.f32 %v8373_v45, %v11510_v39  ;;  %v8376_v47 = vmul.f32 %v8371_v22, %v11513_v42 }
0x102f   : > { %v8236_v11 = vpack.c.bf16 %v8234_v5, %v8232_v16  ;;  %v8366_v30 = vpop.permute.xlu1 %8365  ;;  %v8237_v18 = vpack.c.bf16 %v8235_v10, %v8233_v3 }
0x1030   : > { %v8440_v20 = vpop.permute.xlu0 %8439 }
0x1031   : > { %8320 = vmatprep.subr.bf16.mxu1 %v8237_v18 }
0x1032   : > { %8321 = vmatpush1.bf16.msra.mxu1 %v8236_v11 }
0x1033   : > { %v8370_v17 = vpop.permute.xlu1 %8369 }
0x1034   : > { %v8372_v62 = vsel %vm1131_vm8, %v8366_v30, %v8370_v17  ;;  %v8374_v44 = vsel %vm1131_vm8, %v8370_v17, %v8366_v30  ;;  %v8444_v24 = vpop.permute.xlu0 %8443 }
0x1035   : > { %v8377_v55 = vmul.f32 %v8374_v44, %v11510_v39  ;;  %v8378_v25 = vmul.f32 %v8372_v62, %v11513_v42  ;;  %v8447_v7 = vsel %vm1219_vm9, %v8440_v20, %v8444_v24  ;;  %v8449_v6 = vsel %vm1219_vm9, %v8444_v24, %v8440_v20  ;;  %v10653_v20 = vld [vmem:[%s13614_s26 + $0x18] sm:$0xff]  }
0x1036   : > { %v8452_v8 = vmul.f32 %v8447_v7, %v11549_v2  ;;  %v8451_v14 = vmul.f32 %v8449_v6, %v11544_v0 }
0x1037   : > { %v8379_v21 = vpack.c.bf16 %v8377_v55, %v8375_v29  ;;  %v8442_v56 = vpop.permute.xlu1 %8441  ;;  %v8380_v63 = vpack.c.bf16 %v8378_v25, %v8376_v47  ;;  %v10654_v47 = vld [vmem:[%s13614_s26 + $0x20] sm:$0xff]  }
0x1038   : > { %v8580_v15 = vpop.permute.xlu0 %8579 }
0x1039   : > { %9974 = vmatmul.mubr.msk.bf16.vlgmr.msra.gmra.mrb[24].mxu1 %vm2513_vm10, %v10651_v9  ;;  %8392 = vmatprep.subr.bf16.mxu1 %v8380_v63 }
0x103a   : > { %8393 = vmatpush1.bf16.msra.mxu1 %v8379_v21  ;;  %8424 = vmatprep.mubr.bf16.mxu1 %v10893_v4 }
0x103b   : > { %v8446_v28 = vpop.permute.xlu1 %8445 }
0x103c   : > { %v8448_v60 = vsel %vm1219_vm9, %v8442_v56, %v8446_v28  ;;  %v8450_v46 = vsel %vm1219_vm9, %v8446_v28, %v8442_v56  ;;  %v8584_v5 = vpop.permute.xlu0 %8583 }
0x103d   : > { %v8454_v49 = vmul.f32 %v8448_v60, %v11549_v2  ;;  %v8453_v48 = vmul.f32 %v8450_v46, %v11544_v0  ;;  %v8589_v11 = vsel %vm1407_vm2, %v8584_v5, %v8580_v15  ;;  %v8587_v44 = vsel %vm1407_vm2, %v8580_v15, %v8584_v5 }
0x103e   : > { %v8592_v22 = vmul.f32 %v8589_v11, %v11362_v34  ;;  %v8591_v55 = vmul.f32 %v8587_v44, %v11359_v33 }
0x103f   : > { %v8456_v53 = vpack.c.bf16 %v8454_v49, %v8452_v8  ;;  %v8582_v54 = vpop.permute.xlu1 %8581  ;;  %v8455_v16 = vpack.c.bf16 %v8453_v48, %v8451_v14 }
0x1040   : > { %v8656_v45 = vpop.permute.xlu0 %8655 }
0x1041   : > { %8468 = vmatprep.subr.bf16.mxu1 %v8456_v53  ;;  %v10655_v53 = vld [vmem:[%s13614_s26 + $0x28] sm:$0xff]  }
0x1043   : > { %v8586_v3 = vpop.permute.xlu1 %8585 }
0x1044   : > { %v8590_v10 = vsel %vm1407_vm2, %v8586_v3, %v8582_v54  ;;  %v8660_v17 = vpop.permute.xlu0 %8659 }
0x1045   : > { %9978 = vmatmul.mubr.msk.bf16.vlgmr.msra.gmra.mrb[24].mxu1 %vm2513_vm10, %v10652_v43  ;;  %v8594_v30 = vmul.f32 %v8590_v10, %v11362_v34  ;;  %v8665_v32 = vsel %vm1495_vm3, %v8660_v17, %v8656_v45  ;;  %v8663_v60 = vsel %vm1495_vm3, %v8656_v45, %v8660_v17 }
0x1046   : > { %8469 = vmatpush1.bf16.msra.mxu1 %v8455_v16  ;;  %8500 = vmatprep.mubr.bf16.mxu1 %v10893_v4  ;;  %v8668_v25 = vmul.f32 %v8665_v32, %v11368_v36  ;;  %v8667_v48 = vmul.f32 %v8663_v60, %v11365_v35 }
0x1047   : > { %8532 = vmatprep.subr.bf16.mxu1 %v8520_v23  ;;  %v8658_v18 = vpop.permute.xlu1 %8657  ;;  %v8596_v59 = vpack.c.bf16 %v8594_v30, %v8592_v22  ;;  %v8588_v23 = vsel %vm1407_vm2, %v8582_v54, %v8586_v3  ;;  %v10656_v22 = vld [vmem:[%s13614_s26 + $0x30] sm:$0xff]  }
0x1048   : > { %v8593_v29 = vmul.f32 %v8588_v23, %v11359_v33  ;;  %v8732_v9 = vpop.permute.xlu0 %8731 }
0x104a   : > { %v8595_v21 = vpack.c.bf16 %v8593_v29, %v8591_v55  ;;  %v10657_v29 = vld [vmem:[%s13614_s26 + $0x38] sm:$0xff]  }
0x104b   : > { %v8662_v38 = vpop.permute.xlu1 %8661 }
0x104c   : > { %v8666_v62 = vsel %vm1495_vm3, %v8662_v38, %v8658_v18  ;;  %v8664_v63 = vsel %vm1495_vm3, %v8658_v18, %v8662_v38  ;;  %v8736_v7 = vpop.permute.xlu0 %8735 }
0x104d   : > { %v8670_v57 = vmul.f32 %v8666_v62, %v11368_v36  ;;  %v8669_v8 = vmul.f32 %v8664_v63, %v11365_v35  ;;  %v8741_v46 = vsel %vm1583_vm4, %v8736_v7, %v8732_v9  ;;  %v8739_v11 = vsel %vm1583_vm4, %v8732_v9, %v8736_v7 }
0x104e   : > { %v8744_v54 = vmul.f32 %v8741_v46, %v11372_v37  ;;  %v8743_v45 = vmul.f32 %v8739_v11, %v11392_v58 }
0x104f   : > { %v8672_v24 = vpack.c.bf16 %v8670_v57, %v8668_v25  ;;  %v8671_v14 = vpack.c.bf16 %v8669_v8, %v8667_v48 }
0x1050   : > { %v8808_v43 = vpop.permute.xlu0 %8807 }
0x1051   : > { %9982 = vmatmul.mubr.msk.bf16.vlgmr.msra.gmra.mrb[24].mxu1 %vm2513_vm10, %v10653_v20 }
0x1052   : > { %8533 = vmatpush1.bf16.msra.mxu1 %v8519_v31  ;;  %8564 = vmatprep.mubr.bf16.mxu1 %v10893_v4  ;;  %v8734_v31 = vpop.permute.xlu1 %8733 }
0x1053   : > { %8608 = vmatprep.subr.bf16.mxu1 %v8596_v59 }
0x1054   : > { %v8812_v5 = vpop.permute.xlu0 %8811 }
0x1055   : > { %v8817_v18 = vsel %vm1671_vm5, %v8812_v5, %v8808_v43  ;;  %v8815_v62 = vsel %vm1671_vm5, %v8808_v43, %v8812_v5 }
0x1056   : > { %v8738_v56 = vpop.permute.xlu1 %8737  ;;  %v8820_v59 = vmul.f32 %v8817_v18, %v11405_v1  ;;  %v8819_v32 = vmul.f32 %v8815_v62, %v11417_v19 }
0x1057   : > { %v8742_v28 = vsel %vm1583_vm4, %v8738_v56, %v8734_v31  ;;  %v8740_v3 = vsel %vm1583_vm4, %v8734_v31, %v8738_v56  ;;  %v10658_v31 = vld [vmem:[%s13614_s26 + $0x40] sm:$0xff]  }
0x1058   : > { %v8746_v49 = vmul.f32 %v8742_v28, %v11372_v37  ;;  %v8745_v30 = vmul.f32 %v8740_v3, %v11392_v58 }
0x105a   : > { %v8810_v6 = vpop.permute.xlu1 %8809  ;;  %v8748_v15 = vpack.c.bf16 %v8746_v49, %v8744_v54  ;;  %v8747_v38 = vpack.c.bf16 %v8745_v30, %v8743_v45 }
0x105d   : > { %9986 = vmatmul.mubr.msk.bf16.vlgmr.msra.gmra.mrb[24].mxu1 %vm2513_vm10, %v10654_v47 }
0x105e   : > { %8609 = vmatpush1.bf16.msra.mxu1 %v8595_v21  ;;  %8640 = vmatprep.mubr.bf16.mxu1 %v10893_v4  ;;  %v8814_v16 = vpop.permute.xlu1 %8813 }
0x105f   : > { %8684 = vmatprep.subr.bf16.mxu1 %v8672_v24  ;;  %v8818_v10 = vsel %vm1671_vm5, %v8814_v16, %v8810_v6  ;;  %v8816_v17 = vsel %vm1671_vm5, %v8810_v6, %v8814_v16 }
0x1060   : > { %v8822_v20 = vmul.f32 %v8818_v10, %v11405_v1  ;;  %v8821_v44 = vmul.f32 %v8816_v17, %v11417_v19 }
0x1062   : > { %v8824_v23 = vpack.c.bf16 %v8822_v20, %v8820_v59  ;;  %v8823_v57 = vpack.c.bf16 %v8821_v44, %v8819_v32 }
0x1065   : > { %v8888_v55 = vpop.permute.xlu0 %8887 }
0x1069   : > { %9990 = vmatmul.mubr.msk.bf16.vlgmr.msra.gmra.mrb[24].mxu1 %vm2513_vm10, %v10655_v53 }
0x106a   : > { %8685 = vmatpush1.bf16.msra.mxu1 %v8671_v14  ;;  %8716 = vmatprep.mubr.bf16.mxu1 %v10893_v4  ;;  %v8905_v7 = vpop.permute.xlu0 %8904 }
0x106b   : > { %8760 = vmatprep.subr.bf16.mxu1 %v8748_v15 }
0x106c   : > { %v8893_v47 = vpop.permute.xlu1 %8892 }
0x1071   : > { %v8901_v9 = vpop.permute.xlu1 %8900 }
0x1075   : > { %9994 = vmatmul.mubr.msk.bf16.vlgmr.msra.gmra.mrb[24].mxu1 %vm2513_vm10, %v10656_v22 }
0x1076   : > { %8761 = vmatpush1.bf16.msra.mxu1 %v8747_v38  ;;  %8792 = vmatprep.mubr.bf16.mxu1 %v10893_v4 }
0x1077   : > { %8836 = vmatprep.subr.bf16.mxu1 %v8824_v23 }
0x1081   : > { %9998 = vmatmul.mubr.msk.bf16.vlgmr.msra.gmra.mrb[24].mxu1 %vm2513_vm10, %v10657_v29 }
0x1082   : > { %8837 = vmatpush1.bf16.msra.mxu1 %v8823_v57  ;;  %8868 = vmatprep.mubr.bf16.mxu1 %v10893_v4 }
0x108d   : > { %10002 = vmatmul.mubr.msk.bf16.vlgmr.msra.gmra.mrb[24].mxu1 %vm2513_vm10, %v10658_v31 }
0x1160   : > { %v8870_v25 = vpop.f32.mrb[24].mxu1 }
0x1161   : > { %v8895_v21 = vmul.f32 %v8888_v55, %v8870_v25  ;;  %v8872_v24 = vpop.f32.mrb[25].mxu1 }
0x1162   : > { %v8896_v56 = vmul.f32 %v8888_v55, %v8872_v24  ;;  %v8874_v63 = vpop.f32.mrb[26].mxu1 }
0x1163   : > { %v8907_v28 = vadd.f32 %v8901_v9, %v8895_v21  ;;  %v8897_v60 = vmul.f32 %v8893_v47, %v8874_v63  ;;  %v8876_v8 = vpop.f32.mrb[27].mxu1 }
0x1164   : > { %v8908_v46 = vadd.f32 %v8901_v9, %v8896_v56  ;;  %v8898_v49 = vmul.f32 %v8893_v47, %v8876_v8 }
0x1165   : > { %v8911_v6 = vmax.f32 %v8907_v28, 0.0  ;;  %v8909_v53 = vadd.f32 %v8905_v7, %v8897_v60 }
0x1166   : > { %v8912_v48 = vmax.f32 %v8908_v46, 0.0  ;;  %v8910_v54 = vadd.f32 %v8905_v7, %v8898_v49 }
0x1167   : > { %v8913_v43 = vmax.f32 %v8909_v53, 0.0  ;;  %8934 = vrot.lane.b32.xlu1 %v8911_v6, %s10899_s11  ;;  %v13310_v15 = vmul.f32 %v8911_v6, %v11292_v12 }
0x1168   : > { %v8914_v14 = vmax.f32 %v8910_v54, 0.0  ;;  %8938 = vrot.lane.b32.xlu0 %v8912_v48, %s10899_s11  ;;  %v13316_v3 = vmul.f32 %v8912_v48, %v11295_v13 }
0x1169   : > { %v13313_v16 = vmul.f32 %v8913_v43, %v11292_v12 }
0x116a   : > { %v13319_v5 = vmul.f32 %v8914_v14, %v11295_v13 }
0x116b   : > { %8936 = vrot.lane.b32.xlu1 %v8913_v43, %s10899_s11  ;;  %v9178_v10 = vpack.c.bf16 %v13313_v16, %v13310_v15 }
0x116c   : > { %8915 = vrot.lane.b32.xlu0 %v8911_v6, %s10898_s2  ;;  %v9179_v11 = vpack.c.bf16 %v13319_v5, %v13316_v3 }
0x116f   : > { %8940 = vrot.lane.b32.xlu1 %v8914_v14, %s10899_s11  ;;  %s13616_s11 = sld [smem:[#allocation34_spill]] }
0x1170   : > { %8919 = vrot.lane.b32.xlu0 %v8912_v48, %s10898_s2 }
0x1173   : > { %8917 = vrot.lane.b32.xlu1 %v8913_v43, %s10898_s2 }
0x1174   : > { %9042 = vrot.lane.b32.xlu0 %v8911_v6, %s10900_s8 }
0x1175   : > { %v9492_v12 = vld [vmem:[%s13616_s11] sm:$0x3] }
0x1177   : > { %8921 = vrot.lane.b32.xlu1 %v8914_v14, %s10898_s2 }
0x1178   : > { %9046 = vrot.lane.b32.xlu0 %v8912_v48, %s10900_s8 }
0x117b   : > { %9044 = vrot.lane.b32.xlu1 %v8913_v43, %s10900_s8 }
0x117c   : > { %9108 = vrot.lane.b32.xlu0 %v8911_v6, %s10901_s0 }
0x117f   : > { %9048 = vrot.lane.b32.xlu1 %v8914_v14, %s10900_s8  ;;  %s13617_s8 = sld [smem:[#allocation32_spill]] }
0x1180   : > { %9112 = vrot.lane.b32.xlu0 %v8912_v48, %s10901_s0 }
0x1183   : > { %9110 = vrot.lane.b32.xlu1 %v8913_v43, %s10901_s0 }
0x1184   : > { %9228 = vrot.lane.b32.xlu0 %v8911_v6, %s10894_s7 }
0x1185   : > { %v10003_v9 = vld [vmem:[%s13617_s8 + $0x1] sm:$0x1]  ;;  %v10018_v27 = vld [vmem:[%s13617_s8 + $0x8] sm:$0x1] }
0x1187   : > { %9114 = vrot.lane.b32.xlu1 %v8914_v14, %s10901_s0 }
0x1188   : > { %9232 = vrot.lane.b32.xlu0 %v8912_v48, %s10894_s7 }
0x118b   : > { %9230 = vrot.lane.b32.xlu1 %v8913_v43, %s10894_s7 }
0x118c   : > { %9294 = vrot.lane.b32.xlu0 %v8911_v6, %s10895_s1 }
0x118f   : > { %9234 = vrot.lane.b32.xlu1 %v8914_v14, %s10894_s7 }
0x1190   : > { %9298 = vrot.lane.b32.xlu0 %v8912_v48, %s10895_s1 }
0x1193   : > { %9296 = vrot.lane.b32.xlu1 %v8913_v43, %s10895_s1 }
0x1194   : > { %9360 = vrot.lane.b32.xlu0 %v8911_v6, %s10896_s15 }
0x1197   : > { %9300 = vrot.lane.b32.xlu1 %v8914_v14, %s10895_s1  ;;  %s13618_s1 = sld [smem:[#allocation35_spill]] }
0x1198   : > { %9364 = vrot.lane.b32.xlu0 %v8912_v48, %s10896_s15 }
0x119b   : > { %9362 = vrot.lane.b32.xlu1 %v8913_v43, %s10896_s15 }
0x119c   : > { %9426 = vrot.lane.b32.xlu0 %v8911_v6, %s13615_s3 }
0x119f   : > { %9366 = vrot.lane.b32.xlu1 %v8914_v14, %s10896_s15  ;;  %s940_s15 = scalar_lea.vmem %s13618_s1, %s11265_s27 }
0x11a0   : > { %9430 = vrot.lane.b32.xlu0 %v8912_v48, %s13615_s3 }
0x11a3   : > { %9428 = vrot.lane.b32.xlu1 %v8913_v43, %s13615_s3 }
0x11a4   : > { %9495 = vperm.xlu0 %10576, %v9492_v12  }
0x11a7   : > { %9432 = vrot.lane.b32.xlu1 %v8914_v14, %s13615_s3 }
0x11a8   : > { %10577 = vset.pattern.permute.xlu0 %v10902_v52 }
0x11ab   : > { %9501 = vperm.xlu1 %10574, %v9492_v12  }
0x11d9   : > { %v8935_v13 = vpop.permute.xlu1 %8934 }
0x11da   : > { %v8939_v30 = vpop.permute.xlu0 %8938 }
0x11db   : > { %v8942_v22 = vsel %vm988_vm7, %v8935_v13, %v8939_v30  ;;  %v8944_v45 = vsel %vm988_vm7, %v8939_v30, %v8935_v13  ;;  %v8933_v13 = vld [vmem:[%s13617_s8] sm:$0x1] }
0x11dc   : > { %v8946_v52 = vmul.f32 %v8944_v45, %v11454_v40  ;;  %v8947_v62 = vmul.f32 %v8942_v22, %v11457_v41 }
0x11dd   : > { %v8937_v18 = vpop.permute.xlu1 %8936 }
0x11de   : > { %v8916_v20 = vpop.permute.xlu0 %8915 }
0x11e1   : > { %v8941_v59 = vpop.permute.xlu1 %8940 }
0x11e2   : > { %v8943_v38 = vsel %vm988_vm7, %v8937_v18, %v8941_v59  ;;  %v8945_v23 = vsel %vm988_vm7, %v8941_v59, %v8937_v18  ;;  %v8920_v17 = vpop.permute.xlu0 %8919 }
0x11e3   : > { %v8948_v44 = vmul.f32 %v8945_v23, %v11454_v40  ;;  %v8949_v29 = vmul.f32 %v8943_v38, %v11457_v41  ;;  %v8923_v55 = vsel %vm963_vm6, %v8916_v20, %v8920_v17  ;;  %v8925_v25 = vsel %vm963_vm6, %v8920_v17, %v8916_v20 }
0x11e4   : > { %v8927_v56 = vmul.f32 %v8925_v25, %v11467_v51  ;;  %v8928_v63 = vmul.f32 %v8923_v55, %v11433_v26 }
0x11e5   : > { %v8950_v32 = vpack.c.bf16 %v8948_v44, %v8946_v52  ;;  %v8918_v57 = vpop.permute.xlu1 %8917  ;;  %v8951_v31 = vpack.c.bf16 %v8949_v29, %v8947_v62 }
0x11e6   : > { %v9043_v47 = vpop.permute.xlu0 %9042 }
0x11e7   : > { %8957 = vmatprep.subr.bf16.mxu0 %v8951_v31 }
0x11e8   : > { %8958 = vmatpush1.bf16.msra.mxu0 %v8950_v32  ;;  %v10006_v32 = vld [vmem:[%s13617_s8 + $0x2] sm:$0x1] }
0x11e9   : > { %v8922_v21 = vpop.permute.xlu1 %8921 }
0x11ea   : > { %v8924_v40 = vsel %vm963_vm6, %v8918_v57, %v8922_v21  ;;  %v8926_v41 = vsel %vm963_vm6, %v8922_v21, %v8918_v57  ;;  %v9047_v24 = vpop.permute.xlu0 %9046  ;;  %v10008_v21 = vld [vmem:[%s13617_s8 + $0x3] sm:$0x1] }
0x11eb   : > { %v8929_v7 = vmul.f32 %v8926_v41, %v11467_v51  ;;  %v8930_v28 = vmul.f32 %v8924_v40, %v11433_v26  ;;  %10004 = vmatmul.mubr.msk.bf16.vlgmr.msra.gmra.mrb[16].mxu0 %vm2513_vm10, %v10003_v9  ;;  %v9050_v6 = vsel %vm1131_vm8, %v9043_v47, %v9047_v24  ;;  %v9052_v53 = vsel %vm1131_vm8, %v9047_v24, %v9043_v47 }
0x11ec   : > { %9033 = vmatprep.mubr.bf16.mxu0 %v10893_v4  ;;  %v9054_v54 = vmul.f32 %v9052_v53, %v11510_v39  ;;  %v9055_v43 = vmul.f32 %v9050_v6, %v11513_v42 }
0x11ed   : > { %v8931_v60 = vpack.c.bf16 %v8929_v7, %v8927_v56  ;;  %v9045_v8 = vpop.permute.xlu1 %9044  ;;  %v8932_v46 = vpack.c.bf16 %v8930_v28, %v8928_v63  ;;  %v10010_v28 = vld [vmem:[%s13617_s8 + $0x4] sm:$0x1] }
0x11ee   : > { %v9109_v49 = vpop.permute.xlu0 %9108 }
0x11ef   : > { %9001 = vmatprep.subr.bf16.mxu0 %v8932_v46 }
0x11f0   : > { %9002 = vmatpush1.bf16.msra.mxu0 %v8931_v60 }
0x11f1   : > { %v9049_v48 = vpop.permute.xlu1 %9048 }
0x11f2   : > { %v9051_v26 = vsel %vm1131_vm8, %v9045_v8, %v9049_v48  ;;  %v9053_v51 = vsel %vm1131_vm8, %v9049_v48, %v9045_v8  ;;  %v9113_v18 = vpop.permute.xlu0 %9112 }
0x11f3   : > { %v9056_v14 = vmul.f32 %v9053_v51, %v11510_v39  ;;  %v9057_v12 = vmul.f32 %v9051_v26, %v11513_v42  ;;  %v9116_v45 = vsel %vm1219_vm9, %v9109_v49, %v9113_v18  ;;  %v9118_v17 = vsel %vm1219_vm9, %v9113_v18, %v9109_v49 }
0x11f4   : > { %v9121_v59 = vmul.f32 %v9116_v45, %v11549_v2  ;;  %v9120_v29 = vmul.f32 %v9118_v17, %v11544_v0  ;;  %v10014_v17 = vld [vmem:[%s13617_s8 + $0x6] sm:$0x1] }
0x11f5   : > { %v9058_v30 = vpack.c.bf16 %v9056_v14, %v9054_v54  ;;  %v9111_v20 = vpop.permute.xlu1 %9110  ;;  %v9059_v22 = vpack.c.bf16 %v9057_v12, %v9055_v43  ;;  %v10012_v12 = vld [vmem:[%s13617_s8 + $0x5] sm:$0x1] }
0x11f6   : > { %v9229_v57 = vpop.permute.xlu0 %9228 }
0x11f7   : > { %10005 = vmatmul.mubr.msk.bf16.vlgmr.msra.gmra.mrb[16].mxu0 %vm2513_vm10, %v8933_v13  ;;  %9065 = vmatprep.subr.bf16.mxu0 %v9059_v22 }
0x11f8   : > { %9066 = vmatpush1.bf16.msra.mxu0 %v9058_v30  ;;  %9097 = vmatprep.mubr.bf16.mxu0 %v10893_v4 }
0x11f9   : > { %v9115_v39 = vpop.permute.xlu1 %9114 }
0x11fa   : > { %v9117_v42 = vsel %vm1219_vm9, %v9111_v20, %v9115_v39  ;;  %v9119_v38 = vsel %vm1219_vm9, %v9115_v39, %v9111_v20  ;;  %v9233_v47 = vpop.permute.xlu0 %9232 }
0x11fb   : > { %v9123_v23 = vmul.f32 %v9117_v42, %v11549_v2  ;;  %v9122_v62 = vmul.f32 %v9119_v38, %v11544_v0  ;;  %v9238_v55 = vsel %vm1407_vm2, %v9233_v47, %v9229_v57 }
0x11fc   : > { %v9241_v40 = vmul.f32 %v9238_v55, %v11362_v34 }
0x11fd   : > { %v9125_v52 = vpack.c.bf16 %v9123_v23, %v9121_v59  ;;  %v9231_v44 = vpop.permute.xlu1 %9230  ;;  %v9124_v31 = vpack.c.bf16 %v9122_v62, %v9120_v29 }
0x11fe   : > { %v9295_v41 = vpop.permute.xlu0 %9294 }
0x11ff   : > { %9131 = vmatprep.subr.bf16.mxu0 %v9125_v52 }
0x1201   : > { %v9235_v2 = vpop.permute.xlu1 %9234 }
0x1202   : > { %v9239_v0 = vsel %vm1407_vm2, %v9235_v2, %v9231_v44  ;;  %v9299_v24 = vpop.permute.xlu0 %9298 }
0x1203   : > { %10007 = vmatmul.mubr.msk.bf16.vlgmr.msra.gmra.mrb[16].mxu0 %vm2513_vm10, %v10006_v32  ;;  %v9243_v25 = vmul.f32 %v9239_v0, %v11362_v34  ;;  %v9236_v34 = vsel %vm1407_vm2, %v9229_v57, %v9233_v47  ;;  %v9304_v15 = vsel %vm1495_vm3, %v9299_v24, %v9295_v41 }
0x1204   : > { %9132 = vmatpush1.bf16.msra.mxu0 %v9124_v31  ;;  %9163 = vmatprep.mubr.bf16.mxu0 %v10893_v4  ;;  %v9240_v7 = vmul.f32 %v9236_v34, %v11359_v33  ;;  %v9307_v60 = vmul.f32 %v9304_v15, %v11368_v36 }
0x1205   : > { %9185 = vmatprep.subr.bf16.mxu0 %v9179_v11  ;;  %v9297_v9 = vpop.permute.xlu1 %9296  ;;  %v9245_v3 = vpack.c.bf16 %v9243_v25, %v9241_v40  ;;  %v9237_v11 = vsel %vm1407_vm2, %v9231_v44, %v9235_v2 }
0x1206   : > { %v9242_v63 = vmul.f32 %v9237_v11, %v11359_v33  ;;  %v9361_v8 = vpop.permute.xlu0 %9360 }
0x1208   : > { %v9244_v46 = vpack.c.bf16 %v9242_v63, %v9240_v7 }
0x1209   : > { %v9301_v5 = vpop.permute.xlu1 %9300 }
0x120a   : > { %v9305_v56 = vsel %vm1495_vm3, %v9301_v5, %v9297_v9  ;;  %v9303_v53 = vsel %vm1495_vm3, %v9297_v9, %v9301_v5  ;;  %v9365_v33 = vpop.permute.xlu0 %9364 }
0x120b   : > { %v9309_v16 = vmul.f32 %v9305_v56, %v11368_v36  ;;  %v9302_v36 = vsel %vm1495_vm3, %v9295_v41, %v9299_v24  ;;  %v9308_v26 = vmul.f32 %v9303_v53, %v11365_v35  ;;  %v9370_v51 = vsel %vm1583_vm4, %v9365_v33, %v9361_v8 }
0x120c   : > { %v9306_v14 = vmul.f32 %v9302_v36, %v11365_v35  ;;  %v9373_v13 = vmul.f32 %v9370_v51, %v11372_v37 }
0x120d   : > { %v9311_v49 = vpack.c.bf16 %v9309_v16, %v9307_v60 }
0x120e   : > { %v9427_v30 = vpop.permute.xlu0 %9426  ;;  %v9310_v18 = vpack.c.bf16 %v9308_v26, %v9306_v14 }
0x120f   : > { %10009 = vmatmul.mubr.msk.bf16.vlgmr.msra.gmra.mrb[16].mxu0 %vm2513_vm10, %v10008_v21 }
0x1210   : > { %9186 = vmatpush1.bf16.msra.mxu0 %v9178_v10  ;;  %9217 = vmatprep.mubr.bf16.mxu0 %v10893_v4  ;;  %v9363_v10 = vpop.permute.xlu1 %9362 }
0x1211   : > { %9251 = vmatprep.subr.bf16.mxu0 %v9245_v3 }
0x1212   : > { %v9431_v35 = vpop.permute.xlu0 %9430 }
0x1213   : > { %v9436_v59 = vsel %vm1671_vm5, %v9431_v35, %v9427_v30 }
0x1214   : > { %v9367_v6 = vpop.permute.xlu1 %9366  ;;  %v9439_v52 = vmul.f32 %v9436_v59, %v11405_v1 }
0x1215   : > { %v9371_v48 = vsel %vm1583_vm4, %v9367_v6, %v9363_v10  ;;  %v9369_v45 = vsel %vm1583_vm4, %v9363_v10, %v9367_v6 }
0x1216   : > { %v9375_v54 = vmul.f32 %v9371_v48, %v11372_v37  ;;  %v9368_v37 = vsel %vm1583_vm4, %v9361_v8, %v9365_v33  ;;  %v9374_v42 = vmul.f32 %v9369_v45, %v11392_v58 }
0x1217   : > { %v9372_v23 = vmul.f32 %v9368_v37, %v11392_v58  ;;  %v9434_v58 = vsel %vm1671_vm5, %v9427_v30, %v9431_v35 }
0x1218   : > { %v9429_v43 = vpop.permute.xlu1 %9428  ;;  %v9377_v20 = vpack.c.bf16 %v9375_v54, %v9373_v13  ;;  %v9438_v57 = vmul.f32 %v9434_v58, %v11417_v19 }
0x1219   : > { %v9376_v62 = vpack.c.bf16 %v9374_v42, %v9372_v23 }
0x121b   : > { %10011 = vmatmul.mubr.msk.bf16.vlgmr.msra.gmra.mrb[16].mxu0 %vm2513_vm10, %v10010_v28 }
0x121c   : > { %9252 = vmatpush1.bf16.msra.mxu0 %v9244_v46  ;;  %9283 = vmatprep.mubr.bf16.mxu0 %v10893_v4  ;;  %v9433_v22 = vpop.permute.xlu1 %9432 }
0x121d   : > { %9317 = vmatprep.subr.bf16.mxu0 %v9311_v49  ;;  %v9437_v39 = vsel %vm1671_vm5, %v9433_v22, %v9429_v43  ;;  %v9435_v29 = vsel %vm1671_vm5, %v9429_v43, %v9433_v22 }
0x121e   : > { %v9441_v38 = vmul.f32 %v9437_v39, %v11405_v1  ;;  %v9440_v32 = vmul.f32 %v9435_v29, %v11417_v19  ;;  %v10016_v1 = vld [vmem:[%s13617_s8 + $0x7] sm:$0x1] }
0x1220   : > { %v9443_v44 = vpack.c.bf16 %v9441_v38, %v9439_v52  ;;  %v9442_v31 = vpack.c.bf16 %v9440_v32, %v9438_v57 }
0x1223   : > { %v9496_v2 = vpop.permute.xlu0 %9495 }
0x1227   : > { %10013 = vmatmul.mubr.msk.bf16.vlgmr.msra.gmra.mrb[16].mxu0 %vm2513_vm10, %v10012_v12 }
0x1228   : > { %9318 = vmatpush1.bf16.msra.mxu0 %v9310_v18  ;;  %9349 = vmatprep.mubr.bf16.mxu0 %v10893_v4 }
0x1229   : > { %9383 = vmatprep.subr.bf16.mxu0 %v9377_v20 }
0x122a   : > { %v9502_v55 = vpop.permute.xlu1 %9501 }
0x1233   : > { %10015 = vmatmul.mubr.msk.bf16.vlgmr.msra.gmra.mrb[16].mxu0 %vm2513_vm10, %v10014_v17 }
0x1234   : > { %9384 = vmatpush1.bf16.msra.mxu0 %v9376_v62  ;;  %9415 = vmatprep.mubr.bf16.mxu0 %v10893_v4 }
0x1235   : > { %9449 = vmatprep.subr.bf16.mxu0 %v9443_v44 }
0x123f   : > { %10017 = vmatmul.mubr.msk.bf16.vlgmr.msra.gmra.mrb[16].mxu0 %vm2513_vm10, %v10016_v1 }
0x1240   : > { %9450 = vmatpush1.bf16.msra.mxu0 %v9442_v31  ;;  %9481 = vmatprep.mubr.bf16.mxu0 %v10893_v4 }
0x124b   : > { %10019 = vmatmul.mubr.msk.bf16.vlgmr.msra.gmra.mrb[16].mxu0 %vm2513_vm10, %v10018_v27 }
0x131e   : > { %v9483_v47 = vpop.f32.mrb[16].mxu0 }
0x131f   : > { %v9498_v19 = vmul.f32 %v9496_v2, %v9483_v47  ;;  %v9485_v0 = vpop.f32.mrb[17].mxu0 }
0x1320   : > { %v9499_v25 = vmul.f32 %v9496_v2, %v9485_v0  ;;  %v9487_v9 = vpop.f32.mrb[18].mxu0 }
0x1321   : > { %v9504_v21 = vadd.f32 %v9502_v55, %v9498_v19  ;;  %v9488_v40 = vpop.f32.mrb[19].mxu0 }
0x1322   : > { %v9505_v41 = vadd.f32 %v9502_v55, %v9499_v25 }
0x1323   : > { %v9506_v3 = vadd.f32 %v9504_v21, %v12446_v61 }
0x1324   : > { %v9507_v4 = vadd.f32 %v9505_v41, %v12448_v50 }
0x1326   : > { %v9510_v5 = vcombine.low %v9506_v3, %v9507_v4 }
0x1328   : > { %10020 = vst.sshfl [vmem:[%s940_s15] sm:$0x33 pattern:$0x76325410] %v9510_v5 }
0x1329 PF: > { %s13619_s0 = sld [smem:[#allocation17_spill]] }
0x132f   : > { %s41_s7 = sadd.s32 1, %s13619_s0  }
0x1330   : > { %p38_p9 = scmp.ge.s32.totalorder %s41_s7, 4  }
0x1332   :  { %40 = sbr.rel (!%p38_p9) target bundleno = 23 (0x17), region = 302 }
0x1339   :  { %9541 = vsyncpa [#allocation3], 1 }
0x133a   :  { %9543 = vsyncpa [#allocation3 + $0x1], 1 }
0x133b   :  { %9544 = vsyncpa [#allocation5], 1 }
0x133c   :  { %9545 = vsyncpa [#allocation8], 1 }
0x133d   :  { %9546 = vsyncpa [#allocation11], 1 }

</bundles_post_ra>
